<compile_context>
chip_gen: v6e
topology: v6e:2x2x1
jax: 0.10.0
libtpu: 0.0.40
codegen_flags: <defaults>
</compile_context>

<pallas_src>
import math

import numpy as np
import jax
import jax.numpy as jnp
from jax.experimental import pallas as pl
from jax.experimental.pallas import tpu as pltpu


_TAPS = tuple((dy, dx) for dy in (-1, 0, 1) for dx in (-1, 0, 1))
_OFF_TAPS = tuple(t for t in _TAPS if t != (0, 0))


def _linear_coeffs(n_in, n_out):
    """Per-output-index (i0, i1, w0, w1) 1-D bilinear taps, half-pixel centers."""
    out = []
    scale = n_in / n_out
    for i in range(n_out):
        src = max((i + 0.5) * scale - 0.5, 0.0)
        i0 = min(int(math.floor(src)), n_in - 1)
        i1 = min(i0 + 1, n_in - 1)
        f = src - i0
        out.append((i0, i1, 1.0 - f, f))
    return out


def _upsample_matrix(n_in, n_out):
    """1-D bilinear interpolation matrix (n_out, n_in), align_corners=False."""
    U = np.zeros((n_out, n_in), np.float32)
    for i, (i0, i1, w0, w1) in enumerate(_linear_coeffs(n_in, n_out)):
        U[i, i0] += w0
        U[i, i1] += w1
    return U


def _pick_b_tile(B, HW, max_lanes=1024, min_steps=2):
    """Largest batch-tile that divides B, keeps lane dim <= max_lanes, and (when
    possible) leaves >= min_steps grid steps so v7x megacore still splits work."""
    best = 1
    for bt in range(1, B + 1):
        if B % bt or bt * HW > max_lanes:
            continue
        if B // bt >= min_steps or B < min_steps:
            best = bt
    return best


def _make_frh_kernel(H, W, C, B_tile):
    HW = H * W
    L = B_tile * HW

    def kernel(x_ref, res_ref, u2_ref, masks_ref,
               pre_w_ref,
               post_w_ref, post_s_ref, post_b_ref,
               sc_w_ref, sc_s_ref, sc_b_ref,
               pa_w_ref, pa_b_ref,
               ca_w1_ref, ca_w2_ref,
               proj_dw_ref, proj_s_ref, proj_b_ref, proj_pw_ref,
               out_ref):
        f32 = jnp.float32
        bf16 = jnp.bfloat16

        masks = masks_ref[...]                          # (8, L) multiplicative

        def shift2d(v, dy, dx):
            # out[c, b*HW + h*W + w] = v[c, b*HW + (h+dy)*W + (w+dx)], zero
            # outside each image (mask is per-image, so lane-roll wrap across
            # packed images is always masked out).
            if dy == 0 and dx == 0:
                return v
            s = dy * W + dx
            r = pltpu.roll(v, (-s) % L, axis=1)
            m = masks[_OFF_TAPS.index((dy, dx)):_OFF_TAPS.index((dy, dx)) + 1, :]
            return r * m

        def conv3x3_dense(v, w_ref):
            # grouped im2col: 3 accumulating (C,3C)x(3C,L) MXU matmuls.
            acc = None
            for g, dy in enumerate((-1, 0, 1)):
                cols = [shift2d(v, dy, dx).astype(bf16) for dx in (-1, 0, 1)]
                col = jnp.concatenate(cols, axis=0)      # (3C, L) bf16
                part = jnp.dot(w_ref[g], col, preferred_element_type=f32)
                acc = part if acc is None else acc + part
            return acc

        def conv3x3_dw(v, w_ref):
            # depthwise 3x3: 9 roll+mask+broadcast-mul taps (VPU/XLU).
            acc = None
            for k, (dy, dx) in enumerate(_TAPS):
                term = shift2d(v, dy, dx) * w_ref[:, k:k + 1]
                acc = term if acc is None else acc + term
            return acc

        # fused = fw0*pre_conv(res) + fw1*upsample2x(x); fuse weights are folded
        # into pre_w / u2 host-side -> single full-tile expression, no scratch.
        pre = jnp.dot(pre_w_ref[...], res_ref[0], preferred_element_type=f32)
        xu = jnp.dot(x_ref[0], u2_ref[...], preferred_element_type=f32)
        fused = pre + xu                                 # (C, L) f32

        # post_conv: 3x3 conv -> BN -> ReLU6
        post = conv3x3_dense(fused, post_w_ref)
        post = jnp.clip(post * post_s_ref[...] + post_b_ref[...], 0.0, 6.0)
        post_bf = post.astype(bf16)

        # shortcut: 1x1 conv -> BN
        shortcut = jnp.dot(sc_w_ref[...], post_bf, preferred_element_type=f32)
        shortcut = shortcut * sc_s_ref[...] + sc_b_ref[...]

        # pa: depthwise 3x3 (+bias) -> sigmoid, spatial gate
        pa_lin = conv3x3_dw(post, pa_w_ref) + pa_b_ref[...]
        pa = jax.nn.sigmoid(pa_lin) * post

        # ca: per-image global avg pool -> 1x1 -> ReLU6 -> 1x1 -> sigmoid gate
        gates = []
        for b in range(B_tile):
            sl = slice(b * HW, (b + 1) * HW)             # lane-aligned slice
            m_b = jnp.sum(post[:, sl], axis=1, keepdims=True) * (1.0 / HW)
            h1 = jnp.clip(jnp.sum(ca_w1_ref[...] * m_b, axis=0, keepdims=True),
                          0.0, 6.0)                       # (1, C16)
            ca_lin = jnp.sum(ca_w2_ref[...] * h1, axis=1, keepdims=True)  # (C,1)
            gates.append(jnp.broadcast_to(jax.nn.sigmoid(ca_lin), (C, HW)))
        ca_gate = gates[0] if B_tile == 1 else jnp.concatenate(gates, axis=1)
        ca = ca_gate * post

        x2 = pa + ca

        # proj: depthwise 3x3 -> BN -> pointwise 1x1, +shortcut, ReLU6
        dw = conv3x3_dw(x2, proj_dw_ref) * proj_s_ref[...] + proj_b_ref[...]
        proj = jnp.dot(proj_pw_ref[...], dw.astype(bf16),
                       preferred_element_type=f32)

        out_ref[0] = jnp.clip(proj + shortcut, 0.0, 6.0).astype(out_ref.dtype)

    return kernel


def init_params(key, in_channels, decode_channels):
    C_in, C = in_channels, decode_channels
    C16 = max(C // 16, 1)
    ks = list(jax.random.split(key, 24))
    ki = iter(ks)

    def nrm(shape, scale=0.1):
        return (scale * jax.random.normal(next(ki), shape)).astype(jnp.float32)

    def bn_fold(c):  # inference-mode BN folded into per-channel scale/bias
        gamma = 1.0 + nrm((c,))
        beta = nrm((c,))
        mean = nrm((c,))
        var = 1.0 + jnp.abs(nrm((c,)))
        scale = gamma * jax.lax.rsqrt(var + 1e-5)
        bias = beta - mean * scale
        return (scale.reshape(1, c).astype(jnp.float32),
                bias.reshape(1, c).astype(jnp.float32))

    p = {}
    p["fuse"] = jnp.ones((2,), jnp.float32)          # nn.Parameter(torch.ones(2))
    p["pre_w"] = nrm((C_in, C))                      # 1x1 conv: (Cin, Cout)
    p["post_w"] = nrm((9, C, C))                     # 3x3 conv taps: [ky*3+kx, Cin, Cout]
    p["post_scale"], p["post_bias"] = bn_fold(C)
    p["sc_w"] = nrm((C, C))
    p["sc_scale"], p["sc_bias"] = bn_fold(C)
    p["pa_w"] = nrm((9, C))                          # depthwise 3x3 taps
    p["pa_b"] = nrm((1, C))
    p["ca_w1"] = nrm((C, C16))
    p["ca_w2"] = nrm((C16, C))
    p["proj_dw"] = nrm((9, C))
    p["proj_scale"], p["proj_bias"] = bn_fold(C)
    p["proj_pw"] = nrm((C, C))
    return p


def feature_refinement_head(x_nchw, res_nchw, params, *, b_tile=None):
    B, C, Hs, Ws = x_nchw.shape
    Br, C_in, H, W = res_nchw.shape
    assert Br == B and (H, W) == (2 * Hs, 2 * Ws)
    HW, HsWs = H * W, Hs * Ws
    f32, bf16 = jnp.float32, jnp.bfloat16

    if b_tile is None:
        b_tile = _pick_b_tile(B, HW)
    assert B % b_tile == 0
    G = B // b_tile
    L = b_tile * HW

    # Activations: channel-major, lane-dense; b_tile images packed along lanes.
    x_b = (x_nchw.reshape(G, b_tile, C, HsWs).transpose(0, 2, 1, 3)
           .reshape(G, C, b_tile * HsWs).astype(bf16))
    res_b = (res_nchw.reshape(G, b_tile, C_in, HW).transpose(0, 2, 1, 3)
             .reshape(G, C_in, L).astype(bf16))

    # Fuse weights: relu + normalize, folded into pre_w / upsample matrix.
    wv = jax.nn.relu(params["fuse"])
    fuse = wv / (jnp.sum(wv) + 1e-8)

    pre_w = (params["pre_w"].T * fuse[0]).astype(bf16)            # (C, Cin)

    # 2-D bilinear upsample matrix (HsWs, HW), block-diag over packed images.
    uh = _upsample_matrix(Hs, H)                                  # (H, Hs)
    uw = _upsample_matrix(Ws, W)                                  # (W, Ws)
    u2s = np.kron(uh, uw).T.astype(np.float32)                    # (HsWs, HW)
    u2b = np.zeros((b_tile * HsWs, L), np.float32)
    for b in range(b_tile):
        u2b[b * HsWs:(b + 1) * HsWs, b * HW:(b + 1) * HW] = u2s
    u2 = (jnp.asarray(u2b) * fuse[1]).astype(bf16)

    # Zero-padding border masks for 3x3 taps (multiplicative, per image).
    pos = np.arange(HW)
    hh, ww = pos // W, pos % W
    rows = []
    for dy, dx in _OFF_TAPS:
        m = ((hh + dy >= 0) & (hh + dy < H) & (ww + dx >= 0) & (ww + dx < W))
        rows.append(np.tile(m.astype(np.float32), b_tile))
    masks = jnp.asarray(np.stack(rows))                           # (8, L)

    def col(v):  # (1, C) -> (C, 1) f32, broadcast along lanes in-kernel
        return jnp.asarray(v, f32).reshape(-1, 1)

    # Dense 3x3 weight grouped by ky: (3, Cout, 3*Cin), inner index kx*Cin+ci.
    post_w = (jnp.transpose(params["post_w"], (2, 0, 1))          # (Cout, 9, Cin)
              .reshape(C, 3, 3 * C).transpose(1, 0, 2)            # (3, Cout, 3Cin)
              .astype(bf16))
    sc_w = params["sc_w"].T.astype(bf16)
    proj_pw = params["proj_pw"].T.astype(bf16)
    pa_w = params["pa_w"].T.astype(f32)                           # (C, 9)
    proj_dw = params["proj_dw"].T.astype(f32)                     # (C, 9)
    ca_w1 = params["ca_w1"].astype(f32)                           # (C, C16)
    ca_w2 = params["ca_w2"].T.astype(f32)                         # (C, C16)

    ordered = [
        x_b, res_b, u2, masks,
        pre_w,
        post_w, col(params["post_scale"]), col(params["post_bias"]),
        sc_w, col(params["sc_scale"]), col(params["sc_bias"]),
        pa_w, col(params["pa_b"]),
        ca_w1, ca_w2,
        proj_dw, col(params["proj_scale"]), col(params["proj_bias"]), proj_pw,
    ]

    def full_spec(arr):
        nd = arr.ndim
        return pl.BlockSpec(arr.shape, lambda g, _n=nd: (0,) * _n)

    in_specs = [pl.BlockSpec((1, C, b_tile * HsWs), lambda g: (g, 0, 0)),   # x
                pl.BlockSpec((1, C_in, L), lambda g: (g, 0, 0))]            # res
    in_specs += [full_spec(a) for a in ordered[2:]]                          # weights

    grid_spec = pltpu.PrefetchScalarGridSpec(
        num_scalar_prefetch=0,
        grid=(G,),
        in_specs=in_specs,
        out_specs=pl.BlockSpec((1, C, L), lambda g: (g, 0, 0)),
    )

    out = pl.pallas_call(
        _make_frh_kernel(H, W, C, b_tile),
        out_shape=jax.ShapeDtypeStruct((G, C, L), f32),
        grid_spec=grid_spec,
        compiler_params=pltpu.CompilerParams(
            dimension_semantics=("parallel",)),          # megacore on v7x
    )(*ordered)

    # back to NCHW
    return (out.reshape(G, C, b_tile, HW).transpose(0, 2, 1, 3)
            .reshape(B, C, H, W))


if __name__ == "__main__":
    in_channels = 32
    decode_channels = 32
    B, Hs, Ws = 4, 8, 8          # B=4 -> b_tile=2 (512 lanes/step), 2 grid steps
    H, W = 2 * Hs, 2 * Ws

    key = jax.random.PRNGKey(0)
    kx, kr, kp = jax.random.split(key, 3)
    x = jax.random.normal(kx, (B, decode_channels, Hs, Ws), jnp.float32)   # low-res
    res = jax.random.normal(kr, (B, in_channels, H, W), jnp.float32)       # skip

    params = init_params(kp, in_channels, decode_channels)

    out = feature_refinement_head(x, res, params)
    out = jax.block_until_ready(out)

    assert out.shape == (B, decode_channels, H, W)
    assert bool(jnp.all(jnp.isfinite(out)))
    # final op is ReLU6 -> outputs live in [0, 6]
    assert bool(jnp.all(out >= 0.0)) and bool(jnp.all(out <= 6.0))
    print("KERNEL_OK")
</pallas_src>

<mosaic_0001>
module attributes {stable_mosaic.version = 11 : i64} {
  func.func @kernel(%arg0: i32, %arg1: memref<1x32x128xbf16, #tpu.memory_space<vmem>>, %arg2: memref<1x32x512xbf16, #tpu.memory_space<vmem>>, %arg3: memref<128x512xbf16, #tpu.memory_space<vmem>>, %arg4: memref<8x512xf32, #tpu.memory_space<vmem>>, %arg5: memref<32x32xbf16, #tpu.memory_space<vmem>>, %arg6: memref<3x32x96xbf16, #tpu.memory_space<vmem>>, %arg7: memref<32x1xf32, #tpu.memory_space<vmem>>, %arg8: memref<32x1xf32, #tpu.memory_space<vmem>>, %arg9: memref<32x32xbf16, #tpu.memory_space<vmem>>, %arg10: memref<32x1xf32, #tpu.memory_space<vmem>>, %arg11: memref<32x1xf32, #tpu.memory_space<vmem>>, %arg12: memref<32x9xf32, #tpu.memory_space<vmem>>, %arg13: memref<32x1xf32, #tpu.memory_space<vmem>>, %arg14: memref<32x2xf32, #tpu.memory_space<vmem>>, %arg15: memref<32x2xf32, #tpu.memory_space<vmem>>, %arg16: memref<32x9xf32, #tpu.memory_space<vmem>>, %arg17: memref<32x1xf32, #tpu.memory_space<vmem>>, %arg18: memref<32x1xf32, #tpu.memory_space<vmem>>, %arg19: memref<32x32xbf16, #tpu.memory_space<vmem>>, %arg20: memref<1x32x512xf32, #tpu.memory_space<vmem>>) attributes {dimension_semantics = [#tpu.dimension_semantics<parallel>], iteration_bounds = array<i64: 2>, scalar_prefetch = 0 : i64, scratch_operands = 0 : i64, tpu.core_type = #tpu.core_type<tc>, window_params = [{transform_indices = @transform_0, window_bounds = array<i64: 1, 32, 128>}, {transform_indices = @transform_1, window_bounds = array<i64: 1, 32, 512>}, {pipeline_mode = #tpu.pipeline_mode<synchronous>, transform_indices = @transform_2, window_bounds = array<i64: 128, 512>}, {pipeline_mode = #tpu.pipeline_mode<synchronous>, transform_indices = @transform_3, window_bounds = array<i64: 8, 512>}, {pipeline_mode = #tpu.pipeline_mode<synchronous>, transform_indices = @transform_4, window_bounds = array<i64: 32, 32>}, {pipeline_mode = #tpu.pipeline_mode<synchronous>, transform_indices = @transform_5, window_bounds = array<i64: 3, 32, 96>}, {pipeline_mode = #tpu.pipeline_mode<synchronous>, transform_indices = @transform_6, window_bounds = array<i64: 32, 1>}, {pipeline_mode = #tpu.pipeline_mode<synchronous>, transform_indices = @transform_7, window_bounds = array<i64: 32, 1>}, {pipeline_mode = #tpu.pipeline_mode<synchronous>, transform_indices = @transform_8, window_bounds = array<i64: 32, 32>}, {pipeline_mode = #tpu.pipeline_mode<synchronous>, transform_indices = @transform_9, window_bounds = array<i64: 32, 1>}, {pipeline_mode = #tpu.pipeline_mode<synchronous>, transform_indices = @transform_10, window_bounds = array<i64: 32, 1>}, {pipeline_mode = #tpu.pipeline_mode<synchronous>, transform_indices = @transform_11, window_bounds = array<i64: 32, 9>}, {pipeline_mode = #tpu.pipeline_mode<synchronous>, transform_indices = @transform_12, window_bounds = array<i64: 32, 1>}, {pipeline_mode = #tpu.pipeline_mode<synchronous>, transform_indices = @transform_13, window_bounds = array<i64: 32, 2>}, {pipeline_mode = #tpu.pipeline_mode<synchronous>, transform_indices = @transform_14, window_bounds = array<i64: 32, 2>}, {pipeline_mode = #tpu.pipeline_mode<synchronous>, transform_indices = @transform_15, window_bounds = array<i64: 32, 9>}, {pipeline_mode = #tpu.pipeline_mode<synchronous>, transform_indices = @transform_16, window_bounds = array<i64: 32, 1>}, {pipeline_mode = #tpu.pipeline_mode<synchronous>, transform_indices = @transform_17, window_bounds = array<i64: 32, 1>}, {pipeline_mode = #tpu.pipeline_mode<synchronous>, transform_indices = @transform_18, window_bounds = array<i64: 32, 32>}, {transform_indices = @transform_19, window_bounds = array<i64: 1, 32, 512>}]} {
    %c0 = arith.constant 0 : index
    %c0_0 = arith.constant 0 : index
    %0 = vector.load %arg4[%c0, %c0_0] : memref<8x512xf32, #tpu.memory_space<vmem>>, vector<8x512xf32>
    %c0_1 = arith.constant 0 : index
    %c0_2 = arith.constant 0 : index
    %1 = vector.load %arg5[%c0_1, %c0_2] : memref<32x32xbf16, #tpu.memory_space<vmem>>, vector<32x32xbf16>
    %c0_3 = arith.constant 0 : index
    %c0_4 = arith.constant 0 : index
    %c0_5 = arith.constant 0 : index
    %2 = vector.load %arg2[%c0_3, %c0_4, %c0_5] : memref<1x32x512xbf16, #tpu.memory_space<vmem>>, vector<1x32x512xbf16>
    %3 = vector.shape_cast %2 : vector<1x32x512xbf16> to vector<32x512xbf16>
    %cst = arith.constant dense<0.000000e+00> : vector<32x512xf32>
    %4 = tpu.matmul %1, %3, %cst {dimension_numbers = #tpu.dot_dimension_numbers<[1], [0], [0], [1], [0, 0, 1, 1], [], []>} : vector<32x32xbf16>, vector<32x512xbf16>, vector<32x512xf32> -> vector<32x512xf32>
    %c0_6 = arith.constant 0 : index
    %c0_7 = arith.constant 0 : index
    %c0_8 = arith.constant 0 : index
    %5 = vector.load %arg1[%c0_6, %c0_7, %c0_8] : memref<1x32x128xbf16, #tpu.memory_space<vmem>>, vector<1x32x128xbf16>
    %6 = vector.shape_cast %5 : vector<1x32x128xbf16> to vector<32x128xbf16>
    %c0_9 = arith.constant 0 : index
    %c0_10 = arith.constant 0 : index
    %7 = vector.load %arg3[%c0_9, %c0_10] : memref<128x512xbf16, #tpu.memory_space<vmem>>, vector<128x512xbf16>
    %cst_11 = arith.constant dense<0.000000e+00> : vector<32x512xf32>
    %8 = tpu.matmul %6, %7, %cst_11 {dimension_numbers = #tpu.dot_dimension_numbers<[1], [0], [0], [1], [0, 0, 1, 1], [], []>} : vector<32x128xbf16>, vector<128x512xbf16>, vector<32x512xf32> -> vector<32x512xf32>
    %9 = arith.addf %4, %8 : vector<32x512xf32>
    %c17_i32 = arith.constant 17 : i32
    %10 = tpu.dynamic_rotate %9 by %c17_i32 dim 1 : vector<32x512xf32>, i32 -> vector<32x512xf32>
    %11 = vector.extract_strided_slice %0 {offsets = [0, 0], sizes = [1, 512], strides = [1, 1]} : vector<8x512xf32> to vector<1x512xf32>
    %12 = vector.broadcast %11 : vector<1x512xf32> to vector<32x512xf32>
    %13 = arith.mulf %10, %12 : vector<32x512xf32>
    %14 = arith.truncf %13 : vector<32x512xf32> to vector<32x512xbf16>
    %c16_i32 = arith.constant 16 : i32
    %15 = tpu.dynamic_rotate %9 by %c16_i32 dim 1 : vector<32x512xf32>, i32 -> vector<32x512xf32>
    %16 = vector.extract_strided_slice %0 {offsets = [1, 0], sizes = [1, 512], strides = [1, 1]} : vector<8x512xf32> to vector<1x512xf32>
    %17 = vector.broadcast %16 : vector<1x512xf32> to vector<32x512xf32>
    %18 = arith.mulf %15, %17 : vector<32x512xf32>
    %19 = arith.truncf %18 : vector<32x512xf32> to vector<32x512xbf16>
    %c15_i32 = arith.constant 15 : i32
    %20 = tpu.dynamic_rotate %9 by %c15_i32 dim 1 : vector<32x512xf32>, i32 -> vector<32x512xf32>
    %21 = vector.extract_strided_slice %0 {offsets = [2, 0], sizes = [1, 512], strides = [1, 1]} : vector<8x512xf32> to vector<1x512xf32>
    %22 = vector.broadcast %21 : vector<1x512xf32> to vector<32x512xf32>
    %23 = arith.mulf %20, %22 : vector<32x512xf32>
    %24 = arith.truncf %23 : vector<32x512xf32> to vector<32x512xbf16>
    %25 = tpu.concatenate %14, %19, %24 in 0 : vector<32x512xbf16>, vector<32x512xbf16>, vector<32x512xbf16> -> vector<96x512xbf16>
    %c0_12 = arith.constant 0 : index
    %c0_13 = arith.constant 0 : index
    %c0_14 = arith.constant 0 : index
    %26 = vector.load %arg6[%c0_12, %c0_13, %c0_14] : memref<3x32x96xbf16, #tpu.memory_space<vmem>>, vector<1x32x96xbf16>
    %27 = vector.shape_cast %26 : vector<1x32x96xbf16> to vector<32x96xbf16>
    %cst_15 = arith.constant dense<0.000000e+00> : vector<32x512xf32>
    %28 = tpu.matmul %27, %25, %cst_15 {dimension_numbers = #tpu.dot_dimension_numbers<[1], [0], [0], [1], [0, 0, 1, 1], [], []>} : vector<32x96xbf16>, vector<96x512xbf16>, vector<32x512xf32> -> vector<32x512xf32>
    %c1_i32 = arith.constant 1 : i32
    %29 = tpu.dynamic_rotate %9 by %c1_i32 dim 1 : vector<32x512xf32>, i32 -> vector<32x512xf32>
    %30 = vector.extract_strided_slice %0 {offsets = [3, 0], sizes = [1, 512], strides = [1, 1]} : vector<8x512xf32> to vector<1x512xf32>
    %31 = vector.broadcast %30 : vector<1x512xf32> to vector<32x512xf32>
    %32 = arith.mulf %29, %31 : vector<32x512xf32>
    %33 = arith.truncf %32 : vector<32x512xf32> to vector<32x512xbf16>
    %34 = arith.truncf %9 : vector<32x512xf32> to vector<32x512xbf16>
    %c511_i32 = arith.constant 511 : i32
    %35 = tpu.dynamic_rotate %9 by %c511_i32 dim 1 : vector<32x512xf32>, i32 -> vector<32x512xf32>
    %36 = vector.extract_strided_slice %0 {offsets = [4, 0], sizes = [1, 512], strides = [1, 1]} : vector<8x512xf32> to vector<1x512xf32>
    %37 = vector.broadcast %36 : vector<1x512xf32> to vector<32x512xf32>
    %38 = arith.mulf %35, %37 : vector<32x512xf32>
    %39 = arith.truncf %38 : vector<32x512xf32> to vector<32x512xbf16>
    %40 = tpu.concatenate %33, %34, %39 in 0 : vector<32x512xbf16>, vector<32x512xbf16>, vector<32x512xbf16> -> vector<96x512xbf16>
    %c1 = arith.constant 1 : index
    %c0_16 = arith.constant 0 : index
    %c0_17 = arith.constant 0 : index
    %41 = vector.load %arg6[%c1, %c0_16, %c0_17] : memref<3x32x96xbf16, #tpu.memory_space<vmem>>, vector<1x32x96xbf16>
    %42 = vector.shape_cast %41 : vector<1x32x96xbf16> to vector<32x96xbf16>
    %cst_18 = arith.constant dense<0.000000e+00> : vector<32x512xf32>
    %43 = tpu.matmul %42, %40, %cst_18 {dimension_numbers = #tpu.dot_dimension_numbers<[1], [0], [0], [1], [0, 0, 1, 1], [], []>} : vector<32x96xbf16>, vector<96x512xbf16>, vector<32x512xf32> -> vector<32x512xf32>
    %44 = arith.addf %28, %43 : vector<32x512xf32>
    %c497_i32 = arith.constant 497 : i32
    %45 = tpu.dynamic_rotate %9 by %c497_i32 dim 1 : vector<32x512xf32>, i32 -> vector<32x512xf32>
    %46 = vector.extract_strided_slice %0 {offsets = [5, 0], sizes = [1, 512], strides = [1, 1]} : vector<8x512xf32> to vector<1x512xf32>
    %47 = vector.broadcast %46 : vector<1x512xf32> to vector<32x512xf32>
    %48 = arith.mulf %45, %47 : vector<32x512xf32>
    %49 = arith.truncf %48 : vector<32x512xf32> to vector<32x512xbf16>
    %c496_i32 = arith.constant 496 : i32
    %50 = tpu.dynamic_rotate %9 by %c496_i32 dim 1 : vector<32x512xf32>, i32 -> vector<32x512xf32>
    %51 = vector.extract_strided_slice %0 {offsets = [6, 0], sizes = [1, 512], strides = [1, 1]} : vector<8x512xf32> to vector<1x512xf32>
    %52 = vector.broadcast %51 : vector<1x512xf32> to vector<32x512xf32>
    %53 = arith.mulf %50, %52 : vector<32x512xf32>
    %54 = arith.truncf %53 : vector<32x512xf32> to vector<32x512xbf16>
    %c495_i32 = arith.constant 495 : i32
    %55 = tpu.dynamic_rotate %9 by %c495_i32 dim 1 : vector<32x512xf32>, i32 -> vector<32x512xf32>
    %56 = vector.extract_strided_slice %0 {offsets = [7, 0], sizes = [1, 512], strides = [1, 1]} : vector<8x512xf32> to vector<1x512xf32>
    %57 = vector.broadcast %56 : vector<1x512xf32> to vector<32x512xf32>
    %58 = arith.mulf %55, %57 : vector<32x512xf32>
    %59 = arith.truncf %58 : vector<32x512xf32> to vector<32x512xbf16>
    %60 = tpu.concatenate %49, %54, %59 in 0 : vector<32x512xbf16>, vector<32x512xbf16>, vector<32x512xbf16> -> vector<96x512xbf16>
    %c2 = arith.constant 2 : index
    %c0_19 = arith.constant 0 : index
    %c0_20 = arith.constant 0 : index
    %61 = vector.load %arg6[%c2, %c0_19, %c0_20] : memref<3x32x96xbf16, #tpu.memory_space<vmem>>, vector<1x32x96xbf16>
    %62 = vector.shape_cast %61 : vector<1x32x96xbf16> to vector<32x96xbf16>
    %cst_21 = arith.constant dense<0.000000e+00> : vector<32x512xf32>
    %63 = tpu.matmul %62, %60, %cst_21 {dimension_numbers = #tpu.dot_dimension_numbers<[1], [0], [0], [1], [0, 0, 1, 1], [], []>} : vector<32x96xbf16>, vector<96x512xbf16>, vector<32x512xf32> -> vector<32x512xf32>
    %64 = arith.addf %44, %63 : vector<32x512xf32>
    %c0_22 = arith.constant 0 : index
    %c0_23 = arith.constant 0 : index
    %65 = vector.load %arg7[%c0_22, %c0_23] : memref<32x1xf32, #tpu.memory_space<vmem>>, vector<32x1xf32>
    %66 = vector.broadcast %65 : vector<32x1xf32> to vector<32x512xf32>
    %67 = arith.mulf %64, %66 : vector<32x512xf32>
    %c0_24 = arith.constant 0 : index
    %c0_25 = arith.constant 0 : index
    %68 = vector.load %arg8[%c0_24, %c0_25] : memref<32x1xf32, #tpu.memory_space<vmem>>, vector<32x1xf32>
    %69 = vector.broadcast %68 : vector<32x1xf32> to vector<32x512xf32>
    %70 = arith.addf %67, %69 : vector<32x512xf32>
    %cst_26 = arith.constant 0.000000e+00 : f32
    %cst_27 = arith.constant 6.000000e+00 : f32
    %71 = vector.broadcast %cst_26 : f32 to vector<32x512xf32>
    %72 = arith.maximumf %71, %70 : vector<32x512xf32>
    %73 = vector.broadcast %cst_27 : f32 to vector<32x512xf32>
    %74 = arith.minimumf %73, %72 : vector<32x512xf32>
    %75 = arith.truncf %74 : vector<32x512xf32> to vector<32x512xbf16>
    %c0_28 = arith.constant 0 : index
    %c0_29 = arith.constant 0 : index
    %76 = vector.load %arg9[%c0_28, %c0_29] : memref<32x32xbf16, #tpu.memory_space<vmem>>, vector<32x32xbf16>
    %cst_30 = arith.constant dense<0.000000e+00> : vector<32x512xf32>
    %77 = tpu.matmul %76, %75, %cst_30 {dimension_numbers = #tpu.dot_dimension_numbers<[1], [0], [0], [1], [0, 0, 1, 1], [], []>} : vector<32x32xbf16>, vector<32x512xbf16>, vector<32x512xf32> -> vector<32x512xf32>
    %c0_31 = arith.constant 0 : index
    %c0_32 = arith.constant 0 : index
    %78 = vector.load %arg10[%c0_31, %c0_32] : memref<32x1xf32, #tpu.memory_space<vmem>>, vector<32x1xf32>
    %79 = vector.broadcast %78 : vector<32x1xf32> to vector<32x512xf32>
    %80 = arith.mulf %77, %79 : vector<32x512xf32>
    %c0_33 = arith.constant 0 : index
    %c0_34 = arith.constant 0 : index
    %81 = vector.load %arg11[%c0_33, %c0_34] : memref<32x1xf32, #tpu.memory_space<vmem>>, vector<32x1xf32>
    %82 = vector.broadcast %81 : vector<32x1xf32> to vector<32x512xf32>
    %83 = arith.addf %80, %82 : vector<32x512xf32>
    %c17_i32_35 = arith.constant 17 : i32
    %84 = tpu.dynamic_rotate %74 by %c17_i32_35 dim 1 : vector<32x512xf32>, i32 -> vector<32x512xf32>
    %85 = vector.extract_strided_slice %0 {offsets = [0, 0], sizes = [1, 512], strides = [1, 1]} : vector<8x512xf32> to vector<1x512xf32>
    %86 = vector.broadcast %85 : vector<1x512xf32> to vector<32x512xf32>
    %87 = arith.mulf %84, %86 : vector<32x512xf32>
    %c0_36 = arith.constant 0 : index
    %c0_37 = arith.constant 0 : index
    %88 = vector.load %arg12[%c0_36, %c0_37] : memref<32x9xf32, #tpu.memory_space<vmem>>, vector<32x1xf32>
    %89 = vector.broadcast %88 : vector<32x1xf32> to vector<32x512xf32>
    %90 = arith.mulf %87, %89 : vector<32x512xf32>
    %c16_i32_38 = arith.constant 16 : i32
    %91 = tpu.dynamic_rotate %74 by %c16_i32_38 dim 1 : vector<32x512xf32>, i32 -> vector<32x512xf32>
    %92 = vector.extract_strided_slice %0 {offsets = [1, 0], sizes = [1, 512], strides = [1, 1]} : vector<8x512xf32> to vector<1x512xf32>
    %93 = vector.broadcast %92 : vector<1x512xf32> to vector<32x512xf32>
    %94 = arith.mulf %91, %93 : vector<32x512xf32>
    %c0_39 = arith.constant 0 : index
    %c1_40 = arith.constant 1 : index
    %95 = vector.load %arg12[%c0_39, %c1_40] : memref<32x9xf32, #tpu.memory_space<vmem>>, vector<32x1xf32>
    %96 = vector.broadcast %95 : vector<32x1xf32> to vector<32x512xf32>
    %97 = arith.mulf %94, %96 : vector<32x512xf32>
    %98 = arith.addf %90, %97 : vector<32x512xf32>
    %c15_i32_41 = arith.constant 15 : i32
    %99 = tpu.dynamic_rotate %74 by %c15_i32_41 dim 1 : vector<32x512xf32>, i32 -> vector<32x512xf32>
    %100 = vector.extract_strided_slice %0 {offsets = [2, 0], sizes = [1, 512], strides = [1, 1]} : vector<8x512xf32> to vector<1x512xf32>
    %101 = vector.broadcast %100 : vector<1x512xf32> to vector<32x512xf32>
    %102 = arith.mulf %99, %101 : vector<32x512xf32>
    %c0_42 = arith.constant 0 : index
    %c2_43 = arith.constant 2 : index
    %103 = vector.load %arg12[%c0_42, %c2_43] : memref<32x9xf32, #tpu.memory_space<vmem>>, vector<32x1xf32>
    %104 = vector.broadcast %103 : vector<32x1xf32> to vector<32x512xf32>
    %105 = arith.mulf %102, %104 : vector<32x512xf32>
    %106 = arith.addf %98, %105 : vector<32x512xf32>
    %c1_i32_44 = arith.constant 1 : i32
    %107 = tpu.dynamic_rotate %74 by %c1_i32_44 dim 1 : vector<32x512xf32>, i32 -> vector<32x512xf32>
    %108 = vector.extract_strided_slice %0 {offsets = [3, 0], sizes = [1, 512], strides = [1, 1]} : vector<8x512xf32> to vector<1x512xf32>
    %109 = vector.broadcast %108 : vector<1x512xf32> to vector<32x512xf32>
    %110 = arith.mulf %107, %109 : vector<32x512xf32>
    %c0_45 = arith.constant 0 : index
    %c3 = arith.constant 3 : index
    %111 = vector.load %arg12[%c0_45, %c3] : memref<32x9xf32, #tpu.memory_space<vmem>>, vector<32x1xf32>
    %112 = vector.broadcast %111 : vector<32x1xf32> to vector<32x512xf32>
    %113 = arith.mulf %110, %112 : vector<32x512xf32>
    %114 = arith.addf %106, %113 : vector<32x512xf32>
    %c0_46 = arith.constant 0 : index
    %c4 = arith.constant 4 : index
    %115 = vector.load %arg12[%c0_46, %c4] : memref<32x9xf32, #tpu.memory_space<vmem>>, vector<32x1xf32>
    %116 = vector.broadcast %115 : vector<32x1xf32> to vector<32x512xf32>
    %117 = arith.mulf %74, %116 : vector<32x512xf32>
    %118 = arith.addf %114, %117 : vector<32x512xf32>
    %c511_i32_47 = arith.constant 511 : i32
    %119 = tpu.dynamic_rotate %74 by %c511_i32_47 dim 1 : vector<32x512xf32>, i32 -> vector<32x512xf32>
    %120 = vector.extract_strided_slice %0 {offsets = [4, 0], sizes = [1, 512], strides = [1, 1]} : vector<8x512xf32> to vector<1x512xf32>
    %121 = vector.broadcast %120 : vector<1x512xf32> to vector<32x512xf32>
    %122 = arith.mulf %119, %121 : vector<32x512xf32>
    %c0_48 = arith.constant 0 : index
    %c5 = arith.constant 5 : index
    %123 = vector.load %arg12[%c0_48, %c5] : memref<32x9xf32, #tpu.memory_space<vmem>>, vector<32x1xf32>
    %124 = vector.broadcast %123 : vector<32x1xf32> to vector<32x512xf32>
    %125 = arith.mulf %122, %124 : vector<32x512xf32>
    %126 = arith.addf %118, %125 : vector<32x512xf32>
    %c497_i32_49 = arith.constant 497 : i32
    %127 = tpu.dynamic_rotate %74 by %c497_i32_49 dim 1 : vector<32x512xf32>, i32 -> vector<32x512xf32>
    %128 = vector.extract_strided_slice %0 {offsets = [5, 0], sizes = [1, 512], strides = [1, 1]} : vector<8x512xf32> to vector<1x512xf32>
    %129 = vector.broadcast %128 : vector<1x512xf32> to vector<32x512xf32>
    %130 = arith.mulf %127, %129 : vector<32x512xf32>
    %c0_50 = arith.constant 0 : index
    %c6 = arith.constant 6 : index
    %131 = vector.load %arg12[%c0_50, %c6] : memref<32x9xf32, #tpu.memory_space<vmem>>, vector<32x1xf32>
    %132 = vector.broadcast %131 : vector<32x1xf32> to vector<32x512xf32>
    %133 = arith.mulf %130, %132 : vector<32x512xf32>
    %134 = arith.addf %126, %133 : vector<32x512xf32>
    %c496_i32_51 = arith.constant 496 : i32
    %135 = tpu.dynamic_rotate %74 by %c496_i32_51 dim 1 : vector<32x512xf32>, i32 -> vector<32x512xf32>
    %136 = vector.extract_strided_slice %0 {offsets = [6, 0], sizes = [1, 512], strides = [1, 1]} : vector<8x512xf32> to vector<1x512xf32>
    %137 = vector.broadcast %136 : vector<1x512xf32> to vector<32x512xf32>
    %138 = arith.mulf %135, %137 : vector<32x512xf32>
    %c0_52 = arith.constant 0 : index
    %c7 = arith.constant 7 : index
    %139 = vector.load %arg12[%c0_52, %c7] : memref<32x9xf32, #tpu.memory_space<vmem>>, vector<32x1xf32>
    %140 = vector.broadcast %139 : vector<32x1xf32> to vector<32x512xf32>
    %141 = arith.mulf %138, %140 : vector<32x512xf32>
    %142 = arith.addf %134, %141 : vector<32x512xf32>
    %c495_i32_53 = arith.constant 495 : i32
    %143 = tpu.dynamic_rotate %74 by %c495_i32_53 dim 1 : vector<32x512xf32>, i32 -> vector<32x512xf32>
    %144 = vector.extract_strided_slice %0 {offsets = [7, 0], sizes = [1, 512], strides = [1, 1]} : vector<8x512xf32> to vector<1x512xf32>
    %145 = vector.broadcast %144 : vector<1x512xf32> to vector<32x512xf32>
    %146 = arith.mulf %143, %145 : vector<32x512xf32>
    %c0_54 = arith.constant 0 : index
    %c8 = arith.constant 8 : index
    %147 = vector.load %arg12[%c0_54, %c8] : memref<32x9xf32, #tpu.memory_space<vmem>>, vector<32x1xf32>
    %148 = vector.broadcast %147 : vector<32x1xf32> to vector<32x512xf32>
    %149 = arith.mulf %146, %148 : vector<32x512xf32>
    %150 = arith.addf %142, %149 : vector<32x512xf32>
    %c0_55 = arith.constant 0 : index
    %c0_56 = arith.constant 0 : index
    %151 = vector.load %arg13[%c0_55, %c0_56] : memref<32x1xf32, #tpu.memory_space<vmem>>, vector<32x1xf32>
    %152 = vector.broadcast %151 : vector<32x1xf32> to vector<32x512xf32>
    %153 = arith.addf %150, %152 : vector<32x512xf32>
    %154 = arith.negf %153 : vector<32x512xf32>
    %155 = math.exp %154 : vector<32x512xf32>
    %cst_57 = arith.constant 1.000000e+00 : f32
    %156 = vector.broadcast %cst_57 : f32 to vector<32x512xf32>
    %157 = arith.addf %156, %155 : vector<32x512xf32>
    %158 = arith.divf %156, %157 : vector<32x512xf32>
    %159 = arith.mulf %158, %74 : vector<32x512xf32>
    %160 = vector.extract_strided_slice %74 {offsets = [0, 0], sizes = [32, 256], strides = [1, 1]} : vector<32x512xf32> to vector<32x256xf32>
    %cst_58 = arith.constant dense<0.000000e+00> : vector<32xf32>
    %161 = vector.multi_reduction <add>, %160, %cst_58 [1] : vector<32x256xf32> to vector<32xf32>
    %162 = vector.shape_cast %161 : vector<32xf32> to vector<32x1xf32>
    %cst_59 = arith.constant 3.906250e-03 : f32
    %163 = vector.broadcast %cst_59 : f32 to vector<32x1xf32>
    %164 = arith.mulf %162, %163 : vector<32x1xf32>
    %c0_60 = arith.constant 0 : index
    %c0_61 = arith.constant 0 : index
    %165 = vector.load %arg14[%c0_60, %c0_61] : memref<32x2xf32, #tpu.memory_space<vmem>>, vector<32x2xf32>
    %166 = vector.broadcast %164 : vector<32x1xf32> to vector<32x2xf32>
    %167 = arith.mulf %165, %166 : vector<32x2xf32>
    %cst_62 = arith.constant dense<0.000000e+00> : vector<2xf32>
    %168 = vector.multi_reduction <add>, %167, %cst_62 [0] : vector<32x2xf32> to vector<2xf32>
    %169 = vector.shape_cast %168 : vector<2xf32> to vector<1x2xf32>
    %cst_63 = arith.constant 0.000000e+00 : f32
    %cst_64 = arith.constant 6.000000e+00 : f32
    %170 = vector.broadcast %cst_63 : f32 to vector<1x2xf32>
    %171 = arith.maximumf %170, %169 : vector<1x2xf32>
    %172 = vector.broadcast %cst_64 : f32 to vector<1x2xf32>
    %173 = arith.minimumf %172, %171 : vector<1x2xf32>
    %c0_65 = arith.constant 0 : index
    %c0_66 = arith.constant 0 : index
    %174 = vector.load %arg15[%c0_65, %c0_66] : memref<32x2xf32, #tpu.memory_space<vmem>>, vector<32x2xf32>
    %175 = vector.broadcast %173 : vector<1x2xf32> to vector<32x2xf32>
    %176 = arith.mulf %174, %175 : vector<32x2xf32>
    %cst_67 = arith.constant dense<0.000000e+00> : vector<32xf32>
    %177 = vector.multi_reduction <add>, %176, %cst_67 [1] : vector<32x2xf32> to vector<32xf32>
    %178 = vector.shape_cast %177 : vector<32xf32> to vector<32x1xf32>
    %179 = arith.negf %178 : vector<32x1xf32>
    %180 = math.exp %179 : vector<32x1xf32>
    %cst_68 = arith.constant 1.000000e+00 : f32
    %181 = vector.broadcast %cst_68 : f32 to vector<32x1xf32>
    %182 = arith.addf %181, %180 : vector<32x1xf32>
    %183 = arith.divf %181, %182 : vector<32x1xf32>
    %184 = vector.shape_cast %183 : vector<32x1xf32> to vector<32x1xf32>
    %185 = vector.broadcast %184 : vector<32x1xf32> to vector<32x256xf32>
    %186 = vector.extract_strided_slice %74 {offsets = [0, 256], sizes = [32, 256], strides = [1, 1]} : vector<32x512xf32> to vector<32x256xf32>
    %cst_69 = arith.constant dense<0.000000e+00> : vector<32xf32>
    %187 = vector.multi_reduction <add>, %186, %cst_69 [1] : vector<32x256xf32> to vector<32xf32>
    %188 = vector.shape_cast %187 : vector<32xf32> to vector<32x1xf32>
    %cst_70 = arith.constant 3.906250e-03 : f32
    %189 = vector.broadcast %cst_70 : f32 to vector<32x1xf32>
    %190 = arith.mulf %188, %189 : vector<32x1xf32>
    %c0_71 = arith.constant 0 : index
    %c0_72 = arith.constant 0 : index
    %191 = vector.load %arg14[%c0_71, %c0_72] : memref<32x2xf32, #tpu.memory_space<vmem>>, vector<32x2xf32>
    %192 = vector.broadcast %190 : vector<32x1xf32> to vector<32x2xf32>
    %193 = arith.mulf %191, %192 : vector<32x2xf32>
    %cst_73 = arith.constant dense<0.000000e+00> : vector<2xf32>
    %194 = vector.multi_reduction <add>, %193, %cst_73 [0] : vector<32x2xf32> to vector<2xf32>
    %195 = vector.shape_cast %194 : vector<2xf32> to vector<1x2xf32>
    %cst_74 = arith.constant 0.000000e+00 : f32
    %cst_75 = arith.constant 6.000000e+00 : f32
    %196 = vector.broadcast %cst_74 : f32 to vector<1x2xf32>
    %197 = arith.maximumf %196, %195 : vector<1x2xf32>
    %198 = vector.broadcast %cst_75 : f32 to vector<1x2xf32>
    %199 = arith.minimumf %198, %197 : vector<1x2xf32>
    %c0_76 = arith.constant 0 : index
    %c0_77 = arith.constant 0 : index
    %200 = vector.load %arg15[%c0_76, %c0_77] : memref<32x2xf32, #tpu.memory_space<vmem>>, vector<32x2xf32>
    %201 = vector.broadcast %199 : vector<1x2xf32> to vector<32x2xf32>
    %202 = arith.mulf %200, %201 : vector<32x2xf32>
    %cst_78 = arith.constant dense<0.000000e+00> : vector<32xf32>
    %203 = vector.multi_reduction <add>, %202, %cst_78 [1] : vector<32x2xf32> to vector<32xf32>
    %204 = vector.shape_cast %203 : vector<32xf32> to vector<32x1xf32>
    %205 = arith.negf %204 : vector<32x1xf32>
    %206 = math.exp %205 : vector<32x1xf32>
    %cst_79 = arith.constant 1.000000e+00 : f32
    %207 = vector.broadcast %cst_79 : f32 to vector<32x1xf32>
    %208 = arith.addf %207, %206 : vector<32x1xf32>
    %209 = arith.divf %207, %208 : vector<32x1xf32>
    %210 = vector.shape_cast %209 : vector<32x1xf32> to vector<32x1xf32>
    %211 = vector.broadcast %210 : vector<32x1xf32> to vector<32x256xf32>
    %212 = tpu.concatenate %185, %211 in 1 : vector<32x256xf32>, vector<32x256xf32> -> vector<32x512xf32>
    %213 = arith.mulf %212, %74 : vector<32x512xf32>
    %214 = arith.addf %159, %213 : vector<32x512xf32>
    %c17_i32_80 = arith.constant 17 : i32
    %215 = tpu.dynamic_rotate %214 by %c17_i32_80 dim 1 : vector<32x512xf32>, i32 -> vector<32x512xf32>
    %216 = vector.extract_strided_slice %0 {offsets = [0, 0], sizes = [1, 512], strides = [1, 1]} : vector<8x512xf32> to vector<1x512xf32>
    %217 = vector.broadcast %216 : vector<1x512xf32> to vector<32x512xf32>
    %218 = arith.mulf %215, %217 : vector<32x512xf32>
    %c0_81 = arith.constant 0 : index
    %c0_82 = arith.constant 0 : index
    %219 = vector.load %arg16[%c0_81, %c0_82] : memref<32x9xf32, #tpu.memory_space<vmem>>, vector<32x1xf32>
    %220 = vector.broadcast %219 : vector<32x1xf32> to vector<32x512xf32>
    %221 = arith.mulf %218, %220 : vector<32x512xf32>
    %c16_i32_83 = arith.constant 16 : i32
    %222 = tpu.dynamic_rotate %214 by %c16_i32_83 dim 1 : vector<32x512xf32>, i32 -> vector<32x512xf32>
    %223 = vector.extract_strided_slice %0 {offsets = [1, 0], sizes = [1, 512], strides = [1, 1]} : vector<8x512xf32> to vector<1x512xf32>
    %224 = vector.broadcast %223 : vector<1x512xf32> to vector<32x512xf32>
    %225 = arith.mulf %222, %224 : vector<32x512xf32>
    %c0_84 = arith.constant 0 : index
    %c1_85 = arith.constant 1 : index
    %226 = vector.load %arg16[%c0_84, %c1_85] : memref<32x9xf32, #tpu.memory_space<vmem>>, vector<32x1xf32>
    %227 = vector.broadcast %226 : vector<32x1xf32> to vector<32x512xf32>
    %228 = arith.mulf %225, %227 : vector<32x512xf32>
    %229 = arith.addf %221, %228 : vector<32x512xf32>
    %c15_i32_86 = arith.constant 15 : i32
    %230 = tpu.dynamic_rotate %214 by %c15_i32_86 dim 1 : vector<32x512xf32>, i32 -> vector<32x512xf32>
    %231 = vector.extract_strided_slice %0 {offsets = [2, 0], sizes = [1, 512], strides = [1, 1]} : vector<8x512xf32> to vector<1x512xf32>
    %232 = vector.broadcast %231 : vector<1x512xf32> to vector<32x512xf32>
    %233 = arith.mulf %230, %232 : vector<32x512xf32>
    %c0_87 = arith.constant 0 : index
    %c2_88 = arith.constant 2 : index
    %234 = vector.load %arg16[%c0_87, %c2_88] : memref<32x9xf32, #tpu.memory_space<vmem>>, vector<32x1xf32>
    %235 = vector.broadcast %234 : vector<32x1xf32> to vector<32x512xf32>
    %236 = arith.mulf %233, %235 : vector<32x512xf32>
    %237 = arith.addf %229, %236 : vector<32x512xf32>
    %c1_i32_89 = arith.constant 1 : i32
    %238 = tpu.dynamic_rotate %214 by %c1_i32_89 dim 1 : vector<32x512xf32>, i32 -> vector<32x512xf32>
    %239 = vector.extract_strided_slice %0 {offsets = [3, 0], sizes = [1, 512], strides = [1, 1]} : vector<8x512xf32> to vector<1x512xf32>
    %240 = vector.broadcast %239 : vector<1x512xf32> to vector<32x512xf32>
    %241 = arith.mulf %238, %240 : vector<32x512xf32>
    %c0_90 = arith.constant 0 : index
    %c3_91 = arith.constant 3 : index
    %242 = vector.load %arg16[%c0_90, %c3_91] : memref<32x9xf32, #tpu.memory_space<vmem>>, vector<32x1xf32>
    %243 = vector.broadcast %242 : vector<32x1xf32> to vector<32x512xf32>
    %244 = arith.mulf %241, %243 : vector<32x512xf32>
    %245 = arith.addf %237, %244 : vector<32x512xf32>
    %c0_92 = arith.constant 0 : index
    %c4_93 = arith.constant 4 : index
    %246 = vector.load %arg16[%c0_92, %c4_93] : memref<32x9xf32, #tpu.memory_space<vmem>>, vector<32x1xf32>
    %247 = vector.broadcast %246 : vector<32x1xf32> to vector<32x512xf32>
    %248 = arith.mulf %214, %247 : vector<32x512xf32>
    %249 = arith.addf %245, %248 : vector<32x512xf32>
    %c511_i32_94 = arith.constant 511 : i32
    %250 = tpu.dynamic_rotate %214 by %c511_i32_94 dim 1 : vector<32x512xf32>, i32 -> vector<32x512xf32>
    %251 = vector.extract_strided_slice %0 {offsets = [4, 0], sizes = [1, 512], strides = [1, 1]} : vector<8x512xf32> to vector<1x512xf32>
    %252 = vector.broadcast %251 : vector<1x512xf32> to vector<32x512xf32>
    %253 = arith.mulf %250, %252 : vector<32x512xf32>
    %c0_95 = arith.constant 0 : index
    %c5_96 = arith.constant 5 : index
    %254 = vector.load %arg16[%c0_95, %c5_96] : memref<32x9xf32, #tpu.memory_space<vmem>>, vector<32x1xf32>
    %255 = vector.broadcast %254 : vector<32x1xf32> to vector<32x512xf32>
    %256 = arith.mulf %253, %255 : vector<32x512xf32>
    %257 = arith.addf %249, %256 : vector<32x512xf32>
    %c497_i32_97 = arith.constant 497 : i32
    %258 = tpu.dynamic_rotate %214 by %c497_i32_97 dim 1 : vector<32x512xf32>, i32 -> vector<32x512xf32>
    %259 = vector.extract_strided_slice %0 {offsets = [5, 0], sizes = [1, 512], strides = [1, 1]} : vector<8x512xf32> to vector<1x512xf32>
    %260 = vector.broadcast %259 : vector<1x512xf32> to vector<32x512xf32>
    %261 = arith.mulf %258, %260 : vector<32x512xf32>
    %c0_98 = arith.constant 0 : index
    %c6_99 = arith.constant 6 : index
    %262 = vector.load %arg16[%c0_98, %c6_99] : memref<32x9xf32, #tpu.memory_space<vmem>>, vector<32x1xf32>
    %263 = vector.broadcast %262 : vector<32x1xf32> to vector<32x512xf32>
    %264 = arith.mulf %261, %263 : vector<32x512xf32>
    %265 = arith.addf %257, %264 : vector<32x512xf32>
    %c496_i32_100 = arith.constant 496 : i32
    %266 = tpu.dynamic_rotate %214 by %c496_i32_100 dim 1 : vector<32x512xf32>, i32 -> vector<32x512xf32>
    %267 = vector.extract_strided_slice %0 {offsets = [6, 0], sizes = [1, 512], strides = [1, 1]} : vector<8x512xf32> to vector<1x512xf32>
    %268 = vector.broadcast %267 : vector<1x512xf32> to vector<32x512xf32>
    %269 = arith.mulf %266, %268 : vector<32x512xf32>
    %c0_101 = arith.constant 0 : index
    %c7_102 = arith.constant 7 : index
    %270 = vector.load %arg16[%c0_101, %c7_102] : memref<32x9xf32, #tpu.memory_space<vmem>>, vector<32x1xf32>
    %271 = vector.broadcast %270 : vector<32x1xf32> to vector<32x512xf32>
    %272 = arith.mulf %269, %271 : vector<32x512xf32>
    %273 = arith.addf %265, %272 : vector<32x512xf32>
    %c495_i32_103 = arith.constant 495 : i32
    %274 = tpu.dynamic_rotate %214 by %c495_i32_103 dim 1 : vector<32x512xf32>, i32 -> vector<32x512xf32>
    %275 = vector.extract_strided_slice %0 {offsets = [7, 0], sizes = [1, 512], strides = [1, 1]} : vector<8x512xf32> to vector<1x512xf32>
    %276 = vector.broadcast %275 : vector<1x512xf32> to vector<32x512xf32>
    %277 = arith.mulf %274, %276 : vector<32x512xf32>
    %c0_104 = arith.constant 0 : index
    %c8_105 = arith.constant 8 : index
    %278 = vector.load %arg16[%c0_104, %c8_105] : memref<32x9xf32, #tpu.memory_space<vmem>>, vector<32x1xf32>
    %279 = vector.broadcast %278 : vector<32x1xf32> to vector<32x512xf32>
    %280 = arith.mulf %277, %279 : vector<32x512xf32>
    %281 = arith.addf %273, %280 : vector<32x512xf32>
    %c0_106 = arith.constant 0 : index
    %c0_107 = arith.constant 0 : index
    %282 = vector.load %arg17[%c0_106, %c0_107] : memref<32x1xf32, #tpu.memory_space<vmem>>, vector<32x1xf32>
    %283 = vector.broadcast %282 : vector<32x1xf32> to vector<32x512xf32>
    %284 = arith.mulf %281, %283 : vector<32x512xf32>
    %c0_108 = arith.constant 0 : index
    %c0_109 = arith.constant 0 : index
    %285 = vector.load %arg18[%c0_108, %c0_109] : memref<32x1xf32, #tpu.memory_space<vmem>>, vector<32x1xf32>
    %286 = vector.broadcast %285 : vector<32x1xf32> to vector<32x512xf32>
    %287 = arith.addf %284, %286 : vector<32x512xf32>
    %c0_110 = arith.constant 0 : index
    %c0_111 = arith.constant 0 : index
    %288 = vector.load %arg19[%c0_110, %c0_111] : memref<32x32xbf16, #tpu.memory_space<vmem>>, vector<32x32xbf16>
    %289 = arith.truncf %287 : vector<32x512xf32> to vector<32x512xbf16>
    %cst_112 = arith.constant dense<0.000000e+00> : vector<32x512xf32>
    %290 = tpu.matmul %288, %289, %cst_112 {dimension_numbers = #tpu.dot_dimension_numbers<[1], [0], [0], [1], [0, 0, 1, 1], [], []>} : vector<32x32xbf16>, vector<32x512xbf16>, vector<32x512xf32> -> vector<32x512xf32>
    %291 = arith.addf %290, %83 : vector<32x512xf32>
    %cst_113 = arith.constant 0.000000e+00 : f32
    %cst_114 = arith.constant 6.000000e+00 : f32
    %292 = vector.broadcast %cst_113 : f32 to vector<32x512xf32>
    %293 = arith.maximumf %292, %291 : vector<32x512xf32>
    %294 = vector.broadcast %cst_114 : f32 to vector<32x512xf32>
    %295 = arith.minimumf %294, %293 : vector<32x512xf32>
    %c0_115 = arith.constant 0 : index
    %c0_116 = arith.constant 0 : index
    %c0_117 = arith.constant 0 : index
    %296 = vector.load %arg20[%c0_115, %c0_116, %c0_117] : memref<1x32x512xf32, #tpu.memory_space<vmem>>, vector<1x32x512xf32>
    %297 = vector.shape_cast %296 : vector<1x32x512xf32> to vector<32x512xf32>
    %298 = vector.shape_cast %295 : vector<32x512xf32> to vector<1x32x512xf32>
    tpu.vector_store %arg20[%c0_115, %c0_116, %c0_117], %298 {strides = array<i32>} : memref<1x32x512xf32, #tpu.memory_space<vmem>>, vector<1x32x512xf32>,
    return
  }
  func.func @transform_0(%arg0: i32) -> (i32, i32, i32) {
    %c0_i32 = arith.constant 0 : i32
    %c0_i32_0 = arith.constant 0 : i32
    %c0_i32_1 = arith.constant 0 : i32
    return %arg0, %c0_i32, %c0_i32_0 : i32, i32, i32
  }
  func.func @transform_1(%arg0: i32) -> (i32, i32, i32) {
    %c0_i32 = arith.constant 0 : i32
    %c0_i32_0 = arith.constant 0 : i32
    %c0_i32_1 = arith.constant 0 : i32
    return %arg0, %c0_i32, %c0_i32_0 : i32, i32, i32
  }
  func.func @transform_2(%arg0: i32) -> (i32, i32) {
    %c0_i32 = arith.constant 0 : i32
    %c0_i32_0 = arith.constant 0 : i32
    %c0_i32_1 = arith.constant 0 : i32
    return %c0_i32, %c0_i32_0 : i32, i32
  }
  func.func @transform_3(%arg0: i32) -> (i32, i32) {
    %c0_i32 = arith.constant 0 : i32
    %c0_i32_0 = arith.constant 0 : i32
    %c0_i32_1 = arith.constant 0 : i32
    return %c0_i32, %c0_i32_0 : i32, i32
  }
  func.func @transform_4(%arg0: i32) -> (i32, i32) {
    %c0_i32 = arith.constant 0 : i32
    %c0_i32_0 = arith.constant 0 : i32
    %c0_i32_1 = arith.constant 0 : i32
    return %c0_i32, %c0_i32_0 : i32, i32
  }
  func.func @transform_5(%arg0: i32) -> (i32, i32, i32) {
    %c0_i32 = arith.constant 0 : i32
    %c0_i32_0 = arith.constant 0 : i32
    %c0_i32_1 = arith.constant 0 : i32
    %c0_i32_2 = arith.constant 0 : i32
    return %c0_i32, %c0_i32_0, %c0_i32_1 : i32, i32, i32
  }
  func.func @transform_6(%arg0: i32) -> (i32, i32) {
    %c0_i32 = arith.constant 0 : i32
    %c0_i32_0 = arith.constant 0 : i32
    %c0_i32_1 = arith.constant 0 : i32
    return %c0_i32, %c0_i32_0 : i32, i32
  }
  func.func @transform_7(%arg0: i32) -> (i32, i32) {
    %c0_i32 = arith.constant 0 : i32
    %c0_i32_0 = arith.constant 0 : i32
    %c0_i32_1 = arith.constant 0 : i32
    return %c0_i32, %c0_i32_0 : i32, i32
  }
  func.func @transform_8(%arg0: i32) -> (i32, i32) {
    %c0_i32 = arith.constant 0 : i32
    %c0_i32_0 = arith.constant 0 : i32
    %c0_i32_1 = arith.constant 0 : i32
    return %c0_i32, %c0_i32_0 : i32, i32
  }
  func.func @transform_9(%arg0: i32) -> (i32, i32) {
    %c0_i32 = arith.constant 0 : i32
    %c0_i32_0 = arith.constant 0 : i32
    %c0_i32_1 = arith.constant 0 : i32
    return %c0_i32, %c0_i32_0 : i32, i32
  }
  func.func @transform_10(%arg0: i32) -> (i32, i32) {
    %c0_i32 = arith.constant 0 : i32
    %c0_i32_0 = arith.constant 0 : i32
    %c0_i32_1 = arith.constant 0 : i32
    return %c0_i32, %c0_i32_0 : i32, i32
  }
  func.func @transform_11(%arg0: i32) -> (i32, i32) {
    %c0_i32 = arith.constant 0 : i32
    %c0_i32_0 = arith.constant 0 : i32
    %c0_i32_1 = arith.constant 0 : i32
    return %c0_i32, %c0_i32_0 : i32, i32
  }
  func.func @transform_12(%arg0: i32) -> (i32, i32) {
    %c0_i32 = arith.constant 0 : i32
    %c0_i32_0 = arith.constant 0 : i32
    %c0_i32_1 = arith.constant 0 : i32
    return %c0_i32, %c0_i32_0 : i32, i32
  }
  func.func @transform_13(%arg0: i32) -> (i32, i32) {
    %c0_i32 = arith.constant 0 : i32
    %c0_i32_0 = arith.constant 0 : i32
    %c0_i32_1 = arith.constant 0 : i32
    return %c0_i32, %c0_i32_0 : i32, i32
  }
  func.func @transform_14(%arg0: i32) -> (i32, i32) {
    %c0_i32 = arith.constant 0 : i32
    %c0_i32_0 = arith.constant 0 : i32
    %c0_i32_1 = arith.constant 0 : i32
    return %c0_i32, %c0_i32_0 : i32, i32
  }
  func.func @transform_15(%arg0: i32) -> (i32, i32) {
    %c0_i32 = arith.constant 0 : i32
    %c0_i32_0 = arith.constant 0 : i32
    %c0_i32_1 = arith.constant 0 : i32
    return %c0_i32, %c0_i32_0 : i32, i32
  }
  func.func @transform_16(%arg0: i32) -> (i32, i32) {
    %c0_i32 = arith.constant 0 : i32
    %c0_i32_0 = arith.constant 0 : i32
    %c0_i32_1 = arith.constant 0 : i32
    return %c0_i32, %c0_i32_0 : i32, i32
  }
  func.func @transform_17(%arg0: i32) -> (i32, i32) {
    %c0_i32 = arith.constant 0 : i32
    %c0_i32_0 = arith.constant 0 : i32
    %c0_i32_1 = arith.constant 0 : i32
    return %c0_i32, %c0_i32_0 : i32, i32
  }
  func.func @transform_18(%arg0: i32) -> (i32, i32) {
    %c0_i32 = arith.constant 0 : i32
    %c0_i32_0 = arith.constant 0 : i32
    %c0_i32_1 = arith.constant 0 : i32
    return %c0_i32, %c0_i32_0 : i32, i32
  }
  func.func @transform_19(%arg0: i32) -> (i32, i32, i32) {
    %c0_i32 = arith.constant 0 : i32
    %c0_i32_0 = arith.constant 0 : i32
    %c0_i32_1 = arith.constant 0 : i32
    return %arg0, %c0_i32, %c0_i32_0 : i32, i32, i32
  }
}

</mosaic_0001>

<bundles_post_ra>
// kernel: tpu_custom_call.1
= control target key start
LH: loop header
LB: loop body
LE: loop exit
PB: predicated region body
PF: predicated region fallthrough
CT: control target
= control target key end

     0   :  { %s11799_s0 = inlined_call_operand.hbm [shape: bf16[2,32,128], index: 0, kind: input, shape index: {}]   ;;  %s11800_s1 = inlined_call_operand.vmem [shape: bf16[2,32,512], index: 1, kind: input, shape index: {}]   ;;  %s11801_s2 = inlined_call_operand.vmem [shape: bf16[128,512], index: 2, kind: input, shape index: {}]   ;;  %s11802_s3 = inlined_call_operand.hbm [shape: f32[8,512], index: 3, kind: input, shape index: {}]   ;;  %s11803_s4 = inlined_call_operand.hbm [shape: bf16[32,32], index: 4, kind: input, shape index: {}]   ;;  %s11804_s5 = inlined_call_operand.hbm [shape: bf16[3,32,96], index: 5, kind: input, shape index: {}]   ;;  %s11805_s6 = inlined_call_operand.vmem [shape: f32[32,1], index: 6, kind: input, shape index: {}]   ;;  %s11806_s7 = inlined_call_operand.vmem [shape: f32[32,1], index: 7, kind: input, shape index: {}]   ;;  %s11807_s8 = inlined_call_operand.hbm [shape: bf16[32,32], index: 8, kind: input, shape index: {}]   ;;  %s11808_s9 = inlined_call_operand.vmem [shape: f32[32,1], index: 9, kind: input, shape index: {}]   ;;  %s11809_s10 = inlined_call_operand.vmem [shape: f32[32,1], index: 10, kind: input, shape index: {}]   ;;  %s11810_s11 = inlined_call_operand.vmem [shape: f32[32,9], index: 11, kind: input, shape index: {}]   ;;  %s11811_s12 = inlined_call_operand.vmem [shape: f32[32,1], index: 12, kind: input, shape index: {}]   ;;  %s11812_s13 = inlined_call_operand.vmem [shape: f32[32,2], index: 13, kind: input, shape index: {}]   ;;  %s11813_s14 = inlined_call_operand.vmem [shape: f32[32,2], index: 14, kind: input, shape index: {}]   ;;  %s11814_s15 = inlined_call_operand.vmem [shape: f32[32,9], index: 15, kind: input, shape index: {}]   ;;  %s11815_s16 = inlined_call_operand.vmem [shape: f32[32,1], index: 16, kind: input, shape index: {}]   ;;  %s11816_s17 = inlined_call_operand.vmem [shape: f32[32,1], index: 17, kind: input, shape index: {}]   ;;  %s11817_s18 = inlined_call_operand.hbm [shape: bf16[32,32], index: 18, kind: input, shape index: {}]   ;;  %s11818_s19 = inlined_call_operand.hbm [shape: f32[2,32,512], index: 19, kind: output, shape index: {}]  }
   0x1   :  { %12332 = sst [smem:[#allocation230_spill]] %s11799_s0 }
   0x2   :  { %12333 = sst [smem:[#allocation231_spill]] %s11800_s1 }
   0x3   :  { %12334 = sst [smem:[#allocation232_spill]] %s11801_s2 }
   0x4   :  { %12335 = sst [smem:[#allocation233_spill]] %s11802_s3 }
   0x5   :  { %12336 = sst [smem:[#allocation234_spill]] %s11803_s4 }
   0x6   :  { %12337 = sst [smem:[#allocation235_spill]] %s11804_s5 }
   0x7   :  { %12338 = sst [smem:[#allocation236_spill]] %s11807_s8 }
   0x8   :  { %12339 = sst [smem:[#allocation237_spill]] %s11816_s17 }
   0x9   :  { %12340 = sst [smem:[#allocation238_spill]] %s11817_s18 }
   0xa   :  { %12341 = sst [smem:[#allocation239_spill]] %s11818_s19 }
   0xb   :  { %24 = vsyncpa [#allocation3], 0 }
   0xc   :  { %26 = vsyncpa [#allocation3 + $0x1], 0 }
   0xd   :  { %27 = vsyncpa [#allocation6], 0 }
   0xe   :  { %28 = vsyncpa [#allocation9], 0 }
   0xf   :  { %29 = vsyncpa [#allocation12], 0 }
  0x10   :  { %30 = vsyncpa [#allocation4], 0 }
  0x11   :  { %32 = vsyncpa [#allocation4 + $0x1], 0  ;;  %s6106_s0 = smov 0   ;;  %s6108_s30 = smov 0  }
  0x12   :  { %s6110_s20 = smov 0   ;;  %s6112_s21 = smov 0  }
  0x13 LB: > { %12342 = sst [smem:[#allocation19_spill]] %s5972_s20  ;;  %s5978_s1 = smov [#allocation5]   ;;  %s5976_s21 = sphi %s6112_s21, %s13501_s21   ;;  %s5972_s20 = sphi %s6110_s20, %s13503_s20   ;;  %s5968_s30 = sphi %s6108_s30, %s13505_s30   ;;  %s5964_s0 = sphi %s6106_s0, %s13504_s0  }
  0x14   : > { %12343 = sst [smem:[#allocation20_spill]] %s5976_s21  ;;  %s494_s22 = sshll.u32 %s5978_s1, 4  ;;  %s495_s22 = int_to_ptr.vmem [resolvable:$true] %s494_s22 }
  0x15   : > { %s6127_s2 = sadd.s32 4294967295, %s5976_s21   ;;  %p5276_p0 = scmp.ge.s32.totalorder %s5976_s21, 1 }
  0x16   : > { %p11826_p1 = scmp.eq.s32.totalorder %s6127_s2, 0  ;;  %p478_p2 = scmp.lt.s32.totalorder %s5976_s21, 3 }
  0x17   : > { %s5979_s24 = smov [#allocation8]   ;;  %s5980_s26 = smov [#allocation7]  }
  0x18   : > { %p6132_p3 = pnand %p5276_p0, %p478_p2  ;;  %s517_s25 = sshll.u32 %s5979_s24, 4  ;;  %s6145_s25 = int_to_ptr.vmem [resolvable:$true] %s517_s25 }
  0x19   : > { %s504_s27 = sshll.u32 %s5980_s26, 4  ;;  %s5753_s29 = scalar_lea.vmem %s495_s22, 512  ;;  %s6147_s27 = int_to_ptr.vmem [resolvable:$true] %s504_s27 }
  0x1a   : > { %s12344_s23 = scalar_select %p6132_p3, 1, 0 }
  0x1b   : > { %p5430_p5 = pneg %p6132_p3  ;;  %p5754_p8 = scmp.ne.s32.totalorder %s495_s22, %s5753_s29 }
  0x1c   : > { %p5761_p11 = scmp.lt.s32.totalorder %s495_s22, %s495_s22  ;;  %p5762_p12 = scmp.lt.s32.totalorder %s5753_s29, %s5753_s29 }
  0x1d   : > { %p6141_p6 = pnand %p5430_p5, %p11826_p1 }
  0x1e   : > { %p5763_p13 = por %p5762_p12, %p5761_p11 }
  0x1f   : > { %p6151_p7 = pneg %p6141_p6 }
  0x21   : > { %p5756_p9 = pnand %p5754_p8, %p6151_p7 }
  0x23   : > { %p5757_p10 = pneg %p5756_p9 }
  0x25   : > { %p5764_p0 = pnand %p5763_p13, %p5757_p10 }
  0x27   : > { %5767 = shalt.err (!%p5764_p0)
}
  0x28   : > { %s12347_s26 = sld [smem:[#allocation233_spill]]  ;;  %s5779_s19 = scalar_lea.vmem %s6145_s25, 768 }
  0x29   : > { %p5780_p2 = scmp.ne.s32.totalorder %s6145_s25, %s5779_s19  ;;  %p5787_p9 = scmp.lt.s32.totalorder %s6145_s25, %s6145_s25 }
  0x2a   : > { %p5788_p11 = scmp.lt.s32.totalorder %s5779_s19, %s5779_s19 }
  0x2b   : > { %p5782_p5 = pnand %p5780_p2, %p6151_p7 }
  0x2c   : > { %p5789_p10 = por %p5788_p11, %p5787_p9 }
  0x2d   : > { %p5783_p8 = pneg %p5782_p5 }
  0x2e   : > { %5433 = dma.hbm_to_vmem [thread:$0]  (!%p6141_p6), %s12347_s26, 512, %s495_s22, [#allocation6]  }
  0x2f   : > { %p5790_p12 = pnand %p5789_p10, %p5783_p8 }
  0x31   : > { %5793 = shalt.err (!%p5790_p12)
}
  0x32   : > { %s11823_s29 = smov 64   ;;  %s11824_s1 = smov 4  }
  0x33   : > { %s12348_s5 = sld [smem:[#allocation235_spill]]  ;;  %s5805_s19 = scalar_lea.vmem %s6147_s27, 256 }
  0x34   : > { %p5806_p13 = scmp.ne.s32.totalorder %s6147_s27, %s5805_s19  ;;  %p5813_p5 = scmp.lt.s32.totalorder %s6147_s27, %s6147_s27 }
  0x35   : > { %p5814_p8 = scmp.lt.s32.totalorder %s5805_s19, %s5805_s19 }
  0x36   : > { %p5808_p0 = pnand %p5806_p13, %p6151_p7 }
  0x37   : > { %p5815_p9 = por %p5814_p8, %p5813_p5 }
  0x38   : > { %p5809_p2 = pneg %p5808_p0 }
  0x39   : > { %5439 = dma.hbm_to_vmem [thread:$0]  (!%p6141_p6), %s12348_s5, 768, %s6145_s25, [#allocation9], %s11823_s29, %s11823_s29, %s11824_s1  }
  0x3a   : > { %p5816_p11 = pnand %p5815_p9, %p5809_p2 }
  0x3c   : > { %5819 = shalt.err (!%p5816_p11)
}
  0x3d   : > { %s12349_s4 = sld [smem:[#allocation234_spill]]  ;;  %s5983_s25 = smov [#allocation10]  }
  0x3e   : > { %s536_s24 = sshll.u32 %s5983_s25, 4  ;;  %s5984_s5 = smov [#allocation11]   ;;  %s537_s24 = int_to_ptr.vmem [resolvable:$true] %s536_s24 }
  0x3f   : > { %s576_s17 = sshll.u32 %s5984_s5, 4  ;;  %s5831_s19 = scalar_lea.vmem %s537_s24, 256  ;;  %s577_s17 = int_to_ptr.vmem [resolvable:$true] %s576_s17 }
  0x40   : > { %p5832_p10 = scmp.ne.s32.totalorder %s537_s24, %s5831_s19  ;;  %p5839_p0 = scmp.lt.s32.totalorder %s537_s24, %s537_s24 }
  0x41   : > { %p5840_p2 = scmp.lt.s32.totalorder %s5831_s19, %s5831_s19 }
  0x42   : > { %p5834_p12 = pnand %p5832_p10, %p6151_p7 }
  0x43   : > { %5436 = dma.hbm_to_vmem [thread:$0]  (!%p6141_p6), %s12349_s4, 256, %s6147_s27, [#allocation6], %s11823_s29, %s11823_s29, %s11824_s1  }
  0x44   : > { %p5835_p13 = pneg %p5834_p12  ;;  %p5841_p5 = por %p5840_p2, %p5839_p0 }
  0x46   : > { %p5842_p8 = pnand %p5841_p5, %p5835_p13 }
  0x48   : > { %5845 = shalt.err (!%p5842_p8)
}
  0x49   : > { %s12350_s8 = sld [smem:[#allocation236_spill]]  ;;  %s5857_s5 = scalar_lea.vmem %s577_s17, 256 }
  0x4a   : > { %p5858_p9 = scmp.ne.s32.totalorder %s577_s17, %s5857_s5  ;;  %p5865_p12 = scmp.lt.s32.totalorder %s577_s17, %s577_s17 }
  0x4b   : > { %p5866_p0 = scmp.lt.s32.totalorder %s5857_s5, %s5857_s5 }
  0x4c   : > { %p5860_p11 = pnand %p5858_p9, %p6151_p7 }
  0x4d   : > { %p5867_p13 = por %p5866_p0, %p5865_p12 }
  0x4e   : > { %p5861_p10 = pneg %p5860_p11 }
  0x4f   : > { %5442 = dma.hbm_to_vmem [thread:$0]  (!%p6141_p6), %s12350_s8, 256, %s537_s24, [#allocation9], %s11823_s29, %s11823_s29, %s11824_s1  }
  0x50   : > { %p5868_p2 = pnand %p5867_p13, %p5861_p10 }
  0x52   : > { %5871 = shalt.err (!%p5868_p2)
}
  0x53   : > { %s12351_s18 = sld [smem:[#allocation238_spill]]  ;;  %s5275_s3 = sadd.s32 4294967294, %s5976_s21  }
  0x54   : > { %s6214_s28 = sadd.s32 1, %s5976_s21   ;;  %s45_s24 = sadd.s32 1, %s5972_s20 }
  0x55   : > { %12352 = sst [smem:[#allocation21_spill]] %s6214_s28  ;;  %s42_s19 = ssub.s32 %s5976_s21, %s6214_s28 }
  0x56   : > { %p52_p7 = scmp.ne.s32.totalorder %s5972_s20, %s5968_s30  ;;  %p43_p5 = scmp.eq.s32.totalorder %s42_s19, 0 }
  0x57   : > { %p53_p8 = scmp.eq.s32.totalorder %s5976_s21, 0  ;;  %p58_p9 = scmp.ne.s32.totalorder %s5968_s30, %s5964_s0 }
  0x58   : > { %p465_p11 = scmp.eq.s32.totalorder %s6127_s2, 1  ;;  %p471_p0 = scmp.eq.s32.totalorder %s5275_s3, 1 }
  0x59   : > { %5445 = dma.hbm_to_vmem [thread:$0]  (!%p6141_p6), %s12351_s18, 256, %s577_s17, [#allocation12], %s11823_s29, %s11823_s29, %s11824_s1  }
  0x5a   : > { %s6226_s27 = scalar_select %p43_p5, %s5972_s20, %s45_s24  }
  0x5b   : > { %p54_p10 = por %p53_p8, %p52_p7  ;;  %p6230_p12 = por %p11826_p1, %p58_p9 }
  0x5c   : > { %12353 = sst [smem:[#allocation22_spill]] %s6226_s27  ;;  %p6234_p6 = por %p465_p11, %p52_p7 }
  0x5d   : > { %s12354_s26 = scalar_select %p6230_p12, 1, 0 }
  0x5e   : > { %s12355_s17 = scalar_select %p6234_p6, 1, 0 }
  0x5f   : > { %p5459_p13 = scmp.lt.s32.totalorder %s5976_s21, 2  ;;  %s590_s5 = sand.u32 1, %s5972_s20  }
  0x60   : > { %p6240_p2 = por %p471_p0, %p58_p9  ;;  %s5283_s25 = sshll.u32 %s590_s5, 4 }
  0x61   : > { %s5403_s24 = sshll.u32 %s5976_s21, 8  ;;  %s12357_s1 = sld [smem:[#allocation230_spill]] }
  0x62   : > { %s12356_s22 = scalar_select %p6240_p2, 1, 0 }
  0x63   : > { %s594_s8 = scalar_lea.vmem [#allocation2], %s5283_s25  ;;  %p6250_p7 = pnand %p5459_p13, %p54_p10 }
  0x64   : > { %s601_s18 = sshll.u32 %s594_s8, 4  ;;  %s6256_s27 = scalar_lea.sflag [#allocation3], %s590_s5  ;;  %s6254_s18 = int_to_ptr.vmem [resolvable:$true] %s601_s18 }
  0x65   : > { %p5874_p8 = pneg %p6250_p7 }
  0x67   : > { %s6248_s4 = scalar_lea.hbm %s12357_s1, %s5403_s24  ;;  %s5877_s25 = scalar_lea.hbm %s12357_s1, 512 }
  0x68   : > { %s5872_s20 = scalar_lea.hbm %s6248_s4, 256  ;;  %p5878_p10 = scmp.lt.s32.totalorder %s6248_s4, %s12357_s1 }
  0x69   : > { %p5873_p5 = scmp.ne.s32.totalorder %s6248_s4, %s5872_s20  ;;  %p5879_p0 = scmp.lt.s32.totalorder %s5877_s25, %s5872_s20 }
  0x6b   : > { %p5875_p9 = pnand %p5874_p8, %p5873_p5  ;;  %p5880_p13 = por %p5879_p0, %p5878_p10 }
  0x6d   : > { %p5876_p11 = pneg %p5875_p9 }
  0x6f   : > { %p5881_p4 = pnand %p5880_p13, %p5876_p11 }
  0x71   : > { %5884 = shalt.err (!%p5881_p4)
}
  0x72   : > { %s5885_s5 = scalar_lea.vmem %s6254_s18, 256  ;;  %s5985_s28 = smov [#allocation2]  }
  0x73   : > { %p5886_p1 = scmp.ne.s32.totalorder %s6254_s18, %s5885_s5  ;;  %s5890_s21 = sshll.u32 %s5985_s28, 4  ;;  %s5891_s21 = int_to_ptr.vmem [resolvable:$false] %s5890_s21 }
  0x74   : > { %s5892_s29 = scalar_lea.vmem %s5891_s21, 512  ;;  %p5893_p9 = scmp.lt.s32.totalorder %s6254_s18, %s5891_s21 }
  0x75   : > { %p5888_p2 = pnand %p5886_p1, %p5874_p8  ;;  %p5894_p6 = scmp.lt.s32.totalorder %s5892_s29, %s5885_s5 }
  0x77   : > { %p5889_p5 = pneg %p5888_p2  ;;  %p5895_p12 = por %p5894_p6, %p5893_p9 }
  0x79   : > { %p5896_p3 = pnand %p5895_p12, %p5889_p5 }
  0x7b   : > { %5899 = shalt.err (!%p5896_p3)
}
  0x7c   : > { %s12359_s20 = smov 4   ;;  %s12360_s24 = smov 64  }
  0x7d   : > { %5449 = dma.hbm_to_vmem [thread:$0]  (!%p6250_p7), %s6248_s4, 256, %s6254_s18, %s6256_s27, %s12360_s24, %s12360_s24, %s12359_s20  }
  0x7e   : > { %p12361_p1 = scmp.ne.s32.totalorder %s12344_s23, 0 }
  0x80   : > { %621 = sbr.rel (%p12361_p1) target bundleno = 2463 (0x99f), region = 96 }
  0x85   : > { %s6283_s28 = sand.u32 1, %s5968_s30   ;;  %p12362_p3 = scmp.ne.s32.totalorder %s12354_s26, 0 }
  0x86   : > { %s5287_s21 = sshll.u32 %s6283_s28, 4  ;;  %s624_s25 = scalar_lea.sflag [#allocation3], %s6283_s28 }
  0x87   : > { %s6287_s8 = scalar_lea.vmem [#allocation2], %s5287_s21 }
  0x88   : > { %5943 = dma.done.wait (%p12362_p3), %s624_s25, 256  }
  0x89   : > { %5945 = vsyncadd (%p12362_p3), %s624_s25, 4294967040  ;;  %p12363_p4 = scmp.eq.s32.totalorder %s6127_s2, 0 }
  0x8b   : > { %5947 = dma.done.wait (%p12363_p4), [#allocation6], 768   ;;  %p12364_p12 = pmov %p12363_p4 }
  0x8c   : > { %p12365_p6 = pmov %p12363_p4 }
  0x8d   : > { %5949 = vsyncadd (%p12364_p12), [#allocation6], 4294966528 }
  0x8e   : > { %5951 = dma.done.wait (%p12365_p6), [#allocation9], 1024   ;;  %p12366_p2 = pmov %p12363_p4 }
  0x90   : > { %5953 = vsyncadd (%p12366_p2), [#allocation9], 4294966272  ;;  %p12367_p7 = pmov %p12366_p2 }
  0x91   : > { %p12368_p8 = pmov %p12366_p2 }
  0x92   : > { %5955 = dma.done.wait (%p12367_p7), [#allocation12], 256  }
  0x93   : > { %5957 = vsyncadd (%p12368_p8), [#allocation12], 4294967040  ;;  %v11834_v0 = vmov 0   ;;  %s12369_s23 = sld [smem:[#allocation232_spill]]  ;;  %p707_p11 = scmp.lt.s32.totalorder %s6127_s2, 1  ;;  %v5609_v34 = vld [vmem:[%s6287_s8] sm:$0xff]  }
  0x94   : > { %969 = vmatprep.mubr.bf16.mxu0 %v11834_v0  ;;  %1022 = vmatprep.mubr.bf16.mxu1 %v11834_v0  ;;  %s12370_s20 = sld [smem:[#allocation231_spill]]  ;;  %v2326_v37 = vld [vmem:[%s11805_s6 + $0x8] sm:$0xff]  ;;  %v2327_v42 = vld [vmem:[%s11805_s6 + $0x10] sm:$0xff]  ;;  %v5623_v45 = vld [vmem:[#allocation7] sm:$0xff]   ;;  %vm1093_vm0 = vcmask 261120   ;;  %s5987_s26 = smov 17  }
  0x95   : > { %5524 = vset.pattern.permute.xlu1 %v11834_v0  ;;  %s708_s4 = scalar_select %p707_p11, %s6127_s2, 1  ;;  %v5613_v44 = vld [vmem:[%s6287_s8 + $0x8] sm:$0xff]   ;;  %v2365_v47 = vld [vmem:[%s11806_s7] sm:$0xff]  ;;  %vm1680_vm8 = vcmask 785408   ;;  %vm3763_vm10 = vcmask 15360  }
  0x96   : > { %2336 = vperm.xlu1 %5524, %v2326_v37   ;;  %v5624_v46 = vld [vmem:[#allocation7 + $0x8] sm:$0xff]   ;;  %s5989_s3 = smov 15   ;;  %s5990_s1 = smov 1  }
  0x97   : > { %s5404_s24 = sshll.u32 %s708_s4, 6  ;;  %s5991_s19 = smov 127  }
  0x98   : > { %s5992_s5 = smov 113   ;;  %s5993_s4 = smov 112  }
  0x99   : > { %v5561_v1 = vld [vmem:[%s12369_s23 + $0xe4] ss:$16 sps:$4 sm:$0xff]   ;;  %v5563_v2 = vld [vmem:[%s12369_s23 + $0xec] ss:$16 sps:$4 sm:$0xff]   ;;  %v5565_v3 = vld [vmem:[%s12369_s23 + $0xe0] ss:$16 sps:$4 sm:$0xff]  }
  0x9a   : > { %937 = vmatprep.subr.bf16.mxu0 %v5561_v1  ;;  %v5566_v4 = vld [vmem:[%s12369_s23 + $0xe8] ss:$16 sps:$4 sm:$0xff]   ;;  %990 = vmatprep.subr.bf16.mxu1 %v5563_v2  ;;  %v5567_v5 = vld [vmem:[%s12369_s23 + $0xc4] ss:$16 sps:$4 sm:$0xff]   ;;  %v5569_v6 = vld [vmem:[%s12369_s23 + $0xcc] ss:$16 sps:$4 sm:$0xff]   ;;  %s6391_s21 = scalar_lea.vmem %s12370_s20, %s5404_s24 }
  0x9b   : > { %938 = vmatpush1.bf16.msra.mxu0 %v5565_v3  ;;  %991 = vmatpush1.bf16.msra.mxu1 %v5566_v4  ;;  %v5571_v7 = vld [vmem:[%s12369_s23 + $0xc0] ss:$16 sps:$4 sm:$0xff]   ;;  %v5572_v8 = vld [vmem:[%s12369_s23 + $0xc8] ss:$16 sps:$4 sm:$0xff]   ;;  %v5573_v9 = vld [vmem:[%s12369_s23 + $0xa4] ss:$16 sps:$4 sm:$0xff]  }
  0x9c   : > { %939 = vmatprep.subr.bf16.mxu0 %v5567_v5  ;;  %992 = vmatprep.subr.bf16.mxu1 %v5569_v6  ;;  %v5575_v10 = vld [vmem:[%s12369_s23 + $0xac] ss:$16 sps:$4 sm:$0xff]   ;;  %v5577_v11 = vld [vmem:[%s12369_s23 + $0xa0] ss:$16 sps:$4 sm:$0xff]   ;;  %v5578_v12 = vld [vmem:[%s12369_s23 + $0xa8] ss:$16 sps:$4 sm:$0xff]  }
  0x9d   : > { %v5579_v13 = vld [vmem:[%s12369_s23 + $0x84] ss:$16 sps:$4 sm:$0xff]   ;;  %v5581_v14 = vld [vmem:[%s12369_s23 + $0x8c] ss:$16 sps:$4 sm:$0xff]   ;;  %v5583_v15 = vld [vmem:[%s12369_s23 + $0x80] ss:$16 sps:$4 sm:$0xff]   ;;  %2341 = vperm.xlu1 %5524, %v2327_v42  }
  0x9e   : > { %v5584_v16 = vld [vmem:[%s12369_s23 + $0x88] ss:$16 sps:$4 sm:$0xff]   ;;  %v5585_v17 = vld [vmem:[%s12369_s23 + $0x64] ss:$16 sps:$4 sm:$0xff]   ;;  %v5587_v18 = vld [vmem:[%s12369_s23 + $0x6c] ss:$16 sps:$4 sm:$0xff]  }
  0x9f   : > { %940 = vmatpush1.bf16.msra.mxu0 %v5571_v7  ;;  %993 = vmatpush1.bf16.msra.mxu1 %v5572_v8  ;;  %v5589_v19 = vld [vmem:[%s12369_s23 + $0x60] ss:$16 sps:$4 sm:$0xff]   ;;  %v5590_v20 = vld [vmem:[%s12369_s23 + $0x68] ss:$16 sps:$4 sm:$0xff]   ;;  %v5591_v21 = vld [vmem:[%s12369_s23 + $0x44] ss:$16 sps:$4 sm:$0xff]  }
  0xa0   : > { %941 = vmatprep.subr.bf16.mxu0 %v5573_v9  ;;  %994 = vmatprep.subr.bf16.mxu1 %v5575_v10  ;;  %v5593_v22 = vld [vmem:[%s12369_s23 + $0x4c] ss:$16 sps:$4 sm:$0xff]   ;;  %v5595_v23 = vld [vmem:[%s12369_s23 + $0x40] ss:$16 sps:$4 sm:$0xff]   ;;  %v5596_v24 = vld [vmem:[%s12369_s23 + $0x48] ss:$16 sps:$4 sm:$0xff]  }
  0xa1   : > { %v5597_v25 = vld [vmem:[%s12369_s23 + $0x24] ss:$16 sps:$4 sm:$0xff]   ;;  %v5599_v26 = vld [vmem:[%s12369_s23 + $0x2c] ss:$16 sps:$4 sm:$0xff]   ;;  %v5601_v27 = vld [vmem:[%s12369_s23 + $0x20] ss:$16 sps:$4 sm:$0xff]   ;;  %2371 = vperm.xlu1 %5524, %v2365_v47  }
  0xa2   : > { %v5602_v28 = vld [vmem:[%s12369_s23 + $0x28] ss:$16 sps:$4 sm:$0xff]   ;;  %v5603_v29 = vld [vmem:[%s12369_s23 + $0x4] ss:$16 sps:$4 sm:$0xff]   ;;  %v5605_v30 = vld [vmem:[%s12369_s23 + $0xc] ss:$16 sps:$4 sm:$0xff]  }
  0xa3   : > { %942 = vmatpush1.bf16.msra.mxu0 %v5577_v11  ;;  %995 = vmatpush1.bf16.msra.mxu1 %v5578_v12  ;;  %v5607_v31 = vld [vmem:[%s12369_s23] ss:$16 sps:$4 sm:$0xff]   ;;  %v5608_v32 = vld [vmem:[%s12369_s23 + $0x8] ss:$16 sps:$4 sm:$0xff]   ;;  %v5612_v33 = vld [vmem:[%s6391_s21 + $0x2c] ss:$16 sps:$4 sm:$0xff]  }
  0xa4   : > { %943 = vmatprep.subr.bf16.mxu0 %v5579_v13  ;;  %996 = vmatprep.subr.bf16.mxu1 %v5581_v14  ;;  %v5616_v35 = vld [vmem:[%s6391_s21 + $0x24] ss:$16 sps:$4 sm:$0xff]   ;;  %v5610_v36 = vld [vmem:[%s6391_s21 + $0x28] ss:$16 sps:$4 sm:$0xff]   ;;  %v5614_v38 = vld [vmem:[%s6391_s21 + $0x20] ss:$16 sps:$4 sm:$0xff]  }
  0xa5   : > { %v5619_v39 = vld [vmem:[%s6391_s21 + $0x4] ss:$16 sps:$4 sm:$0xff]   ;;  %v5622_v40 = vld [vmem:[%s6391_s21 + $0xc] ss:$16 sps:$4 sm:$0xff]   ;;  %v5620_v41 = vld [vmem:[%s6391_s21 + $0x8] ss:$16 sps:$4 sm:$0xff]  }
  0xa6   : > { %v5617_v43 = vld [vmem:[%s6391_s21] ss:$16 sps:$4 sm:$0xff]   ;;  %s5988_s24 = smov 16   ;;  %s5994_s29 = smov 111  }
  0xa7   : > { %944 = vmatpush1.bf16.msra.mxu0 %v5583_v15  ;;  %997 = vmatpush1.bf16.msra.mxu1 %v5584_v16  ;;  %s5293_s25 = sshll.u32 %s6283_s28, 7  ;;  %s13496_s18 = sld [smem:[#allocation239_spill]] }
  0xa8   : > { %945 = vmatprep.subr.bf16.mxu0 %v5585_v17  ;;  %998 = vmatprep.subr.bf16.mxu1 %v5587_v18  ;;  %p13497_p0 = scmp.ne.s32.totalorder %s12355_s17, 0 }
  0xab   : > { %946 = vmatpush1.bf16.msra.mxu0 %v5589_v19  ;;  %999 = vmatpush1.bf16.msra.mxu1 %v5590_v20 }
  0xac   : > { %947 = vmatprep.subr.bf16.mxu0 %v5591_v21  ;;  %1000 = vmatprep.subr.bf16.mxu1 %v5593_v22 }
  0xaf   : > { %948 = vmatpush1.bf16.msra.mxu0 %v5595_v23  ;;  %1001 = vmatpush1.bf16.msra.mxu1 %v5596_v24 }
  0xb0   : > { %949 = vmatprep.subr.bf16.mxu0 %v5597_v25  ;;  %1002 = vmatprep.subr.bf16.mxu1 %v5599_v26 }
  0xb3   : > { %950 = vmatpush1.bf16.msra.mxu0 %v5601_v27  ;;  %1003 = vmatpush1.bf16.msra.mxu1 %v5602_v28 }
  0xb4   : > { %951 = vmatprep.subr.bf16.mxu0 %v5603_v29  ;;  %1004 = vmatprep.subr.bf16.mxu1 %v5605_v30 }
  0xb7   : > { %952 = vmatpush1.bf16.msra.mxu0 %v5607_v31  ;;  %1005 = vmatpush1.bf16.msra.mxu1 %v5608_v32 }
  0xb8   : > { %1165 = vmatprep.subr.bf16.mxu1 %v5612_v33  ;;  %1112 = vmatprep.subr.bf16.mxu0 %v5616_v35 }
  0xba   : > { %970 = vmatmul.mubr.bf16.vlgmr.msra.gmra.mxu0 %v5609_v34  ;;  %1023 = vmatmul.mubr.bf16.vlgmr.msra.gmra.mxu1 %v5609_v34 }
  0xbb   : > { %1166 = vmatpush1.bf16.msra.mxu1 %v5610_v36  ;;  %979 = vmatprep.mubr.bf16.mxu0 %v11834_v0 }
  0xbc   : > { %1032 = vmatprep.mubr.bf16.mxu1 %v11834_v0  ;;  %1113 = vmatpush1.bf16.msra.mxu0 %v5614_v38 }
  0xbd   : > { %1114 = vmatprep.subr.bf16.mxu0 %v5619_v39  ;;  %1167 = vmatprep.subr.bf16.mxu1 %v5622_v40 }
  0xbf   : > { %1168 = vmatpush1.bf16.msra.mxu1 %v5620_v41 }
  0xc0   : > { %1115 = vmatpush1.bf16.msra.mxu0 %v5617_v43 }
  0xc2   : > { %980 = vmatmul.mubr.bf16.gmra.mxu0 %v5613_v44  ;;  %1033 = vmatmul.mubr.bf16.gmra.mxu1 %v5613_v44 }
  0xc3   : > { %1132 = vmatprep.mubr.bf16.mxu0 %v11834_v0  ;;  %1185 = vmatprep.mubr.bf16.mxu1 %v11834_v0 }
  0xca   : > { %5340 = vmatmul.mubr.msk.bf16.vlgmr.msra.gmra.mxu0 %vm1093_vm0, %v5623_v45  ;;  %5342 = vmatmul.mubr.msk.bf16.vlgmr.msra.gmra.mxu1 %vm1093_vm0, %v5623_v45 }
  0xcb   : > { %1142 = vmatprep.mubr.bf16.mxu0 %v11834_v0  ;;  %1195 = vmatprep.mubr.bf16.mxu1 %v11834_v0 }
  0xd2   : > { %5341 = vmatmul.mubr.msk.bf16.gmra.mxu0 %vm1093_vm0, %v5624_v46  ;;  %5343 = vmatmul.mubr.msk.bf16.gmra.mxu1 %vm1093_vm0, %v5624_v46 }
  0xd3   : > { %1719 = vmatprep.mubr.bf16.mxu0 %v11834_v0  ;;  %1772 = vmatprep.mubr.bf16.mxu1 %v11834_v0 }
 0x111   : > { %v6587_v18 = vpop.permute.xlu1 %2336 }
 0x112   : > { %12379 = vst [vmem:[#allocation31_spill] sm:$0xff] %v6587_v18 }
 0x118   : > { %v6593_v19 = vpop.permute.xlu1 %2341 }
 0x119   : > { %12380 = vst [vmem:[#allocation32_spill] sm:$0xff] %v6593_v19 }
 0x11c   : > { %v6603_v20 = vpop.permute.xlu1 %2371 }
 0x11d   : > { %12381 = vst [vmem:[#allocation33_spill] sm:$0xff] %v6603_v20 }
 0x17a   : > { %v971_v48 = vpop.f32.mrf.mxu0  ;;  %v1024_v49 = vpop.f32.mrf.mxu1 }
 0x17c   : > { %v6442_v50 = vpop.f32.mrf.mxu0  ;;  %v1026_v51 = vpop.f32.mrf.mxu1 }
 0x17e   : > { %v975_v52 = vpop.f32.mrf.mxu0  ;;  %v1028_v53 = vpop.f32.mrf.mxu1 }
 0x180   : > { %v6444_v54 = vpop.f32.mrf.mxu0  ;;  %v6446_v55 = vpop.f32.mrf.mxu1 }
 0x182   : > { %v6448_v56 = vpop.f32.mrf.mxu0  ;;  %v6450_v57 = vpop.f32.mrf.mxu1 }
 0x184   : > { %v6452_v58 = vpop.f32.mrf.mxu0  ;;  %v6454_v59 = vpop.f32.mrf.mxu1 }
 0x186   : > { %v6456_v60 = vpop.f32.mrf.mxu0  ;;  %v6458_v61 = vpop.f32.mrf.mxu1 }
 0x188   : > { %v6460_v62 = vpop.f32.mrf.mxu0  ;;  %v6462_v63 = vpop.f32.mrf.mxu1 }
 0x18a   : > { %v1134_v1 = vpop.f32.mrf.mxu0  ;;  %v1187_v2 = vpop.f32.mrf.mxu1 }
 0x18b   : > { %v6464_v3 = vadd.f32 %v1134_v1, %v971_v48  ;;  %v6470_v8 = vadd.f32 %v1187_v2, %v1024_v49 }
 0x18c   : > { %v1136_v4 = vpop.f32.mrf.mxu0  ;;  %v1189_v5 = vpop.f32.mrf.mxu1 }
 0x18d   : > { %12371 = vst [vmem:[#allocation23_spill] sm:$0xff] %v6464_v3  ;;  %v6466_v6 = vadd.f32 %v1189_v5, %v1026_v51  ;;  %1206 = vrot.lane.b32.xlu0 %v6464_v3, %s5987_s26  ;;  %12373 = vst [vmem:[#allocation25_spill] sm:$0xff] %v6470_v8  ;;  %v6539_v14 = vadd.f32 %v1136_v4, %v6442_v50 }
 0x18e   : > { %v1191_v7 = vpop.f32.mrf.mxu1  ;;  %v1138_v10 = vpop.f32.mrf.mxu0 }
 0x18f   : > { %12372 = vst [vmem:[#allocation24_spill] sm:$0xff] %v6466_v6  ;;  %v6472_v9 = vadd.f32 %v1191_v7, %v1028_v53  ;;  %v6480_v12 = vadd.f32 %v1138_v10, %v975_v52  ;;  %12376 = vst [vmem:[#allocation28_spill] sm:$0xff] %v6539_v14 }
 0x190   : > { %v1140_v13 = vpop.f32.mrf.mxu0  ;;  %v1193_v16 = vpop.f32.mrf.mxu1 }
 0x191   : > { %12374 = vst [vmem:[#allocation26_spill] sm:$0xff] %v6472_v9  ;;  %1224 = vrot.lane.b32.xlu1 %v6472_v9, %s5987_s26  ;;  %1222 = vrot.lane.b32.xlu0 %v6470_v8, %s5987_s26  ;;  %12375 = vst [vmem:[#allocation27_spill] sm:$0xff] %v6480_v12  ;;  %v6542_v15 = vadd.f32 %v1140_v13, %v6444_v54  ;;  %v6549_v17 = vadd.f32 %v1193_v16, %v6446_v55 }
 0x192   : > { %v1144_v24 = vpop.f32.mrf.mxu0  ;;  %v1197_v27 = vpop.f32.mrf.mxu1 }
 0x193   : > { %12377 = vst [vmem:[#allocation29_spill] sm:$0xff] %v6542_v15  ;;  %12378 = vst [vmem:[#allocation30_spill] sm:$0xff] %v6549_v17  ;;  %v6630_v29 = vadd.f32 %v1144_v24, %v6448_v56  ;;  %v6643_v34 = vadd.f32 %v1197_v27, %v6450_v57 }
 0x194   : > { %v6623_v28 = vpop.f32.mrf.mxu0  ;;  %v6636_v32 = vpop.f32.mrf.mxu1 }
 0x195   : > { %1299 = vrot.lane.b32.xlu1 %v6480_v12, %s5988_s24  ;;  %1297 = vrot.lane.b32.xlu0 %v6464_v3, %s5988_s24  ;;  %12382 = vst [vmem:[#allocation34_spill] sm:$0xff] %v6630_v29  ;;  %12383 = vst [vmem:[#allocation35_spill] sm:$0xff] %v6643_v34  ;;  %v6792_v18 = vadd.f32 %v6636_v32, %v6454_v59 }
 0x196   : > { %v1148_v33 = vpop.f32.mrf.mxu0  ;;  %v1201_v38 = vpop.f32.mrf.mxu1 }
 0x197   : > { %v6646_v35 = vadd.f32 %v1148_v33, %v6456_v60  ;;  %v6657_v39 = vadd.f32 %v1201_v38, %v6458_v61  ;;  %v6777_v33 = vadd.f32 %v6623_v28, %v6452_v58  ;;  %12406 = vst [vmem:[#allocation58_spill] sm:$0xff] %v6792_v18 }
 0x198   : > { %v1150_v38 = vpop.f32.mrf.mxu0  ;;  %v1203_v58 = vpop.f32.mrf.mxu1 }
 0x199   : > { %1315 = vrot.lane.b32.xlu1 %v6472_v9, %s5988_s24  ;;  %1313 = vrot.lane.b32.xlu0 %v6470_v8, %s5988_s24  ;;  %12384 = vst [vmem:[#allocation36_spill] sm:$0xff] %v6646_v35  ;;  %12385 = vst [vmem:[#allocation37_spill] sm:$0xff] %v6657_v39  ;;  %v6784_v11 = vadd.f32 %v1150_v38, %v6460_v62  ;;  %v6799_v28 = vadd.f32 %v1203_v58, %v6462_v63 }
 0x19a   : > { %12404 = vst [vmem:[#allocation56_spill] sm:$0xff] %v6777_v33 }
 0x19b   : > { %12405 = vst [vmem:[#allocation57_spill] sm:$0xff] %v6784_v11  ;;  %12407 = vst [vmem:[#allocation59_spill] sm:$0xff] %v6799_v28 }
 0x19d   : > { %1388 = vrot.lane.b32.xlu1 %v6480_v12, %s5989_s3  ;;  %1386 = vrot.lane.b32.xlu0 %v6464_v3, %s5989_s3 }
 0x1a1   : > { %1404 = vrot.lane.b32.xlu1 %v6472_v9, %s5989_s3  ;;  %1402 = vrot.lane.b32.xlu0 %v6470_v8, %s5989_s3 }
 0x1a5   : > { %1481 = vrot.lane.b32.xlu1 %v6480_v12, %s5990_s1  ;;  %1479 = vrot.lane.b32.xlu0 %v6464_v3, %s5990_s1 }
 0x1a9   : > { %1497 = vrot.lane.b32.xlu1 %v6472_v9, %s5990_s1  ;;  %1495 = vrot.lane.b32.xlu0 %v6470_v8, %s5990_s1 }
 0x1ad   : > { %1578 = vrot.lane.b32.xlu1 %v6480_v12, %s5991_s19  ;;  %1576 = vrot.lane.b32.xlu0 %v6464_v3, %s5991_s19 }
 0x1b1   : > { %1594 = vrot.lane.b32.xlu1 %v6472_v9, %s5991_s19  ;;  %1592 = vrot.lane.b32.xlu0 %v6470_v8, %s5991_s19 }
 0x1b5   : > { %1917 = vrot.lane.b32.xlu1 %v6480_v12, %s5992_s5  ;;  %1915 = vrot.lane.b32.xlu0 %v6464_v3, %s5992_s5 }
 0x1b9   : > { %1933 = vrot.lane.b32.xlu1 %v6472_v9, %s5992_s5  ;;  %1931 = vrot.lane.b32.xlu0 %v6470_v8, %s5992_s5 }
 0x1bd   : > { %2006 = vrot.lane.b32.xlu1 %v6480_v12, %s5993_s4  ;;  %2004 = vrot.lane.b32.xlu0 %v6464_v3, %s5993_s4 }
 0x1c1   : > { %2022 = vrot.lane.b32.xlu1 %v6472_v9, %s5993_s4  ;;  %2020 = vrot.lane.b32.xlu0 %v6470_v8, %s5993_s4 }
 0x1c5   : > { %2095 = vrot.lane.b32.xlu1 %v6480_v12, %s5994_s29  ;;  %2093 = vrot.lane.b32.xlu0 %v6464_v3, %s5994_s29 }
 0x1c9   : > { %2111 = vrot.lane.b32.xlu1 %v6472_v9, %s5994_s29  ;;  %2109 = vrot.lane.b32.xlu0 %v6470_v8, %s5994_s29 }
 0x1cd   : > { %1216 = vrot.lane.b32.xlu1 %v6542_v15, %s5987_s26  ;;  %1214 = vrot.lane.b32.xlu0 %v6539_v14, %s5987_s26 }
 0x1d1   : > { %1232 = vrot.lane.b32.xlu1 %v6549_v17, %s5987_s26  ;;  %1230 = vrot.lane.b32.xlu0 %v6466_v6, %s5987_s26 }
 0x1d5   : > { %1307 = vrot.lane.b32.xlu1 %v6542_v15, %s5988_s24  ;;  %1305 = vrot.lane.b32.xlu0 %v6539_v14, %s5988_s24 }
 0x1d9   : > { %1323 = vrot.lane.b32.xlu1 %v6549_v17, %s5988_s24  ;;  %1321 = vrot.lane.b32.xlu0 %v6466_v6, %s5988_s24 }
 0x1dd   : > { %1396 = vrot.lane.b32.xlu1 %v6542_v15, %s5989_s3  ;;  %1394 = vrot.lane.b32.xlu0 %v6539_v14, %s5989_s3 }
 0x1e1   : > { %1412 = vrot.lane.b32.xlu1 %v6549_v17, %s5989_s3  ;;  %1410 = vrot.lane.b32.xlu0 %v6466_v6, %s5989_s3 }
 0x1e5   : > { %1489 = vrot.lane.b32.xlu1 %v6542_v15, %s5990_s1  ;;  %1487 = vrot.lane.b32.xlu0 %v6539_v14, %s5990_s1 }
 0x1e9   : > { %1505 = vrot.lane.b32.xlu1 %v6549_v17, %s5990_s1  ;;  %1503 = vrot.lane.b32.xlu0 %v6466_v6, %s5990_s1 }
 0x1ed   : > { %1586 = vrot.lane.b32.xlu1 %v6542_v15, %s5991_s19  ;;  %1584 = vrot.lane.b32.xlu0 %v6539_v14, %s5991_s19 }
 0x1f1   : > { %1602 = vrot.lane.b32.xlu1 %v6549_v17, %s5991_s19  ;;  %1600 = vrot.lane.b32.xlu0 %v6466_v6, %s5991_s19 }
 0x1f5   : > { %1925 = vrot.lane.b32.xlu1 %v6542_v15, %s5992_s5  ;;  %1923 = vrot.lane.b32.xlu0 %v6539_v14, %s5992_s5 }
 0x1f9   : > { %1941 = vrot.lane.b32.xlu1 %v6549_v17, %s5992_s5  ;;  %1939 = vrot.lane.b32.xlu0 %v6466_v6, %s5992_s5 }
 0x1fd   : > { %2014 = vrot.lane.b32.xlu1 %v6542_v15, %s5993_s4  ;;  %2012 = vrot.lane.b32.xlu0 %v6539_v14, %s5993_s4 }
 0x1ff   : > { %v6605_v21 = vpop.permute.xlu0 %1206 }
 0x201   : > { %2030 = vrot.lane.b32.xlu1 %v6549_v17, %s5993_s4  ;;  %2028 = vrot.lane.b32.xlu0 %v6466_v6, %s5993_s4 }
 0x203   : > { %v6611_v22 = vpop.permute.xlu1 %1224  ;;  %v6613_v23 = vpop.permute.xlu0 %1222 }
 0x205   : > { %2103 = vrot.lane.b32.xlu1 %v6542_v15, %s5994_s29  ;;  %2101 = vrot.lane.b32.xlu0 %v6539_v14, %s5994_s29 }
 0x207   : > { %v6619_v25 = vpop.permute.xlu1 %1299  ;;  %v6621_v26 = vpop.permute.xlu0 %1297 }
 0x209   : > { %2119 = vrot.lane.b32.xlu1 %v6549_v17, %s5994_s29  ;;  %2117 = vrot.lane.b32.xlu0 %v6466_v6, %s5994_s29  ;;  %v2325_v17 = vld [vmem:[%s11805_s6] sm:$0xff] }
 0x20b   : > { %v6632_v30 = vpop.permute.xlu1 %1315  ;;  %v6634_v31 = vpop.permute.xlu0 %1313 }
 0x20d   : > { %1210 = vrot.lane.b32.xlu1 %v6630_v29, %s5987_s26  ;;  %1208 = vrot.lane.b32.xlu0 %v6480_v12, %s5987_s26 }
 0x20f   : > { %v6648_v36 = vpop.permute.xlu1 %1388  ;;  %v6650_v37 = vpop.permute.xlu0 %1386 }
 0x211   : > { %1212 = vrot.lane.b32.xlu1 %v6646_v35, %s5987_s26  ;;  %1226 = vrot.lane.b32.xlu0 %v6643_v34, %s5987_s26 }
 0x213   : > { %v6659_v40 = vpop.permute.xlu1 %1404  ;;  %v6661_v41 = vpop.permute.xlu0 %1402 }
 0x215   : > { %1228 = vrot.lane.b32.xlu1 %v6657_v39, %s5987_s26  ;;  %1301 = vrot.lane.b32.xlu0 %v6630_v29, %s5988_s24 }
 0x217   : > { %v6667_v42 = vpop.permute.xlu1 %1481  ;;  %v6669_v43 = vpop.permute.xlu0 %1479 }
 0x218   : > { %12386 = vst [vmem:[#allocation38_spill] sm:$0xff] %v6669_v43 }
 0x219   : > { %1303 = vrot.lane.b32.xlu1 %v6646_v35, %s5988_s24  ;;  %1317 = vrot.lane.b32.xlu0 %v6643_v34, %s5988_s24 }
 0x21b   : > { %v6675_v44 = vpop.permute.xlu1 %1497  ;;  %v6677_v45 = vpop.permute.xlu0 %1495 }
 0x21c   : > { %12387 = vst [vmem:[#allocation39_spill] sm:$0xff] %v6677_v45 }
 0x21d   : > { %1319 = vrot.lane.b32.xlu1 %v6657_v39, %s5988_s24  ;;  %1390 = vrot.lane.b32.xlu0 %v6630_v29, %s5989_s3 }
 0x21f   : > { %v6683_v46 = vpop.permute.xlu1 %1578  ;;  %v6685_v47 = vpop.permute.xlu0 %1576 }
 0x220   : > { %12388 = vst [vmem:[#allocation40_spill] sm:$0xff] %v6683_v46  ;;  %12389 = vst [vmem:[#allocation41_spill] sm:$0xff] %v6685_v47  ;;  %v1238_v47 = vlaneseq }
 0x221   : > { %1392 = vrot.lane.b32.xlu1 %v6646_v35, %s5989_s3  ;;  %1406 = vrot.lane.b32.xlu0 %v6643_v34, %s5989_s3 }
 0x223   : > { %v6691_v48 = vpop.permute.xlu1 %1594  ;;  %v6693_v49 = vpop.permute.xlu0 %1592 }
 0x225   : > { %1408 = vrot.lane.b32.xlu1 %v6657_v39, %s5989_s3  ;;  %1483 = vrot.lane.b32.xlu0 %v6630_v29, %s5990_s1 }
 0x227   : > { %v6699_v50 = vpop.permute.xlu1 %1917  ;;  %v6701_v51 = vpop.permute.xlu0 %1915 }
 0x228   : > { %12390 = vst [vmem:[#allocation42_spill] sm:$0xff] %v6699_v50  ;;  %12391 = vst [vmem:[#allocation43_spill] sm:$0xff] %v6701_v51  ;;  %v2571_v51 = vld [vmem:[%s11808_s9] sm:$0xff] }
 0x229   : > { %1485 = vrot.lane.b32.xlu1 %v6646_v35, %s5990_s1  ;;  %1499 = vrot.lane.b32.xlu0 %v6643_v34, %s5990_s1 }
 0x22b   : > { %v6707_v52 = vpop.permute.xlu1 %1933  ;;  %v6709_v53 = vpop.permute.xlu0 %1931 }
 0x22c   : > { %12392 = vst [vmem:[#allocation44_spill] sm:$0xff] %v6707_v52  ;;  %12393 = vst [vmem:[#allocation45_spill] sm:$0xff] %v6709_v53 }
 0x22d   : > { %1501 = vrot.lane.b32.xlu1 %v6657_v39, %s5990_s1  ;;  %1580 = vrot.lane.b32.xlu0 %v6630_v29, %s5991_s19 }
 0x22f   : > { %v6715_v54 = vpop.permute.xlu1 %2006  ;;  %v6717_v55 = vpop.permute.xlu0 %2004 }
 0x230   : > { %12394 = vst [vmem:[#allocation46_spill] sm:$0xff] %v6715_v54  ;;  %12395 = vst [vmem:[#allocation47_spill] sm:$0xff] %v6717_v55 }
 0x231   : > { %1582 = vrot.lane.b32.xlu1 %v6646_v35, %s5991_s19  ;;  %1596 = vrot.lane.b32.xlu0 %v6643_v34, %s5991_s19 }
 0x233   : > { %v6723_v56 = vpop.permute.xlu1 %2022  ;;  %v6725_v57 = vpop.permute.xlu0 %2020 }
 0x234   : > { %12396 = vst [vmem:[#allocation48_spill] sm:$0xff] %v6723_v56  ;;  %12397 = vst [vmem:[#allocation49_spill] sm:$0xff] %v6725_v57 }
 0x235   : > { %1598 = vrot.lane.b32.xlu1 %v6657_v39, %s5991_s19  ;;  %1919 = vrot.lane.b32.xlu0 %v6630_v29, %s5992_s5 }
 0x237   : > { %v6731_v60 = vpop.permute.xlu1 %2095  ;;  %v6733_v61 = vpop.permute.xlu0 %2093 }
 0x238   : > { %12398 = vst [vmem:[#allocation50_spill] sm:$0xff] %v6731_v60  ;;  %12399 = vst [vmem:[#allocation51_spill] sm:$0xff] %v6733_v61 }
 0x239   : > { %1921 = vrot.lane.b32.xlu1 %v6646_v35, %s5992_s5  ;;  %1935 = vrot.lane.b32.xlu0 %v6643_v34, %s5992_s5 }
 0x23b   : > { %v6739_v1 = vpop.permute.xlu1 %2111  ;;  %v6741_v2 = vpop.permute.xlu0 %2109 }
 0x23c   : > { %12400 = vst [vmem:[#allocation52_spill] sm:$0xff] %v6739_v1  ;;  %12401 = vst [vmem:[#allocation53_spill] sm:$0xff] %v6741_v2 }
 0x23d   : > { %1937 = vrot.lane.b32.xlu1 %v6657_v39, %s5992_s5  ;;  %2008 = vrot.lane.b32.xlu0 %v6630_v29, %s5993_s4 }
 0x23f   : > { %v6747_v4 = vpop.permute.xlu1 %1216  ;;  %v6749_v5 = vpop.permute.xlu0 %1214 }
 0x240   : > { %12402 = vst [vmem:[#allocation54_spill] sm:$0xff] %v6747_v4 }
 0x241   : > { %2010 = vrot.lane.b32.xlu1 %v6646_v35, %s5993_s4  ;;  %2024 = vrot.lane.b32.xlu0 %v6643_v34, %s5993_s4 }
 0x243   : > { %v6755_v7 = vpop.permute.xlu1 %1232  ;;  %v6757_v10 = vpop.permute.xlu0 %1230 }
 0x244   : > { %12403 = vst [vmem:[#allocation55_spill] sm:$0xff] %v6755_v7 }
 0x245   : > { %2026 = vrot.lane.b32.xlu1 %v6657_v39, %s5993_s4  ;;  %2097 = vrot.lane.b32.xlu0 %v6630_v29, %s5994_s29 }
 0x247   : > { %v6763_v13 = vpop.permute.xlu1 %1307  ;;  %v6765_v16 = vpop.permute.xlu0 %1305 }
 0x249   : > { %2099 = vrot.lane.b32.xlu1 %v6646_v35, %s5994_s29  ;;  %2113 = vrot.lane.b32.xlu0 %v6643_v34, %s5994_s29 }
 0x24b   : > { %v6771_v24 = vpop.permute.xlu1 %1323  ;;  %v6773_v27 = vpop.permute.xlu0 %1321 }
 0x24d   : > { %2115 = vrot.lane.b32.xlu1 %v6657_v39, %s5994_s29  ;;  %1218 = vrot.lane.b32.xlu0 %v6777_v33, %s5987_s26 }
 0x24f   : > { %v6786_v0 = vpop.permute.xlu1 %1396  ;;  %v6788_v19 = vpop.permute.xlu0 %1394 }
 0x251   : > { %1220 = vrot.lane.b32.xlu1 %v6784_v11, %s5987_s26  ;;  %1234 = vrot.lane.b32.xlu0 %v6792_v18, %s5987_s26 }
 0x253   : > { %v6801_v62 = vpop.permute.xlu1 %1412  ;;  %v6803_v38 = vpop.permute.xlu0 %1410 }
 0x255   : > { %1236 = vrot.lane.b32.xlu1 %v6799_v28, %s5987_s26  ;;  %1309 = vrot.lane.b32.xlu0 %v6777_v33, %s5988_s24 }
 0x257   : > { %v6809_v59 = vpop.permute.xlu1 %1489  ;;  %v6811_v32 = vpop.permute.xlu0 %1487 }
 0x259   : > { %1311 = vrot.lane.b32.xlu1 %v6784_v11, %s5988_s24  ;;  %1325 = vrot.lane.b32.xlu0 %v6792_v18, %s5988_s24 }
 0x25b   : > { %v6817_v63 = vpop.permute.xlu1 %1505  ;;  %v6819_v58 = vpop.permute.xlu0 %1503 }
 0x25c   : > { %12408 = vst [vmem:[#allocation60_spill] sm:$0xff] %v6817_v63  ;;  %12409 = vst [vmem:[#allocation61_spill] sm:$0xff] %v6819_v58  ;;  %v7027_v63 = vld [vmem:[#allocation5 + $0x18] sm:$0xff] }
 0x25d   : > { %1327 = vrot.lane.b32.xlu1 %v6799_v28, %s5988_s24  ;;  %1398 = vrot.lane.b32.xlu0 %v6777_v33, %s5989_s3 }
 0x25f   : > { %v6825_v20 = vpop.permute.xlu1 %1586  ;;  %v6827_v61 = vpop.permute.xlu0 %1584 }
 0x261   : > { %1400 = vrot.lane.b32.xlu1 %v6784_v11, %s5989_s3  ;;  %1414 = vrot.lane.b32.xlu0 %v6792_v18, %s5989_s3 }
 0x263   : > { %v6833_v2 = vpop.permute.xlu1 %1602  ;;  %v6835_v60 = vpop.permute.xlu0 %1600 }
 0x264   : > { %12410 = vst [vmem:[#allocation62_spill] sm:$0xff] %v6833_v2  ;;  %12411 = vst [vmem:[#allocation63_spill] sm:$0xff] %v6835_v60 }
 0x265   : > { %1416 = vrot.lane.b32.xlu1 %v6799_v28, %s5989_s3  ;;  %1491 = vrot.lane.b32.xlu0 %v6777_v33, %s5990_s1 }
 0x267   : > { %v6841_v1 = vpop.permute.xlu1 %1925  ;;  %v6843_v55 = vpop.permute.xlu0 %1923 }
 0x268   : > { %12412 = vst [vmem:[#allocation64_spill] sm:$0xff] %v6841_v1  ;;  %12413 = vst [vmem:[#allocation65_spill] sm:$0xff] %v6843_v55 }
 0x269   : > { %1493 = vrot.lane.b32.xlu1 %v6784_v11, %s5990_s1  ;;  %1507 = vrot.lane.b32.xlu0 %v6792_v18, %s5990_s1 }
 0x26b   : > { %v6849_v8 = vpop.permute.xlu1 %1941  ;;  %v6851_v9 = vpop.permute.xlu0 %1939 }
 0x26c   : > { %12414 = vst [vmem:[#allocation66_spill] sm:$0xff] %v6849_v8  ;;  %12415 = vst [vmem:[#allocation67_spill] sm:$0xff] %v6851_v9 }
 0x26d   : > { %1509 = vrot.lane.b32.xlu1 %v6799_v28, %s5990_s1  ;;  %1588 = vrot.lane.b32.xlu0 %v6777_v33, %s5991_s19 }
 0x26f   : > { %v6857_v57 = vpop.permute.xlu1 %2014  ;;  %v6859_v54 = vpop.permute.xlu0 %2012 }
 0x270   : > { %12416 = vst [vmem:[#allocation68_spill] sm:$0xff] %v6857_v57  ;;  %12417 = vst [vmem:[#allocation69_spill] sm:$0xff] %v6859_v54 }
 0x271   : > { %1590 = vrot.lane.b32.xlu1 %v6784_v11, %s5991_s19  ;;  %1604 = vrot.lane.b32.xlu0 %v6792_v18, %s5991_s19 }
 0x273   : > { %v6865_v56 = vpop.permute.xlu1 %2030  ;;  %v6867_v8 = vpop.permute.xlu0 %2028 }
 0x274   : > { %12418 = vst [vmem:[#allocation70_spill] sm:$0xff] %v6865_v56  ;;  %12419 = vst [vmem:[#allocation71_spill] sm:$0xff] %v6867_v8 }
 0x275   : > { %1606 = vrot.lane.b32.xlu1 %v6799_v28, %s5991_s19  ;;  %1927 = vrot.lane.b32.xlu0 %v6777_v33, %s5992_s5 }
 0x277   : > { %v6873_v9 = vpop.permute.xlu1 %2103  ;;  %v6875_v57 = vpop.permute.xlu0 %2101 }
 0x278   : > { %12420 = vst [vmem:[#allocation72_spill] sm:$0xff] %v6873_v9  ;;  %12421 = vst [vmem:[#allocation73_spill] sm:$0xff] %v6875_v57 }
 0x279   : > { %1929 = vrot.lane.b32.xlu1 %v6784_v11, %s5992_s5  ;;  %1943 = vrot.lane.b32.xlu0 %v6792_v18, %s5992_s5 }
 0x27b   : > { %v6881_v54 = vpop.permute.xlu1 %2119  ;;  %v6883_v56 = vpop.permute.xlu0 %2117 }
 0x27c   : > { %12422 = vst [vmem:[#allocation74_spill] sm:$0xff] %v6881_v54  ;;  %12423 = vst [vmem:[#allocation75_spill] sm:$0xff] %v6883_v56 }
 0x27d   : > { %1945 = vrot.lane.b32.xlu1 %v6799_v28, %s5992_s5  ;;  %2016 = vrot.lane.b32.xlu0 %v6777_v33, %s5993_s4 }
 0x27f   : > { %v6889_v8 = vpop.permute.xlu1 %1210  ;;  %v6891_v9 = vpop.permute.xlu0 %1208 }
 0x280   : > { %12424 = vst [vmem:[#allocation76_spill] sm:$0xff] %v6889_v8  ;;  %12425 = vst [vmem:[#allocation77_spill] sm:$0xff] %v6891_v9 }
 0x281   : > { %2018 = vrot.lane.b32.xlu1 %v6784_v11, %s5993_s4  ;;  %2032 = vrot.lane.b32.xlu0 %v6792_v18, %s5993_s4 }
 0x283   : > { %v6897_v57 = vpop.permute.xlu1 %1212  ;;  %v6899_v54 = vpop.permute.xlu0 %1226 }
 0x284   : > { %12426 = vst [vmem:[#allocation78_spill] sm:$0xff] %v6897_v57  ;;  %12427 = vst [vmem:[#allocation79_spill] sm:$0xff] %v6899_v54  ;;  %v2367_v54 = vld [vmem:[%s11806_s7 + $0x10] sm:$0xff] }
 0x285   : > { %2034 = vrot.lane.b32.xlu1 %v6799_v28, %s5993_s4  ;;  %2105 = vrot.lane.b32.xlu0 %v6777_v33, %s5994_s29 }
 0x287   : > { %v6905_v56 = vpop.permute.xlu1 %1228  ;;  %v6907_v8 = vpop.permute.xlu0 %1301 }
 0x288   : > { %12428 = vst [vmem:[#allocation80_spill] sm:$0xff] %v6905_v56  ;;  %12429 = vst [vmem:[#allocation81_spill] sm:$0xff] %v6907_v8 }
 0x289   : > { %2107 = vrot.lane.b32.xlu1 %v6784_v11, %s5994_s29  ;;  %2121 = vrot.lane.b32.xlu0 %v6792_v18, %s5994_s29 }
 0x28b   : > { %v6913_v9 = vpop.permute.xlu1 %1303  ;;  %v6915_v57 = vpop.permute.xlu0 %1317 }
 0x28c   : > { %12430 = vst [vmem:[#allocation82_spill] sm:$0xff] %v6913_v9  ;;  %12431 = vst [vmem:[#allocation83_spill] sm:$0xff] %v6915_v57  ;;  %v2573_v57 = vld [vmem:[%s11808_s9 + $0x10] sm:$0xff] }
 0x28d   : > { %2123 = vrot.lane.b32.xlu1 %v6799_v28, %s5994_s29  ;;  %v11929_v28 = vmov 2  }
 0x28f   : > { %v6922_v56 = vpop.permute.xlu1 %1319  ;;  %v6924_v8 = vpop.permute.xlu0 %1390 }
 0x290   : > { %12432 = vst [vmem:[#allocation84_spill] sm:$0xff] %v6922_v56  ;;  %12433 = vst [vmem:[#allocation85_spill] sm:$0xff] %v6924_v8 }
 0x291   : > { %2381 = vperm.xlu1 %5524, %v2367_v54   ;;  %v2611_v54 = vld [vmem:[%s11809_s10] sm:$0xff] }
 0x293   : > { %v6929_v55 = vpop.permute.xlu1 %1392  ;;  %v6931_v9 = vpop.permute.xlu0 %1406 }
 0x294   : > { %12434 = vst [vmem:[#allocation86_spill] sm:$0xff] %v6929_v55  ;;  %12435 = vst [vmem:[#allocation87_spill] sm:$0xff] %v6931_v9 }
 0x295   : > { %2577 = vperm.xlu1 %5524, %v2571_v51   ;;  %v2613_v51 = vld [vmem:[%s11809_s10 + $0x10] sm:$0xff] }
 0x297   : > { %v6936_v53 = vpop.permute.xlu1 %1408  ;;  %v6938_v50 = vpop.permute.xlu0 %1483 }
 0x298   : > { %12436 = vst [vmem:[#allocation88_spill] sm:$0xff] %v6936_v53  ;;  %12437 = vst [vmem:[#allocation89_spill] sm:$0xff] %v6938_v50 }
 0x299   : > { %2587 = vperm.xlu1 %5524, %v2573_v57   ;;  %v6957_v57 = vld [vmem:[%s11810_s11] sm:$0xff] }
 0x29b   : > { %v6943_v56 = vpop.permute.xlu1 %1485  ;;  %v6945_v8 = vpop.permute.xlu0 %1499 }
 0x29c   : > { %12438 = vst [vmem:[#allocation90_spill] sm:$0xff] %v6943_v56  ;;  %12439 = vst [vmem:[#allocation91_spill] sm:$0xff] %v6945_v8 }
 0x29d   : > { %2617 = vperm.xlu1 %5524, %v2611_v54   ;;  %v6967_v54 = vld [vmem:[%s11810_s11 + $0x10] sm:$0xff] }
 0x29f   : > { %v6950_v9 = vpop.permute.xlu1 %1501  ;;  %v6952_v55 = vpop.permute.xlu0 %1580 }
 0x2a0   : > { %12440 = vst [vmem:[#allocation92_spill] sm:$0xff] %v6950_v9  ;;  %12441 = vst [vmem:[#allocation93_spill] sm:$0xff] %v6952_v55 }
 0x2a1   : > { %2627 = vperm.xlu1 %5524, %v2613_v51  }
 0x2a3   : > { %v6959_v53 = vpop.permute.xlu1 %1582  ;;  %v6961_v1 = vpop.permute.xlu0 %1596 }
 0x2a4   : > { %12442 = vst [vmem:[#allocation94_spill] sm:$0xff] %v6959_v53  ;;  %12443 = vst [vmem:[#allocation95_spill] sm:$0xff] %v6961_v1 }
 0x2a5   : > { %2721 = vperm.xlu1 %5524, %v6957_v57  }
 0x2a7   : > { %v6969_v8 = vpop.permute.xlu1 %1598  ;;  %v6971_v9 = vpop.permute.xlu0 %1919 }
 0x2a8   : > { %12444 = vst [vmem:[#allocation96_spill] sm:$0xff] %v6969_v8  ;;  %12445 = vst [vmem:[#allocation97_spill] sm:$0xff] %v6971_v9 }
 0x2a9   : > { %2731 = vperm.xlu1 %5524, %v6967_v54  }
 0x2ab   : > { %v6974_v51 = vpop.permute.xlu1 %1921  ;;  %v6976_v52 = vpop.permute.xlu0 %1935 }
 0x2ac   : > { %12446 = vst [vmem:[#allocation98_spill] sm:$0xff] %v6974_v51  ;;  %12447 = vst [vmem:[#allocation99_spill] sm:$0xff] %v6976_v52  ;;  %v6997_v51 = vld [vmem:[%s11810_s11 + $0x8] sm:$0xff]  ;;  %v11897_v52 = vmov 5  }
 0x2ad   : > { %12456 = vst [vmem:[#allocation108_spill] sm:$0xff] %v6997_v51  ;;  %5530 = vset.pattern.permute.xlu0 %v11897_v52 }
 0x2ae   : > { %3208 = vperm.xlu0 %5530, %v6997_v51  }
 0x2af   : > { %v6978_v50 = vpop.permute.xlu1 %1937  ;;  %v6980_v56 = vpop.permute.xlu0 %2008 }
 0x2b0   : > { %12448 = vst [vmem:[#allocation100_spill] sm:$0xff] %v6978_v50  ;;  %12449 = vst [vmem:[#allocation101_spill] sm:$0xff] %v6980_v56  ;;  %v11899_v50 = vmov 1  }
 0x2b1   : > { %5525 = vset.pattern.permute.xlu1 %v11899_v50  ;;  %v7017_v50 = vld [vmem:[%s11810_s11 + $0x18] sm:$0xff] }
 0x2b2   : > { %2820 = vperm.xlu1 %5525, %v6957_v57  }
 0x2b3   : > { %v6982_v58 = vpop.permute.xlu1 %2010  ;;  %v6984_v53 = vpop.permute.xlu0 %2024 }
 0x2b4   : > { %12450 = vst [vmem:[#allocation102_spill] sm:$0xff] %v6982_v58  ;;  %12451 = vst [vmem:[#allocation103_spill] sm:$0xff] %v6984_v53  ;;  %v1258_v53 = vshrl.u32 %v1238_v47, 7 }
 0x2b6   : > { %2828 = vperm.xlu1 %5525, %v6967_v54   ;;  %v1627_v1 = vsub.s32 4, %v1258_v53  ;;  %v1966_v18 = vsub.s32 5, %v1258_v53  ;;  %v2055_v11 = vsub.s32 6, %v1258_v53 }
 0x2b7   : > { %v6986_v60 = vpop.permute.xlu1 %2026  ;;  %v6988_v2 = vpop.permute.xlu0 %2097 }
 0x2b8   : > { %12452 = vst [vmem:[#allocation104_spill] sm:$0xff] %v6986_v60  ;;  %12453 = vst [vmem:[#allocation105_spill] sm:$0xff] %v6988_v2  ;;  %v11906_v2 = vmov 8  }
 0x2b9   : > { %5533 = vset.pattern.permute.xlu0 %v11906_v2  ;;  %v1437_v2 = vsub.s32 2, %v1258_v53 }
 0x2ba   : > { %3540 = vperm.xlu0 %5533, %v6957_v57   ;;  %2832 = vperm.xlu1 %5525, %v7017_v50  }
 0x2bb   : > { %v6990_v8 = vpop.permute.xlu1 %2099  ;;  %v6992_v9 = vpop.permute.xlu0 %2113 }
 0x2bc   : > { %12454 = vst [vmem:[#allocation106_spill] sm:$0xff] %v6990_v8  ;;  %12455 = vst [vmem:[#allocation107_spill] sm:$0xff] %v6992_v9  ;;  %v7019_v8 = vand.u32 127, %v1238_v47  ;;  %v1259_v9 = vsub.s32 0, %v1258_v53  ;;  %v1530_v47 = vsub.s32 3, %v1258_v53 }
 0x2be   : > { %12461 = vst [vmem:[#allocation113_spill] sm:$0xff] %v7019_v8  ;;  %3548 = vperm.xlu0 %5533, %v6967_v54   ;;  %vm1240_vm1 = vcmp.lt.s32.totalorder %v7019_v8, 17  ;;  %v7057_v6 = vrot.slane %v7027_v63, %v1259_v9  ;;  %5526 = vset.pattern.permute.xlu1 %v11929_v28  ;;  %vm1329_vm2 = vcmp.lt.s32.totalorder %v7019_v8, 16  ;;  %vm1418_vm3 = vcmp.lt.s32.totalorder %v7019_v8, 15 }
 0x2bf   : > { %v7001_v56 = vpop.permute.xlu1 %2115  ;;  %v7005_v58 = vpop.permute.xlu0 %1218  ;;  %2936 = vperm.xlu1 %5526, %v6997_v51   ;;  %v2328_v51 = vld [vmem:[%s11805_s6 + $0x18] sm:$0xff]  ;;  %vm1511_vm4 = vcmp.lt.s32.totalorder %v7019_v8, 1  ;;  %vm1608_vm5 = vcmp.lt.s32.totalorder %v7019_v8, 127  ;;  %vm1947_vm6 = vcmp.lt.s32.totalorder %v7019_v8, 113  ;;  %vm2036_vm7 = vcmp.lt.s32.totalorder %v7019_v8, 112 }
 0x2c0   : > { %12457 = vst [vmem:[#allocation109_spill] sm:$0xff] %v7001_v56  ;;  %12458 = vst [vmem:[#allocation110_spill] sm:$0xff] %v7005_v58  ;;  %v7021_v56 = vld [vmem:[#allocation5 + $0x10] sm:$0xff]  ;;  %v7023_v58 = vld [vmem:[#allocation5 + $0x8] sm:$0xff]  ;;  %vm2125_vm9 = vcmp.lt.s32.totalorder %v7019_v8, 111 }
 0x2c1   : > { %v7051_v45 = vrot.slane %v7021_v56, %v1259_v9  ;;  %v7054_v46 = vrot.slane %v7023_v58, %v1259_v9  ;;  %12466 = vst [vmem:[#allocation118_spill] sm:$0xff] %v7057_v6  ;;  %v7082_v14 = vrot.slane %v7023_v58, %v1437_v2  ;;  %v7085_v15 = vrot.slane %v7021_v56, %v1437_v2 }
 0x2c2   : > { %v7098_v28 = vrot.slane %v7023_v58, %v1530_v47  ;;  %v7101_v33 = vrot.slane %v7021_v56, %v1530_v47 }
 0x2c3   : > { %v7007_v60 = vpop.permute.xlu1 %1220  ;;  %v7011_v52 = vpop.permute.xlu0 %1234  ;;  %12464 = vst [vmem:[#allocation116_spill] sm:$0xff] %v7051_v45  ;;  %12465 = vst [vmem:[#allocation117_spill] sm:$0xff] %v7054_v46  ;;  %2940 = vperm.xlu1 %5526, %v6967_v54  }
 0x2c4   : > { %12459 = vst [vmem:[#allocation111_spill] sm:$0xff] %v7007_v60  ;;  %12460 = vst [vmem:[#allocation112_spill] sm:$0xff] %v7011_v52  ;;  %v1348_v60 = vsub.s32 1, %v1258_v53  ;;  %v7029_v52 = vld [vmem:[#allocation5] sm:$0xff] }
 0x2c5   : > { %12473 = vst [vmem:[#allocation125_spill] sm:$0xff] %v7082_v14  ;;  %12474 = vst [vmem:[#allocation126_spill] sm:$0xff] %v7085_v15  ;;  %v7088_v29 = vrot.slane %v7029_v52, %v1437_v2  ;;  %v7105_v43 = vrot.slane %v7029_v52, %v1530_v47 }
 0x2c6   : > { %v7069_v34 = vrot.slane %v7021_v56, %v1348_v60  ;;  %v7072_v39 = vrot.slane %v7029_v52, %v1348_v60  ;;  %v7075_v12 = vrot.slane %v7027_v63, %v1348_v60  ;;  %12479 = vst [vmem:[#allocation130_spill] sm:$0xff] %v7098_v28  ;;  %12480 = vst [vmem:[#allocation131_spill] sm:$0xff] %v7101_v33 }
 0x2c7   : > { %v7031_v55 = vpop.permute.xlu1 %1236  ;;  %v7042_v3 = vpop.permute.xlu0 %1309  ;;  %12475 = vst [vmem:[#allocation127_spill] sm:$0xff] %v7088_v29  ;;  %12481 = vst [vmem:[#allocation132_spill] sm:$0xff] %v7105_v43  ;;  %v7117_v33 = vrot.slane %v7023_v58, %v1627_v1  ;;  %v7123_v28 = vrot.slane %v7027_v63, %v1627_v1  ;;  %v7135_v43 = vrot.slane %v7023_v58, %v1966_v18 }
 0x2c8   : > { %12462 = vst [vmem:[#allocation114_spill] sm:$0xff] %v7031_v55  ;;  %12463 = vst [vmem:[#allocation115_spill] sm:$0xff] %v7042_v3  ;;  %v7060_v3 = vrot.slane %v7029_v52, %v1259_v9  ;;  %v7063_v55 = vrot.slane %v7023_v58, %v1348_v60  ;;  %v12477_v60 = vmov 0  }
 0x2c9   : > { %12469 = vst [vmem:[#allocation121_spill] sm:$0xff] %v7069_v34  ;;  %12470 = vst [vmem:[#allocation122_spill] sm:$0xff] %v7072_v39  ;;  %5535 = vset.pattern.permute.xlu0 %v12477_v60  ;;  %v7108_v60 = vrot.slane %v7027_v63, %v1530_v47  ;;  %v7126_v47 = vrot.slane %v7029_v52, %v1966_v18 }
 0x2ca   : > { %12467 = vst [vmem:[#allocation119_spill] sm:$0xff] %v7060_v3  ;;  %12468 = vst [vmem:[#allocation120_spill] sm:$0xff] %v7063_v55  ;;  %2331 = vperm.xlu0 %5535, %v2325_v17   ;;  %v7120_v17 = vrot.slane %v7021_v56, %v1627_v1 }
 0x2cb   : > { %12471 = vst [vmem:[#allocation123_spill] sm:$0xff] %v7075_v12  ;;  %v7077_v9 = vpop.permute.xlu1 %1311  ;;  %v7090_v35 = vpop.permute.xlu0 %1325  ;;  %12482 = vst [vmem:[#allocation133_spill] sm:$0xff] %v7108_v60 }
 0x2cc   : > { %12472 = vst [vmem:[#allocation124_spill] sm:$0xff] %v7077_v9  ;;  %12476 = vst [vmem:[#allocation128_spill] sm:$0xff] %v7090_v35  ;;  %v7095_v9 = vrot.slane %v7027_v63, %v1437_v2  ;;  %v7111_v35 = vrot.slane %v7029_v52, %v1627_v1  ;;  %v2144_v2 = vsub.s32 7, %v1258_v53  ;;  %v1246_v53 = vsel %vm1240_vm1, %v6747_v4, %v6611_v22 }
 0x2cd   : > { %12484 = vst [vmem:[#allocation135_spill] sm:$0xff] %v7117_v33  ;;  %12485 = vst [vmem:[#allocation136_spill] sm:$0xff] %v7120_v17  ;;  %v7141_v17 = vrot.slane %v7027_v63, %v1966_v18  ;;  %v7153_v4 = vrot.slane %v7021_v56, %v2055_v11 }
 0x2ce   : > { %12478 = vst [vmem:[#allocation129_spill] sm:$0xff] %v7095_v9  ;;  %12483 = vst [vmem:[#allocation134_spill] sm:$0xff] %v7111_v35  ;;  %v7138_v35 = vrot.slane %v7021_v56, %v1966_v18  ;;  %2346 = vperm.xlu0 %5535, %v2328_v51   ;;  %v1245_v18 = vsel %vm1240_vm1, %v6749_v5, %v6613_v23  ;;  %v7172_v51 = vmul.f32 %v7051_v45, %v1246_v53 }
 0x2cf   : > { %12486 = vst [vmem:[#allocation137_spill] sm:$0xff] %v7123_v28  ;;  %12487 = vst [vmem:[#allocation138_spill] sm:$0xff] %v7126_v47  ;;  %v7128_v60 = vpop.permute.xlu1 %1327  ;;  %v7143_v1 = vpop.permute.xlu0 %1398  ;;  %v7150_v47 = vrot.slane %v7023_v58, %v2055_v11  ;;  %v1335_v53 = vsel %vm1329_vm2, %v6763_v13, %v6632_v30 }
 0x2d0   : > { %12488 = vst [vmem:[#allocation139_spill] sm:$0xff] %v7128_v60  ;;  %12489 = vst [vmem:[#allocation140_spill] sm:$0xff] %v7135_v43  ;;  %v7147_v60 = vrot.slane %v7029_v52, %v2055_v11 }
 0x2d1   : > { %12490 = vst [vmem:[#allocation141_spill] sm:$0xff] %v7138_v35  ;;  %12491 = vst [vmem:[#allocation142_spill] sm:$0xff] %v7141_v17  ;;  %v7160_v35 = vrot.slane %v7027_v63, %v2055_v11  ;;  %v7163_v17 = vrot.slane %v7029_v52, %v2144_v2  ;;  %v1242_v11 = vsel %vm1240_vm1, %v6611_v22, %v6755_v7  ;;  %v11954_v7 = vmov 3  }
 0x2d2   : > { %12492 = vst [vmem:[#allocation143_spill] sm:$0xff] %v7147_v60  ;;  %12493 = vst [vmem:[#allocation144_spill] sm:$0xff] %v7150_v47  ;;  %v7166_v60 = vrot.slane %v7023_v58, %v2144_v2  ;;  %v2366_v47 = vld [vmem:[%s11806_s7 + $0x8] sm:$0xff]  ;;  %v1241_v52 = vsel %vm1240_vm1, %v6613_v23, %v6757_v10  ;;  %v1334_v22 = vsel %vm1329_vm2, %v6765_v16, %v6634_v31  ;;  %5527 = vset.pattern.permute.xlu1 %v11954_v7 }
 0x2d3   : > { %12494 = vst [vmem:[#allocation145_spill] sm:$0xff] %v7153_v4  ;;  %12495 = vst [vmem:[#allocation146_spill] sm:$0xff] %v7160_v35  ;;  %v1249_v4 = vsel %vm1240_vm1, %v6605_v21, %v6749_v5  ;;  %v7187_v58 = vpop.permute.xlu1 %1400  ;;  %v1339_v5 = vsel %vm1329_vm2, %v6619_v25, %v6763_v13  ;;  %v1338_v23 = vsel %vm1329_vm2, %v6621_v26, %v6765_v16  ;;  %v7206_v35 = vpop.permute.xlu0 %1414  ;;  %2376 = vperm.xlu0 %5535, %v2366_v47  }
 0x2d4   : > { %12496 = vst [vmem:[#allocation147_spill] sm:$0xff] %v7163_v17  ;;  %12497 = vst [vmem:[#allocation148_spill] sm:$0xff] %v7166_v60  ;;  %v1331_v13 = vsel %vm1329_vm2, %v6632_v30, %v6771_v24  ;;  %v1343_v60 = vsel %vm1329_vm2, %v6771_v24, %v6619_v25  ;;  %v1330_v16 = vsel %vm1329_vm2, %v6634_v31, %v6773_v27  ;;  %v2368_v31 = vld [vmem:[%s11806_s7 + $0x18] sm:$0xff]  ;;  %3044 = vperm.xlu1 %5527, %v6957_v57  }
 0x2d5   : > { %12498 = vst [vmem:[#allocation149_spill] sm:$0xff] %v7172_v51  ;;  %12499 = vst [vmem:[#allocation150_spill] sm:$0xff] %v7206_v35  ;;  %v1342_v7 = vsel %vm1329_vm2, %v6773_v27, %v6621_v26  ;;  %v7226_v17 = vmul.f32 %v7051_v45, %v1245_v18  ;;  %v7229_v30 = vmul.f32 %v7057_v6, %v1242_v11 }
 0x2d6   : > { %v1253_v25 = vsel %vm1240_vm1, %v6757_v10, %v6605_v21  ;;  %v7236_v24 = vmul.f32 %v7057_v6, %v1241_v52  ;;  %v7243_v26 = vmul.f32 %v7063_v55, %v1339_v5  ;;  %v7246_v27 = vmul.f32 %v7069_v34, %v1335_v53 }
 0x2d7   : > { %12500 = vst [vmem:[#allocation151_spill] sm:$0xff] %v7226_v17  ;;  %12501 = vst [vmem:[#allocation152_spill] sm:$0xff] %v7229_v30  ;;  %v7249_v47 = vmul.f32 %v7063_v55, %v1338_v23  ;;  %v7252_v21 = vmul.f32 %v7069_v34, %v1334_v22  ;;  %v7254_v10 = vpop.permute.xlu1 %1416  ;;  %v7257_v18 = vmul.f32 %v7072_v39, %v1343_v60  ;;  %v7268_v5 = vpop.permute.xlu0 %1491  ;;  %2386 = vperm.xlu0 %5535, %v2368_v31   ;;  %v12528_v34 = vld [vmem:[#allocation96_spill] sm:$0xff] }
 0x2d8   : > { %12502 = vst [vmem:[#allocation153_spill] sm:$0xff] %v7236_v24  ;;  %12503 = vst [vmem:[#allocation154_spill] sm:$0xff] %v7243_v26  ;;  %v7260_v11 = vmul.f32 %v7075_v12, %v1331_v13  ;;  %v7263_v52 = vmul.f32 %v7072_v39, %v1342_v7  ;;  %v7266_v53 = vmul.f32 %v7075_v12, %v1330_v16  ;;  %3052 = vperm.xlu1 %5527, %v6967_v54   ;;  %v12516_v24 = vld [vmem:[#allocation40_spill] sm:$0xff]  ;;  %v12529_v12 = vld [vmem:[#allocation94_spill] sm:$0xff] }
 0x2d9   : > { %12504 = vst [vmem:[#allocation155_spill] sm:$0xff] %v7246_v27  ;;  %12505 = vst [vmem:[#allocation156_spill] sm:$0xff] %v7249_v47  ;;  %v7271_v23 = vmul.f32 %v7054_v46, %v1249_v4  ;;  %v1428_v60 = vsel %vm1418_vm3, %v6648_v36, %v6786_v0  ;;  %v7278_v22 = vrot.slane %v7021_v56, %v2144_v2  ;;  %v12518_v27 = vld [vmem:[#allocation131_spill] sm:$0xff]  ;;  %v12525_v26 = vld [vmem:[#allocation108_spill] sm:$0xff] }
 0x2da   : > { %12506 = vst [vmem:[#allocation157_spill] sm:$0xff] %v7252_v21  ;;  %12507 = vst [vmem:[#allocation158_spill] sm:$0xff] %v7257_v18  ;;  %v7281_v13 = vrot.slane %v7027_v63, %v2144_v2  ;;  %v7286_v16 = vmul.f32 %v7060_v3, %v1253_v25  ;;  %v1424_v4 = vsel %vm1418_vm3, %v6786_v0, %v6659_v40  ;;  %v2572_v63 = vld [vmem:[%s11808_s9 + $0x8] sm:$0xff]  ;;  %v12517_v21 = vld [vmem:[#allocation130_spill] sm:$0xff]  ;;  %v11977_v18 = vmov 4  }
 0x2db   : > { %12508 = vst [vmem:[#allocation159_spill] sm:$0xff] %v7260_v11  ;;  %12509 = vst [vmem:[#allocation160_spill] sm:$0xff] %v7263_v52  ;;  %v1427_v56 = vsel %vm1418_vm3, %v6650_v37, %v6788_v19  ;;  %v1423_v25 = vsel %vm1418_vm3, %v6788_v19, %v6661_v41  ;;  %v7306_v0 = vpop.permute.xlu1 %1493  ;;  %v7315_v51 = vmul.f32 %v7082_v14, %v1428_v60  ;;  %v7321_v19 = vpop.permute.xlu0 %1507  ;;  %2582 = vperm.xlu0 %5535, %v2572_v63   ;;  %v12520_v11 = vld [vmem:[#allocation95_spill] sm:$0xff]  ;;  %v12521_v52 = vld [vmem:[#allocation93_spill] sm:$0xff] }
 0x2dc   : > { %12510 = vst [vmem:[#allocation161_spill] sm:$0xff] %v7266_v53  ;;  %12511 = vst [vmem:[#allocation162_spill] sm:$0xff] %v7271_v23  ;;  %v1432_v2 = vsel %vm1418_vm3, %v6801_v62, %v6648_v36  ;;  %v7326_v31 = vmul.f32 %v7085_v15, %v1424_v4  ;;  %v7329_v7 = vmul.f32 %v7082_v14, %v1427_v56  ;;  %3056 = vperm.xlu1 %5527, %v7017_v50   ;;  %v12519_v23 = vld [vmem:[#allocation39_spill] sm:$0xff]  ;;  %v12524_v3 = vld [vmem:[#allocation41_spill] sm:$0xff] }
 0x2dd   : > { %12512 = vst [vmem:[#allocation163_spill] sm:$0xff] %v7278_v22  ;;  %12513 = vst [vmem:[#allocation164_spill] sm:$0xff] %v7281_v13  ;;  %v1420_v60 = vsel %vm1418_vm3, %v6659_v40, %v6801_v62  ;;  %v1431_v36 = vsel %vm1418_vm3, %v6803_v38, %v6650_v37  ;;  %v7340_v17 = vmul.f32 %v7085_v15, %v1423_v25  ;;  %v2574_v37 = vld [vmem:[%s11808_s9 + $0x18] sm:$0xff]  ;;  %v12527_v46 = vld [vmem:[#allocation63_spill] sm:$0xff] }
 0x2de   : > { %12514 = vst [vmem:[#allocation165_spill] sm:$0xff] %v7286_v16  ;;  %v1419_v4 = vsel %vm1418_vm3, %v6661_v41, %v6803_v38  ;;  %v1517_v56 = vsel %vm1511_vm4, %v6809_v59, %v6675_v44  ;;  %v1521_v40 = vsel %vm1511_vm4, %v6667_v42, %v6809_v59  ;;  %v7359_v62 = vmul.f32 %v7088_v29, %v1432_v2  ;;  %v12515_v2 = vld [vmem:[#allocation38_spill] sm:$0xff] }
 0x2df   : > { %v1614_v41 = vsel %vm1608_vm5, %v6825_v20, %v6691_v48  ;;  %v1613_v38 = vsel %vm1608_vm5, %v6827_v61, %v6693_v49  ;;  %v7369_v59 = vpop.permute.xlu1 %1509  ;;  %v7372_v63 = vmul.f32 %v7095_v9, %v1420_v60  ;;  %v7375_v25 = vmul.f32 %v7088_v29, %v1431_v36  ;;  %v1589_v13 = vpop.permute.xlu0 %1588  ;;  %2592 = vperm.xlu0 %5535, %v2574_v37   ;;  %v12522_v37 = vld [vmem:[#allocation60_spill] sm:$0xff] }
 0x2e0   : > { %v1520_v22 = vsel %vm1511_vm4, %v12515_v2, %v6811_v32  ;;  %v1618_v30 = vsel %vm1608_vm5, %v12516_v24, %v6825_v20  ;;  %v7386_v16 = vmul.f32 %v7095_v9, %v1419_v4  ;;  %v7389_v60 = vmul.f32 %v12517_v21, %v1521_v40  ;;  %5528 = vset.pattern.permute.xlu1 %v11977_v18  ;;  %v12526_v18 = vld [vmem:[#allocation62_spill] sm:$0xff] }
 0x2e1   : > { %v7392_v36 = vmul.f32 %v12518_v27, %v1517_v56  ;;  %v1516_v45 = vsel %vm1511_vm4, %v6811_v32, %v12519_v23  ;;  %v1646_v53 = vmul.f32 %v7117_v33, %v1614_v41  ;;  %v1642_v20 = vmul.f32 %v7117_v33, %v1613_v38  ;;  %v2612_v56 = vld [vmem:[%s11809_s10 + $0x8] sm:$0xff]  ;;  %v12523_v38 = vld [vmem:[#allocation134_spill] sm:$0xff]  ;;  %3096 = vperm.xlu1 %5528, %v12525_v26  }
 0x2e2   : > { %v1615_v4 = vsel %vm1608_vm5, %v1589_v13, %v12520_v11  ;;  %v1619_v40 = vsel %vm1608_vm5, %v12521_v52, %v1589_v13  ;;  %v7411_v32 = vmul.f32 %v12517_v21, %v1520_v22  ;;  %v1525_v41 = vsel %vm1511_vm4, %v12522_v37, %v6667_v42 }
 0x2e3   : > { %v1645_v6 = vmul.f32 %v12523_v38, %v1618_v30  ;;  %v1617_v13 = vsel %vm1608_vm5, %v12524_v3, %v6827_v61  ;;  %v1591_v47 = vpop.permute.xlu1 %1590  ;;  %v1622_v22 = vsel %vm1608_vm5, %v12526_v18, %v12516_v24  ;;  %v1621_v42 = vsel %vm1608_vm5, %v12527_v46, %v12524_v3  ;;  %v1605_v39 = vpop.permute.xlu0 %1604  ;;  %2622 = vperm.xlu0 %5535, %v2612_v56  }
 0x2e4   : > { %v1616_v30 = vsel %vm1608_vm5, %v1591_v47, %v12528_v34  ;;  %v1620_v61 = vsel %vm1608_vm5, %v12529_v12, %v1591_v47  ;;  %v1649_v55 = vmul.f32 %v12523_v38, %v1619_v40  ;;  %v1650_v15 = vmul.f32 %v7117_v33, %v1615_v4 }
 0x2e5   : > { %v1653_v24 = vmul.f32 %v12523_v38, %v1620_v61  ;;  %v1654_v9 = vmul.f32 %v7117_v33, %v1616_v30  ;;  %v1641_v3 = vmul.f32 %v12523_v38, %v1617_v13  ;;  %v1611_v29 = vsel %vm1608_vm5, %v12520_v11, %v1605_v39  ;;  %v2614_v11 = vld [vmem:[%s11809_s10 + $0x18] sm:$0xff]  ;;  %3100 = vperm.xlu1 %5528, %v6967_v54  }
 0x2e6   : > { %v1623_v47 = vsel %vm1608_vm5, %v1605_v39, %v12521_v52  ;;  %v1658_v35 = vpack.c.bf16 %v1646_v53, %v1642_v20  ;;  %v1610_v4 = vsel %vm1608_vm5, %v6691_v48, %v12526_v18  ;;  %v1609_v40 = vsel %vm1608_vm5, %v6693_v49, %v12527_v46  ;;  %v12530_v49 = vld [vmem:[#allocation136_spill] sm:$0xff]  ;;  %v12531_v20 = vld [vmem:[#allocation61_spill] sm:$0xff]  ;;  %v12582_v38 = vld [vmem:[#allocation150_spill] sm:$0xff] }
 0x2e7   : > { %v1661_v56 = vpack.c.bf16 %v1653_v24, %v1649_v55  ;;  %v1607_v13 = vpop.permute.xlu1 %1606  ;;  %v1662_v30 = vpack.c.bf16 %v1654_v9, %v1650_v15  ;;  %v1648_v39 = vmul.f32 %v7123_v28, %v1622_v22  ;;  %v1644_v52 = vmul.f32 %v7123_v28, %v1621_v42  ;;  %2632 = vperm.xlu0 %5535, %v2614_v11   ;;  %v12537_v11 = vld [vmem:[#allocation56_spill] sm:$0xff] }
 0x2e8   : > { %v1612_v48 = vsel %vm1608_vm5, %v12528_v34, %v1607_v13  ;;  %v1624_v46 = vsel %vm1608_vm5, %v1607_v13, %v12529_v12  ;;  %v1651_v15 = vmul.f32 %v12530_v49, %v1611_v29  ;;  %v1652_v55 = vmul.f32 %v7123_v28, %v1623_v47 }
 0x2e9   : > { %v1655_v9 = vmul.f32 %v12530_v49, %v1612_v48  ;;  %v1656_v18 = vmul.f32 %v7123_v28, %v1624_v46  ;;  %1691 = vmatprep.subr.bf16.mxu0 %v1662_v30  ;;  %v1513_v53 = vsel %vm1511_vm4, %v6675_v44, %v12522_v37  ;;  %v1512_v34 = vsel %vm1511_vm4, %v12519_v23, %v12531_v20  ;;  %v12533_v44 = vld [vmem:[#allocation132_spill] sm:$0xff]  ;;  %v12536_v30 = vld [vmem:[#allocation57_spill] sm:$0xff] }
 0x2ea   : > { %v1524_v12 = vsel %vm1511_vm4, %v12531_v20, %v12515_v2  ;;  %1692 = vmatpush1.bf16.msra.mxu0 %v1661_v56  ;;  %v7485_v29 = vmul.f32 %v12518_v27, %v1516_v45  ;;  %v12532_v61 = vmov 5   ;;  %v7489_v37 = vmul.f32 %v12533_v44, %v1525_v41  ;;  %v12534_v2 = vld [vmem:[#allocation133_spill] sm:$0xff]  ;;  %v12535_v41 = vld [vmem:[#allocation90_spill] sm:$0xff] }
 0x2eb   : > { %v1663_v22 = vpack.c.bf16 %v1655_v9, %v1651_v15  ;;  %1693 = vmatprep.subr.bf16.mxu0 %v1658_v35  ;;  %v1664_v42 = vpack.c.bf16 %v1656_v18, %v1652_v55  ;;  %5529 = vset.pattern.permute.xlu1 %v12532_v61  ;;  %v1657_v24 = vpack.c.bf16 %v1645_v6, %v1641_v3  ;;  %v12539_v46 = vld [vmem:[#allocation89_spill] sm:$0xff]  ;;  %v7536_v20 = vpop.permute.xlu1 %1929 }
 0x2ec   : > { %v1647_v23 = vmul.f32 %v12530_v49, %v1610_v4  ;;  %v1643_v47 = vmul.f32 %v12530_v49, %v1609_v40  ;;  %3204 = vperm.xlu1 %5529, %v6957_v57   ;;  %v7495_v56 = vmul.f32 %v12534_v2, %v1513_v53  ;;  %v7498_v45 = vmul.f32 %v12533_v44, %v1524_v12  ;;  %v12564_v40 = vld [vmem:[#allocation37_spill] sm:$0xff] }
 0x2ed   : > { %v7501_v35 = vmul.f32 %v12534_v2, %v1512_v34  ;;  %1744 = vmatprep.subr.bf16.mxu1 %v1664_v42  ;;  %v1660_v13 = vpack.c.bf16 %v1648_v39, %v1644_v52  ;;  %v1523_v3 = vsel %vm1511_vm4, %v12535_v41, %v7306_v0  ;;  %v12538_v39 = vpack.c.bf16 %v12536_v30, %v12537_v11  ;;  %v12556_v52 = vld [vmem:[#allocation91_spill] sm:$0xff]  ;;  %v12575_v9 = vld [vmem:[#allocation49_spill] sm:$0xff] }
 0x2ee   : > { %1694 = vmatpush1.bf16.msra.mxu0 %v1657_v24  ;;  %1745 = vmatpush1.bf16.msra.mxu1 %v1663_v22  ;;  %v1659_v48 = vpack.c.bf16 %v1647_v23, %v1643_v47  ;;  %v1522_v15 = vsel %vm1511_vm4, %v12539_v46, %v7268_v5  ;;  %v1561_v55 = vpack.c.bf16 %v7389_v60, %v7411_v32  ;;  %v12540_v60 = vld [vmem:[#allocation44_spill] sm:$0xff]  ;;  %v12545_v23 = vld [vmem:[#allocation34_spill] sm:$0xff]  ;;  %v12565_v34 = vld [vmem:[#allocation35_spill] sm:$0xff] }
 0x2ef   : > { %1695 = vmatprep.subr.bf16.mxu0 %v12538_v39  ;;  %1746 = vmatprep.subr.bf16.mxu1 %v1660_v13  ;;  %v1557_v18 = vmul.f32 %v12517_v21, %v1523_v3  ;;  %v1527_v53 = vsel %vm1511_vm4, %v7369_v59, %v12535_v41  ;;  %v12541_v32 = vld [vmem:[#allocation64_spill] sm:$0xff]  ;;  %v12547_v13 = vld [vmem:[#allocation45_spill] sm:$0xff]  ;;  %v1553_v30 = vmul.f32 %v12517_v21, %v1522_v15  ;;  %v7564_v39 = vpop.permute.xlu0 %1927 }
 0x2f0   : > { %2726 = vperm.xlu0 %5535, %v12525_v26   ;;  %3212 = vperm.xlu1 %5529, %v6967_v54   ;;  %v1953_v54 = vsel %vm1947_vm6, %v12541_v32, %v12540_v60  ;;  %v12542_v26 = vld [vmem:[#allocation42_spill] sm:$0xff]  ;;  %v12543_v22 = vld [vmem:[#allocation92_spill] sm:$0xff]  ;;  %v12548_v41 = vld [vmem:[#allocation65_spill] sm:$0xff]  ;;  %v1526_v11 = vsel %vm1511_vm4, %v7321_v19, %v12539_v46  ;;  %v1514_v46 = vsel %vm1511_vm4, %v12556_v52, %v7321_v19 }
 0x2f1   : > { %v1957_v12 = vsel %vm1947_vm6, %v12542_v26, %v12541_v32  ;;  %v1515_v42 = vsel %vm1511_vm4, %v12543_v22, %v7369_v59  ;;  %v12544_v24 = vld [vmem:[#allocation36_spill] sm:$0xff]  ;;  %v1952_v3 = vsel %vm1947_vm6, %v12548_v41, %v12547_v13  ;;  %v12549_v59 = vld [vmem:[#allocation29_spill] sm:$0xff]  ;;  %v1556_v4 = vmul.f32 %v12533_v44, %v1527_v53  ;;  %v12560_v19 = vld [vmem:[#allocation86_spill] sm:$0xff] }
 0x2f2   : > { %v12546_v47 = vpack.c.bf16 %v12544_v24, %v12545_v23  ;;  %1747 = vmatpush1.bf16.msra.mxu1 %v1659_v48  ;;  %v12550_v32 = vld [vmem:[#allocation28_spill] sm:$0xff]  ;;  %v12552_v24 = vld [vmem:[#allocation59_spill] sm:$0xff]  ;;  %v12553_v48 = vld [vmem:[#allocation58_spill] sm:$0xff]  ;;  %v1430_v53 = vsel %vm1418_vm3, %v12560_v19, %v7187_v58  ;;  %v7679_v21 = vmul.f32 %v7135_v43, %v1952_v3 }
 0x2f3   : > { %v12551_v6 = vpack.c.bf16 %v12549_v59, %v12550_v32  ;;  %v12554_v23 = vpack.c.bf16 %v12552_v24, %v12553_v48  ;;  %v1519_v32 = vsel %vm1511_vm4, %v7306_v0, %v12543_v22  ;;  %v1565_v24 = vpack.c.bf16 %v1557_v18, %v1553_v30  ;;  %v12568_v30 = vld [vmem:[#allocation30_spill] sm:$0xff]  ;;  %v12576_v28 = vld [vmem:[#allocation69_spill] sm:$0xff]  ;;  %v12629_v60 = vld [vmem:[#allocation112_spill] sm:$0xff] }
 0x2f4   : > { %1696 = vmatpush1.bf16.msra.mxu0 %v12546_v47  ;;  %v12555_v47 = vld [vmem:[#allocation43_spill] sm:$0xff]  ;;  %2736 = vperm.xlu0 %5535, %v7017_v50   ;;  %v7593_v48 = vmul.f32 %v7135_v43, %v1953_v54  ;;  %v12566_v0 = vpack.c.bf16 %v12564_v40, %v12565_v34  ;;  %v1518_v54 = vsel %vm1511_vm4, %v7268_v5, %v12556_v52  ;;  %v12572_v40 = vld [vmem:[#allocation68_spill] sm:$0xff]  ;;  %v12579_v49 = vld [vmem:[#allocation25_spill] sm:$0xff] }
 0x2f5   : > { %1697 = vmatprep.subr.bf16.mxu0 %v12551_v6  ;;  %1748 = vmatprep.subr.bf16.mxu1 %v12554_v23  ;;  %v1956_v15 = vsel %vm1947_vm6, %v12555_v47, %v12548_v41  ;;  %v12557_v6 = vld [vmem:[#allocation138_spill] sm:$0xff]  ;;  %v1559_v41 = vmul.f32 %v12534_v2, %v1515_v42  ;;  %v12562_v23 = vld [vmem:[#allocation23_spill] sm:$0xff]  ;;  %v1555_v22 = vmul.f32 %v12534_v2, %v1514_v46  ;;  %v7614_v42 = vpop.permute.xlu1 %1945  ;;  %v12620_v61 = vld [vmem:[#allocation121_spill] sm:$0xff] }
 0x2f6   : > { %3216 = vperm.xlu1 %5529, %v7017_v50   ;;  %v7585_v59 = vmul.f32 %v12557_v6, %v1957_v12  ;;  %12559 = vst [vmem:[#allocation40_spill] sm:$0xff] %v7593_v48  ;;  %v1552_v50 = vmul.f32 %v12533_v44, %v1526_v11  ;;  %v12561_v12 = vld [vmem:[#allocation27_spill] sm:$0xff]  ;;  %1749 = vmatpush1.bf16.msra.mxu1 %v12566_v0  ;;  %v12569_v11 = vld [vmem:[#allocation24_spill] sm:$0xff]  ;;  %v12574_v46 = vld [vmem:[#allocation46_spill] sm:$0xff] }
 0x2f7   : > { %v12563_v57 = vpack.c.bf16 %v12561_v12, %v12562_v23  ;;  %v7607_v18 = vmul.f32 %v12557_v6, %v1956_v15  ;;  %v12571_v12 = vld [vmem:[#allocation48_spill] sm:$0xff]  ;;  %v12573_v15 = vld [vmem:[#allocation85_spill] sm:$0xff]  ;;  %v1558_v5 = vmul.f32 %v12518_v27, %v1519_v32  ;;  %v1464_v0 = vmul.f32 %v7082_v14, %v1430_v53  ;;  %12587 = vst [vmem:[#allocation95_spill] sm:$0xff] %v7679_v21  ;;  %v12630_v21 = vld [vmem:[#allocation154_spill] sm:$0xff] }
 0x2f8   : > { %12558 = vst [vmem:[#allocation38_spill] sm:$0xff] %v7585_v59  ;;  %v2042_v34 = vsel %vm2036_vm7, %v12572_v40, %v12571_v12  ;;  %v1429_v23 = vsel %vm1418_vm3, %v12573_v15, %v7143_v1  ;;  %v1564_v52 = vpack.c.bf16 %v1556_v4, %v1552_v50  ;;  %v2041_v4 = vsel %vm2036_vm7, %v12576_v28, %v12575_v9  ;;  %v12577_v32 = vld [vmem:[#allocation88_spill] sm:$0xff]  ;;  %v12625_v13 = vld [vmem:[#allocation77_spill] sm:$0xff] }
 0x2f9   : > { %1698 = vmatpush1.bf16.msra.mxu0 %v12563_v57  ;;  %12567 = vst [vmem:[#allocation39_spill] sm:$0xff] %v7607_v18  ;;  %v12570_v57 = vpack.c.bf16 %v12568_v30, %v12569_v11  ;;  %v1434_v30 = vsel %vm1418_vm3, %v7254_v10, %v12560_v19  ;;  %v7637_v11 = vpop.permute.xlu0 %1943  ;;  %v1422_v50 = vsel %vm1418_vm3, %v12577_v32, %v7254_v10  ;;  %v12581_v19 = vld [vmem:[#allocation47_spill] sm:$0xff]  ;;  %v12583_v10 = vld [vmem:[#allocation144_spill] sm:$0xff]  ;;  %v12624_v18 = vld [vmem:[#allocation54_spill] sm:$0xff] }
 0x2fa   : > { %1699 = vmatprep.subr.bf16.mxu0 %v1565_v24  ;;  %v2046_v24 = vsel %vm2036_vm7, %v12574_v46, %v12572_v40  ;;  %v1554_v53 = vmul.f32 %v12518_v27, %v1518_v54  ;;  %v12578_v40 = vld [vmem:[#allocation26_spill] sm:$0xff]  ;;  %v1433_v2 = vsel %vm1418_vm3, %v12582_v38, %v12573_v15  ;;  %v7661_v54 = vmul.f32 %v12583_v10, %v2042_v34  ;;  %v12586_v15 = vld [vmem:[#allocation129_spill] sm:$0xff]  ;;  %v7676_v34 = vpop.permute.xlu1 %2018  ;;  %v5625_v27 = vld [vmem:[#allocation8 + $0x10] sm:$0xff]  }
 0x2fb   : > { %1750 = vmatprep.subr.bf16.mxu1 %v12570_v57  ;;  %v1567_v57 = vpack.c.bf16 %v1559_v41, %v1555_v22  ;;  %v12580_v33 = vpack.c.bf16 %v12578_v40, %v12579_v49  ;;  %v2045_v41 = vsel %vm2036_vm7, %v12581_v19, %v12576_v28  ;;  %v1460_v22 = vmul.f32 %v7082_v14, %v1429_v23  ;;  %v12584_v49 = vld [vmem:[#allocation87_spill] sm:$0xff] }
 0x2fc   : > { %v1566_v28 = vpack.c.bf16 %v1558_v5, %v1554_v53  ;;  %v7669_v23 = vmul.f32 %v12583_v10, %v2041_v4  ;;  %v12590_v53 = vpack.c.bf16 %v7489_v37, %v7498_v45  ;;  %v1425_v3 = vsel %vm1418_vm3, %v7143_v1, %v12584_v49  ;;  %v12593_v45 = vld [vmem:[#allocation115_spill] sm:$0xff] }
 0x2fd   : > { %1700 = vmatpush1.bf16.msra.mxu0 %v1564_v52  ;;  %1751 = vmatpush1.bf16.msra.mxu1 %v12580_v33  ;;  %v1421_v33 = vsel %vm1418_vm3, %v12584_v49, %v12582_v38  ;;  %v12585_v52 = vld [vmem:[#allocation127_spill] sm:$0xff]  ;;  %v1472_v44 = vpack.c.bf16 %v1464_v0, %v1460_v22  ;;  %v12588_v38 = vld [vmem:[#allocation124_spill] sm:$0xff] }
 0x2fe   : > { %1701 = vmatprep.subr.bf16.mxu0 %v1561_v55  ;;  %1752 = vmatprep.subr.bf16.mxu1 %v1567_v57  ;;  %v1463_v40 = vmul.f32 %v12585_v52, %v1434_v30  ;;  %v1426_v55 = vsel %vm1418_vm3, %v7187_v58, %v12577_v32  ;;  %v1466_v57 = vmul.f32 %v12586_v15, %v1422_v50  ;;  %v12589_v30 = vld [vmem:[#allocation82_spill] sm:$0xff]  ;;  %v12591_v58 = vld [vmem:[#allocation143_spill] sm:$0xff]  ;;  %v7697_v50 = vpop.permute.xlu0 %2016  ;;  %v12596_v49 = vld [vmem:[#allocation120_spill] sm:$0xff] }
 0x2ff   : > { %v1341_v5 = vsel %vm1329_vm2, %v12589_v30, %v12588_v38  ;;  %v1459_v4 = vmul.f32 %v12585_v52, %v1433_v2  ;;  %v7690_v32 = vmul.f32 %v12591_v58, %v2046_v24  ;;  %v1462_v0 = vmul.f32 %v12586_v15, %v1421_v33  ;;  %v12594_v24 = vld [vmem:[#allocation81_spill] sm:$0xff]  ;;  %v12597_v15 = vld [vmem:[#allocation139_spill] sm:$0xff] }
 0x300   : > { %v12592_v2 = vpack.c.bf16 %v7495_v56, %v7501_v35  ;;  %v7703_v37 = vmul.f32 %v12591_v58, %v2045_v41  ;;  %v1340_v22 = vsel %vm1329_vm2, %v12594_v24, %v12593_v45  ;;  %v1375_v33 = vmul.f32 %v12596_v49, %v1341_v5  ;;  %v12598_v41 = vld [vmem:[#allocation70_spill] sm:$0xff]  ;;  %v12607_v35 = vld [vmem:[#allocation52_spill] sm:$0xff]  ;;  %v12611_v52 = vld [vmem:[#allocation111_spill] sm:$0xff] }
 0x301   : > { %1702 = vmatpush1.bf16.msra.mxu0 %v12590_v53  ;;  %1753 = vmatpush1.bf16.msra.mxu1 %v1566_v28  ;;  %v12595_v28 = vld [vmem:[#allocation126_spill] sm:$0xff]  ;;  %v1471_v1 = vpack.c.bf16 %v1463_v40, %v1459_v4  ;;  %v1345_v56 = vsel %vm1329_vm2, %v12597_v15, %v12589_v30  ;;  %v7723_v40 = vsel %vm2036_vm7, %v12571_v12, %v12598_v41 }
 0x302   : > { %1754 = vmatprep.subr.bf16.mxu1 %v12592_v2  ;;  %1813 = vmatprep.subr.bf16.mxu0 %v1472_v44  ;;  %v1465_v53 = vmul.f32 %v12595_v28, %v1426_v55  ;;  %v1474_v44 = vpack.c.bf16 %v1466_v57, %v1462_v0  ;;  %v12599_v55 = vld [vmem:[#allocation84_spill] sm:$0xff]  ;;  %v1461_v30 = vmul.f32 %v12595_v28, %v1425_v3  ;;  %v7744_v2 = vpop.permute.xlu1 %2034  ;;  %v12604_v3 = vld [vmem:[#allocation83_spill] sm:$0xff]  ;;  %v12612_v28 = vld [vmem:[#allocation78_spill] sm:$0xff] }
 0x303   : > { %v1333_v5 = vsel %vm1329_vm2, %v12599_v55, %v12597_v15  ;;  %v12600_v57 = vpack.c.bf16 %v7392_v36, %v7485_v29  ;;  %v7737_v4 = vsel %vm2036_vm7, %v12598_v41, %v12574_v46  ;;  %v1371_v12 = vmul.f32 %v12596_v49, %v1340_v22  ;;  %v12601_v0 = vld [vmem:[#allocation128_spill] sm:$0xff]  ;;  %v12603_v29 = vld [vmem:[#allocation71_spill] sm:$0xff]  ;;  %v7770_v49 = vpop.permute.xlu0 %2032 }
 0x304   : > { %5346 = vmatmul.mubr.msk.bf16.vlgmr.msra.gmra.mxu0 %vm1680_vm8, %v5625_v27  ;;  %v1344_v15 = vsel %vm1329_vm2, %v12601_v0, %v12594_v24  ;;  %v12602_v36 = vpack.c.bf16 %v7315_v51, %v7329_v7  ;;  %v7753_v46 = vsel %vm2036_vm7, %v12575_v9, %v12603_v29  ;;  %v1332_v22 = vsel %vm1329_vm2, %v12604_v3, %v12601_v0  ;;  %v12608_v51 = vld [vmem:[#allocation72_spill] sm:$0xff] }
 0x305   : > { %1755 = vmatpush1.bf16.msra.mxu1 %v12600_v57  ;;  %1814 = vmatpush1.bf16.msra.mxu0 %v1471_v1  ;;  %v12605_v1 = vld [vmem:[#allocation122_spill] sm:$0xff]  ;;  %v1473_v41 = vpack.c.bf16 %v1465_v53, %v1461_v30  ;;  %v12606_v57 = vmov 0   ;;  %v2131_v7 = vsel %vm2125_vm9, %v12608_v51, %v12607_v35  ;;  %v1337_v9 = vsel %vm1329_vm2, %v12588_v38, %v12599_v55  ;;  %v5626_v53 = vld [vmem:[#allocation8 + $0x18] sm:$0xff]  }
 0x306   : > { %1815 = vmatprep.subr.bf16.mxu0 %v12602_v36  ;;  %1866 = vmatprep.subr.bf16.mxu1 %v1474_v44  ;;  %v1374_v24 = vmul.f32 %v12605_v1, %v1345_v56  ;;  %v12609_v44 = vld [vmem:[#allocation123_spill] sm:$0xff]  ;;  %v1383_v56 = vpack.c.bf16 %v1375_v33, %v1371_v12  ;;  %v12610_v30 = vld [vmem:[#allocation50_spill] sm:$0xff]  ;;  %v1252_v14 = vsel %vm1240_vm1, %v12612_v28, %v12611_v52  ;;  %v12615_v33 = vld [vmem:[#allocation73_spill] sm:$0xff] }
 0x307   : > { %1729 = vmatprep.mubr.bf16.mxu0 %v12606_v57  ;;  %v1377_v36 = vmul.f32 %v12609_v44, %v1333_v5  ;;  %v2135_v0 = vsel %vm2125_vm9, %v12610_v30, %v12608_v51  ;;  %v1370_v38 = vmul.f32 %v12605_v1, %v1344_v15  ;;  %v12613_v55 = vpack.c.bf16 %v7359_v62, %v7375_v25  ;;  %v12617_v62 = vld [vmem:[#allocation51_spill] sm:$0xff]  ;;  %v2106_v48 = vpop.permute.xlu0 %2105 }
 0x308   : > { %5348 = vmatmul.mubr.msk.bf16.vlgmr.msra.gmra.mxu1 %vm1680_vm8, %v5625_v27  ;;  %v12614_v27 = vld [vmem:[#allocation53_spill] sm:$0xff]  ;;  %v1336_v12 = vsel %vm1329_vm2, %v12593_v45, %v12604_v3  ;;  %v1373_v51 = vmul.f32 %v12609_v44, %v1332_v22  ;;  %v12616_v15 = vpack.c.bf16 %v7372_v63, %v7386_v16  ;;  %v2134_v25 = vsel %vm2125_vm9, %v12617_v62, %v12615_v33  ;;  %v12621_v3 = vld [vmem:[#allocation147_spill] sm:$0xff] }
 0x309   : > { %1816 = vmatpush1.bf16.msra.mxu0 %v12613_v55  ;;  %1867 = vmatpush1.bf16.msra.mxu1 %v1473_v41  ;;  %v2130_v5 = vsel %vm2125_vm9, %v12615_v33, %v12614_v27  ;;  %v12618_v41 = vld [vmem:[#allocation110_spill] sm:$0xff]  ;;  %v12619_v55 = vld [vmem:[#allocation76_spill] sm:$0xff]  ;;  %v1376_v59 = vmul.f32 %v12620_v61, %v1337_v9  ;;  %v1382_v45 = vpack.c.bf16 %v1374_v24, %v1370_v38  ;;  %v12622_v16 = vld [vmem:[#allocation117_spill] sm:$0xff] }
 0x30a   : > { %1817 = vmatprep.subr.bf16.mxu0 %v1383_v56  ;;  %1868 = vmatprep.subr.bf16.mxu1 %v12616_v15  ;;  %v1251_v1 = vsel %vm1240_vm1, %v12619_v55, %v12618_v41  ;;  %v7808_v22 = vmul.f32 %v12621_v3, %v2135_v0  ;;  %v1286_v63 = vmul.f32 %v12622_v16, %v1252_v14  ;;  %v12623_v56 = vld [vmem:[#allocation114_spill] sm:$0xff]  ;;  %v2108_v15 = vpop.permute.xlu1 %2107  ;;  %v12626_v9 = vld [vmem:[#allocation80_spill] sm:$0xff] }
 0x30b   : > { %1782 = vmatprep.mubr.bf16.mxu1 %v12606_v57  ;;  %v1256_v33 = vsel %vm1240_vm1, %v12623_v56, %v12612_v28  ;;  %v1385_v44 = vpack.c.bf16 %v1377_v36, %v1373_v51  ;;  %v1250_v24 = vsel %vm1240_vm1, %v12625_v13, %v12624_v18  ;;  %v1244_v0 = vsel %vm1240_vm1, %v12626_v9, %v12623_v56  ;;  %v12628_v36 = vld [vmem:[#allocation148_spill] sm:$0xff] }
 0x30c   : > { %5347 = vmatmul.mubr.msk.bf16.gmra.mxu0 %vm1680_vm8, %v5626_v53  ;;  %v1372_v14 = vmul.f32 %v12620_v61, %v1336_v12  ;;  %v12627_v28 = vpack.c.bf16 %v7326_v31, %v7340_v17  ;;  %v7829_v38 = vmul.f32 %v12628_v36, %v2131_v7  ;;  %v1282_v51 = vmul.f32 %v12622_v16, %v1251_v1  ;;  %v12631_v56 = vld [vmem:[#allocation156_spill] sm:$0xff]  ;;  %v12633_v12 = vld [vmem:[#allocation55_spill] sm:$0xff] }
 0x30d   : > { %1818 = vmatpush1.bf16.msra.mxu0 %v1382_v45  ;;  %v1255_v18 = vsel %vm1240_vm1, %v12629_v60, %v12619_v55  ;;  %v12632_v47 = vpack.c.bf16 %v12630_v21, %v12631_v56  ;;  %v1254_v17 = vsel %vm1240_vm1, %v12633_v12, %v12625_v13  ;;  %v12634_v31 = vld [vmem:[#allocation79_spill] sm:$0xff]  ;;  %1841 = vmatprep.mubr.bf16.mxu0 %v12606_v57 }
 0x30e   : > { %1869 = vmatpush1.bf16.msra.mxu1 %v12627_v28  ;;  %v1243_v1 = vsel %vm1240_vm1, %v12634_v31, %v12629_v60  ;;  %v12635_v7 = vld [vmem:[#allocation119_spill] sm:$0xff]  ;;  %v1384_v28 = vpack.c.bf16 %v1376_v59, %v1372_v14  ;;  %v1278_v55 = vmul.f32 %v12622_v16, %v1250_v24  ;;  %v1248_v21 = vsel %vm1240_vm1, %v12611_v52, %v12626_v9  ;;  %v12637_v59 = vld [vmem:[#allocation109_spill] sm:$0xff]  ;;  %v12638_v24 = vld [vmem:[#allocation158_spill] sm:$0xff] }
 0x30f   : > { %1819 = vmatprep.subr.bf16.mxu0 %v12632_v47  ;;  %1870 = vmatprep.subr.bf16.mxu1 %v1385_v44  ;;  %v1285_v45 = vmul.f32 %v12635_v7, %v1256_v33  ;;  %v12636_v47 = vld [vmem:[#allocation118_spill] sm:$0xff]  ;;  %v1294_v13 = vpack.c.bf16 %v1286_v63, %v1282_v51  ;;  %v7857_v56 = vmul.f32 %v12628_v36, %v2130_v5  ;;  %v12639_v14 = vld [vmem:[#allocation160_spill] sm:$0xff]  ;;  %v2124_v63 = vpop.permute.xlu1 %2123  ;;  %v12641_v9 = vld [vmem:[#allocation159_spill] sm:$0xff] }
 0x310   : > { %v1288_v44 = vmul.f32 %v12636_v47, %v1244_v0  ;;  %5349 = vmatmul.mubr.msk.bf16.gmra.mxu1 %vm1680_vm8, %v5626_v53  ;;  %v1281_v60 = vmul.f32 %v12635_v7, %v1255_v18  ;;  %v2133_v33 = vsel %vm2125_vm9, %v2108_v15, %v12637_v59  ;;  %v12640_v12 = vpack.c.bf16 %v12638_v24, %v12639_v14  ;;  %v12642_v0 = vld [vmem:[#allocation161_spill] sm:$0xff]  ;;  %v12644_v24 = vld [vmem:[#allocation116_spill] sm:$0xff] }
 0x311   : > { %v7867_v52 = vmul.f32 %v12621_v3, %v2134_v25  ;;  %v1247_v53 = vsel %vm1240_vm1, %v12618_v41, %v12634_v31  ;;  %v1284_v5 = vmul.f32 %v12636_v47, %v1243_v1  ;;  %v12643_v51 = vpack.c.bf16 %v12641_v9, %v12642_v0  ;;  %v12645_v25 = vld [vmem:[#allocation107_spill] sm:$0xff]  ;;  %1894 = vmatprep.mubr.bf16.mxu1 %v12606_v57  ;;  %v12646_v41 = vld [vmem:[#allocation106_spill] sm:$0xff] }
 0x312   : > { %1820 = vmatpush1.bf16.msra.mxu0 %v12640_v12  ;;  %1871 = vmatpush1.bf16.msra.mxu1 %v1384_v28  ;;  %v1277_v18 = vmul.f32 %v12635_v7, %v1254_v17  ;;  %v1287_v28 = vmul.f32 %v12644_v24, %v1248_v21  ;;  %v1293_v14 = vpack.c.bf16 %v1285_v45, %v1281_v60  ;;  %v12647_v9 = vld [vmem:[#allocation162_spill] sm:$0xff]  ;;  %v12648_v21 = vld [vmem:[#allocation155_spill] sm:$0xff]  ;;  %v12649_v60 = vld [vmem:[#allocation157_spill] sm:$0xff] }
 0x313   : > { %1821 = vmatprep.subr.bf16.mxu0 %v1294_v13  ;;  %1872 = vmatprep.subr.bf16.mxu1 %v12643_v51  ;;  %v2132_v12 = vsel %vm2125_vm9, %v2106_v48, %v12645_v25  ;;  %v2137_v31 = vsel %vm2125_vm9, %v12646_v41, %v2108_v15  ;;  %v2171_v1 = vmul.f32 %v12628_v36, %v2133_v33  ;;  %v2122_v13 = vpop.permute.xlu0 %2121  ;;  %v12651_v7 = vld [vmem:[#allocation74_spill] sm:$0xff] }
 0x314   : > { %v1290_v0 = vpack.c.bf16 %v1278_v55, %v12647_v9  ;;  %v1296_v51 = vpack.c.bf16 %v1288_v44, %v1284_v5  ;;  %v1283_v17 = vmul.f32 %v12644_v24, %v1247_v53  ;;  %v2141_v45 = vsel %vm2125_vm9, %v2124_v63, %v12646_v41  ;;  %v12652_v44 = vld [vmem:[#allocation105_spill] sm:$0xff] }
 0x315   : > { %v12650_v47 = vpack.c.bf16 %v12648_v21, %v12649_v60  ;;  %v2175_v15 = vpack.c.bf16 %v7829_v38, %v7857_v56  ;;  %v2127_v55 = vsel %vm2125_vm9, %v12607_v35, %v12651_v7  ;;  %v2136_v33 = vsel %vm2125_vm9, %v12652_v44, %v2106_v48  ;;  %v12653_v5 = vld [vmem:[#allocation165_spill] sm:$0xff]  ;;  %v12654_v56 = vld [vmem:[#allocation164_spill] sm:$0xff]  ;;  %v12660_v21 = vld [vmem:[#allocation103_spill] sm:$0xff] }
 0x316   : > { %1822 = vmatpush1.bf16.msra.mxu0 %v1293_v14  ;;  %v2167_v53 = vmul.f32 %v12628_v36, %v2132_v12  ;;  %v1289_v14 = vpack.c.bf16 %v1277_v18, %v12653_v5  ;;  %v1295_v41 = vpack.c.bf16 %v1287_v28, %v1283_v17  ;;  %v2140_v38 = vsel %vm2125_vm9, %v2122_v13, %v12652_v44  ;;  %v5627_v18 = vld [vmem:[#allocation8] sm:$0xff]   ;;  %v12655_v28 = vld [vmem:[#allocation75_spill] sm:$0xff] }
 0x317   : > { %1873 = vmatpush1.bf16.msra.mxu1 %v12650_v47  ;;  %1823 = vmatprep.subr.bf16.mxu0 %v1290_v0  ;;  %v2170_v47 = vmul.f32 %v12621_v3, %v2137_v31  ;;  %v2139_v35 = vsel %vm2125_vm9, %v12651_v7, %v12610_v30  ;;  %v2129_v48 = vsel %vm2125_vm9, %v12637_v59, %v2124_v63  ;;  %v12656_v0 = vld [vmem:[#allocation104_spill] sm:$0xff] }
 0x318   : > { %1874 = vmatprep.subr.bf16.mxu1 %v1296_v51  ;;  %v2173_v12 = vmul.f32 %v12654_v56, %v2141_v45  ;;  %v2179_v9 = vpack.c.bf16 %v2171_v1, %v2167_v53  ;;  %v2138_v31 = vsel %vm2125_vm9, %v12655_v28, %v12617_v62  ;;  %v2044_v51 = vsel %vm2036_vm7, %v7676_v34, %v12656_v0  ;;  %v12657_v63 = vld [vmem:[#allocation152_spill] sm:$0xff]  ;;  %v12658_v1 = vld [vmem:[#allocation153_spill] sm:$0xff] }
 0x319   : > { %v2166_v30 = vmul.f32 %v12621_v3, %v2136_v33  ;;  %v2126_v7 = vsel %vm2125_vm9, %v12614_v27, %v12655_v28  ;;  %v2128_v59 = vsel %vm2125_vm9, %v12645_v25, %v2122_v13  ;;  %v2169_v62 = vmul.f32 %v12654_v56, %v2140_v38  ;;  %v12661_v27 = vld [vmem:[#allocation163_spill] sm:$0xff]  ;;  %v12662_v25 = vld [vmem:[#allocation102_spill] sm:$0xff]  ;;  %v12666_v28 = vld [vmem:[#allocation101_spill] sm:$0xff] }
 0x31a   : > { %1824 = vmatpush1.bf16.msra.mxu0 %v1289_v14  ;;  %v12659_v17 = vpack.c.bf16 %v12657_v63, %v12658_v1  ;;  %v2165_v45 = vmul.f32 %v12654_v56, %v2139_v35  ;;  %v2043_v60 = vsel %vm2036_vm7, %v7697_v50, %v12660_v21  ;;  %v2172_v33 = vmul.f32 %v12661_v27, %v2129_v48  ;;  %v12663_v35 = vld [vmem:[#allocation149_spill] sm:$0xff]  ;;  %v12664_v48 = vld [vmem:[#allocation151_spill] sm:$0xff]  ;;  %v12668_v1 = vld [vmem:[#allocation100_spill] sm:$0xff] }
 0x31b   : > { %1875 = vmatpush1.bf16.msra.mxu1 %v1295_v41  ;;  %2207 = vmatprep.subr.bf16.mxu0 %v2179_v9  ;;  %v2178_v44 = vpack.c.bf16 %v2170_v47, %v2166_v30  ;;  %v2161_v53 = vmul.f32 %v12654_v56, %v2138_v31  ;;  %v2048_v13 = vsel %vm2036_vm7, %v12662_v25, %v7676_v34 }
 0x31c   : > { %1876 = vmatprep.subr.bf16.mxu1 %v12659_v17  ;;  %v2082_v5 = vmul.f32 %v12583_v10, %v2044_v51  ;;  %v2181_v14 = vpack.c.bf16 %v2173_v12, %v2169_v62  ;;  %v2174_v41 = vpack.c.bf16 %v7808_v22, %v7867_v52  ;;  %v2052_v47 = vsel %vm2036_vm7, %v7744_v2, %v12662_v25  ;;  %v5628_v62 = vld [vmem:[#allocation8 + $0x8] sm:$0xff]  }
 0x31d   : > { %5352 = vmatmul.mubr.msk.bf16.vlgmr.msra.gmra.mxu0 %vm1680_vm8, %v5627_v18  ;;  %v2168_v38 = vmul.f32 %v12661_v27, %v2128_v59  ;;  %v12665_v9 = vpack.c.bf16 %v12663_v35, %v12664_v48  ;;  %v2164_v34 = vmul.f32 %v12661_v27, %v2127_v55  ;;  %v2047_v12 = vsel %vm2036_vm7, %v12666_v28, %v7697_v50  ;;  %v12667_v55 = vld [vmem:[#allocation146_spill] sm:$0xff] }
 0x31e   : > { %2208 = vmatpush1.bf16.msra.mxu0 %v2178_v44  ;;  %v2078_v22 = vmul.f32 %v12583_v10, %v2043_v60  ;;  %v2160_v52 = vmul.f32 %v12661_v27, %v2126_v7  ;;  %v2081_v31 = vmul.f32 %v12591_v58, %v2048_v13  ;;  %v2051_v51 = vsel %vm2036_vm7, %v7770_v49, %v12666_v28  ;;  %v12671_v25 = vld [vmem:[#allocation98_spill] sm:$0xff] }
 0x31f   : > { %1877 = vmatpush1.bf16.msra.mxu1 %v12665_v9  ;;  %2209 = vmatprep.subr.bf16.mxu0 %v2175_v15  ;;  %v2180_v30 = vpack.c.bf16 %v2172_v33, %v2168_v38  ;;  %v2040_v50 = vsel %vm2036_vm7, %v12656_v0, %v7744_v2  ;;  %v2084_v15 = vmul.f32 %v12667_v55, %v2052_v47  ;;  %v12670_v33 = vld [vmem:[#allocation145_spill] sm:$0xff]  ;;  %v12675_v28 = vld [vmem:[#allocation66_spill] sm:$0xff] }
 0x320   : > { %2260 = vmatprep.subr.bf16.mxu1 %v2181_v14  ;;  %1851 = vmatprep.mubr.bf16.mxu0 %v12606_v57  ;;  %v2090_v7 = vpack.c.bf16 %v2082_v5, %v2078_v22  ;;  %v2177_v59 = vpack.c.bf16 %v2165_v45, %v2161_v53  ;;  %v2049_v63 = vsel %vm2036_vm7, %v12603_v29, %v12581_v19  ;;  %v12669_v29 = vld [vmem:[#allocation99_spill] sm:$0xff]  ;;  %v12672_v47 = vld [vmem:[#allocation97_spill] sm:$0xff] }
 0x321   : > { %v1955_v17 = vsel %vm1947_vm6, %v7536_v20, %v12668_v1  ;;  %v2077_v60 = vmul.f32 %v12591_v58, %v2047_v12  ;;  %v2076_v2 = vmul.f32 %v12667_v55, %v7737_v4  ;;  %v2080_v0 = vmul.f32 %v12667_v55, %v2051_v51  ;;  %v12676_v22 = vld [vmem:[#allocation43_spill] sm:$0xff] }
 0x322   : > { %5354 = vmatmul.mubr.msk.bf16.vlgmr.msra.gmra.mxu1 %vm1680_vm8, %v5627_v18  ;;  %2210 = vmatpush1.bf16.msra.mxu0 %v2174_v41  ;;  %v2039_v18 = vsel %vm2036_vm7, %v12660_v21, %v7770_v49  ;;  %v2176_v19 = vpack.c.bf16 %v2164_v34, %v2160_v52  ;;  %v1954_v45 = vsel %vm1947_vm6, %v7564_v39, %v12669_v29  ;;  %v12677_v52 = vld [vmem:[#allocation67_spill] sm:$0xff] }
 0x323   : > { %2261 = vmatpush1.bf16.msra.mxu1 %v2180_v30  ;;  %2211 = vmatprep.subr.bf16.mxu0 %v2090_v7  ;;  %v2089_v44 = vpack.c.bf16 %v2081_v31, %v2077_v60  ;;  %v2083_v53 = vmul.f32 %v12670_v33, %v2040_v50  ;;  %v2072_v4 = vmul.f32 %v12667_v55, %v2049_v63  ;;  %v12678_v50 = vld [vmem:[#allocation95_spill] sm:$0xff]  ;;  %v12680_v7 = vld [vmem:[#allocation44_spill] sm:$0xff]  ;;  %v12682_v60 = vld [vmem:[#allocation45_spill] sm:$0xff] }
 0x324   : > { %2262 = vmatprep.subr.bf16.mxu1 %v2177_v59  ;;  %1904 = vmatprep.mubr.bf16.mxu1 %v12606_v57  ;;  %v1959_v49 = vsel %vm1947_vm6, %v12671_v25, %v7536_v20  ;;  %v1993_v21 = vmul.f32 %v7135_v43, %v1955_v17  ;;  %v2092_v13 = vpack.c.bf16 %v2084_v15, %v2080_v0 }
 0x325   : > { %5353 = vmatmul.mubr.msk.bf16.gmra.mxu0 %vm1680_vm8, %v5628_v62  ;;  %v2085_v5 = vpack.c.bf16 %v7690_v32, %v7703_v37  ;;  %v1963_v14 = vsel %vm1947_vm6, %v7614_v42, %v12671_v25  ;;  %v2079_v41 = vmul.f32 %v12670_v33, %v2039_v18  ;;  %v2075_v20 = vmul.f32 %v12670_v33, %v7723_v40 }
 0x326   : > { %2212 = vmatpush1.bf16.msra.mxu0 %v2089_v44  ;;  %v1958_v38 = vsel %vm1947_vm6, %v12672_v47, %v7564_v39  ;;  %v1989_v35 = vmul.f32 %v7135_v43, %v1954_v45  ;;  %v12673_v32 = vpack.c.bf16 %v7661_v54, %v7669_v23  ;;  %v2071_v37 = vmul.f32 %v12670_v33, %v7753_v46  ;;  %v12674_v54 = vld [vmem:[#allocation142_spill] sm:$0xff] }
 0x327   : > { %2263 = vmatpush1.bf16.msra.mxu1 %v2176_v19  ;;  %v1992_v48 = vmul.f32 %v12557_v6, %v1959_v49  ;;  %v1962_v40 = vsel %vm1947_vm6, %v7637_v11, %v12672_v47  ;;  %v2091_v9 = vpack.c.bf16 %v2083_v53, %v2079_v41  ;;  %2235 = vmatprep.mubr.bf16.mxu0 %v12606_v57  ;;  %v12684_v45 = vld [vmem:[#allocation38_spill] sm:$0xff]  ;;  %v8085_v41 = vld [vmem:[%s11810_s11 + $0x8] sm:$0xff]  ;;  %v12016_v47 = vmov 7  }
 0x328   : > { %2213 = vmatprep.subr.bf16.mxu0 %v12673_v32  ;;  %2264 = vmatprep.subr.bf16.mxu1 %v2092_v13  ;;  %v1951_v39 = vsel %vm1947_vm6, %v12668_v1, %v7614_v42  ;;  %v1995_v23 = vmul.f32 %v12674_v54, %v1963_v14  ;;  %v2001_v46 = vpack.c.bf16 %v1993_v21, %v1989_v35  ;;  %v12681_v1 = vld [vmem:[#allocation141_spill] sm:$0xff]  ;;  %v12018_v14 = vmov 6   ;;  %v8101_v35 = vld [vmem:[%s11810_s11 + $0x18] sm:$0xff] }
 0x329   : > { %v2088_v34 = vpack.c.bf16 %v2076_v2, %v2072_v4  ;;  %v1961_v12 = vsel %vm1947_vm6, %v12675_v28, %v12542_v26  ;;  %v1960_v31 = vsel %vm1947_vm6, %v12677_v52, %v12676_v22  ;;  %v1988_v51 = vmul.f32 %v12557_v6, %v1958_v38  ;;  %v12679_v26 = vld [vmem:[#allocation40_spill] sm:$0xff]  ;;  %v5629_v21 = vld [vmem:[#allocation8 + $0x20] sm:$0xff]   ;;  %5531 = vset.pattern.permute.xlu1 %v12018_v14  ;;  %v8095_v38 = vld [vmem:[%s11810_s11] sm:$0xff] }
 0x32a   : > { %5355 = vmatmul.mubr.msk.bf16.gmra.mxu1 %vm1680_vm8, %v5628_v62  ;;  %2214 = vmatpush1.bf16.msra.mxu0 %v2085_v5  ;;  %v1950_v42 = vsel %vm1947_vm6, %v12669_v29, %v7637_v11  ;;  %v1991_v30 = vmul.f32 %v12674_v54, %v1962_v40  ;;  %v1997_v15 = vpack.c.bf16 %v12679_v26, %v12678_v50  ;;  %v12683_v29 = vld [vmem:[#allocation39_spill] sm:$0xff]  ;;  %v5630_v5 = vld [vmem:[#allocation8 + $0x28] sm:$0xff]   ;;  %v12685_v32 = vmov 8  }
 0x32b   : > { %2265 = vmatpush1.bf16.msra.mxu1 %v2091_v9  ;;  %2215 = vmatprep.subr.bf16.mxu0 %v2001_v46  ;;  %v1949_v59 = vsel %vm1947_vm6, %v12680_v7, %v12675_v28  ;;  %v2087_v62 = vpack.c.bf16 %v2075_v20, %v2071_v37  ;;  %v2000_v63 = vpack.c.bf16 %v1992_v48, %v1988_v51  ;;  %v5732_v20 = vld [vmem:[%s11810_s11 + $0x10] sm:$0xff] }
 0x32c   : > { %2266 = vmatprep.subr.bf16.mxu1 %v2088_v34  ;;  %v1994_v17 = vmul.f32 %v12681_v1, %v1951_v39  ;;  %2288 = vmatprep.mubr.bf16.mxu1 %v12606_v57  ;;  %v1987_v11 = vmul.f32 %v12674_v54, %v1961_v12  ;;  %v1948_v2 = vsel %vm1947_vm6, %v12682_v60, %v12677_v52 }
 0x32d   : > { %v1983_v18 = vmul.f32 %v12674_v54, %v1960_v31  ;;  %v2003_v0 = vpack.c.bf16 %v1995_v23, %v1991_v30  ;;  %v1990_v19 = vmul.f32 %v12681_v1, %v1950_v42  ;;  %v1996_v44 = vpack.c.bf16 %v12684_v45, %v12683_v29  ;;  %3320 = vperm.xlu1 %5531, %v8085_v41  }
 0x32e   : > { %2216 = vmatpush1.bf16.msra.mxu0 %v2000_v63  ;;  %v1986_v53 = vmul.f32 %v12681_v1, %v1949_v59  ;;  %v1982_v4 = vmul.f32 %v12681_v1, %v1948_v2  ;;  %v8122_v59 = vpop.permute.xlu0 %3208 }
 0x32f   : > { %2267 = vmatpush1.bf16.msra.mxu1 %v2087_v62  ;;  %2217 = vmatprep.subr.bf16.mxu0 %v1997_v15  ;;  %v2002_v25 = vpack.c.bf16 %v1994_v17, %v1990_v19  ;;  %v1999_v49 = vpack.c.bf16 %v1987_v11, %v1983_v18  ;;  %12686 = vst [vmem:[#allocation93_spill] sm:$0xff] %v8122_v59 }
 0x330   : > { %2268 = vmatprep.subr.bf16.mxu1 %v2003_v0  ;;  %v1998_v13 = vpack.c.bf16 %v1986_v53, %v1982_v4 }
 0x331   : > { %3324 = vperm.xlu1 %5531, %v5732_v20  }
 0x332   : > { %2218 = vmatpush1.bf16.msra.mxu0 %v1996_v44 }
 0x333   : > { %2269 = vmatpush1.bf16.msra.mxu1 %v2002_v25 }
 0x334   : > { %2270 = vmatprep.subr.bf16.mxu1 %v1999_v49 }
 0x335   : > { %5358 = vmatmul.mubr.msk.bf16.vlgmr.msra.gmra.mxu0 %vm1680_vm8, %v5629_v21  ;;  %5532 = vset.pattern.permute.xlu1 %v12016_v47  ;;  %v8124_v2 = vpop.permute.xlu0 %3540 }
 0x336   : > { %2245 = vmatprep.mubr.bf16.mxu0 %v12606_v57  ;;  %3428 = vperm.xlu1 %5532, %v8095_v38   ;;  %12687 = vst [vmem:[#allocation60_spill] sm:$0xff] %v8124_v2 }
 0x337   : > { %2271 = vmatpush1.bf16.msra.mxu1 %v1998_v13 }
 0x339   : > { %v8126_v19 = vpop.permute.xlu0 %3548 }
 0x33a   : > { %5360 = vmatmul.mubr.msk.bf16.vlgmr.msra.gmra.mxu1 %vm1680_vm8, %v5629_v21  ;;  %3436 = vperm.xlu1 %5532, %v5732_v20   ;;  %12688 = vst [vmem:[#allocation41_spill] sm:$0xff] %v8126_v19  ;;  %v12689_v19 = vld [vmem:[#allocation33_spill] sm:$0xff] }
 0x33b   : > { %2298 = vmatprep.mubr.bf16.mxu1 %v12606_v57 }
 0x33d   : > { %5359 = vmatmul.mubr.msk.bf16.gmra.mxu0 %vm1680_vm8, %v5630_v5 }
 0x33e   : > { %2497 = vmatprep.mubr.bf16.mxu0 %v12606_v57  ;;  %3440 = vperm.xlu1 %5532, %v8101_v35  }
 0x342   : > { %5361 = vmatmul.mubr.msk.bf16.gmra.mxu1 %vm1680_vm8, %v5630_v5  ;;  %5534 = vset.pattern.permute.xlu1 %v12685_v32 }
 0x343   : > { %2550 = vmatprep.mubr.bf16.mxu1 %v12606_v57  ;;  %3544 = vperm.xlu1 %5534, %v8085_v41  }
 0x345   : > { %v8132_v4 = vpop.permute.xlu0 %2331 }
 0x349   : > { %v8135_v55 = vpop.permute.xlu0 %2346 }
 0x3c4   : > { %v1721_v37 = vpop.f32.mrf.mxu0 }
 0x3c6   : > { %v1723_v48 = vpop.f32.mrf.mxu0 }
 0x3c8   : > { %v1725_v40 = vpop.f32.mrf.mxu0  ;;  %v1774_v9 = vpop.f32.mrf.mxu1 }
 0x3ca   : > { %v8106_v39 = vpop.f32.mrf.mxu1  ;;  %v1727_v23 = vpop.f32.mrf.mxu0 }
 0x3cc   : > { %v8108_v46 = vpop.f32.mrf.mxu1  ;;  %v1731_v34 = vpop.f32.mrf.mxu0 }
 0x3ce   : > { %v8110_v28 = vpop.f32.mrf.mxu1  ;;  %v1733_v12 = vpop.f32.mrf.mxu0 }
 0x3d0   : > { %v8112_v22 = vpop.f32.mrf.mxu1  ;;  %v1735_v52 = vpop.f32.mrf.mxu0 }
 0x3d2   : > { %v8114_v31 = vpop.f32.mrf.mxu1  ;;  %v8116_v51 = vpop.f32.mrf.mxu0 }
 0x3d4   : > { %v8118_v42 = vpop.f32.mrf.mxu1 }
 0x3d6   : > { %v8120_v50 = vpop.f32.mrf.mxu1 }
 0x3dd   : > { %v1843_v30 = vpop.f32.mrf.mxu0 }
 0x3de   : > { %v1844_v25 = vadd.f32 %v1843_v30, %v1721_v37 }
 0x3df   : > { %v1845_v26 = vpop.f32.mrf.mxu0 }
 0x3e1   : > { %v1847_v15 = vpop.f32.mrf.mxu0 }
 0x3e2   : > { %v1896_v7 = vpop.f32.mrf.mxu1 }
 0x3e3   : > { %v1849_v62 = vpop.f32.mrf.mxu0  ;;  %v1897_v20 = vadd.f32 %v1896_v7, %v1774_v9 }
 0x3e4   : > { %v1898_v63 = vpop.f32.mrf.mxu1  ;;  %v1850_v37 = vadd.f32 %v1849_v62, %v1727_v23 }
 0x3e5   : > { %v1853_v11 = vpop.f32.mrf.mxu0 }
 0x3e6   : > { %v1900_v17 = vpop.f32.mrf.mxu1 }
 0x3e7   : > { %v1855_v18 = vpop.f32.mrf.mxu0 }
 0x3e8   : > { %v1902_v60 = vpop.f32.mrf.mxu1  ;;  %v1856_v54 = vadd.f32 %v1855_v18, %v1733_v12  ;;  %v1901_v12 = vadd.f32 %v1900_v17, %v8108_v46  ;;  %v2382_v17 = vpop.permute.xlu1 %2381 }
 0x3e9   : > { %v1857_v29 = vpop.f32.mrf.mxu0 }
 0x3ea   : > { %v1906_v0 = vpop.f32.mrf.mxu1 }
 0x3eb   : > { %v1859_v44 = vpop.f32.mrf.mxu0 }
 0x3ec   : > { %v8128_v45 = vpop.f32.mrf.mxu1 }
 0x3ee   : > { %v8130_v53 = vpop.f32.mrf.mxu1 }
 0x3f0   : > { %v1912_v13 = vpop.f32.mrf.mxu1 }
 0x3f5   : > { %v2237_v49 = vpop.f32.mrf.mxu0 }
 0x3f6   : > { %v2309_v21 = vadd.f32 %v2237_v49, %v1844_v25  ;;  %v1846_v49 = vadd.f32 %v1845_v26, %v1723_v48 }
 0x3f7   : > { %v2239_v5 = vpop.f32.mrf.mxu0 }
 0x3f8   : > { %v2349_v47 = vmul.f32 %v8132_v4, %v2309_v21  ;;  %v1848_v21 = vadd.f32 %v1847_v15, %v1725_v40 }
 0x3f9   : > { %v2241_v14 = vpop.f32.mrf.mxu0 }
 0x3fa   : > { %v2290_v59 = vpop.f32.mrf.mxu1  ;;  %v2389_v33 = vadd.f32 %v12689_v19, %v2349_v47  ;;  %v8142_v47 = vpop.permute.xlu0 %2376 }
 0x3fb   : > { %v2311_v10 = vadd.f32 %v2290_v59, %v1897_v20  ;;  %v2243_v58 = vpop.f32.mrf.mxu0  ;;  %v1854_v59 = vadd.f32 %v1853_v11, %v1731_v34  ;;  %v2310_v20 = vadd.f32 %v2239_v5, %v1846_v49  ;;  %v1899_v34 = vadd.f32 %v1898_v63, %v8106_v39 }
 0x3fc   : > { %v2292_v2 = vpop.f32.mrf.mxu1  ;;  %v2405_v56 = vmax.f32 %v2389_v33, 0.0  ;;  %v2314_v24 = vadd.f32 %v2243_v58, %v1850_v37  ;;  %v1858_v58 = vadd.f32 %v1857_v29, %v1735_v52  ;;  %v1913_v29 = vadd.f32 %v1912_v13, %v8120_v50 }
 0x3fd   : > { %v2351_v27 = vmul.f32 %v8132_v4, %v2311_v10  ;;  %v2247_v30 = vpop.f32.mrf.mxu0  ;;  %v2313_v10 = vadd.f32 %v2241_v14, %v1848_v21  ;;  %v2350_v62 = vmul.f32 %v8132_v4, %v2310_v20  ;;  %v12693_v14 = vld [vmem:[#allocation32_spill] sm:$0xff] }
 0x3fe   : > { %v2294_v25 = vpop.f32.mrf.mxu1  ;;  %v8139_v9 = vmin.f32 %v2405_v56, 6.0  ;;  %v2317_v23 = vadd.f32 %v2247_v30, %v1854_v59 }
 0x3ff   : > { %v2391_v7 = vadd.f32 %v12689_v19, %v2351_v27  ;;  %v2249_v16 = vpop.f32.mrf.mxu0  ;;  %v1903_v27 = vadd.f32 %v1902_v60, %v8110_v28  ;;  %v1860_v28 = vadd.f32 %v1859_v44, %v8116_v51  ;;  %v2315_v63 = vadd.f32 %v2294_v25, %v1901_v12  ;;  %v2387_v60 = vpop.permute.xlu0 %2386 }
 0x400   : > { %12690 = vst [vmem:[#allocation108_spill] sm:$0xff] %v8139_v9  ;;  %v2296_v36 = vpop.f32.mrf.mxu1  ;;  %v2318_v1 = vadd.f32 %v2249_v16, %v1856_v54  ;;  %2867 = vrot.lane.b32.xlu0 %v8139_v9, %s5989_s3  ;;  %2651 = vrot.lane.b32.xlu1 %v8139_v9, %s5987_s26  ;;  %v1907_v16 = vadd.f32 %v1906_v0, %v8112_v22  ;;  %v12692_v54 = vld [vmem:[#allocation31_spill] sm:$0xff] }
 0x401   : > { %v2407_v33 = vmax.f32 %v2391_v7, 0.0  ;;  %v2251_v56 = vpop.f32.mrf.mxu0  ;;  %v2354_v26 = vmul.f32 %v12692_v54, %v2314_v24  ;;  %v2316_v18 = vadd.f32 %v2296_v36, %v1903_v27  ;;  %v2353_v39 = vmul.f32 %v12692_v54, %v2313_v10 }
 0x402   : > { %v2300_v48 = vpop.f32.mrf.mxu1  ;;  %v2358_v11 = vmul.f32 %v12693_v14, %v2318_v1  ;;  %v2321_v5 = vadd.f32 %v2251_v56, %v1858_v58  ;;  %v2312_v24 = vadd.f32 %v2292_v2, %v1899_v34  ;;  %v2357_v22 = vmul.f32 %v12693_v14, %v2317_v23 }
 0x403   : > { %v8149_v40 = vmin.f32 %v2407_v33, 6.0  ;;  %v2319_v52 = vadd.f32 %v2300_v48, %v1907_v16  ;;  %v2253_v36 = vpop.f32.mrf.mxu0  ;;  %v1909_v0 = vadd.f32 %v8128_v45, %v8114_v31  ;;  %v1911_v51 = vadd.f32 %v8130_v53, %v8118_v42 }
 0x404   : > { %v2302_v15 = vpop.f32.mrf.mxu1  ;;  %v2361_v1 = vmul.f32 %v8135_v55, %v2321_v5  ;;  %v2394_v44 = vadd.f32 %v8142_v47, %v2354_v26  ;;  %v2390_v2 = vadd.f32 %v12689_v19, %v2350_v62  ;;  %v2398_v37 = vadd.f32 %v2382_v17, %v2358_v11 }
 0x405   : > { %12691 = vst [vmem:[#allocation62_spill] sm:$0xff] %v8149_v40  ;;  %2883 = vrot.lane.b32.xlu0 %v8149_v40, %s5989_s3  ;;  %2667 = vrot.lane.b32.xlu1 %v8149_v40, %s5987_s26  ;;  %v2356_v30 = vmul.f32 %v12692_v54, %v2316_v18  ;;  %v2359_v49 = vmul.f32 %v12693_v14, %v2319_v52 }
 0x406   : > { %v2304_v46 = vpop.f32.mrf.mxu1  ;;  %v2401_v25 = vadd.f32 %v2387_v60, %v2361_v1  ;;  %v2322_v7 = vadd.f32 %v2253_v36, %v1860_v28  ;;  %v2320_v31 = vadd.f32 %v2302_v15, %v1909_v0  ;;  %v2393_v42 = vadd.f32 %v8142_v47, %v2353_v39 }
 0x407   : > { %v2323_v45 = vadd.f32 %v2304_v46, %v1911_v51  ;;  %v2352_v50 = vmul.f32 %v8132_v4, %v2312_v24  ;;  %v2397_v53 = vadd.f32 %v2382_v17, %v2357_v22  ;;  %v2355_v13 = vmul.f32 %v12692_v54, %v2315_v63 }
 0x408   : > { %v2306_v21 = vpop.f32.mrf.mxu1  ;;  %v2410_v59 = vmax.f32 %v2394_v44, 0.0  ;;  %v2362_v20 = vmul.f32 %v8135_v55, %v2322_v7  ;;  %v2360_v33 = vmul.f32 %v12693_v14, %v2320_v31  ;;  %v2414_v56 = vmax.f32 %v2398_v37, 0.0 }
 0x409   : > { %3251 = vrot.lane.b32.xlu0 %v8139_v9, %s5992_s5  ;;  %2755 = vrot.lane.b32.xlu1 %v8139_v9, %s5988_s24  ;;  %v2363_v10 = vmul.f32 %v8135_v55, %v2323_v45  ;;  %v2396_v48 = vadd.f32 %v8142_v47, %v2356_v30  ;;  %v2417_v27 = vmax.f32 %v2401_v25, 0.0  ;;  %v2324_v58 = vadd.f32 %v2306_v21, %v1913_v29 }
 0x40a   : > { %v2399_v23 = vadd.f32 %v2382_v17, %v2359_v49  ;;  %v2402_v4 = vadd.f32 %v2387_v60, %v2362_v20  ;;  %v2400_v34 = vadd.f32 %v2382_v17, %v2360_v33  ;;  %v2406_v16 = vmax.f32 %v2390_v2, 0.0 }
 0x40b   : > { %v2403_v12 = vadd.f32 %v2387_v60, %v2363_v10  ;;  %v2392_v54 = vadd.f32 %v12689_v19, %v2352_v50  ;;  %v2413_v26 = vmax.f32 %v2397_v53, 0.0  ;;  %v2364_v15 = vmul.f32 %v8135_v55, %v2324_v58  ;;  %v5632_v53 = vld [vmem:[#allocation10 + $0x8] sm:$0xff]  }
 0x40c   : > { %v2409_v62 = vmax.f32 %v2393_v42, 0.0  ;;  %v2395_v14 = vadd.f32 %v8142_v47, %v2355_v13  ;;  %v2418_v11 = vmax.f32 %v2402_v4, 0.0  ;;  %v2412_v5 = vmax.f32 %v2396_v48, 0.0  ;;  %v5631_v42 = vld [vmem:[#allocation10] sm:$0xff]   ;;  %v8258_v13 = vpop.permute.xlu1 %2577 }
 0x40d   : > { %3267 = vrot.lane.b32.xlu0 %v8149_v40, %s5992_s5  ;;  %2771 = vrot.lane.b32.xlu1 %v8149_v40, %s5988_s24  ;;  %v2419_v18 = vmax.f32 %v2403_v12, 0.0  ;;  %v8192_v28 = vmin.f32 %v2417_v27, 6.0  ;;  %v2416_v39 = vmax.f32 %v2400_v34, 0.0  ;;  %v2404_v52 = vadd.f32 %v2387_v60, %v2364_v15  ;;  %12708 = vst [vmem:[#allocation29_spill] sm:$0xff] %v8258_v13 }
 0x40e   : > { %v8196_v46 = vmin.f32 %v2410_v59, 6.0  ;;  %v8198_v24 = vmin.f32 %v2414_v56, 6.0  ;;  %v2415_v19 = vmax.f32 %v2399_v23, 0.0  ;;  %v8200_v22 = vmin.f32 %v2418_v11, 6.0 }
 0x40f   : > { %12694 = vst [vmem:[#allocation63_spill] sm:$0xff] %v8192_v28  ;;  %v8204_v55 = vmin.f32 %v2406_v16, 6.0  ;;  %v2408_v47 = vmax.f32 %v2392_v54, 0.0  ;;  %v8206_v63 = vmin.f32 %v2413_v26, 6.0  ;;  %v2420_v1 = vmax.f32 %v2404_v52, 0.0 }
 0x410   : > { %12695 = vst [vmem:[#allocation96_spill] sm:$0xff] %v8196_v46  ;;  %12696 = vst [vmem:[#allocation94_spill] sm:$0xff] %v8198_v24  ;;  %v8208_v36 = vmin.f32 %v2409_v62, 6.0  ;;  %v2411_v17 = vmax.f32 %v2395_v14, 0.0  ;;  %v8210_v60 = vmin.f32 %v2419_v18, 6.0  ;;  %v2442_v0 = vpack.c.bf16 %v8200_v22, %v8198_v24  ;;  %v8268_v59 = vpop.permute.xlu1 %2587 }
 0x411   : > { %3475 = vrot.lane.b32.xlu0 %v8139_v9, %s5994_s29  ;;  %12697 = vst [vmem:[#allocation61_spill] sm:$0xff] %v8200_v22  ;;  %2979 = vrot.lane.b32.xlu1 %v8139_v9, %s5990_s1  ;;  %12698 = vst [vmem:[#allocation90_spill] sm:$0xff] %v8204_v55  ;;  %v8214_v51 = vmin.f32 %v2412_v5, 6.0  ;;  %v8216_v29 = vmin.f32 %v2416_v39, 6.0  ;;  %v8218_v44 = vmin.f32 %v2420_v1, 6.0  ;;  %v2441_v2 = vpack.c.bf16 %v8192_v28, %v8206_v63  ;;  %v8368_v5 = vpop.permute.xlu0 %2582 }
 0x412   : > { %12699 = vst [vmem:[#allocation57_spill] sm:$0xff] %v8206_v63  ;;  %12700 = vst [vmem:[#allocation56_spill] sm:$0xff] %v8208_v36  ;;  %v8224_v37 = vmin.f32 %v2415_v19, 6.0  ;;  %2477 = vmatprep.subr.bf16.mxu0 %v2442_v0  ;;  %v2438_v30 = vpack.c.bf16 %v8196_v46, %v8204_v55  ;;  %v8230_v25 = vmin.f32 %v2408_v47, 6.0  ;;  %v8234_v7 = vmin.f32 %v2411_v17, 6.0 }
 0x413   : > { %12701 = vst [vmem:[#allocation89_spill] sm:$0xff] %v8210_v60  ;;  %12702 = vst [vmem:[#allocation64_spill] sm:$0xff] %v8214_v51  ;;  %2478 = vmatpush1.bf16.msra.mxu0 %v2441_v2  ;;  %v2444_v49 = vpack.c.bf16 %v8218_v44, %v8216_v29  ;;  %v2437_v45 = vpack.c.bf16 %v8208_v36, %v8139_v9  ;;  %v3739_v11 = vadd.f32 %v8204_v55, %v8139_v9 }
 0x414   : > { %12703 = vst [vmem:[#allocation42_spill] sm:$0xff] %v8216_v29  ;;  %12704 = vst [vmem:[#allocation92_spill] sm:$0xff] %v8218_v44  ;;  %2479 = vmatprep.subr.bf16.mxu0 %v2438_v30  ;;  %v2443_v31 = vpack.c.bf16 %v8210_v60, %v8224_v37  ;;  %v2440_v21 = vpack.c.bf16 %v8214_v51, %v8230_v25  ;;  %v2439_v50 = vpack.c.bf16 %v8234_v7, %v8149_v40  ;;  %v8278_v20 = vpop.permute.xlu1 %2617 }
 0x415   : > { %3491 = vrot.lane.b32.xlu0 %v8149_v40, %s5994_s29  ;;  %12705 = vst [vmem:[#allocation36_spill] sm:$0xff] %v8224_v37  ;;  %2995 = vrot.lane.b32.xlu1 %v8149_v40, %s5990_s1  ;;  %12706 = vst [vmem:[#allocation34_spill] sm:$0xff] %v8230_v25  ;;  %v3823_v54 = vadd.f32 %v8230_v25, %v8149_v40  ;;  %v8374_v52 = vpop.permute.xlu0 %2592 }
 0x416   : > { %12707 = vst [vmem:[#allocation65_spill] sm:$0xff] %v8234_v7  ;;  %2530 = vmatprep.subr.bf16.mxu1 %v2444_v49  ;;  %12709 = vst [vmem:[#allocation28_spill] sm:$0xff] %v8268_v59 }
 0x417   : > { %2531 = vmatpush1.bf16.msra.mxu1 %v2443_v31  ;;  %2480 = vmatpush1.bf16.msra.mxu0 %v2437_v45  ;;  %12710 = vst [vmem:[#allocation59_spill] sm:$0xff] %v8278_v20  ;;  %12724 = vst [vmem:[#allocation49_spill] sm:$0xff] %v8368_v5 }
 0x418   : > { %2532 = vmatprep.subr.bf16.mxu1 %v2440_v21  ;;  %v8286_v33 = vpop.permute.xlu1 %2627  ;;  %12726 = vst [vmem:[#allocation88_spill] sm:$0xff] %v8374_v52 }
 0x419   : > { %2875 = vrot.lane.b32.xlu0 %v8204_v55, %s5989_s3  ;;  %3139 = vrot.lane.b32.xlu1 %v8139_v9, %s5991_s19  ;;  %12711 = vst [vmem:[#allocation58_spill] sm:$0xff] %v8286_v33  ;;  %v8382_v47 = vpop.permute.xlu0 %2622 }
 0x41a   : > { %5364 = vmatmul.mubr.msk.bf16.vlgmr.msra.gmra.mxu0 %vm1093_vm0, %v5631_v42  ;;  %12728 = vst [vmem:[#allocation25_spill] sm:$0xff] %v8382_v47 }
 0x41b   : > { %2533 = vmatpush1.bf16.msra.mxu1 %v2439_v50  ;;  %2507 = vmatprep.mubr.bf16.mxu0 %v12606_v57 }
 0x41c   : > { %v8294_v10 = vpop.permute.xlu1 %2721 }
 0x41d   : > { %2891 = vrot.lane.b32.xlu0 %v8230_v25, %s5989_s3  ;;  %3155 = vrot.lane.b32.xlu1 %v8149_v40, %s5991_s19  ;;  %12712 = vst [vmem:[#allocation91_spill] sm:$0xff] %v8294_v10  ;;  %v8390_v17 = vpop.permute.xlu0 %2632 }
 0x41e   : > { %5366 = vmatmul.mubr.msk.bf16.vlgmr.msra.gmra.mxu1 %vm1093_vm0, %v5631_v42  ;;  %12730 = vst [vmem:[#allocation150_spill] sm:$0xff] %v8390_v17 }
 0x41f   : > { %2560 = vmatprep.mubr.bf16.mxu1 %v12606_v57 }
 0x420   : > { %v8302_v56 = vpop.permute.xlu1 %2731 }
 0x421   : > { %3259 = vrot.lane.b32.xlu0 %v8204_v55, %s5992_s5  ;;  %3363 = vrot.lane.b32.xlu1 %v8139_v9, %s5993_s4  ;;  %12713 = vst [vmem:[#allocation86_spill] sm:$0xff] %v8302_v56  ;;  %v8400_v2 = vpop.permute.xlu0 %2726 }
 0x422   : > { %5365 = vmatmul.mubr.msk.bf16.gmra.mxu0 %vm1093_vm0, %v5632_v53  ;;  %12732 = vst [vmem:[#allocation124_spill] sm:$0xff] %v8400_v2 }
 0x423   : > { %5006 = vmatprep.mubr.bf16.mxu0 %v12606_v57 }
 0x424   : > { %v8308_v48 = vpop.permute.xlu1 %2820 }
 0x425   : > { %3275 = vrot.lane.b32.xlu0 %v8230_v25, %s5992_s5  ;;  %3379 = vrot.lane.b32.xlu1 %v8149_v40, %s5993_s4  ;;  %v8410_v49 = vpop.permute.xlu0 %2736 }
 0x426   : > { %5367 = vmatmul.mubr.msk.bf16.gmra.mxu1 %vm1093_vm0, %v5632_v53  ;;  %12734 = vst [vmem:[#allocation115_spill] sm:$0xff] %v8410_v49 }
 0x427   : > { %5059 = vmatprep.mubr.bf16.mxu1 %v12606_v57 }
 0x428   : > { %v8316_v27 = vpop.permute.xlu1 %2828 }
 0x429   : > { %3483 = vrot.lane.b32.xlu0 %v8204_v55, %s5994_s29  ;;  %2659 = vrot.lane.b32.xlu1 %v8204_v55, %s5987_s26  ;;  %12714 = vst [vmem:[#allocation27_spill] sm:$0xff] %v8316_v27 }
 0x42c   : > { %v8324_v58 = vpop.permute.xlu1 %2832 }
 0x42d   : > { %3499 = vrot.lane.b32.xlu0 %v8230_v25, %s5994_s29  ;;  %2675 = vrot.lane.b32.xlu1 %v8230_v25, %s5987_s26  ;;  %12715 = vst [vmem:[#allocation23_spill] sm:$0xff] %v8324_v58 }
 0x430   : > { %v8332_v23 = vpop.permute.xlu1 %2936 }
 0x431   : > { %2653 = vrot.lane.b32.xlu0 %v8208_v36, %s5987_s26  ;;  %2763 = vrot.lane.b32.xlu1 %v8204_v55, %s5988_s24  ;;  %12716 = vst [vmem:[#allocation37_spill] sm:$0xff] %v8332_v23 }
 0x434   : > { %v8338_v4 = vpop.permute.xlu1 %2940 }
 0x435   : > { %2669 = vrot.lane.b32.xlu0 %v8234_v7, %s5987_s26  ;;  %2779 = vrot.lane.b32.xlu1 %v8230_v25, %s5988_s24  ;;  %12717 = vst [vmem:[#allocation35_spill] sm:$0xff] %v8338_v4 }
 0x438   : > { %v8342_v34 = vpop.permute.xlu1 %3044 }
 0x439   : > { %2757 = vrot.lane.b32.xlu0 %v8208_v36, %s5988_s24  ;;  %2987 = vrot.lane.b32.xlu1 %v8204_v55, %s5990_s1  ;;  %12718 = vst [vmem:[#allocation30_spill] sm:$0xff] %v8342_v34 }
 0x43c   : > { %v8348_v12 = vpop.permute.xlu1 %3052 }
 0x43d   : > { %2773 = vrot.lane.b32.xlu0 %v8234_v7, %s5988_s24  ;;  %3003 = vrot.lane.b32.xlu1 %v8230_v25, %s5990_s1  ;;  %12719 = vst [vmem:[#allocation24_spill] sm:$0xff] %v8348_v12  ;;  %v3826_v12 = vadd.f32 %v8214_v51, %v8234_v7 }
 0x440   : > { %v8350_v16 = vpop.permute.xlu1 %3056 }
 0x441   : > { %2981 = vrot.lane.b32.xlu0 %v8208_v36, %s5990_s1  ;;  %3147 = vrot.lane.b32.xlu1 %v8204_v55, %s5991_s19  ;;  %12720 = vst [vmem:[#allocation48_spill] sm:$0xff] %v8350_v16 }
 0x444   : > { %v8354_v26 = vpop.permute.xlu1 %3096 }
 0x445   : > { %2997 = vrot.lane.b32.xlu0 %v8234_v7, %s5990_s1  ;;  %3163 = vrot.lane.b32.xlu1 %v8230_v25, %s5991_s19 }
 0x448   : > { %v8356_v15 = vpop.permute.xlu1 %3100 }
 0x449   : > { %3141 = vrot.lane.b32.xlu0 %v8208_v36, %s5991_s19  ;;  %3371 = vrot.lane.b32.xlu1 %v8204_v55, %s5993_s4  ;;  %v3742_v55 = vadd.f32 %v8196_v46, %v8208_v36 }
 0x44c   : > { %v8358_v62 = vpop.permute.xlu1 %3204 }
 0x44d   : > { %3157 = vrot.lane.b32.xlu0 %v8234_v7, %s5991_s19  ;;  %3387 = vrot.lane.b32.xlu1 %v8230_v25, %s5993_s4  ;;  %12721 = vst [vmem:[#allocation68_spill] sm:$0xff] %v8358_v62 }
 0x450   : > { %v8360_v14 = vpop.permute.xlu1 %3212 }
 0x451   : > { %3365 = vrot.lane.b32.xlu0 %v8208_v36, %s5993_s4  ;;  %2869 = vrot.lane.b32.xlu1 %v8208_v36, %s5989_s3  ;;  %12722 = vst [vmem:[#allocation85_spill] sm:$0xff] %v8360_v14 }
 0x454   : > { %v8366_v18 = vpop.permute.xlu1 %3216 }
 0x455   : > { %3381 = vrot.lane.b32.xlu0 %v8234_v7, %s5993_s4  ;;  %2885 = vrot.lane.b32.xlu1 %v8234_v7, %s5989_s3  ;;  %12723 = vst [vmem:[#allocation46_spill] sm:$0xff] %v8366_v18 }
 0x458   : > { %v8372_v39 = vpop.permute.xlu1 %3320 }
 0x459   : > { %3253 = vrot.lane.b32.xlu1 %v8208_v36, %s5992_s5  ;;  %12725 = vst [vmem:[#allocation69_spill] sm:$0xff] %v8372_v39 }
 0x45c   : > { %v8380_v19 = vpop.permute.xlu1 %3324 }
 0x45d   : > { %3269 = vrot.lane.b32.xlu1 %v8234_v7, %s5992_s5  ;;  %12727 = vst [vmem:[#allocation26_spill] sm:$0xff] %v8380_v19 }
 0x460   : > { %v8388_v1 = vpop.permute.xlu1 %3428 }
 0x461   : > { %3477 = vrot.lane.b32.xlu1 %v8208_v36, %s5994_s29  ;;  %12729 = vst [vmem:[#allocation47_spill] sm:$0xff] %v8388_v1 }
 0x464   : > { %v8398_v0 = vpop.permute.xlu1 %3436 }
 0x465   : > { %3493 = vrot.lane.b32.xlu1 %v8234_v7, %s5994_s29  ;;  %12731 = vst [vmem:[#allocation87_spill] sm:$0xff] %v8398_v0 }
 0x468   : > { %v8408_v30 = vpop.permute.xlu1 %3440 }
 0x469   : > { %12733 = vst [vmem:[#allocation82_spill] sm:$0xff] %v8408_v30 }
 0x46c   : > { %v8420_v45 = vpop.permute.xlu1 %3544 }
 0x46d   : > { %12735 = vst [vmem:[#allocation81_spill] sm:$0xff] %v8420_v45 }
 0x472   : > { %v8416_v31 = vpop.permute.xlu0 %2867  ;;  %v8430_v42 = vpop.permute.xlu1 %2651 }
 0x474   : > { %3824 = vadd.xlane.f32.xlu0 %v3823_v54 }
 0x477   : > { %v8426_v21 = vpop.permute.xlu0 %2883  ;;  %v8440_v53 = vpop.permute.xlu1 %2667 }
 0x47b   : > { %v8436_v50 = vpop.permute.xlu0 %3251 }
 0x47f   : > { %v8446_v54 = vpop.permute.xlu0 %3267 }
 0x483   : > { %v8456_v17 = vpop.permute.xlu0 %3475 }
 0x487   : > { %v8464_v33 = vpop.permute.xlu0 %3491 }
 0x489   : > { %3740 = vadd.xlane.f32.xlu1 %v3739_v11  ;;  %v8450_v11 = vpop.permute.xlu1 %2755 }
 0x48a   : > { %2661 = vrot.lane.b32.xlu0 %v8196_v46, %s5987_s26 }
 0x48b   : > { %v8472_v20 = vpop.permute.xlu0 %2875 }
 0x48d   : > { %v8460_v52 = vpop.permute.xlu1 %2771 }
 0x48e   : > { %2677 = vrot.lane.b32.xlu0 %v8214_v51, %s5987_s26 }
 0x48f   : > { %v8478_v5 = vpop.permute.xlu0 %2891 }
 0x491   : > { %v8468_v47 = vpop.permute.xlu1 %2979 }
 0x492   : > { %2765 = vrot.lane.b32.xlu0 %v8196_v46, %s5988_s24 }
 0x493   : > { %v8484_v25 = vpop.permute.xlu0 %3259 }
 0x495   : > { %v8474_v59 = vpop.permute.xlu1 %2995 }
 0x496   : > { %2781 = vrot.lane.b32.xlu0 %v8214_v51, %s5988_s24  ;;  %12736 = vst [vmem:[#allocation139_spill] sm:$0xff] %v8474_v59 }
 0x497   : > { %v8490_v9 = vpop.permute.xlu0 %3275 }
 0x499   : > { %v8482_v13 = vpop.permute.xlu1 %3139 }
 0x49a   : > { %2989 = vrot.lane.b32.xlu0 %v8196_v46, %s5990_s1  ;;  %2877 = vrot.lane.b32.xlu1 %v8196_v46, %s5989_s3  ;;  %12737 = vst [vmem:[#allocation70_spill] sm:$0xff] %v8482_v13 }
 0x49b   : > { %v8494_v18 = vpop.permute.xlu0 %3483 }
 0x49d   : > { %v8486_v40 = vpop.permute.xlu1 %3155 }
 0x49e   : > { %3005 = vrot.lane.b32.xlu0 %v8214_v51, %s5990_s1  ;;  %2893 = vrot.lane.b32.xlu1 %v8214_v51, %s5989_s3  ;;  %12738 = vst [vmem:[#allocation84_spill] sm:$0xff] %v8486_v40 }
 0x49f   : > { %v8498_v49 = vpop.permute.xlu0 %3499 }
 0x4a1   : > { %v8492_v30 = vpop.permute.xlu1 %3363 }
 0x4a2   : > { %3149 = vrot.lane.b32.xlu0 %v8196_v46, %s5991_s19  ;;  %3261 = vrot.lane.b32.xlu1 %v8196_v46, %s5992_s5  ;;  %12739 = vst [vmem:[#allocation128_spill] sm:$0xff] %v8492_v30 }
 0x4a3   : > { %v8502_v0 = vpop.permute.xlu0 %2653 }
 0x4a4   : > { %12741 = vst [vmem:[#allocation83_spill] sm:$0xff] %v8502_v0 }
 0x4a5   : > { %v8496_v16 = vpop.permute.xlu1 %3379 }
 0x4a6   : > { %3165 = vrot.lane.b32.xlu0 %v8214_v51, %s5991_s19  ;;  %3277 = vrot.lane.b32.xlu1 %v8214_v51, %s5992_s5  ;;  %12740 = vst [vmem:[#allocation71_spill] sm:$0xff] %v8496_v16 }
 0x4a7   : > { %v8510_v19 = vpop.permute.xlu0 %2669 }
 0x4a8   : > { %12742 = vst [vmem:[#allocation52_spill] sm:$0xff] %v8510_v19 }
 0x4a9   : > { %v8500_v58 = vpop.permute.xlu1 %2659 }
 0x4aa   : > { %3373 = vrot.lane.b32.xlu0 %v8196_v46, %s5993_s4  ;;  %3485 = vrot.lane.b32.xlu1 %v8196_v46, %s5994_s29 }
 0x4ab   : > { %v8516_v56 = vpop.permute.xlu0 %2757 }
 0x4ac   : > { %12743 = vst [vmem:[#allocation72_spill] sm:$0xff] %v8516_v56 }
 0x4ad   : > { %v8504_v14 = vpop.permute.xlu1 %2675 }
 0x4ae   : > { %3389 = vrot.lane.b32.xlu0 %v8214_v51, %s5993_s4  ;;  %3501 = vrot.lane.b32.xlu1 %v8214_v51, %s5994_s29 }
 0x4af   : > { %v8524_v4 = vpop.permute.xlu0 %2773 }
 0x4b0   : > { %12744 = vst [vmem:[#allocation50_spill] sm:$0xff] %v8524_v4 }
 0x4b2   : > { %2871 = vrot.lane.b32.xlu0 %v8206_v63, %s5989_s3  ;;  %2655 = vrot.lane.b32.xlu1 %v8206_v63, %s5987_s26 }
 0x4b6   : > { %2887 = vrot.lane.b32.xlu0 %v8224_v37, %s5989_s3  ;;  %2671 = vrot.lane.b32.xlu1 %v8224_v37, %s5987_s26 }
 0x4ba   : > { %3255 = vrot.lane.b32.xlu0 %v8206_v63, %s5992_s5  ;;  %2759 = vrot.lane.b32.xlu1 %v8206_v63, %s5988_s24 }
 0x4be   : > { %3271 = vrot.lane.b32.xlu0 %v8224_v37, %s5992_s5  ;;  %2775 = vrot.lane.b32.xlu1 %v8224_v37, %s5988_s24 }
 0x4c2   : > { %3479 = vrot.lane.b32.xlu0 %v8206_v63, %s5994_s29  ;;  %2983 = vrot.lane.b32.xlu1 %v8206_v63, %s5990_s1 }
 0x4c6   : > { %3495 = vrot.lane.b32.xlu0 %v8224_v37, %s5994_s29  ;;  %2999 = vrot.lane.b32.xlu1 %v8224_v37, %s5990_s1 }
 0x4ca   : > { %3143 = vrot.lane.b32.xlu1 %v8206_v63, %s5991_s19 }
 0x4ce   : > { %3159 = vrot.lane.b32.xlu1 %v8224_v37, %s5991_s19 }
 0x4d2   : > { %3367 = vrot.lane.b32.xlu1 %v8206_v63, %s5993_s4 }
 0x4d6   : > { %3383 = vrot.lane.b32.xlu1 %v8224_v37, %s5993_s4 }
 0x4e5   : > { %3743 = vadd.xlane.f32.xlu0 %v3742_v55  ;;  %v8512_v55 = vpop.permute.xlu1 %2763 }
 0x4e9   : > { %v8518_v27 = vpop.permute.xlu1 %2779 }
 0x4ed   : > { %v8526_v45 = vpop.permute.xlu1 %2987 }
 0x4f1   : > { %v8534_v39 = vpop.permute.xlu1 %3003 }
 0x4f2   : > { %12746 = vst [vmem:[#allocation78_spill] sm:$0xff] %v8534_v39 }
 0x4f5   : > { %v8544_v2 = vpop.permute.xlu1 %3147 }
 0x4f6   : > { %12748 = vst [vmem:[#allocation73_spill] sm:$0xff] %v8544_v2 }
 0x4f9   : > { %v8554_v4 = vpop.permute.xlu1 %3163 }
 0x4fa   : > { %3827 = vadd.xlane.f32.xlu1 %v3826_v12  ;;  %v8532_v12 = vpop.permute.xlu0 %2981  ;;  %12750 = vst [vmem:[#allocation110_spill] sm:$0xff] %v8554_v4 }
 0x4fb   : > { %2879 = vrot.lane.b32.xlu0 %v8198_v24, %s5989_s3  ;;  %12745 = vst [vmem:[#allocation111_spill] sm:$0xff] %v8532_v12 }
 0x4fd   : > { %v8564_v56 = vpop.permute.xlu1 %3371 }
 0x4fe   : > { %v8542_v23 = vpop.permute.xlu0 %2997  ;;  %12752 = vst [vmem:[#allocation114_spill] sm:$0xff] %v8564_v56 }
 0x4ff   : > { %2895 = vrot.lane.b32.xlu0 %v8216_v29, %s5989_s3  ;;  %12747 = vst [vmem:[#allocation53_spill] sm:$0xff] %v8542_v23 }
 0x501   : > { %v8574_v1 = vpop.permute.xlu1 %3387 }
 0x502   : > { %v8552_v12 = vpop.permute.xlu0 %3141  ;;  %12754 = vst [vmem:[#allocation77_spill] sm:$0xff] %v8574_v1 }
 0x503   : > { %3263 = vrot.lane.b32.xlu0 %v8198_v24, %s5992_s5  ;;  %12749 = vst [vmem:[#allocation51_spill] sm:$0xff] %v8552_v12 }
 0x505   : > { %v8584_v62 = vpop.permute.xlu1 %2869 }
 0x506   : > { %v8562_v23 = vpop.permute.xlu0 %3157  ;;  %12756 = vst [vmem:[#allocation112_spill] sm:$0xff] %v8584_v62 }
 0x507   : > { %3279 = vrot.lane.b32.xlu0 %v8216_v29, %s5992_s5  ;;  %12751 = vst [vmem:[#allocation76_spill] sm:$0xff] %v8562_v23 }
 0x509   : > { %v8594_v0 = vpop.permute.xlu1 %2885 }
 0x50a   : > { %v8572_v12 = vpop.permute.xlu0 %3365  ;;  %12757 = vst [vmem:[#allocation154_spill] sm:$0xff] %v8594_v0 }
 0x50b   : > { %3487 = vrot.lane.b32.xlu0 %v8198_v24, %s5994_s29  ;;  %2663 = vrot.lane.b32.xlu1 %v8198_v24, %s5987_s26  ;;  %12753 = vst [vmem:[#allocation54_spill] sm:$0xff] %v8572_v12 }
 0x50d   : > { %v8604_v62 = vpop.permute.xlu1 %3253 }
 0x50e   : > { %v8582_v23 = vpop.permute.xlu0 %3381  ;;  %12759 = vst [vmem:[#allocation55_spill] sm:$0xff] %v8604_v62 }
 0x50f   : > { %3503 = vrot.lane.b32.xlu0 %v8216_v29, %s5994_s29  ;;  %2679 = vrot.lane.b32.xlu1 %v8216_v29, %s5987_s26  ;;  %12755 = vst [vmem:[#allocation80_spill] sm:$0xff] %v8582_v23 }
 0x511   : > { %v8612_v0 = vpop.permute.xlu1 %3269 }
 0x512   : > { %v8590_v12 = vpop.xlane.xlu0 %3824  ;;  %12761 = vst [vmem:[#allocation109_spill] sm:$0xff] %v8612_v0 }
 0x513   : > { %2657 = vrot.lane.b32.xlu0 %v8192_v28, %s5987_s26  ;;  %2767 = vrot.lane.b32.xlu1 %v8198_v24, %s5988_s24 }
 0x516   : > { %v8600_v23 = vpop.permute.xlu0 %2661 }
 0x517   : > { %2673 = vrot.lane.b32.xlu0 %v8210_v60, %s5987_s26  ;;  %2783 = vrot.lane.b32.xlu1 %v8216_v29, %s5988_s24  ;;  %12758 = vst [vmem:[#allocation156_spill] sm:$0xff] %v8600_v23  ;;  %v8618_v23 = vpop.permute.xlu1 %3477 }
 0x518   : > { %12763 = vst [vmem:[#allocation160_spill] sm:$0xff] %v8618_v23 }
 0x51a   : > { %v8608_v19 = vpop.permute.xlu0 %2677 }
 0x51b   : > { %2761 = vrot.lane.b32.xlu0 %v8192_v28, %s5988_s24  ;;  %2991 = vrot.lane.b32.xlu1 %v8198_v24, %s5990_s1  ;;  %12760 = vst [vmem:[#allocation79_spill] sm:$0xff] %v8608_v19  ;;  %v8626_v19 = vpop.permute.xlu1 %3493 }
 0x51c   : > { %12765 = vst [vmem:[#allocation161_spill] sm:$0xff] %v8626_v19 }
 0x51e   : > { %v8616_v1 = vpop.permute.xlu0 %2765 }
 0x51f   : > { %2777 = vrot.lane.b32.xlu0 %v8210_v60, %s5988_s24  ;;  %3007 = vrot.lane.b32.xlu1 %v8216_v29, %s5990_s1  ;;  %12762 = vst [vmem:[#allocation158_spill] sm:$0xff] %v8616_v1  ;;  %v8630_v0 = vpop.xlane.xlu1 %3740  ;;  %v3745_v1 = vadd.f32 %v8198_v24, %v8206_v63 }
 0x522   : > { %v8622_v62 = vpop.permute.xlu0 %2781 }
 0x523   : > { %2985 = vrot.lane.b32.xlu0 %v8192_v28, %s5990_s1  ;;  %3151 = vrot.lane.b32.xlu1 %v8198_v24, %s5991_s19  ;;  %12764 = vst [vmem:[#allocation159_spill] sm:$0xff] %v8622_v62  ;;  %v8636_v23 = vpop.permute.xlu1 %2877 }
 0x524   : > { %12768 = vst [vmem:[#allocation162_spill] sm:$0xff] %v8636_v23  ;;  %v3748_v23 = vadd.f32 %v8200_v22, %v8192_v28 }
 0x526   : > { %v8628_v16 = vpop.permute.xlu0 %2989 }
 0x527   : > { %3001 = vrot.lane.b32.xlu0 %v8210_v60, %s5990_s1  ;;  %3167 = vrot.lane.b32.xlu1 %v8216_v29, %s5991_s19  ;;  %12766 = vst [vmem:[#allocation107_spill] sm:$0xff] %v8628_v16  ;;  %v8640_v62 = vpop.permute.xlu1 %2893 }
 0x528   : > { %12770 = vst [vmem:[#allocation157_spill] sm:$0xff] %v8640_v62 }
 0x52a   : > { %v8632_v30 = vpop.permute.xlu0 %3005 }
 0x52b   : > { %3145 = vrot.lane.b32.xlu0 %v8192_v28, %s5991_s19  ;;  %3375 = vrot.lane.b32.xlu1 %v8198_v24, %s5993_s4  ;;  %12767 = vst [vmem:[#allocation106_spill] sm:$0xff] %v8632_v30  ;;  %v8644_v40 = vpop.permute.xlu1 %3261  ;;  %v3829_v30 = vadd.f32 %v8216_v29, %v8224_v37 }
 0x52c   : > { %12772 = vst [vmem:[#allocation105_spill] sm:$0xff] %v8644_v40 }
 0x52e   : > { %v8638_v56 = vpop.permute.xlu0 %3149 }
 0x52f   : > { %3161 = vrot.lane.b32.xlu0 %v8210_v60, %s5991_s19  ;;  %3391 = vrot.lane.b32.xlu1 %v8216_v29, %s5993_s4  ;;  %12769 = vst [vmem:[#allocation155_spill] sm:$0xff] %v8638_v56  ;;  %v8648_v16 = vpop.permute.xlu1 %3277 }
 0x530   : > { %12774 = vst [vmem:[#allocation75_spill] sm:$0xff] %v8648_v16 }
 0x532   : > { %v8642_v4 = vpop.permute.xlu0 %3165 }
 0x533   : > { %3369 = vrot.lane.b32.xlu0 %v8192_v28, %s5993_s4  ;;  %2873 = vrot.lane.b32.xlu1 %v8192_v28, %s5989_s3  ;;  %12771 = vst [vmem:[#allocation74_spill] sm:$0xff] %v8642_v4 }
 0x536   : > { %v8646_v19 = vpop.permute.xlu0 %3373 }
 0x537   : > { %3385 = vrot.lane.b32.xlu0 %v8210_v60, %s5993_s4  ;;  %2889 = vrot.lane.b32.xlu1 %v8210_v60, %s5989_s3  ;;  %12773 = vst [vmem:[#allocation165_spill] sm:$0xff] %v8646_v19 }
 0x53a   : > { %v8652_v34 = vpop.permute.xlu0 %3389 }
 0x53b   : > { %3257 = vrot.lane.b32.xlu1 %v8192_v28, %s5992_s5  ;;  %12775 = vst [vmem:[#allocation104_spill] sm:$0xff] %v8652_v34 }
 0x53e   : > { %v8660_v4 = vpop.permute.xlu0 %2871 }
 0x53f   : > { %3273 = vrot.lane.b32.xlu1 %v8210_v60, %s5992_s5  ;;  %12777 = vst [vmem:[#allocation153_spill] sm:$0xff] %v8660_v4 }
 0x542   : > { %v8666_v19 = vpop.permute.xlu0 %2887 }
 0x543   : > { %3481 = vrot.lane.b32.xlu1 %v8192_v28, %s5994_s29  ;;  %12779 = vst [vmem:[#allocation102_spill] sm:$0xff] %v8666_v19 }
 0x547   : > { %3497 = vrot.lane.b32.xlu1 %v8210_v60, %s5994_s29 }
 0x556   : > { %3746 = vadd.xlane.f32.xlu0 %v3745_v1  ;;  %v8656_v1 = vpop.permute.xlu1 %3485 }
 0x557   : > { %12776 = vst [vmem:[#allocation152_spill] sm:$0xff] %v8656_v1 }
 0x55a   : > { %v8662_v40 = vpop.permute.xlu1 %3501 }
 0x55b   : > { %12778 = vst [vmem:[#allocation103_spill] sm:$0xff] %v8662_v40 }
 0x55e   : > { %v8670_v34 = vpop.permute.xlu1 %2655 }
 0x55f   : > { %12780 = vst [vmem:[#allocation149_spill] sm:$0xff] %v8670_v34 }
 0x562   : > { %v8678_v4 = vpop.permute.xlu1 %2671 }
 0x563   : > { %12782 = vst [vmem:[#allocation101_spill] sm:$0xff] %v8678_v4 }
 0x566   : > { %v8688_v34 = vpop.permute.xlu1 %2759 }
 0x567   : > { %12784 = vst [vmem:[#allocation99_spill] sm:$0xff] %v8688_v34 }
 0x56b   : > { %3830 = vadd.xlane.f32.xlu1 %v3829_v30  ;;  %v8674_v30 = vpop.permute.xlu0 %3255 }
 0x56c   : > { %2665 = vrot.lane.b32.xlu0 %v8200_v22, %s5987_s26  ;;  %12781 = vst [vmem:[#allocation151_spill] sm:$0xff] %v8674_v30  ;;  %v8698_v30 = vpop.permute.xlu1 %2775 }
 0x56d   : > { %12786 = vst [vmem:[#allocation97_spill] sm:$0xff] %v8698_v30 }
 0x56f   : > { %v8684_v40 = vpop.permute.xlu0 %3271 }
 0x570   : > { %2681 = vrot.lane.b32.xlu0 %v8218_v44, %s5987_s26  ;;  %12783 = vst [vmem:[#allocation100_spill] sm:$0xff] %v8684_v40  ;;  %v8708_v34 = vpop.permute.xlu1 %2983 }
 0x571   : > { %12788 = vst [vmem:[#allocation43_spill] sm:$0xff] %v8708_v34 }
 0x573   : > { %v8694_v4 = vpop.permute.xlu0 %3479 }
 0x574   : > { %2769 = vrot.lane.b32.xlu0 %v8200_v22, %s5988_s24  ;;  %12785 = vst [vmem:[#allocation98_spill] sm:$0xff] %v8694_v4  ;;  %v8714_v19 = vpop.permute.xlu1 %2999 }
 0x575   : > { %12789 = vst [vmem:[#allocation67_spill] sm:$0xff] %v8714_v19 }
 0x577   : > { %v8704_v40 = vpop.permute.xlu0 %3495 }
 0x578   : > { %2785 = vrot.lane.b32.xlu0 %v8218_v44, %s5988_s24  ;;  %12787 = vst [vmem:[#allocation66_spill] sm:$0xff] %v8704_v40  ;;  %v8718_v1 = vpop.permute.xlu1 %3143 }
 0x579   : > { %12791 = vst [vmem:[#allocation40_spill] sm:$0xff] %v8718_v1  ;;  %v3832_v1 = vadd.f32 %v8218_v44, %v8210_v60 }
 0x57b   : > { %v8712_v4 = vpop.xlane.xlu0 %3743 }
 0x57c   : > { %2993 = vrot.lane.b32.xlu0 %v8200_v22, %s5990_s1  ;;  %2881 = vrot.lane.b32.xlu1 %v8200_v22, %s5989_s3  ;;  %v8722_v62 = vpop.permute.xlu1 %3159 }
 0x57d   : > { %12793 = vst [vmem:[#allocation45_spill] sm:$0xff] %v8722_v62 }
 0x57f   : > { %v8716_v30 = vpop.permute.xlu0 %2879 }
 0x580   : > { %3009 = vrot.lane.b32.xlu0 %v8218_v44, %s5990_s1  ;;  %2897 = vrot.lane.b32.xlu1 %v8218_v44, %s5989_s3  ;;  %12790 = vst [vmem:[#allocation95_spill] sm:$0xff] %v8716_v30  ;;  %v8726_v56 = vpop.permute.xlu1 %3367 }
 0x581   : > { %12795 = vst [vmem:[#allocation38_spill] sm:$0xff] %v8726_v56 }
 0x583   : > { %v8720_v16 = vpop.permute.xlu0 %2895 }
 0x584   : > { %3153 = vrot.lane.b32.xlu0 %v8200_v22, %s5991_s19  ;;  %3265 = vrot.lane.b32.xlu1 %v8200_v22, %s5992_s5  ;;  %12792 = vst [vmem:[#allocation44_spill] sm:$0xff] %v8720_v16  ;;  %v8732_v13 = vpop.permute.xlu1 %3383 }
 0x585   : > { %12797 = vst [vmem:[#allocation31_spill] sm:$0xff] %v8732_v13 }
 0x587   : > { %v8724_v40 = vpop.permute.xlu0 %3263 }
 0x588   : > { %3169 = vrot.lane.b32.xlu0 %v8218_v44, %s5991_s19  ;;  %3281 = vrot.lane.b32.xlu1 %v8218_v44, %s5992_s5  ;;  %12794 = vst [vmem:[#allocation39_spill] sm:$0xff] %v8724_v40  ;;  %v8736_v30 = vpop.xlane.xlu1 %3827 }
 0x58b   : > { %v8728_v34 = vpop.permute.xlu0 %3279 }
 0x58c   : > { %3377 = vrot.lane.b32.xlu0 %v8200_v22, %s5993_s4  ;;  %3489 = vrot.lane.b32.xlu1 %v8200_v22, %s5994_s29  ;;  %12796 = vst [vmem:[#allocation33_spill] sm:$0xff] %v8728_v34  ;;  %v8742_v40 = vpop.permute.xlu1 %2663 }
 0x58d   : > { %12800 = vst [vmem:[#allocation167_spill] sm:$0xff] %v8742_v40  ;;  %v12811_v40 = vmov 2  }
 0x58f   : > { %v8734_v19 = vpop.permute.xlu0 %3487 }
 0x590   : > { %3393 = vrot.lane.b32.xlu0 %v8218_v44, %s5993_s4  ;;  %3505 = vrot.lane.b32.xlu1 %v8218_v44, %s5994_s29  ;;  %12798 = vst [vmem:[#allocation32_spill] sm:$0xff] %v8734_v19  ;;  %v8746_v34 = vpop.permute.xlu1 %2679  ;;  %v3587_v44 = vld [vmem:[%s11811_s12] sm:$0xff] }
 0x591   : > { %12802 = vst [vmem:[#allocation169_spill] sm:$0xff] %v8746_v34 }
 0x593   : > { %v8740_v62 = vpop.permute.xlu0 %3503 }
 0x594   : > { %12799 = vst [vmem:[#allocation166_spill] sm:$0xff] %v8740_v62  ;;  %v8753_v28 = vpop.permute.xlu1 %2767  ;;  %v8791_v62 = vld [vmem:[%s11814_s15 + $0x8] sm:$0xff] }
 0x595   : > { %12804 = vst [vmem:[#allocation171_spill] sm:$0xff] %v8753_v28 }
 0x597   : > { %v8744_v56 = vpop.permute.xlu0 %2657 }
 0x598   : > { %12801 = vst [vmem:[#allocation168_spill] sm:$0xff] %v8744_v56  ;;  %v8763_v56 = vpop.permute.xlu1 %2783 }
 0x599   : > { %12807 = vst [vmem:[#allocation173_spill] sm:$0xff] %v8763_v56 }
 0x59b   : > { %v8751_v22 = vpop.permute.xlu0 %2673 }
 0x59c   : > { %12803 = vst [vmem:[#allocation170_spill] sm:$0xff] %v8751_v22  ;;  %v3589_v22 = vld [vmem:[%s11811_s12 + $0x10] sm:$0xff] }
 0x59f   : > { %v8760_v60 = vpop.permute.xlu0 %2761 }
 0x5a0   : > { %12806 = vst [vmem:[#allocation172_spill] sm:$0xff] %v8760_v60  ;;  %v8778_v60 = vld [vmem:[%s11814_s15 + $0x18] sm:$0xff] }
 0x5a3   : > { %v8780_v13 = vpop.permute.xlu0 %2777 }
 0x5a4   : > { %12808 = vst [vmem:[#allocation174_spill] sm:$0xff] %v8780_v13 }
 0x5a7   : > { %v8793_v19 = vpop.permute.xlu0 %2985 }
 0x5a8   : > { %12810 = vst [vmem:[#allocation176_spill] sm:$0xff] %v8793_v19 }
 0x5af   : > { %3749 = vadd.xlane.f32.xlu0 %v3748_v23  ;;  %v3588_v23 = vld [vmem:[%s11811_s12 + $0x8] sm:$0xff] }
 0x5b4   : > { %3833 = vadd.xlane.f32.xlu1 %v3832_v1  ;;  %v12805_v1 = vmov 1  }
 0x5c5   : > { %3598 = vperm.xlu0 %5535, %v3588_v23   ;;  %3552 = vperm.xlu1 %5534, %v8101_v35   ;;  %v8769_v23 = vld [vmem:[%s11814_s15] sm:$0xff] }
 0x5c9   : > { %5537 = vset.pattern.permute.xlu0 %v12805_v1  ;;  %5536 = vset.pattern.permute.xlu1 %v12606_v57  ;;  %v8782_v57 = vpop.permute.xlu1 %2991 }
 0x5ca   : > { %2824 = vperm.xlu0 %5537, %v8085_v41   ;;  %3593 = vperm.xlu1 %5536, %v3587_v44   ;;  %12809 = vst [vmem:[#allocation175_spill] sm:$0xff] %v8782_v57  ;;  %v3590_v44 = vld [vmem:[%s11811_s12 + $0x18] sm:$0xff] }
 0x5cd   : > { %v8796_v13 = vpop.permute.xlu1 %3007 }
 0x5ce   : > { %4099 = vperm.xlu0 %5537, %v8769_v23   ;;  %3603 = vperm.xlu1 %5536, %v3589_v22   ;;  %12812 = vst [vmem:[#allocation177_spill] sm:$0xff] %v8796_v13  ;;  %v8801_v22 = vpop.permute.xlu0 %3001  ;;  %v12817_v13 = vmov 3  }
 0x5cf   : > { %12813 = vst [vmem:[#allocation178_spill] sm:$0xff] %v8801_v22  ;;  %v3996_v22 = vld [vmem:[%s11814_s15 + $0x10] sm:$0xff] }
 0x5d2   : > { %4111 = vperm.xlu0 %5537, %v8778_v60   ;;  %3608 = vperm.xlu1 %5536, %v3590_v44   ;;  %v8804_v44 = vpop.permute.xlu1 %3151  ;;  %v8809_v19 = vpop.permute.xlu0 %3145 }
 0x5d3   : > { %12814 = vst [vmem:[#allocation179_spill] sm:$0xff] %v8804_v44  ;;  %12815 = vst [vmem:[#allocation180_spill] sm:$0xff] %v8809_v19 }
 0x5d6   : > { %5539 = vset.pattern.permute.xlu0 %v12811_v40  ;;  %4005 = vperm.xlu1 %5536, %v8791_v62   ;;  %v8811_v57 = vpop.permute.xlu1 %3167  ;;  %v8818_v44 = vpop.permute.xlu0 %3161 }
 0x5d7   : > { %2932 = vperm.xlu0 %5539, %v8095_v38   ;;  %12816 = vst [vmem:[#allocation181_spill] sm:$0xff] %v8811_v57  ;;  %12818 = vst [vmem:[#allocation182_spill] sm:$0xff] %v8818_v44 }
 0x5da   : > { %4015 = vperm.xlu1 %5536, %v8778_v60   ;;  %v8824_v19 = vpop.permute.xlu0 %3369 }
 0x5db   : > { %2944 = vperm.xlu0 %5539, %v8101_v35   ;;  %12820 = vst [vmem:[#allocation184_spill] sm:$0xff] %v8824_v19 }
 0x5de   : > { %5538 = vset.pattern.permute.xlu1 %v12805_v1  ;;  %v8821_v1 = vpop.permute.xlu1 %3375  ;;  %v8832_v44 = vpop.permute.xlu0 %3385 }
 0x5df   : > { %4223 = vperm.xlu0 %5539, %v8778_v60   ;;  %4103 = vperm.xlu1 %5538, %v8791_v62   ;;  %12819 = vst [vmem:[#allocation183_spill] sm:$0xff] %v8821_v1  ;;  %12822 = vst [vmem:[#allocation186_spill] sm:$0xff] %v8832_v44 }
 0x5e2   : > { %v8827_v57 = vpop.permute.xlu1 %3391  ;;  %v3747_v19 = vpop.xlane.xlu0 %3746 }
 0x5e3   : > { %4215 = vperm.xlu0 %5539, %v8791_v62   ;;  %4107 = vperm.xlu1 %5538, %v3996_v22   ;;  %12821 = vst [vmem:[#allocation185_spill] sm:$0xff] %v8827_v57 }
 0x5e6   : > { %v8836_v1 = vpop.permute.xlu1 %2873 }
 0x5e7   : > { %5543 = vset.pattern.permute.xlu0 %v12817_v13  ;;  %5540 = vset.pattern.permute.xlu1 %v12811_v40  ;;  %12824 = vst [vmem:[#allocation187_spill] sm:$0xff] %v8836_v1 }
 0x5e8   : > { %3048 = vperm.xlu0 %5543, %v8085_v41   ;;  %4219 = vperm.xlu1 %5540, %v3996_v22   ;;  %v12823_v41 = vmov 4  }
 0x5ea   : > { %v8842_v57 = vpop.permute.xlu1 %2889 }
 0x5eb   : > { %12825 = vst [vmem:[#allocation188_spill] sm:$0xff] %v8842_v57  ;;  %v5735_v57 = vld [vmem:[%s11810_s11] sm:$0xff] }
 0x5ec   : > { %4331 = vperm.xlu0 %5543, %v3996_v22   ;;  %5541 = vset.pattern.permute.xlu1 %v12817_v13 }
 0x5ed   : > { %4335 = vperm.xlu1 %5541, %v8778_v60  }
 0x5ee   : > { %v8848_v44 = vpop.permute.xlu1 %3257 }
 0x5ef   : > { %12827 = vst [vmem:[#allocation190_spill] sm:$0xff] %v8848_v44  ;;  %v5736_v44 = vld [vmem:[%s11810_s11 + $0x18] sm:$0xff] }
 0x5f0   : > { %4327 = vperm.xlu0 %5543, %v8791_v62  }
 0x5f1   : > { %5542 = vset.pattern.permute.xlu1 %v12811_v40  ;;  %v8845_v40 = vpop.permute.xlu0 %2665 }
 0x5f2   : > { %4211 = vperm.xlu1 %5542, %v8769_v23   ;;  %12826 = vst [vmem:[#allocation189_spill] sm:$0xff] %v8845_v40 }
 0x5f4   : > { %5546 = vset.pattern.permute.xlu0 %v12823_v41 }
 0x5f5   : > { %3092 = vperm.xlu0 %5546, %v8095_v38   ;;  %v12828_v38 = vmov 5   ;;  %v8852_v1 = vpop.permute.xlu0 %2681 }
 0x5f6   : > { %5544 = vset.pattern.permute.xlu1 %v12823_v41  ;;  %12829 = vst [vmem:[#allocation191_spill] sm:$0xff] %v8852_v1 }
 0x5f7   : > { %4383 = vperm.xlu1 %5544, %v8778_v60  }
 0x5f9   : > { %3104 = vperm.xlu0 %5546, %v8101_v35   ;;  %v12830_v35 = vmov 6   ;;  %v8861_v40 = vpop.permute.xlu0 %2769 }
 0x5fa   : > { %12832 = vst [vmem:[#allocation193_spill] sm:$0xff] %v8861_v40 }
 0x5fb   : > { %5545 = vset.pattern.permute.xlu1 %v12817_v13  ;;  %v8858_v13 = vpop.permute.xlu1 %3273 }
 0x5fc   : > { %4323 = vperm.xlu1 %5545, %v8769_v23   ;;  %12831 = vst [vmem:[#allocation192_spill] sm:$0xff] %v8858_v13 }
 0x5fd   : > { %4379 = vperm.xlu0 %5546, %v3996_v22  }
 0x5ff   : > { %v8868_v1 = vpop.permute.xlu1 %3481 }
 0x600   : > { %5547 = vset.pattern.permute.xlu1 %v12828_v38  ;;  %12833 = vst [vmem:[#allocation194_spill] sm:$0xff] %v8868_v1 }
 0x601   : > { %4371 = vperm.xlu0 %5546, %v8769_v23   ;;  %4491 = vperm.xlu1 %5547, %v3996_v22  }
 0x603   : > { %v8875_v13 = vpop.permute.xlu1 %3497 }
 0x604   : > { %12835 = vst [vmem:[#allocation196_spill] sm:$0xff] %v8875_v13 }
 0x605   : > { %5548 = vset.pattern.permute.xlu0 %v12830_v35  ;;  %4495 = vperm.xlu1 %5547, %v8778_v60  }
 0x606   : > { %3316 = vperm.xlu0 %5548, %v5735_v57   ;;  %v8871_v57 = vpop.permute.xlu0 %2785 }
 0x607   : > { %12834 = vst [vmem:[#allocation195_spill] sm:$0xff] %v8871_v57  ;;  %v3831_v1 = vpop.xlane.xlu1 %3830  ;;  %v5737_v57 = vld [vmem:[%s11810_s11 + $0x8] sm:$0xff] }
 0x609   : > { %5549 = vset.pattern.permute.xlu1 %v12823_v41  ;;  %v12837_v41 = vmov 7  }
 0x60a   : > { %3328 = vperm.xlu0 %5548, %v5736_v44   ;;  %4375 = vperm.xlu1 %5549, %v8791_v62   ;;  %v8878_v44 = vpop.permute.xlu0 %2993 }
 0x60b   : > { %12836 = vst [vmem:[#allocation197_spill] sm:$0xff] %v8878_v44  ;;  %v8888_v13 = vpop.permute.xlu1 %2881 }
 0x60c   : > { %12839 = vst [vmem:[#allocation199_spill] sm:$0xff] %v8888_v13 }
 0x60e   : > { %4607 = vperm.xlu0 %5548, %v8778_v60   ;;  %5550 = vset.pattern.permute.xlu1 %v12830_v35  ;;  %v8886_v40 = vpop.permute.xlu0 %3009 }
 0x60f   : > { %4603 = vperm.xlu1 %5550, %v3996_v22   ;;  %12838 = vst [vmem:[#allocation198_spill] sm:$0xff] %v8886_v40  ;;  %v8894_v44 = vpop.permute.xlu1 %2897  ;;  %v3837_v40 = vmul.f32 0.00390625, %v3831_v1 }
 0x610   : > { %12841 = vst [vmem:[#allocation201_spill] sm:$0xff] %v8894_v44  ;;  %v3753_v44 = vmul.f32 0.00390625, %v3747_v19 }
 0x612   : > { %4599 = vperm.xlu0 %5548, %v8791_v62  }
 0x613   : > { %5551 = vset.pattern.permute.xlu1 %v12828_v38  ;;  %v8892_v38 = vpop.permute.xlu0 %3153 }
 0x614   : > { %4483 = vperm.xlu1 %5551, %v8769_v23   ;;  %12840 = vst [vmem:[#allocation200_spill] sm:$0xff] %v8892_v38  ;;  %v3836_v38 = vmul.f32 0.00390625, %v8736_v30 }
 0x616   : > { %5554 = vset.pattern.permute.xlu0 %v12837_v41 }
 0x617   : > { %3432 = vperm.xlu0 %5554, %v5737_v57   ;;  %v8898_v57 = vpop.permute.xlu0 %3169 }
 0x618   : > { %4487 = vperm.xlu1 %5551, %v8791_v62   ;;  %12842 = vst [vmem:[#allocation202_spill] sm:$0xff] %v8898_v57  ;;  %v8901_v62 = vpop.permute.xlu1 %3265 }
 0x619   : > { %12843 = vst [vmem:[#allocation203_spill] sm:$0xff] %v8901_v62  ;;  %v3755_v62 = vld [vmem:[%s11812_s13] sm:$0xff] }
 0x61b   : > { %4715 = vperm.xlu0 %5554, %v3996_v22   ;;  %v8903_v22 = vpop.permute.xlu0 %3377 }
 0x61c   : > { %5552 = vset.pattern.permute.xlu1 %v12837_v41  ;;  %12844 = vst [vmem:[#allocation204_spill] sm:$0xff] %v8903_v22  ;;  %v3752_v41 = vmul.f32 0.00390625, %v8712_v4  ;;  %v8906_v13 = vpop.permute.xlu1 %3281 }
 0x61d   : > { %4719 = vperm.xlu1 %5552, %v8778_v60   ;;  %12845 = vst [vmem:[#allocation205_spill] sm:$0xff] %v8906_v13  ;;  %v3756_v60 = vld [vmem:[%s11812_s13 + $0x8] sm:$0xff] }
 0x61f   : > { %v8918_v22 = vpop.permute.xlu0 %3393 }
 0x620   : > { %12846 = vst [vmem:[#allocation206_spill] sm:$0xff] %v8918_v22  ;;  %v8920_v57 = vpop.permute.xlu1 %3489 }
 0x621   : > { %5553 = vset.pattern.permute.xlu1 %v12830_v35  ;;  %v3751_v35 = vmul.f32 0.00390625, %v8630_v0  ;;  %12847 = vst [vmem:[#allocation207_spill] sm:$0xff] %v8920_v57  ;;  %v3835_v0 = vmul.f32 0.00390625, %v8590_v12  ;;  %v3840_v57 = vmul.f32 %v3836_v38, %v3756_v60 }
 0x622   : > { %4595 = vperm.xlu1 %5553, %v8769_v23   ;;  %v3757_v23 = vld [vmem:[%s11812_s13 + $0x10] sm:$0xff] }
 0x623   : > { %v3759_v4 = vmul.f32 %v3755_v62, %v3751_v35  ;;  %v3761_v13 = vmul.f32 %v3757_v23, %v3753_v44  ;;  %v3839_v56 = vmul.f32 %v3835_v0, %v3755_v62  ;;  %v3841_v2 = vmul.f32 %v3837_v40, %v3757_v23 }
 0x624   : > { %v8930_v16 = vpop.permute.xlu1 %3505  ;;  %v3844_v1 = vsel %vm3763_vm10, %v3840_v57, 0.0 }
 0x625   : > { %v3764_v34 = vsel %vm3763_vm10, %v3759_v4, 0.0  ;;  %v3767_v35 = vsel %vm3763_vm10, %v3761_v13, 0.0  ;;  %12848 = vst [vmem:[#allocation208_spill] sm:$0xff] %v8930_v16  ;;  %v3843_v10 = vsel %vm3763_vm10, %v3839_v56, 0.0  ;;  %v3846_v4 = vsel %vm3763_vm10, %v3841_v2, 0.0  ;;  %v12920_v16 = vld [vmem:[#allocation145_spill] sm:$0xff] }
 0x626   : > { %5555 = vset.pattern.permute.xlu1 %v12685_v32  ;;  %v3760_v32 = vmul.f32 %v3756_v60, %v3752_v41  ;;  %v3758_v41 = vld [vmem:[%s11812_s13 + $0x18] sm:$0xff] }
 0x628   : > { %v3765_v19 = vsel %vm3763_vm10, %v3760_v32, 0.0 }
 0x629   : > { %v3766_v22 = vadd.f32 %v3765_v19, %v3764_v34  ;;  %v3845_v34 = vadd.f32 %v3844_v1, %v3843_v10  ;;  %v3780_v10 = vld [vmem:[%s11813_s14 + $0x8] sm:$0xff]  ;;  %v3781_v1 = vld [vmem:[%s11813_s14 + $0x10] sm:$0xff] }
 0x62b   : > { %v3768_v32 = vadd.f32 %v3767_v35, %v3766_v22  ;;  %v3847_v19 = vadd.f32 %v3846_v4, %v3845_v34 }
 0x638   : > { %v3750_v28 = vpop.xlane.xlu0 %3749 }
 0x639   : > { %v3754_v44 = vmul.f32 0.00390625, %v3750_v28 }
 0x63b   : > { %v3762_v30 = vmul.f32 %v3758_v41, %v3754_v44 }
 0x63d   : > { %v3769_v12 = vsel %vm3763_vm10, %v3762_v30, 0.0  ;;  %v3834_v59 = vpop.xlane.xlu1 %3833 }
 0x63e   : > { %v3770_v39 = vadd.f32 %v3769_v12, %v3768_v32  ;;  %v3838_v28 = vmul.f32 0.00390625, %v3834_v59  ;;  %v3779_v59 = vld [vmem:[%s11813_s14] sm:$0xff] }
 0x640   : > { %v3771_v13 = vrot.slane %v3770_v39, 4  ;;  %v3842_v60 = vmul.f32 %v3838_v28, %v3758_v41  ;;  %v8950_v28 = vmul.f32 %v8354_v26, %v8208_v36  ;;  %v12874_v36 = vld [vmem:[#allocation142_spill] sm:$0xff] }
 0x642   : > { %v3772_v38 = vadd.f32 %v3771_v13, %v3770_v39  ;;  %v3848_v62 = vsel %vm3763_vm10, %v3842_v60, 0.0  ;;  %v8946_v13 = vpop.permute.xlu0 %3598  ;;  %12850 = vst [vmem:[#allocation210_spill] sm:$0xff] %v8950_v28 }
 0x643   : > { %v3849_v40 = vadd.f32 %v3848_v62, %v3847_v19  ;;  %12849 = vst [vmem:[#allocation209_spill] sm:$0xff] %v8946_v13  ;;  %v8956_v19 = vmul.f32 %v8354_v26, %v8196_v46  ;;  %v8964_v62 = vmul.f32 %v8356_v15, %v8206_v63  ;;  %v12869_v46 = vld [vmem:[#allocation141_spill] sm:$0xff]  ;;  %v12873_v63 = vld [vmem:[#allocation116_spill] sm:$0xff] }
 0x644   : > { %v3773_v44 = vrot.slane %v3772_v38, 2 }
 0x645   : > { %v3850_v23 = vrot.slane %v3849_v40, 4  ;;  %12851 = vst [vmem:[#allocation211_spill] sm:$0xff] %v8956_v19 }
 0x646   : > { %v3774_v22 = vadd.f32 %v3773_v44, %v3772_v38  ;;  %v8960_v44 = vmul.f32 %v8354_v26, %v8234_v7  ;;  %v9019_v7 = vpop.permute.xlu0 %2824 }
 0x647   : > { %v3851_v57 = vadd.f32 %v3850_v23, %v3849_v40  ;;  %v8971_v23 = vmul.f32 %v8356_v15, %v8198_v24  ;;  %12860 = vst [vmem:[#allocation217_spill] sm:$0xff] %v9019_v7 }
 0x648   : > { %v3775_v0 = vrot.slane %v3774_v22, 1  ;;  %12852 = vst [vmem:[#allocation212_spill] sm:$0xff] %v8960_v44 }
 0x649   : > { %v3852_v30 = vrot.slane %v3851_v57, 2 }
 0x64a   : > { %v3776_v35 = vadd.f32 %v3775_v0, %v3774_v22  ;;  %v3782_v22 = vld [vmem:[%s11813_s14 + $0x18] sm:$0xff]  ;;  %v2903_v0 = vsel %vm1418_vm3, %v8472_v20, %v8426_v21 }
 0x64b   : > { %v3853_v32 = vadd.f32 %v3852_v30, %v3851_v57  ;;  %v2907_v57 = vsel %vm1418_vm3, %v8416_v31, %v8472_v20  ;;  %v8987_v30 = vmul.f32 %v8354_v26, %v8214_v51  ;;  %v3291_v20 = vsel %vm1947_vm6, %v8436_v50, %v8484_v25 }
 0x64c   : > { %v3777_v56 = vmax.f32 %v3776_v35, 0.0  ;;  %v2911_v35 = vsel %vm1418_vm3, %v8478_v5, %v8416_v31  ;;  %v3287_v26 = vsel %vm1947_vm6, %v8484_v25, %v8446_v54  ;;  %v12861_v25 = vld [vmem:[#allocation129_spill] sm:$0xff] }
 0x64d   : > { %v3854_v39 = vrot.slane %v3853_v32, 1  ;;  %12853 = vst [vmem:[#allocation213_spill] sm:$0xff] %v8987_v30  ;;  %v12880_v30 = vld [vmem:[#allocation60_spill] sm:$0xff] }
 0x64e   : > { %v3778_v2 = vmin.f32 %v3777_v56, 6.0  ;;  %v2899_v56 = vsel %vm1418_vm3, %v8426_v21, %v8478_v5  ;;  %v12856_v21 = vld [vmem:[#allocation126_spill] sm:$0xff] }
 0x64f   : > { %v3855_v4 = vadd.f32 %v3854_v39, %v3853_v32  ;;  %v8991_v32 = vmul.f32 %v8356_v15, %v8224_v37  ;;  %v12868_v37 = vld [vmem:[#allocation123_spill] sm:$0xff] }
 0x650   : > { %v3783_v41 = vmul.f32 %v3779_v59, %v3778_v2  ;;  %v3784_v12 = vmul.f32 %v3780_v10, %v3778_v2  ;;  %v3785_v60 = vmul.f32 %v3781_v1, %v3778_v2 }
 0x651   : > { %v3856_v40 = vmax.f32 %v3855_v4, 0.0  ;;  %v12854_v4 = vld [vmem:[#allocation125_spill] sm:$0xff] }
 0x652   : > { %v3787_v34 = vsel %vm3763_vm10, %v3783_v41, 0.0  ;;  %v3790_v38 = vsel %vm3763_vm10, %v3784_v12, 0.0  ;;  %v3793_v31 = vsel %vm3763_vm10, %v3785_v60, 0.0  ;;  %v3786_v41 = vmul.f32 %v3782_v22, %v3778_v2 }
 0x653   : > { %3788 = vadd.xlane.f32.xlu0 %v3787_v34  ;;  %3791 = vadd.xlane.f32.xlu1 %v3790_v38  ;;  %v3857_v39 = vmin.f32 %v3856_v40, 6.0  ;;  %v9008_v12 = vmul.f32 %v8356_v15, %v8216_v29  ;;  %v9011_v5 = vmul.f32 %v2907_v57, %v12854_v4  ;;  %v9014_v34 = vmul.f32 %v2903_v0, %v12856_v21  ;;  %v12858_v38 = vld [vmem:[#allocation127_spill] sm:$0xff] }
 0x654   : > { %v9017_v51 = vmul.f32 %v2911_v35, %v12858_v38  ;;  %v9022_v60 = vmul.f32 %v2899_v56, %v12861_v25  ;;  %v9025_v2 = vmul.f32 %v3291_v20, %v12557_v6  ;;  %v3515_v15 = vsel %vm2125_vm9, %v8456_v17, %v8494_v18 }
 0x655   : > { %12855 = vst [vmem:[#allocation214_spill] sm:$0xff] %v9011_v5  ;;  %12857 = vst [vmem:[#allocation215_spill] sm:$0xff] %v9014_v34  ;;  %v3858_v40 = vmul.f32 %v3857_v39, %v3779_v59  ;;  %v9032_v0 = vmul.f32 %v3287_v26, %v7135_v43  ;;  %v3283_v57 = vsel %vm1947_vm6, %v8446_v54, %v8490_v9  ;;  %v3796_v20 = vsel %vm3763_vm10, %v3786_v41, 0.0  ;;  %v12866_v41 = vld [vmem:[#allocation120_spill] sm:$0xff] }
 0x656   : > { %12859 = vst [vmem:[#allocation216_spill] sm:$0xff] %v9017_v51  ;;  %12862 = vst [vmem:[#allocation218_spill] sm:$0xff] %v9022_v60  ;;  %v3295_v35 = vsel %vm1947_vm6, %v8490_v9, %v8436_v50  ;;  %v3511_v56 = vsel %vm2125_vm9, %v8494_v18, %v8464_v33  ;;  %v3860_v26 = vmul.f32 %v3857_v39, %v3781_v1  ;;  %v12916_v60 = vld [vmem:[#allocation137_spill] sm:$0xff] }
 0x657   : > { %3794 = vadd.xlane.f32.xlu0 %v3793_v31  ;;  %12863 = vst [vmem:[#allocation219_spill] sm:$0xff] %v9025_v2  ;;  %12864 = vst [vmem:[#allocation220_spill] sm:$0xff] %v9032_v0  ;;  %v3862_v59 = vsel %vm3763_vm10, %v3858_v40, 0.0  ;;  %v3859_v31 = vmul.f32 %v3857_v39, %v3780_v10  ;;  %v3523_v29 = vmul.f32 %v3515_v15, %v12621_v3 }
 0x658   : > { %v2687_v54 = vsel %vm1240_vm1, %v8500_v58, %v8440_v53  ;;  %v2795_v9 = vsel %vm1329_vm2, %v8450_v11, %v8512_v55  ;;  %3863 = vadd.xlane.f32.xlu1 %v3862_v59  ;;  %v2691_v18 = vsel %vm1240_vm1, %v8430_v42, %v8500_v58  ;;  %v2791_v50 = vsel %vm1329_vm2, %v8512_v55, %v8460_v52 }
 0x659   : > { %v2787_v10 = vsel %vm1329_vm2, %v8460_v52, %v8518_v27  ;;  %v2799_v1 = vsel %vm1329_vm2, %v8518_v27, %v8450_v11  ;;  %v3507_v58 = vsel %vm2125_vm9, %v8464_v33, %v8498_v49  ;;  %v3519_v55 = vsel %vm2125_vm9, %v8498_v49, %v8456_v17  ;;  %v9089_v11 = vpop.permute.xlu0 %4099  ;;  %v12867_v49 = vld [vmem:[#allocation122_spill] sm:$0xff] }
 0x65a   : > { %v2683_v52 = vsel %vm1240_vm1, %v8440_v53, %v8504_v14  ;;  %v2695_v27 = vsel %vm1240_vm1, %v8504_v14, %v8430_v42  ;;  %12865 = vst [vmem:[#allocation221_spill] sm:$0xff] %v9089_v11  ;;  %v2804_v15 = vmul.f32 %v2795_v9, %v12866_v41  ;;  %v3868_v33 = vsel %vm3763_vm10, %v3860_v26, 0.0  ;;  %v12871_v14 = vld [vmem:[#allocation148_spill] sm:$0xff]  ;;  %v12872_v11 = vld [vmem:[#allocation117_spill] sm:$0xff] }
 0x65b   : > { %3797 = vadd.xlane.f32.xlu0 %v3796_v20  ;;  %v3865_v40 = vsel %vm3763_vm10, %v3859_v31, 0.0  ;;  %v3861_v59 = vmul.f32 %v3857_v39, %v3782_v22  ;;  %v2805_v17 = vmul.f32 %v2791_v50, %v12620_v61  ;;  %v2803_v20 = vmul.f32 %v2799_v1, %v12867_v49  ;;  %v12876_v22 = vld [vmem:[#allocation119_spill] sm:$0xff]  ;;  %v12877_v50 = vld [vmem:[#allocation118_spill] sm:$0xff] }
 0x65c   : > { %v2806_v53 = vmul.f32 %v2787_v10, %v12868_v37  ;;  %3869 = vadd.xlane.f32.xlu1 %v3868_v33  ;;  %v9098_v24 = vmul.f32 %v3283_v57, %v12869_v46  ;;  %v3524_v42 = vmul.f32 %v3511_v56, %v12871_v14  ;;  %v2700_v9 = vmul.f32 %v2691_v18, %v12872_v11  ;;  %v12878_v57 = vld [vmem:[#allocation163_spill] sm:$0xff] }
 0x65d   : > { %v2701_v26 = vmul.f32 %v2687_v54, %v12873_v63  ;;  %v9104_v31 = vmul.f32 %v3295_v35, %v12874_v36  ;;  %v2699_v39 = vmul.f32 %v2695_v27, %v12876_v22  ;;  %v2702_v1 = vmul.f32 %v2683_v52, %v12877_v50  ;;  %v9122_v13 = vpop.permute.xlu0 %4111 }
 0x65e   : > { %12870 = vst [vmem:[#allocation222_spill] sm:$0xff] %v9098_v24  ;;  %v3019_v10 = vsel %vm1511_vm4, %v8468_v47, %v8526_v45  ;;  %v3525_v33 = vmul.f32 %v3507_v58, %v12878_v57  ;;  %v2836_v18 = vmul.f32 %v8308_v48, %v2804_v15  ;;  %v3871_v54 = vsel %vm3763_vm10, %v3861_v59, 0.0  ;;  %12882 = vst [vmem:[#allocation224_spill] sm:$0xff] %v9122_v13  ;;  %v12885_v59 = vld [vmem:[#allocation130_spill] sm:$0xff]  ;;  %v12910_v24 = vld [vmem:[#allocation135_spill] sm:$0xff] }
 0x65f   : > { %3866 = vadd.xlane.f32.xlu0 %v3865_v40  ;;  %12875 = vst [vmem:[#allocation223_spill] sm:$0xff] %v9104_v31  ;;  %v12879_v40 = vld [vmem:[#allocation164_spill] sm:$0xff]  ;;  %v9117_v35 = vmul.f32 %v12880_v30, %v3523_v29  ;;  %v2837_v27 = vmul.f32 %v8308_v48, %v2805_v17  ;;  %v2835_v52 = vmul.f32 %v8308_v48, %v2803_v20  ;;  %v12887_v20 = vld [vmem:[#allocation78_spill] sm:$0xff] }
 0x660   : > { %v3526_v56 = vmul.f32 %v3519_v55, %v12879_v40  ;;  %v2838_v44 = vmul.f32 %v8308_v48, %v2806_v53  ;;  %v9125_v58 = vmul.f32 %v12880_v30, %v3524_v42  ;;  %v12884_v55 = vld [vmem:[#allocation91_spill] sm:$0xff]  ;;  %v3028_v19 = vmul.f32 %v3019_v10, %v12885_v59 }
 0x661   : > { %12881 = vst [vmem:[#allocation60_spill] sm:$0xff] %v9117_v35  ;;  %v2740_v31 = vmul.f32 %v12884_v55, %v2700_v9  ;;  %v2741_v15 = vmul.f32 %v12884_v55, %v2701_v26  ;;  %v2739_v29 = vmul.f32 %v12884_v55, %v2699_v39  ;;  %v2742_v17 = vmul.f32 %v12884_v55, %v2702_v1  ;;  %v12886_v35 = vld [vmem:[#allocation139_spill] sm:$0xff]  ;;  %v12899_v55 = vld [vmem:[#allocation132_spill] sm:$0xff] }
 0x662   : > { %12883 = vst [vmem:[#allocation225_spill] sm:$0xff] %v9125_v58  ;;  %v3015_v48 = vsel %vm1511_vm4, %v8526_v45, %v12886_v35  ;;  %v3023_v53 = vsel %vm1511_vm4, %v12887_v20, %v8468_v47  ;;  %v9141_v42 = vmul.f32 %v12880_v30, %v3525_v33  ;;  %v9144_v9 = vmul.f32 %v12880_v30, %v3526_v56  ;;  %v12894_v47 = vld [vmem:[#allocation73_spill] sm:$0xff]  ;;  %v12896_v30 = vld [vmem:[#allocation131_spill] sm:$0xff] }
 0x663   : > { %3872 = vadd.xlane.f32.xlu0 %v3871_v54  ;;  %v9146_v26 = vadd.f32 %v2836_v18, %v2740_v31  ;;  %v3011_v39 = vsel %vm1511_vm4, %v12886_v35, %v12887_v20  ;;  %v9152_v1 = vadd.f32 %v2837_v27, %v2741_v15  ;;  %v9154_v45 = vadd.f32 %v2835_v52, %v2739_v29  ;;  %v12895_v54 = vld [vmem:[#allocation70_spill] sm:$0xff]  ;;  %v12901_v27 = vld [vmem:[#allocation133_spill] sm:$0xff]  ;;  %v9184_v20 = vpop.permute.xlu0 %2932 }
 0x664   : > { %12888 = vst [vmem:[#allocation91_spill] sm:$0xff] %v9141_v42  ;;  %12889 = vst [vmem:[#allocation139_spill] sm:$0xff] %v9144_v9  ;;  %v9156_v10 = vadd.f32 %v2838_v44, %v2742_v17  ;;  %v3179_v33 = vsel %vm1608_vm5, %v12895_v54, %v12894_v47  ;;  %v3029_v56 = vmul.f32 %v3015_v48, %v12896_v30  ;;  %v12897_v31 = vld [vmem:[#allocation30_spill] sm:$0xff]  ;;  %v12900_v9 = vld [vmem:[#allocation84_spill] sm:$0xff] }
 0x665   : > { %12890 = vst [vmem:[#allocation78_spill] sm:$0xff] %v9146_v26  ;;  %12891 = vst [vmem:[#allocation226_spill] sm:$0xff] %v9152_v1  ;;  %v9164_v18 = vmul.f32 %v12897_v31, %v3028_v19  ;;  %v3027_v13 = vmul.f32 %v3023_v53, %v12899_v55  ;;  %v3175_v35 = vsel %vm1608_vm5, %v12894_v47, %v12900_v9  ;;  %v12902_v52 = vld [vmem:[#allocation110_spill] sm:$0xff]  ;;  %v12904_v17 = vld [vmem:[#allocation128_spill] sm:$0xff] }
 0x666   : > { %12892 = vst [vmem:[#allocation227_spill] sm:$0xff] %v9154_v45  ;;  %12893 = vst [vmem:[#allocation228_spill] sm:$0xff] %v9156_v10  ;;  %v3030_v44 = vmul.f32 %v3011_v39, %v12901_v27  ;;  %v3171_v15 = vsel %vm1608_vm5, %v12900_v9, %v12902_v52  ;;  %v3183_v19 = vsel %vm1608_vm5, %v12902_v52, %v12895_v54  ;;  %v12903_v29 = vld [vmem:[#allocation114_spill] sm:$0xff]  ;;  %v12907_v39 = vld [vmem:[#allocation71_spill] sm:$0xff]  ;;  %v9199_v52 = vpop.permute.xlu1 %3552 }
 0x667   : > { %12898 = vst [vmem:[#allocation73_spill] sm:$0xff] %v9164_v18  ;;  %v3403_v48 = vsel %vm2036_vm7, %v12904_v17, %v12903_v29  ;;  %12905 = vst [vmem:[#allocation70_spill] sm:$0xff] %v9184_v20  ;;  %v12906_v53 = vld [vmem:[#allocation134_spill] sm:$0xff]  ;;  %v3399_v42 = vsel %vm2036_vm7, %v12903_v29, %v12907_v39  ;;  %v12908_v9 = vld [vmem:[#allocation77_spill] sm:$0xff]  ;;  %v3188_v0 = vmul.f32 %v3175_v35, %v12910_v24 }
 0x668   : > { %v3187_v47 = vmul.f32 %v3179_v33, %v12906_v53  ;;  %v3395_v58 = vsel %vm2036_vm7, %v12907_v39, %v12908_v9  ;;  %v3407_v54 = vsel %vm2036_vm7, %v12908_v9, %v12904_v17  ;;  %12909 = vst [vmem:[#allocation30_spill] sm:$0xff] %v9199_v52  ;;  %v12911_v33 = vld [vmem:[#allocation52_spill] sm:$0xff]  ;;  %v12913_v29 = vld [vmem:[#allocation83_spill] sm:$0xff]  ;;  %v3190_v2 = vmul.f32 %v3183_v19, %v12916_v60  ;;  %v12921_v20 = vld [vmem:[#allocation146_spill] sm:$0xff] }
 0x669   : > { %v12912_v10 = vld [vmem:[#allocation156_spill] sm:$0xff]  ;;  %v12914_v39 = vld [vmem:[#allocation79_spill] sm:$0xff]  ;;  %v9222_v52 = vmul.f32 %v12897_v31, %v3029_v56  ;;  %v3413_v45 = vmul.f32 %v3395_v58, %v12920_v16 }
 0x66a   : > { %v2688_v18 = vsel %vm1240_vm1, %v12912_v10, %v12911_v33  ;;  %v2692_v1 = vsel %vm1240_vm1, %v12913_v29, %v12912_v10  ;;  %v2696_v28 = vsel %vm1240_vm1, %v12914_v39, %v12913_v29  ;;  %v12915_v17 = vld [vmem:[#allocation136_spill] sm:$0xff]  ;;  %v12917_v35 = vld [vmem:[#allocation143_spill] sm:$0xff]  ;;  %v2684_v34 = vsel %vm1240_vm1, %v12911_v33, %v12914_v39 }
 0x66b   : > { %v3189_v9 = vmul.f32 %v3171_v15, %v12915_v17  ;;  %v3411_v26 = vmul.f32 %v3403_v48, %v12917_v35  ;;  %12918 = vst [vmem:[#allocation84_spill] sm:$0xff] %v9222_v52  ;;  %v12919_v10 = vld [vmem:[#allocation144_spill] sm:$0xff]  ;;  %v3414_v29 = vmul.f32 %v3407_v54, %v12921_v20  ;;  %v9228_v15 = vmul.f32 %v12897_v31, %v3027_v13  ;;  %v9243_v54 = vpop.permute.xlu0 %2944 }
 0x66c   : > { %v3412_v5 = vmul.f32 %v3399_v42, %v12919_v10  ;;  %v2704_v19 = vmul.f32 %v2692_v1, %v12872_v11  ;;  %v2705_v48 = vmul.f32 %v2688_v18, %v12873_v63  ;;  %v2703_v51 = vmul.f32 %v2696_v28, %v12876_v22  ;;  %v12924_v56 = vld [vmem:[#allocation68_spill] sm:$0xff]  ;;  %12927 = vst [vmem:[#allocation77_spill] sm:$0xff] %v9243_v54  ;;  %v12930_v28 = vld [vmem:[#allocation47_spill] sm:$0xff] }
 0x66d   : > { %12922 = vst [vmem:[#allocation110_spill] sm:$0xff] %v9228_v15  ;;  %v9234_v33 = vmul.f32 %v12897_v31, %v3030_v44  ;;  %v9237_v39 = vmul.f32 %v12924_v56, %v3187_v47  ;;  %v9240_v42 = vmul.f32 %v12924_v56, %v3188_v0  ;;  %v2706_v58 = vmul.f32 %v2684_v34, %v12877_v50  ;;  %v12932_v31 = vld [vmem:[#allocation158_spill] sm:$0xff]  ;;  %v12933_v44 = vld [vmem:[#allocation72_spill] sm:$0xff]  ;;  %v9258_v0 = vpop.permute.xlu1 %3593 }
 0x66e   : > { %v9246_v13 = vmul.f32 %v12924_v56, %v3189_v9  ;;  %v9249_v1 = vmul.f32 %v12924_v56, %v3190_v2  ;;  %v9252_v18 = vmul.f32 %v12930_v28, %v3411_v26  ;;  %v2796_v47 = vsel %vm1329_vm2, %v12933_v44, %v12932_v31  ;;  %12934 = vst [vmem:[#allocation79_spill] sm:$0xff] %v9258_v0  ;;  %v12938_v2 = vld [vmem:[#allocation50_spill] sm:$0xff]  ;;  %v12939_v56 = vld [vmem:[#allocation124_spill] sm:$0xff] }
 0x66f   : > { %12923 = vst [vmem:[#allocation114_spill] sm:$0xff] %v9234_v33  ;;  %12925 = vst [vmem:[#allocation128_spill] sm:$0xff] %v9237_v39  ;;  %v9261_v34 = vmul.f32 %v12930_v28, %v3412_v5  ;;  %v9267_v9 = vmul.f32 %v12930_v28, %v3414_v29  ;;  %v2792_v26 = vsel %vm1329_vm2, %v12932_v31, %v12938_v2  ;;  %v12946_v31 = vld [vmem:[#allocation154_spill] sm:$0xff]  ;;  %v12957_v39 = vld [vmem:[#allocation157_spill] sm:$0xff]  ;;  %v9330_v54 = vpop.permute.xlu0 %4223 }
 0x670   : > { %12926 = vst [vmem:[#allocation71_spill] sm:$0xff] %v9240_v42  ;;  %12928 = vst [vmem:[#allocation52_spill] sm:$0xff] %v9246_v13  ;;  %v9264_v42 = vmul.f32 %v12930_v28, %v3413_v45  ;;  %v9277_v13 = vmul.f32 %v12939_v56, %v2705_v48  ;;  %v9280_v5 = vmul.f32 %v12939_v56, %v2703_v51  ;;  %v12943_v45 = vld [vmem:[#allocation159_spill] sm:$0xff] }
 0x671   : > { %12929 = vst [vmem:[#allocation156_spill] sm:$0xff] %v9249_v1  ;;  %12931 = vst [vmem:[#allocation83_spill] sm:$0xff] %v9252_v18  ;;  %v9274_v1 = vmul.f32 %v12939_v56, %v2704_v19  ;;  %v2800_v29 = vsel %vm1329_vm2, %v12943_v45, %v12933_v44  ;;  %v9287_v28 = vmul.f32 %v12939_v56, %v2706_v58  ;;  %v12947_v19 = vld [vmem:[#allocation162_spill] sm:$0xff]  ;;  %v12950_v44 = vld [vmem:[#allocation76_spill] sm:$0xff]  ;;  %v9342_v15 = vpop.permute.xlu1 %3603 }
 0x672   : > { %12935 = vst [vmem:[#allocation68_spill] sm:$0xff] %v9261_v34  ;;  %12936 = vst [vmem:[#allocation47_spill] sm:$0xff] %v9264_v42  ;;  %v2904_v48 = vsel %vm1418_vm3, %v12947_v19, %v12946_v31  ;;  %v12948_v42 = vld [vmem:[#allocation112_spill] sm:$0xff]  ;;  %v9301_v0 = vmul.f32 %v2792_v26, %v12620_v61  ;;  %v2788_v58 = vsel %vm1329_vm2, %v12938_v2, %v12943_v45  ;;  %v12952_v34 = vld [vmem:[#allocation51_spill] sm:$0xff] }
 0x673   : > { %12937 = vst [vmem:[#allocation158_spill] sm:$0xff] %v9267_v9  ;;  %12940 = vst [vmem:[#allocation72_spill] sm:$0xff] %v9274_v1  ;;  %v9290_v9 = vmul.f32 %v2796_v47, %v12866_v41  ;;  %v2908_v51 = vsel %vm1418_vm3, %v12948_v42, %v12947_v19  ;;  %v12951_v47 = vld [vmem:[#allocation155_spill] sm:$0xff]  ;;  %v9316_v19 = vmul.f32 %v2800_v29, %v12867_v49  ;;  %v12954_v26 = vld [vmem:[#allocation53_spill] sm:$0xff] }
 0x674   : > { %12941 = vst [vmem:[#allocation50_spill] sm:$0xff] %v9277_v13  ;;  %12942 = vst [vmem:[#allocation124_spill] sm:$0xff] %v9280_v5  ;;  %v3176_v56 = vsel %vm1608_vm5, %v12951_v47, %v12950_v44  ;;  %v3180_v33 = vsel %vm1608_vm5, %v12952_v34, %v12951_v47  ;;  %v12955_v18 = vld [vmem:[#allocation107_spill] sm:$0xff]  ;;  %v12959_v47 = vld [vmem:[#allocation106_spill] sm:$0xff]  ;;  %v2920_v1 = vmul.f32 %v2908_v51, %v12854_v4 }
 0x675   : > { %12944 = vst [vmem:[#allocation159_spill] sm:$0xff] %v9287_v28  ;;  %12945 = vst [vmem:[#allocation229_spill] sm:$0xff] %v9290_v9  ;;  %v3016_v52 = vsel %vm1511_vm4, %v12955_v18, %v12954_v26  ;;  %v12956_v2 = vld [vmem:[#allocation111_spill] sm:$0xff]  ;;  %v2912_v28 = vsel %vm1418_vm3, %v12957_v39, %v12948_v42  ;;  %v3012_v29 = vsel %vm1511_vm4, %v12954_v26, %v12959_v47  ;;  %v12994_v5 = vld [vmem:[#allocation69_spill] sm:$0xff] }
 0x676   : > { %12949 = vst [vmem:[#allocation154_spill] sm:$0xff] %v9301_v0  ;;  %12953 = vst [vmem:[#allocation162_spill] sm:$0xff] %v9316_v19  ;;  %v3020_v45 = vsel %vm1511_vm4, %v12956_v2, %v12955_v18  ;;  %v3024_v13 = vsel %vm1511_vm4, %v12959_v47, %v12956_v2  ;;  %v2921_v18 = vmul.f32 %v2904_v48, %v12856_v21  ;;  %v12961_v0 = vld [vmem:[#allocation74_spill] sm:$0xff]  ;;  %v12968_v47 = vld [vmem:[#allocation55_spill] sm:$0xff] }
 0x677   : > { %12958 = vst [vmem:[#allocation112_spill] sm:$0xff] %v9330_v54  ;;  %12960 = vst [vmem:[#allocation76_spill] sm:$0xff] %v9342_v15  ;;  %v3191_v42 = vmul.f32 %v3180_v33, %v12906_v53  ;;  %v3192_v54 = vmul.f32 %v3176_v56, %v12910_v24  ;;  %v2900_v26 = vsel %vm1418_vm3, %v12946_v31, %v12957_v39  ;;  %v12979_v15 = vld [vmem:[#allocation75_spill] sm:$0xff]  ;;  %v13026_v19 = vld [vmem:[#allocation101_spill] sm:$0xff] }
 0x678   : > { %v3172_v2 = vsel %vm1608_vm5, %v12950_v44, %v12961_v0  ;;  %v9355_v51 = vmul.f32 %v2788_v58, %v12868_v37  ;;  %v9358_v48 = vmul.f32 %v3020_v45, %v12885_v59  ;;  %v2919_v33 = vmul.f32 %v2912_v28, %v12858_v38  ;;  %v12967_v58 = vld [vmem:[#allocation105_spill] sm:$0xff] }
 0x679   : > { %v3184_v56 = vsel %vm1608_vm5, %v12961_v0, %v12952_v34  ;;  %v9366_v39 = vmul.f32 %v3016_v52, %v12896_v30  ;;  %v9369_v31 = vmul.f32 %v3024_v13, %v12899_v55  ;;  %v9372_v44 = vmul.f32 %v3012_v29, %v12901_v27  ;;  %v12969_v28 = vld [vmem:[#allocation37_spill] sm:$0xff]  ;;  %v9387_v34 = vpop.permute.xlu1 %3608 }
 0x67a   : > { %12962 = vst [vmem:[#allocation155_spill] sm:$0xff] %v9355_v51  ;;  %12963 = vst [vmem:[#allocation51_spill] sm:$0xff] %v9358_v48  ;;  %v3292_v45 = vsel %vm1947_vm6, %v12968_v47, %v12967_v58  ;;  %v9379_v48 = vmul.f32 %v12969_v28, %v2920_v1  ;;  %v2922_v51 = vmul.f32 %v2900_v26, %v12861_v25  ;;  %v12971_v52 = vld [vmem:[#allocation109_spill] sm:$0xff]  ;;  %v13128_v8 = vld [vmem:[#allocation72_spill] sm:$0xff] }
 0x67b   : > { %12964 = vst [vmem:[#allocation53_spill] sm:$0xff] %v9366_v39  ;;  %12965 = vst [vmem:[#allocation107_spill] sm:$0xff] %v9369_v31  ;;  %v3193_v0 = vmul.f32 %v3172_v2, %v12915_v17  ;;  %v3288_v13 = vsel %vm1947_vm6, %v12967_v58, %v12971_v52  ;;  %v9390_v29 = vmul.f32 %v12969_v28, %v2921_v18 }
 0x67c   : > { %12966 = vst [vmem:[#allocation111_spill] sm:$0xff] %v9372_v44  ;;  %12970 = vst [vmem:[#allocation157_spill] sm:$0xff] %v9379_v48  ;;  %v12974_v44 = vld [vmem:[#allocation93_spill] sm:$0xff]  ;;  %v3194_v26 = vmul.f32 %v3184_v56, %v12916_v60  ;;  %v9399_v48 = vpop.permute.xlu0 %4215  ;;  %v9402_v2 = vmul.f32 %v12969_v28, %v2919_v33  ;;  %v3303_v58 = vmul.f32 %v3292_v45, %v12557_v6 }
 0x67d   : > { %12972 = vst [vmem:[#allocation106_spill] sm:$0xff] %v9387_v34  ;;  %12973 = vst [vmem:[#allocation74_spill] sm:$0xff] %v9390_v29  ;;  %v9393_v39 = vmul.f32 %v12974_v44, %v3191_v42  ;;  %v9396_v1 = vmul.f32 %v12974_v44, %v3192_v54  ;;  %v3284_v18 = vsel %vm1947_vm6, %v12971_v52, %v12979_v15  ;;  %v12980_v56 = vld [vmem:[#allocation165_spill] sm:$0xff]  ;;  %v12981_v34 = vld [vmem:[#allocation54_spill] sm:$0xff] }
 0x67e   : > { %12977 = vst [vmem:[#allocation37_spill] sm:$0xff] %v9399_v48  ;;  %12978 = vst [vmem:[#allocation109_spill] sm:$0xff] %v9402_v2  ;;  %v3296_v54 = vsel %vm1947_vm6, %v12979_v15, %v12968_v47  ;;  %v3304_v42 = vmul.f32 %v3288_v13, %v7135_v43  ;;  %v3404_v33 = vsel %vm2036_vm7, %v12981_v34, %v12980_v56  ;;  %v12982_v48 = vld [vmem:[#allocation161_spill] sm:$0xff]  ;;  %v12987_v47 = vld [vmem:[#allocation80_spill] sm:$0xff] }
 0x67f   : > { %12975 = vst [vmem:[#allocation105_spill] sm:$0xff] %v9393_v39  ;;  %12976 = vst [vmem:[#allocation55_spill] sm:$0xff] %v9396_v1  ;;  %v12983_v1 = vld [vmem:[#allocation152_spill] sm:$0xff]  ;;  %v9427_v29 = vmul.f32 %v12969_v28, %v2922_v51  ;;  %v9430_v15 = vmul.f32 %v12974_v44, %v3193_v0  ;;  %v3400_v13 = vsel %vm2036_vm7, %v12980_v56, %v12987_v47  ;;  %v12989_v28 = vld [vmem:[#allocation95_spill] sm:$0xff] }
 0x680   : > { %v3512_v45 = vsel %vm2125_vm9, %v12983_v1, %v12982_v48  ;;  %v12984_v39 = vld [vmem:[#allocation160_spill] sm:$0xff]  ;;  %v3305_v9 = vmul.f32 %v3284_v18, %v12869_v46  ;;  %v12990_v0 = vld [vmem:[#allocation153_spill] sm:$0xff]  ;;  %v9451_v56 = vmul.f32 %v12974_v44, %v3194_v26  ;;  %v9461_v7 = vmul.f32 %v12994_v5, %v3303_v58  ;;  %v9472_v26 = vpop.permute.xlu0 %3048 }
 0x681   : > { %v3516_v52 = vsel %vm2125_vm9, %v12984_v39, %v12983_v1  ;;  %12985 = vst [vmem:[#allocation93_spill] sm:$0xff] %v9427_v29  ;;  %12986 = vst [vmem:[#allocation75_spill] sm:$0xff] %v9430_v15  ;;  %v12988_v2 = vld [vmem:[#allocation104_spill] sm:$0xff]  ;;  %v3306_v1 = vmul.f32 %v3296_v54, %v12874_v36  ;;  %v2909_v15 = vsel %vm1418_vm3, %v12990_v0, %v12989_v28 }
 0x682   : > { %v3396_v31 = vsel %vm2036_vm7, %v12987_v47, %v12988_v2  ;;  %v3408_v51 = vsel %vm2036_vm7, %v12988_v2, %v12981_v34  ;;  %12991 = vst [vmem:[#allocation165_spill] sm:$0xff] %v9451_v56  ;;  %v9454_v29 = vmul.f32 %v3404_v33, %v12917_v35  ;;  %v3527_v18 = vmul.f32 %v3516_v52, %v12621_v3  ;;  %v9458_v47 = vpop.permute.xlu1 %4005 }
 0x683   : > { %v3528_v54 = vmul.f32 %v3512_v45, %v12871_v14  ;;  %12993 = vst [vmem:[#allocation161_spill] sm:$0xff] %v9458_v47  ;;  %12995 = vst [vmem:[#allocation152_spill] sm:$0xff] %v9461_v7  ;;  %v9464_v34 = vmul.f32 %v12994_v5, %v3304_v42  ;;  %v9467_v2 = vmul.f32 %v3400_v13, %v12919_v10  ;;  %v13001_v45 = vld [vmem:[#allocation102_spill] sm:$0xff]  ;;  %v13002_v42 = vld [vmem:[#allocation99_spill] sm:$0xff] }
 0x684   : > { %12992 = vst [vmem:[#allocation54_spill] sm:$0xff] %v9454_v29  ;;  %v9470_v44 = vmul.f32 %v3396_v31, %v12920_v16  ;;  %12999 = vst [vmem:[#allocation95_spill] sm:$0xff] %v9472_v26  ;;  %v9475_v33 = vmul.f32 %v3408_v51, %v12921_v20  ;;  %v2905_v58 = vsel %vm1418_vm3, %v12989_v28, %v13001_v45  ;;  %v13003_v47 = vld [vmem:[#allocation173_spill] sm:$0xff]  ;;  %v13006_v51 = vld [vmem:[#allocation103_spill] sm:$0xff]  ;;  %v9550_v7 = vpop.permute.xlu0 %4331 }
 0x685   : > { %12996 = vst [vmem:[#allocation160_spill] sm:$0xff] %v9464_v34  ;;  %12997 = vst [vmem:[#allocation80_spill] sm:$0xff] %v9467_v2  ;;  %v2924_v52 = vmul.f32 %v2909_v15, %v12854_v4  ;;  %v2801_v13 = vsel %vm1329_vm2, %v13003_v47, %v13002_v42  ;;  %v9487_v31 = vmul.f32 %v12994_v5, %v3305_v9  ;;  %v13007_v28 = vld [vmem:[#allocation44_spill] sm:$0xff]  ;;  %v13024_v26 = vld [vmem:[#allocation43_spill] sm:$0xff] }
 0x686   : > { %12998 = vst [vmem:[#allocation104_spill] sm:$0xff] %v9470_v44  ;;  %13000 = vst [vmem:[#allocation153_spill] sm:$0xff] %v9475_v33  ;;  %v9490_v56 = vmul.f32 %v12994_v5, %v3306_v1  ;;  %v3508_v33 = vsel %vm2125_vm9, %v12982_v48, %v13006_v51  ;;  %v2913_v15 = vsel %vm1418_vm3, %v13007_v28, %v12990_v0  ;;  %v13008_v44 = vld [vmem:[#allocation81_spill] sm:$0xff] }
 0x687   : > { %13004 = vst [vmem:[#allocation69_spill] sm:$0xff] %v9487_v31  ;;  %v9501_v34 = vmul.f32 %v13008_v44, %v3527_v18  ;;  %v9504_v2 = vmul.f32 %v13008_v44, %v3528_v54  ;;  %v9510_v9 = vsel %vm2125_vm9, %v13006_v51, %v12984_v39  ;;  %v13012_v5 = vld [vmem:[#allocation149_spill] sm:$0xff]  ;;  %v2901_v0 = vsel %vm1418_vm3, %v13001_v45, %v13007_v28  ;;  %v13014_v18 = vld [vmem:[#allocation171_spill] sm:$0xff]  ;;  %v9535_v45 = vpop.permute.xlu1 %4015  ;;  %v13020_v28 = vld [vmem:[#allocation100_spill] sm:$0xff] }
 0x688   : > { %13005 = vst [vmem:[#allocation102_spill] sm:$0xff] %v9490_v56  ;;  %13011 = vst [vmem:[#allocation103_spill] sm:$0xff] %v9510_v9  ;;  %v13013_v1 = vld [vmem:[#allocation169_spill] sm:$0xff]  ;;  %v2925_v56 = vmul.f32 %v2905_v58, %v12856_v21  ;;  %v2797_v54 = vsel %vm1329_vm2, %v13002_v42, %v13014_v18  ;;  %v2811_v39 = vmul.f32 %v2801_v13, %v12867_v49  ;;  %v13016_v9 = vld [vmem:[#allocation35_spill] sm:$0xff] }
 0x689   : > { %13009 = vst [vmem:[#allocation99_spill] sm:$0xff] %v9501_v34  ;;  %13010 = vst [vmem:[#allocation173_spill] sm:$0xff] %v9504_v2  ;;  %v2697_v48 = vsel %vm1240_vm1, %v13013_v1, %v13012_v5  ;;  %v9527_v51 = vmul.f32 %v3508_v33, %v12878_v57  ;;  %v2956_v44 = vmul.f32 %v13016_v9, %v2924_v52  ;;  %v13017_v58 = vld [vmem:[#allocation39_spill] sm:$0xff] }
 0x68a   : > { %v2923_v31 = vmul.f32 %v2913_v15, %v12858_v38  ;;  %v13018_v2 = vld [vmem:[#allocation151_spill] sm:$0xff]  ;;  %13019 = vst [vmem:[#allocation149_spill] sm:$0xff] %v9535_v45  ;;  %v3289_v42 = vsel %vm1947_vm6, %v13017_v58, %v13020_v28  ;;  %v2707_v52 = vmul.f32 %v2697_v48, %v12876_v22  ;;  %v13022_v15 = vld [vmem:[#allocation97_spill] sm:$0xff]  ;;  %13023 = vst [vmem:[#allocation169_spill] sm:$0xff] %v9550_v7 }
 0x68b   : > { %13015 = vst [vmem:[#allocation44_spill] sm:$0xff] %v9527_v51  ;;  %v3293_v34 = vsel %vm1947_vm6, %v13018_v2, %v13017_v58  ;;  %v13021_v13 = vld [vmem:[#allocation167_spill] sm:$0xff]  ;;  %v2793_v51 = vsel %vm1329_vm2, %v13014_v18, %v13022_v15  ;;  %v2926_v45 = vmul.f32 %v2901_v0, %v12861_v25  ;;  %v2812_v29 = vmul.f32 %v2797_v54, %v12866_v41  ;;  %v9576_v4 = vpop.permute.xlu1 %4103 }
 0x68c   : > { %v2693_v33 = vsel %vm1240_vm1, %v13012_v5, %v13021_v13  ;;  %v2789_v58 = vsel %vm1329_vm2, %v13022_v15, %v13003_v47  ;;  %v13025_v5 = vld [vmem:[#allocation177_spill] sm:$0xff]  ;;  %v2957_v38 = vmul.f32 %v13016_v9, %v2925_v56  ;;  %v3307_v18 = vmul.f32 %v3293_v34, %v12557_v6  ;;  %v13027_v54 = vld [vmem:[#allocation27_spill] sm:$0xff]  ;;  %13028 = vst [vmem:[#allocation171_spill] sm:$0xff] %v9576_v4  ;;  %v13029_v34 = vld [vmem:[#allocation86_spill] sm:$0xff] }
 0x68d   : > { %v3025_v48 = vsel %vm1511_vm4, %v13025_v5, %v13024_v26  ;;  %v2689_v0 = vsel %vm1240_vm1, %v13021_v13, %v13026_v19  ;;  %v2843_v7 = vmul.f32 %v13027_v54, %v2811_v39  ;;  %v3308_v25 = vmul.f32 %v3289_v42, %v7135_v43  ;;  %v13030_v13 = vld [vmem:[#allocation175_spill] sm:$0xff] }
 0x68e   : > { %v2708_v47 = vmul.f32 %v2693_v33, %v12872_v11  ;;  %v2685_v15 = vsel %vm1240_vm1, %v13026_v19, %v13013_v1  ;;  %v2813_v56 = vmul.f32 %v2793_v51, %v12620_v61  ;;  %v2747_v6 = vmul.f32 %v13029_v34, %v2707_v52  ;;  %v13031_v51 = vld [vmem:[#allocation26_spill] sm:$0xff]  ;;  %v13032_v22 = vld [vmem:[#allocation67_spill] sm:$0xff] }
 0x68f   : > { %v2814_v21 = vmul.f32 %v2789_v58, %v12868_v37  ;;  %v3021_v39 = vsel %vm1511_vm4, %v13024_v26, %v13030_v13  ;;  %v3035_v42 = vmul.f32 %v3025_v48, %v12899_v55  ;;  %v2955_v33 = vmul.f32 %v13016_v9, %v2923_v31  ;;  %v9597_v48 = vpop.permute.xlu0 %4327  ;;  %v13037_v55 = vld [vmem:[#allocation40_spill] sm:$0xff] }
 0x690   : > { %v2958_v43 = vmul.f32 %v13016_v9, %v2926_v45  ;;  %v2709_v19 = vmul.f32 %v2689_v0, %v12873_v63  ;;  %v2844_v1 = vmul.f32 %v13027_v54, %v2812_v29  ;;  %v9590_v4 = vmul.f32 %v13031_v51, %v3307_v18  ;;  %13033 = vst [vmem:[#allocation35_spill] sm:$0xff] %v9597_v48  ;;  %v13036_v48 = vld [vmem:[#allocation179_spill] sm:$0xff] }
 0x691   : > { %v2710_v52 = vmul.f32 %v2685_v15, %v12877_v50  ;;  %v2859_v58 = vadd.f32 %v2843_v7, %v2747_v6  ;;  %v3017_v26 = vsel %vm1511_vm4, %v13030_v13, %v13032_v22  ;;  %v2748_v31 = vmul.f32 %v13029_v34, %v2708_v47  ;;  %v13034_v7 = vld [vmem:[#allocation33_spill] sm:$0xff]  ;;  %v13035_v47 = vld [vmem:[#allocation24_spill] sm:$0xff] }
 0x692   : > { %v2845_v9 = vmul.f32 %v13027_v54, %v2813_v56  ;;  %v3036_v45 = vmul.f32 %v3021_v39, %v12885_v59  ;;  %v3013_v29 = vsel %vm1511_vm4, %v13032_v22, %v13025_v5  ;;  %v9607_v6 = vmul.f32 %v13031_v51, %v3308_v25  ;;  %v9621_v22 = vpop.permute.xlu1 %4107 }
 0x693   : > { %v3285_v18 = vsel %vm1947_vm6, %v13020_v28, %v13034_v7  ;;  %v2846_v0 = vmul.f32 %v13027_v54, %v2814_v21  ;;  %v3067_v15 = vmul.f32 %v13035_v47, %v3035_v42  ;;  %v2749_v56 = vmul.f32 %v13029_v34, %v2709_v19  ;;  %13038 = vst [vmem:[#allocation39_spill] sm:$0xff] %v9621_v22  ;;  %v13039_v21 = vld [vmem:[#allocation45_spill] sm:$0xff] }
 0x694   : > { %v2860_v13 = vadd.f32 %v2844_v1, %v2748_v31  ;;  %v3037_v39 = vmul.f32 %v3017_v26, %v12896_v30  ;;  %v3181_v25 = vsel %vm1608_vm5, %v13037_v55, %v13036_v48  ;;  %v2750_v5 = vmul.f32 %v13029_v34, %v2710_v52  ;;  %v13040_v52 = vld [vmem:[#allocation181_spill] sm:$0xff] }
 0x695   : > { %v2971_v59 = vadd.f32 %v2955_v33, %v2859_v58  ;;  %v3038_v28 = vmul.f32 %v3013_v29, %v12901_v27  ;;  %v3177_v54 = vsel %vm1608_vm5, %v13036_v48, %v13039_v21  ;;  %v3297_v42 = vsel %vm1947_vm6, %v13034_v7, %v13018_v2  ;;  %v9640_v48 = vpop.permute.xlu0 %3092  ;;  %v13043_v7 = vld [vmem:[#allocation66_spill] sm:$0xff] }
 0x696   : > { %v3309_v19 = vmul.f32 %v3285_v18, %v12869_v46  ;;  %v2861_v1 = vadd.f32 %v2845_v9, %v2749_v56  ;;  %v3068_v26 = vmul.f32 %v13035_v47, %v3036_v45  ;;  %v2862_v31 = vadd.f32 %v2846_v0, %v2750_v5  ;;  %13041 = vst [vmem:[#allocation151_spill] sm:$0xff] %v9640_v48  ;;  %v13044_v18 = vld [vmem:[#allocation32_spill] sm:$0xff]  ;;  %v13047_v5 = vld [vmem:[#allocation38_spill] sm:$0xff] }
 0x697   : > { %v3083_v34 = vadd.f32 %v3067_v15, %v2971_v59  ;;  %v3195_v33 = vmul.f32 %v3181_v25, %v12906_v53  ;;  %v3173_v58 = vsel %vm1608_vm5, %v13039_v21, %v13040_v52  ;;  %v2972_v29 = vadd.f32 %v2956_v44, %v2860_v13  ;;  %v9648_v59 = vpop.permute.xlu1 %4219  ;;  %v13045_v44 = vld [vmem:[#allocation98_spill] sm:$0xff]  ;;  %v13046_v25 = vld [vmem:[#allocation183_spill] sm:$0xff] }
 0x698   : > { %v3069_v22 = vmul.f32 %v13035_v47, %v3037_v39  ;;  %v3196_v2 = vmul.f32 %v3177_v54, %v12910_v24  ;;  %v3185_v9 = vsel %vm1608_vm5, %v13040_v52, %v13037_v55  ;;  %13042 = vst [vmem:[#allocation100_spill] sm:$0xff] %v9648_v59  ;;  %v3310_v45 = vmul.f32 %v3297_v42, %v12874_v36  ;;  %v13048_v52 = vld [vmem:[#allocation85_spill] sm:$0xff]  ;;  %v13049_v36 = vld [vmem:[#allocation166_spill] sm:$0xff] }
 0x699   : > { %v3513_v0 = vsel %vm2125_vm9, %v13044_v18, %v13043_v7  ;;  %v3517_v15 = vsel %vm2125_vm9, %v13045_v44, %v13044_v18  ;;  %v3070_v56 = vmul.f32 %v13035_v47, %v3038_v28  ;;  %v2973_v13 = vadd.f32 %v2957_v38, %v2861_v1  ;;  %v13050_v1 = vld [vmem:[#allocation31_spill] sm:$0xff] }
 0x69a   : > { %v3084_v39 = vadd.f32 %v3068_v26, %v2972_v29  ;;  %v3197_v55 = vmul.f32 %v3173_v58, %v12915_v17  ;;  %v3405_v21 = vsel %vm2036_vm7, %v13047_v5, %v13046_v25  ;;  %v2974_v54 = vadd.f32 %v2958_v43, %v2862_v31  ;;  %v13051_v29 = vld [vmem:[#allocation185_spill] sm:$0xff] }
 0x69b   : > { %v3131_v42 = vadd.f32 %v8964_v62, %v3083_v34  ;;  %v3227_v59 = vmul.f32 %v13048_v52, %v3195_v33  ;;  %v3198_v48 = vmul.f32 %v3185_v9, %v12916_v60  ;;  %v3531_v18 = vmul.f32 %v3517_v15, %v12621_v3  ;;  %v9683_v34 = vpop.permute.xlu0 %3104 }
 0x69c   : > { %v3509_v38 = vsel %vm2125_vm9, %v13043_v7, %v13049_v36  ;;  %v3085_v47 = vadd.f32 %v3069_v22, %v2973_v13  ;;  %v3228_v28 = vmul.f32 %v13048_v52, %v3196_v2  ;;  %v3521_v43 = vsel %vm2125_vm9, %v13049_v36, %v13045_v44  ;;  %v9692_v2 = vpop.permute.xlu1 %4335 }
 0x69d   : > { %v3086_v62 = vadd.f32 %v3070_v56, %v2974_v54  ;;  %v3401_v26 = vsel %vm2036_vm7, %v13046_v25, %v13050_v1  ;;  %v3419_v31 = vmul.f32 %v3405_v21, %v12917_v35  ;;  %v3532_v33 = vmul.f32 %v3513_v0, %v12871_v14  ;;  %13052 = vst [vmem:[#allocation167_spill] sm:$0xff] %v9692_v2  ;;  %v13053_v25 = vld [vmem:[#allocation87_spill] sm:$0xff]  ;;  %v13054_v54 = vld [vmem:[#allocation41_spill] sm:$0xff] }
 0x69e   : > { %v3132_v22 = vadd.f32 %v8971_v23, %v3084_v39  ;;  %v3229_v58 = vmul.f32 %v13048_v52, %v3197_v55  ;;  %v3397_v36 = vsel %vm2036_vm7, %v13050_v1, %v13051_v29  ;;  %v3533_v9 = vmul.f32 %v3509_v38, %v12878_v57  ;;  %v13095_v2 = vld [vmem:[#allocation217_spill] sm:$0xff] }
 0x69f   : > { %v3243_v7 = vadd.f32 %v3227_v59, %v3131_v42  ;;  %v3230_v44 = vmul.f32 %v13048_v52, %v3198_v48  ;;  %v3409_v0 = vsel %vm2036_vm7, %v13051_v29, %v13047_v5  ;;  %v3534_v23 = vmul.f32 %v3521_v43, %v12879_v40  ;;  %v13127_v40 = vld [vmem:[#allocation155_spill] sm:$0xff] }
 0x6a0   : > { %v3244_v15 = vadd.f32 %v3228_v28, %v3132_v22  ;;  %v3133_v56 = vadd.f32 %v8991_v32, %v3085_v47  ;;  %v3420_v13 = vmul.f32 %v3401_v26, %v12919_v10  ;;  %v3341_v39 = vmul.f32 %v13031_v51, %v3309_v19  ;;  %v9713_v28 = vpop.permute.xlu0 %4379  ;;  %v9722_v1 = vpop.permute.xlu1 %4211  ;;  %v13060_v22 = vld [vmem:[#allocation195_spill] sm:$0xff] }
 0x6a1   : > { %v3134_v55 = vadd.f32 %v9008_v12, %v3086_v62  ;;  %v3451_v59 = vmul.f32 %v13053_v25, %v3419_v31  ;;  %v3421_v48 = vmul.f32 %v3397_v36, %v12920_v16  ;;  %v3342_v21 = vmul.f32 %v13031_v51, %v3310_v45  ;;  %13055 = vst [vmem:[#allocation97_spill] sm:$0xff] %v9713_v28  ;;  %v13056_v45 = vld [vmem:[#allocation193_spill] sm:$0xff] }
 0x6a2   : > { %v3563_v42 = vmul.f32 %v13054_v54, %v3531_v18  ;;  %v3245_v5 = vadd.f32 %v3229_v58, %v3133_v56  ;;  %v3422_v52 = vmul.f32 %v3409_v0, %v12921_v20  ;;  %v3564_v38 = vmul.f32 %v13054_v54, %v3532_v33  ;;  %v13057_v18 = vld [vmem:[#allocation172_spill] sm:$0xff]  ;;  %13058 = vst [vmem:[#allocation43_spill] sm:$0xff] %v9722_v1  ;;  %v13059_v33 = vld [vmem:[#allocation174_spill] sm:$0xff]  ;;  %v13061_v36 = vld [vmem:[#allocation189_spill] sm:$0xff] }
 0x6a3   : > { %v3565_v32 = vmul.f32 %v13054_v54, %v3533_v9  ;;  %v3246_v47 = vadd.f32 %v3230_v44, %v3134_v55  ;;  %v3355_v19 = vadd.f32 %v9590_v4, %v3243_v7  ;;  %v3566_v12 = vmul.f32 %v13054_v54, %v3534_v23  ;;  %v13062_v9 = vld [vmem:[#allocation168_spill] sm:$0xff]  ;;  %v13063_v23 = vld [vmem:[#allocation170_spill] sm:$0xff]  ;;  %v13064_v56 = vld [vmem:[#allocation191_spill] sm:$0xff] }
 0x6a4   : > { %v3356_v43 = vadd.f32 %v9607_v6, %v3244_v15  ;;  %v3452_v51 = vmul.f32 %v13053_v25, %v3420_v13  ;;  %v2798_v62 = vsel %vm1329_vm2, %v13057_v18, %v13056_v45  ;;  %v3453_v31 = vmul.f32 %v13053_v25, %v3421_v48  ;;  %v13087_v1 = vld [vmem:[#allocation126_spill] sm:$0xff] }
 0x6a5   : > { %v3467_v26 = vadd.f32 %v3451_v59, %v3355_v19  ;;  %v2794_v4 = vsel %vm1329_vm2, %v13056_v45, %v13059_v33  ;;  %v2802_v6 = vsel %vm1329_vm2, %v13060_v22, %v13057_v18  ;;  %v3357_v58 = vadd.f32 %v3341_v39, %v3245_v5  ;;  %v13067_v18 = vld [vmem:[#allocation197_spill] sm:$0xff] }
 0x6a6   : > { %v3454_v29 = vmul.f32 %v13053_v25, %v3422_v52  ;;  %v2694_v7 = vsel %vm1240_vm1, %v13062_v9, %v13061_v36  ;;  %v2790_v44 = vsel %vm1329_vm2, %v13059_v33, %v13060_v22  ;;  %v3358_v0 = vadd.f32 %v3342_v21, %v3246_v47  ;;  %v9761_v47 = vpop.permute.xlu0 %4371  ;;  %v13070_v22 = vld [vmem:[#allocation23_spill] sm:$0xff] }
 0x6a7   : > { %v2690_v15 = vsel %vm1240_vm1, %v13061_v36, %v13063_v23  ;;  %v2698_v13 = vsel %vm1240_vm1, %v13064_v56, %v13062_v9  ;;  %v2816_v39 = vmul.f32 %v2798_v62, %v12866_v41  ;;  %v3468_v55 = vadd.f32 %v3452_v51, %v3356_v43  ;;  %13065 = vst [vmem:[#allocation177_spill] sm:$0xff] %v9761_v47  ;;  %v13066_v51 = vld [vmem:[#allocation119_spill] sm:$0xff]  ;;  %v13068_v62 = vld [vmem:[#allocation176_spill] sm:$0xff]  ;;  %v13125_v41 = vld [vmem:[#allocation109_spill] sm:$0xff] }
 0x6a8   : > { %v2686_v25 = vsel %vm1240_vm1, %v13063_v23, %v13064_v56  ;;  %v2817_v59 = vmul.f32 %v2794_v4, %v12620_v61  ;;  %v2815_v48 = vmul.f32 %v2802_v6, %v12867_v49  ;;  %v3469_v21 = vadd.f32 %v3453_v31, %v3357_v58  ;;  %v9769_v4 = vpop.permute.xlu1 %4383  ;;  %v13072_v58 = vld [vmem:[#allocation198_spill] sm:$0xff]  ;;  %v13091_v47 = vld [vmem:[#allocation192_spill] sm:$0xff] }
 0x6a9   : > { %v2712_v54 = vmul.f32 %v2694_v7, %v12872_v11  ;;  %v2818_v5 = vmul.f32 %v2790_v44, %v12868_v37  ;;  %v9759_v52 = vadd.f32 %v3563_v42, %v3467_v26  ;;  %v3470_v19 = vadd.f32 %v3454_v29, %v3358_v0  ;;  %13069 = vst [vmem:[#allocation101_spill] sm:$0xff] %v9769_v4  ;;  %v13071_v42 = vld [vmem:[#allocation178_spill] sm:$0xff]  ;;  %v13073_v0 = vld [vmem:[#allocation115_spill] sm:$0xff]  ;;  %v13115_v61 = vld [vmem:[#allocation196_spill] sm:$0xff] }
 0x6aa   : > { %v2713_v43 = vmul.f32 %v2690_v15, %v12873_v63  ;;  %v2711_v45 = vmul.f32 %v2698_v13, %v13066_v51  ;;  %v3022_v33 = vsel %vm1511_vm4, %v13068_v62, %v13067_v18  ;;  %v2714_v31 = vmul.f32 %v2686_v25, %v12877_v50  ;;  %v13074_v56 = vld [vmem:[#allocation130_spill] sm:$0xff]  ;;  %v13100_v50 = vld [vmem:[#allocation127_spill] sm:$0xff] }
 0x6ab   : > { %v2848_v6 = vmul.f32 %v13070_v22, %v2816_v39  ;;  %v3018_v26 = vsel %vm1511_vm4, %v13067_v18, %v13071_v42  ;;  %v3026_v29 = vsel %vm1511_vm4, %v13072_v58, %v13068_v62  ;;  %v2849_v36 = vmul.f32 %v13070_v22, %v2817_v59  ;;  %v13075_v18 = vld [vmem:[#allocation132_spill] sm:$0xff]  ;;  %v13109_v37 = vld [vmem:[#allocation194_spill] sm:$0xff] }
 0x6ac   : > { %v2847_v9 = vmul.f32 %v13070_v22, %v2815_v48  ;;  %v3014_v7 = vsel %vm1511_vm4, %v13071_v42, %v13072_v58  ;;  %v9787_v44 = vadd.f32 %v3564_v38, %v3468_v55  ;;  %v2752_v23 = vmul.f32 %v13073_v0, %v2712_v54  ;;  %v13081_v58 = vld [vmem:[#allocation188_spill] sm:$0xff] }
 0x6ad   : > { %v2850_v15 = vmul.f32 %v13070_v22, %v2818_v5  ;;  %v3040_v13 = vmul.f32 %v3022_v33, %v13074_v56  ;;  %v9792_v39 = vadd.f32 %v3565_v32, %v3469_v21  ;;  %v2753_v25 = vmul.f32 %v13073_v0, %v2713_v43  ;;  %v9804_v5 = vpop.permute.xlu0 %3316  ;;  %v13076_v43 = vld [vmem:[#allocation182_spill] sm:$0xff]  ;;  %v13078_v22 = vld [vmem:[#allocation180_spill] sm:$0xff]  ;;  %v13101_v56 = vld [vmem:[#allocation129_spill] sm:$0xff] }
 0x6ae   : > { %v2751_v59 = vmul.f32 %v13073_v0, %v2711_v45  ;;  %v3041_v48 = vmul.f32 %v3018_v26, %v12896_v30  ;;  %v3039_v62 = vmul.f32 %v3026_v29, %v13075_v18  ;;  %v2754_v42 = vmul.f32 %v13073_v0, %v2714_v31  ;;  %v13077_v45 = vld [vmem:[#allocation200_spill] sm:$0xff]  ;;  %v13082_v29 = vld [vmem:[#allocation199_spill] sm:$0xff] }
 0x6af   : > { %v9799_v38 = vadd.f32 %v2848_v6, %v2752_v23  ;;  %v3042_v55 = vmul.f32 %v3014_v7, %v12901_v27  ;;  %v9802_v54 = vadd.f32 %v3566_v12, %v3470_v19  ;;  %v9806_v32 = vadd.f32 %v2849_v36, %v2753_v25  ;;  %v9818_v6 = vpop.permute.xlu1 %4323  ;;  %v13080_v19 = vld [vmem:[#allocation48_spill] sm:$0xff]  ;;  %v13099_v27 = vld [vmem:[#allocation46_spill] sm:$0xff] }
 0x6b0   : > { %v9808_v21 = vadd.f32 %v2847_v9, %v2751_v59  ;;  %v3178_v33 = vsel %vm1608_vm5, %v13077_v45, %v13076_v43  ;;  %v3182_v31 = vsel %vm1608_vm5, %v13078_v22, %v13077_v45  ;;  %13079 = vst [vmem:[#allocation27_spill] sm:$0xff] %v9818_v6  ;;  %v9820_v12 = vadd.f32 %v2850_v15, %v2754_v42  ;;  %v13083_v9 = vld [vmem:[#allocation202_spill] sm:$0xff]  ;;  %v13084_v15 = vld [vmem:[#allocation187_spill] sm:$0xff] }
 0x6b1   : > { %v9823_v26 = vmul.f32 %v13080_v19, %v3040_v13  ;;  %v2906_v36 = vsel %vm1418_vm3, %v13082_v29, %v13081_v58  ;;  %v3174_v7 = vsel %vm1608_vm5, %v13076_v43, %v13083_v9  ;;  %v9834_v0 = vmul.f32 %v13080_v19, %v3041_v48  ;;  %v13085_v43 = vld [vmem:[#allocation186_spill] sm:$0xff] }
 0x6b2   : > { %v9837_v23 = vmul.f32 %v13080_v19, %v3039_v62  ;;  %v2910_v13 = vsel %vm1418_vm3, %v13084_v15, %v13082_v29  ;;  %v3186_v25 = vsel %vm1608_vm5, %v13083_v9, %v13078_v22  ;;  %v9848_v59 = vmul.f32 %v13080_v19, %v3042_v55  ;;  %v13086_v62 = vld [vmem:[#allocation204_spill] sm:$0xff]  ;;  %v13088_v29 = vld [vmem:[#allocation201_spill] sm:$0xff] }
 0x6b3   : > { %v3199_v42 = vmul.f32 %v3182_v31, %v12906_v53  ;;  %v3200_v48 = vmul.f32 %v3178_v33, %v12910_v24  ;;  %v3402_v45 = vsel %vm2036_vm7, %v13086_v62, %v13085_v43  ;;  %v9857_v6 = vmul.f32 %v2906_v36, %v13087_v1  ;;  %v13089_v19 = vld [vmem:[#allocation184_spill] sm:$0xff]  ;;  %v13090_v31 = vld [vmem:[#allocation125_spill] sm:$0xff]  ;;  %v13092_v24 = vld [vmem:[#allocation203_spill] sm:$0xff] }
 0x6b4   : > { %v2914_v22 = vsel %vm1418_vm3, %v13088_v29, %v13084_v15  ;;  %v3201_v55 = vmul.f32 %v3174_v7, %v12915_v17  ;;  %v3406_v33 = vsel %vm2036_vm7, %v13089_v19, %v13086_v62  ;;  %v9869_v9 = vmul.f32 %v2910_v13, %v13090_v31  ;;  %v9880_v15 = vpop.permute.xlu0 %3328  ;;  %v13093_v17 = vld [vmem:[#allocation190_spill] sm:$0xff] }
 0x6b5   : > { %v2902_v36 = vsel %vm1418_vm3, %v13081_v58, %v13088_v29  ;;  %v3202_v28 = vmul.f32 %v3186_v25, %v12916_v60  ;;  %v3290_v7 = vsel %vm1947_vm6, %v13092_v24, %v13091_v47  ;;  %v3294_v13 = vsel %vm1947_vm6, %v13093_v17, %v13092_v24  ;;  %v13094_v53 = vld [vmem:[#allocation162_spill] sm:$0xff]  ;;  %v13096_v58 = vld [vmem:[#allocation216_spill] sm:$0xff]  ;;  %v9891_v60 = vpop.permute.xlu1 %4491 }
 0x6b6   : > { %v3424_v62 = vmul.f32 %v3402_v45, %v12919_v10  ;;  %v2839_v4 = vmul.f32 %v13095_v2, %v13094_v53  ;;  %v13097_v29 = vld [vmem:[#allocation70_spill] sm:$0xff]  ;;  %13098 = vst [vmem:[#allocation86_spill] sm:$0xff] %v9891_v60  ;;  %v9894_v18 = vmul.f32 %v13099_v27, %v3199_v42  ;;  %v9897_v30 = vmul.f32 %v13099_v27, %v3200_v48  ;;  %v13102_v10 = vld [vmem:[#allocation205_spill] sm:$0xff] }
 0x6b7   : > { %v2947_v25 = vmul.f32 %v13097_v29, %v13096_v58  ;;  %v2927_v51 = vmul.f32 %v2914_v22, %v13100_v50  ;;  %v3423_v24 = vmul.f32 %v3406_v33, %v12917_v35  ;;  %v9902_v45 = vmul.f32 %v2902_v36, %v13101_v56  ;;  %v13103_v42 = vld [vmem:[#allocation206_spill] sm:$0xff]  ;;  %v13106_v36 = vld [vmem:[#allocation140_spill] sm:$0xff]  ;;  %v13108_v50 = vld [vmem:[#allocation207_spill] sm:$0xff] }
 0x6b8   : > { %v9905_v53 = vmul.f32 %v13099_v27, %v3201_v55  ;;  %v3286_v58 = vsel %vm1947_vm6, %v13091_v47, %v13102_v10  ;;  %v3398_v48 = vsel %vm2036_vm7, %v13085_v43, %v13103_v42  ;;  %v9916_v22 = vmul.f32 %v13099_v27, %v3202_v28  ;;  %v13105_v33 = vld [vmem:[#allocation138_spill] sm:$0xff]  ;;  %v13110_v28 = vld [vmem:[#allocation124_spill] sm:$0xff]  ;;  %v9946_v49 = vpop.permute.xlu0 %4607 }
 0x6b9   : > { %v9919_v60 = vmul.f32 %v3294_v13, %v13105_v33  ;;  %v9922_v35 = vmul.f32 %v3290_v7, %v13106_v36  ;;  %v3298_v55 = vsel %vm1947_vm6, %v13102_v10, %v13093_v17  ;;  %v13107_v47 = vld [vmem:[#allocation82_spill] sm:$0xff]  ;;  %v3518_v27 = vsel %vm2125_vm9, %v13109_v37, %v13108_v50  ;;  %v13111_v13 = vld [vmem:[#allocation227_spill] sm:$0xff]  ;;  %v13112_v10 = vld [vmem:[#allocation229_spill] sm:$0xff]  ;;  %13113 = vst [vmem:[#allocation26_spill] sm:$0xff] %v9946_v49 }
 0x6ba   : > { %13104 = vst [vmem:[#allocation175_spill] sm:$0xff] %v9916_v22  ;;  %v9929_v56 = vmul.f32 %v13107_v47, %v3424_v62  ;;  %v2855_v43 = vadd.f32 %v2839_v4, %v13110_v28  ;;  %v2963_v33 = vadd.f32 %v2947_v25, %v13111_v13  ;;  %v9938_v7 = vmul.f32 %v13107_v47, %v3423_v24  ;;  %v13114_v1 = vld [vmem:[#allocation142_spill] sm:$0xff]  ;;  %v13116_v25 = vld [vmem:[#allocation107_spill] sm:$0xff]  ;;  %v13123_v49 = vld [vmem:[#allocation76_spill] sm:$0xff] }
 0x6bb   : > { %v9941_v36 = vmul.f32 %v3286_v58, %v12869_v46  ;;  %v3425_v17 = vmul.f32 %v3398_v48, %v12920_v16  ;;  %v2840_v62 = vmul.f32 %v13095_v2, %v13112_v10  ;;  %v9949_v63 = vmul.f32 %v3298_v55, %v13114_v1  ;;  %v13117_v24 = vld [vmem:[#allocation95_spill] sm:$0xff]  ;;  %v13118_v58 = vld [vmem:[#allocation108_spill] sm:$0xff]  ;;  %v9959_v48 = vpop.permute.xlu1 %4495  ;;  %v13122_v1 = vld [vmem:[#allocation154_spill] sm:$0xff] }
 0x6bc   : > { %v3514_v4 = vsel %vm2125_vm9, %v13108_v50, %v13115_v61  ;;  %v3063_v28 = vmul.f32 %v13117_v24, %v13116_v25  ;;  %v13119_v13 = vld [vmem:[#allocation151_spill] sm:$0xff]  ;;  %13120 = vst [vmem:[#allocation67_spill] sm:$0xff] %v9959_v48  ;;  %v9965_v10 = vsel %vm2036_vm7, %v13103_v42, %v13089_v19  ;;  %v3535_v55 = vmul.f32 %v3518_v27, %v12621_v3  ;;  %v13121_v16 = vld [vmem:[#allocation208_spill] sm:$0xff]  ;;  %v13124_v48 = vld [vmem:[#allocation214_spill] sm:$0xff] }
 0x6bd   : > { %v3107_v46 = vmul.f32 %v13119_v13, %v13118_v58  ;;  %v3510_v50 = vsel %vm2125_vm9, %v13115_v61, %v13121_v16  ;;  %v2841_v25 = vmul.f32 %v13095_v2, %v13122_v1  ;;  %v3619_v31 = vadd.f32 %v13123_v49, %v9759_v52  ;;  %v13126_v19 = vld [vmem:[#allocation110_spill] sm:$0xff] }
 0x6be   : > { %v2948_v11 = vmul.f32 %v13097_v29, %v13124_v48  ;;  %v2967_v58 = vadd.f32 %v13125_v41, %v2855_v43  ;;  %v3075_v42 = vadd.f32 %v13126_v19, %v2963_v33  ;;  %v9981_v27 = vmul.f32 %v13107_v47, %v3425_v17  ;;  %v13129_v52 = vld [vmem:[#allocation30_spill] sm:$0xff] }
 0x6bf   : > { %v3536_v3 = vmul.f32 %v3514_v4, %v12871_v14  ;;  %v2842_v61 = vmul.f32 %v13095_v2, %v13127_v40  ;;  %v2856_v1 = vadd.f32 %v2840_v62, %v13128_v8  ;;  %v3537_v16 = vmul.f32 %v3510_v50, %v12878_v57  ;;  %v9991_v41 = vpop.permute.xlu1 %4375  ;;  %v13131_v33 = vld [vmem:[#allocation50_spill] sm:$0xff]  ;;  %v13132_v4 = vld [vmem:[#allocation215_spill] sm:$0xff]  ;;  %v13133_v40 = vld [vmem:[#allocation77_spill] sm:$0xff]  ;;  %v9999_v8 = vpop.permute.xlu0 %4599 }
 0x6c0   : > { %v9989_v37 = vmul.f32 %v13129_v52, %v3535_v55  ;;  %v3079_v48 = vadd.f32 %v3063_v28, %v2967_v58  ;;  %v3123_v22 = vadd.f32 %v3107_v46, %v3075_v42  ;;  %13130 = vst [vmem:[#allocation33_spill] sm:$0xff] %v9991_v41  ;;  %v2857_v43 = vadd.f32 %v2841_v25, %v13131_v33  ;;  %v13135_v28 = vld [vmem:[#allocation78_spill] sm:$0xff]  ;;  %v13136_v58 = vld [vmem:[#allocation219_spill] sm:$0xff] }
 0x6c1   : > { %v3620_v17 = vadd.f32 %v13123_v49, %v9787_v44  ;;  %v2949_v19 = vmul.f32 %v13097_v29, %v13132_v4  ;;  %v2959_v2 = vmul.f32 %v13133_v40, %v2927_v51  ;;  %13134 = vst [vmem:[#allocation24_spill] sm:$0xff] %v9999_v8  ;;  %v10002_v62 = vmul.f32 %v13129_v52, %v3536_v3  ;;  %v13137_v44 = vld [vmem:[#allocation159_spill] sm:$0xff]  ;;  %v13138_v33 = vld [vmem:[#allocation218_spill] sm:$0xff]  ;;  %v13139_v4 = vld [vmem:[#allocation157_spill] sm:$0xff] }
 0x6c2   : > { %v5376_v55 = vmul.f32 -1.442695, %v3619_v31  ;;  %v2964_v46 = vadd.f32 %v2948_v11, %v13135_v28  ;;  %v3331_v50 = vmul.f32 %v9804_v5, %v13136_v58  ;;  %v10008_v25 = vmul.f32 %v13129_v52, %v3537_v16  ;;  %v13140_v31 = vld [vmem:[#allocation210_spill] sm:$0xff]  ;;  %v13142_v58 = vld [vmem:[#allocation128_spill] sm:$0xff] }
 0x6c3   : > { %v10011_v42 = vadd.f32 %v2842_v61, %v13137_v44  ;;  %v2950_v51 = vmul.f32 %v13097_v29, %v13138_v33  ;;  %v2968_v57 = vadd.f32 %v13139_v4, %v2856_v1  ;;  %v2960_v3 = vmul.f32 %v13133_v40, %v9869_v9  ;;  %v13141_v11 = vld [vmem:[#allocation90_spill] sm:$0xff]  ;;  %v13145_v1 = vld [vmem:[#allocation73_spill] sm:$0xff]  ;;  %v13147_v4 = vld [vmem:[#allocation228_spill] sm:$0xff] }
 0x6c4   : > { %v3127_v14 = vadd.f32 %v13140_v31, %v3079_v48  ;;  %v3108_v28 = vmul.f32 %v13119_v13, %v13141_v11  ;;  %v3235_v8 = vadd.f32 %v13142_v58, %v3123_v22  ;;  %v5377_v16 = vmul.f32 -1.442695, %v3620_v17  ;;  %v13143_v41 = vld [vmem:[#allocation226_spill] sm:$0xff]  ;;  %v10028_v48 = vpop.permute.xlu1 %4603 }
 0x6c5   : > { %v2965_v52 = vadd.f32 %v2949_v19, %v13143_v41  ;;  %v2975_v61 = vadd.f32 %v2959_v2, %v9808_v21  ;;  %v13144_v44 = vld [vmem:[#allocation74_spill] sm:$0xff]  ;;  %v3621_v29 = vadd.f32 %v13123_v49, %v9792_v39  ;;  %5635 = vpow2.f32 %v5376_v55  ;;  %13146 = vst [vmem:[#allocation179_spill] sm:$0xff] %v10028_v48  ;;  %v13149_v21 = vld [vmem:[#allocation63_spill] sm:$0xff]  ;;  %v10037_v19 = vpop.permute.xlu0 %3432 }
 0x6c6   : > { %v2969_v47 = vadd.f32 %v13144_v44, %v2857_v43  ;;  %v3076_v9 = vadd.f32 %v13145_v1, %v2964_v46  ;;  %v3347_v33 = vadd.f32 %v3331_v50, %v3235_v8  ;;  %v2966_v31 = vadd.f32 %v2950_v51, %v13147_v4  ;;  %v13148_v17 = vld [vmem:[#allocation62_spill] sm:$0xff]  ;;  %v13150_v2 = vld [vmem:[#allocation51_spill] sm:$0xff]  ;;  %v13151_v46 = vld [vmem:[#allocation105_spill] sm:$0xff] }
 0x6c7   : > { %v2961_v22 = vmul.f32 %v13133_v40, %v9857_v6  ;;  %v3109_v41 = vmul.f32 %v13119_v13, %v13148_v17  ;;  %v3119_v43 = vmul.f32 %v9683_v34, %v13149_v21  ;;  %v2976_v39 = vadd.f32 %v2960_v3, %v9799_v38  ;;  %v13152_v51 = vld [vmem:[#allocation84_spill] sm:$0xff]  ;;  %v13153_v6 = vld [vmem:[#allocation34_spill] sm:$0xff]  ;;  %v13154_v4 = vld [vmem:[#allocation61_spill] sm:$0xff] }
 0x6c8   : > { %v3064_v8 = vmul.f32 %v13117_v24, %v13150_v2  ;;  %v3124_v55 = vadd.f32 %v3108_v28, %v3076_v9  ;;  %v3239_v50 = vadd.f32 %v13151_v46, %v3127_v14  ;;  %5637 = vpow2.f32 %v5377_v16  ;;  %v13155_v17 = vld [vmem:[#allocation220_spill] sm:$0xff]  ;;  %v13156_v3 = vld [vmem:[#allocation83_spill] sm:$0xff]  ;;  %v13157_v2 = vld [vmem:[#allocation54_spill] sm:$0xff]  ;;  %v10059_v11 = vpop.permute.xlu1 %4483 }
 0x6c9   : > { %v3077_v58 = vadd.f32 %v13152_v51, %v2965_v52  ;;  %v3110_v44 = vmul.f32 %v13119_v13, %v13153_v6  ;;  %v3087_v1 = vadd.f32 %v9837_v23, %v2975_v61  ;;  %v3120_v48 = vmul.f32 %v9683_v34, %v13154_v4  ;;  %v13158_v16 = vld [vmem:[#allocation114_spill] sm:$0xff]  ;;  %v13159_v61 = vld [vmem:[#allocation71_spill] sm:$0xff]  ;;  %v13160_v6 = vld [vmem:[#allocation152_spill] sm:$0xff]  ;;  %13161 = vst [vmem:[#allocation40_spill] sm:$0xff] %v10059_v11 }
 0x6ca   : > { %v3332_v38 = vmul.f32 %v9804_v5, %v13155_v17  ;;  %v3459_v21 = vadd.f32 %v13156_v3, %v3347_v33  ;;  %v3447_v28 = vmul.f32 %v10037_v19, %v13157_v2  ;;  %v2977_v14 = vadd.f32 %v2961_v22, %v9806_v32  ;;  %v13162_v33 = vld [vmem:[#allocation89_spill] sm:$0xff]  ;;  %v13163_v2 = vld [vmem:[#allocation222_spill] sm:$0xff] }
 0x6cb   : > { %v3078_v52 = vadd.f32 %v13158_v16, %v2966_v31  ;;  %v3125_v9 = vadd.f32 %v3109_v41, %v3077_v58  ;;  %v3135_v46 = vadd.f32 %v3119_v43, %v3087_v1  ;;  %v3080_v13 = vadd.f32 %v3064_v8, %v2968_v57  ;;  %v13164_v41 = vld [vmem:[#allocation60_spill] sm:$0xff]  ;;  %v13167_v1 = vld [vmem:[#allocation211_spill] sm:$0xff] }
 0x6cc   : > { %v3088_v23 = vadd.f32 %v9823_v26, %v2976_v39  ;;  %v3236_v51 = vadd.f32 %v13159_v61, %v3124_v55  ;;  %v3351_v4 = vadd.f32 %v13160_v6, %v3239_v50  ;;  %v3121_v3 = vmul.f32 %v9683_v34, %v13162_v33  ;;  %v13165_v39 = vld [vmem:[#allocation53_spill] sm:$0xff]  ;;  %v13166_v50 = vld [vmem:[#allocation52_spill] sm:$0xff] }
 0x6cd   : > { %v3126_v17 = vadd.f32 %v3110_v44, %v3078_v52  ;;  %v3333_v32 = vmul.f32 %v9804_v5, %v13163_v2  ;;  %v3343_v31 = vmul.f32 %v9880_v15, %v9919_v60  ;;  %v3571_v26 = vadd.f32 %v13164_v41, %v3459_v21  ;;  %v13168_v60 = vld [vmem:[#allocation223_spill] sm:$0xff] }
 0x6ce   : > { %v3136_v22 = vadd.f32 %v3120_v48, %v3088_v23  ;;  %v3348_v57 = vadd.f32 %v3332_v38, %v3236_v51  ;;  %v3463_v43 = vadd.f32 %v3447_v28, %v3351_v4  ;;  %v3065_v8 = vmul.f32 %v13117_v24, %v13165_v39  ;;  %v13169_v38 = vld [vmem:[#allocation156_spill] sm:$0xff]  ;;  %v13171_v23 = vld [vmem:[#allocation79_spill] sm:$0xff]  ;;  %v13174_v51 = vld [vmem:[#allocation93_spill] sm:$0xff] }
 0x6cf   : > { %v3089_v55 = vadd.f32 %v9834_v0, %v2977_v14  ;;  %v3237_v58 = vadd.f32 %v13166_v50, %v3125_v9  ;;  %v3247_v6 = vadd.f32 %v9894_v18, %v3135_v46  ;;  %v3622_v44 = vadd.f32 %v13123_v49, %v9802_v54  ;;  %v13170_v14 = vld [vmem:[#allocation68_spill] sm:$0xff]  ;;  %v13172_v49 = vld [vmem:[#allocation99_spill] sm:$0xff] }
 0x6d0   : > { %v3128_v16 = vadd.f32 %v13167_v1, %v3080_v13  ;;  %v3334_v48 = vmul.f32 %v9804_v5, %v13168_v60  ;;  %v3344_v21 = vmul.f32 %v9880_v15, %v9922_v35  ;;  %v3238_v28 = vadd.f32 %v13169_v38, %v3126_v17  ;;  %v10085_v13 = vpop.permute.xlu1 %4487  ;;  %v13176_v41 = vld [vmem:[#allocation47_spill] sm:$0xff] }
 0x6d1   : > { %v3137_v4 = vadd.f32 %v3121_v3, %v3089_v55  ;;  %v3349_v52 = vadd.f32 %v3333_v32, %v3237_v58  ;;  %v3359_v0 = vadd.f32 %v3343_v31, %v3247_v6  ;;  %v3460_v9 = vadd.f32 %v13170_v14, %v3348_v57  ;;  %13173 = vst [vmem:[#allocation45_spill] sm:$0xff] %v10085_v13  ;;  %v13175_v57 = vld [vmem:[#allocation55_spill] sm:$0xff] }
 0x6d2   : > { %v3611_v18 = vadd.f32 %v13171_v23, %v3571_v26  ;;  %v3248_v46 = vadd.f32 %v9897_v30, %v3136_v22  ;;  %v3575_v54 = vadd.f32 %v13172_v49, %v3463_v43  ;;  %v5636_v61 = vpop.eup %5635  ;;  %v5378_v5 = vmul.f32 -1.442695, %v3621_v29  ;;  %v13181_v6 = vld [vmem:[#allocation111_spill] sm:$0xff] }
 0x6d3   : > { %v2962_v35 = vmul.f32 %v13133_v40, %v9902_v45  ;;  %v2970_v17 = vadd.f32 %v13174_v51, %v10011_v42  ;;  %v3081_v3 = vadd.f32 %v3065_v8, %v2969_v47  ;;  %v3350_v2 = vadd.f32 %v3334_v48, %v3238_v28  ;;  %v13177_v45 = vld [vmem:[#allocation225_spill] sm:$0xff]  ;;  %v13178_v42 = vld [vmem:[#allocation80_spill] sm:$0xff] }
 0x6d4   : > { %v3345_v32 = vmul.f32 %v9880_v15, %v9941_v36  ;;  %v3360_v31 = vadd.f32 %v3344_v21, %v3248_v46  ;;  %v3240_v30 = vadd.f32 %v13175_v57, %v3128_v16  ;;  %v5379_v22 = vmul.f32 -1.442695, %v3622_v44  ;;  %v13179_v8 = vld [vmem:[#allocation209_spill] sm:$0xff]  ;;  %v10101_v36 = vpop.permute.xlu1 %4719  ;;  %v13184_v21 = vld [vmem:[#allocation160_spill] sm:$0xff] }
 0x6d5   : > { %v3461_v26 = vadd.f32 %v13176_v41, %v3349_v52  ;;  %v3249_v43 = vadd.f32 %v9905_v53, %v3137_v4  ;;  %v3471_v29 = vadd.f32 %v9938_v7, %v3359_v0  ;;  %v5638_v39 = vpop.eup %5637  ;;  %v3572_v40 = vadd.f32 %v13177_v45, %v3460_v9  ;;  %13180 = vst [vmem:[#allocation181_spill] sm:$0xff] %v10101_v36  ;;  %v13182_v53 = vld [vmem:[#allocation212_spill] sm:$0xff]  ;;  %v13183_v7 = vld [vmem:[#allocation158_spill] sm:$0xff]  ;;  %v13186_v0 = vld [vmem:[#allocation91_spill] sm:$0xff] }
 0x6d6   : > { %v5368_v55 = vmul.f32 -1.442695, %v3611_v18  ;;  %v3448_v47 = vmul.f32 %v10037_v19, %v13178_v42  ;;  %v3615_v50 = vadd.f32 %v13179_v8, %v3575_v54  ;;  %5639 = vpow2.f32 %v5378_v5  ;;  %v13185_v28 = vld [vmem:[#allocation92_spill] sm:$0xff] }
 0x6d7   : > { %v2978_v58 = vadd.f32 %v2962_v35, %v9820_v12  ;;  %v3066_v44 = vmul.f32 %v13117_v24, %v13181_v6  ;;  %v3129_v1 = vadd.f32 %v13182_v53, %v3081_v3  ;;  %v3462_v16 = vadd.f32 %v13183_v7, %v3350_v2  ;;  %v10120_v3 = vpop.permute.xlu0 %4715  ;;  %v13196_v53 = vld [vmem:[#allocation175_spill] sm:$0xff] }
 0x6d8   : > { %v3361_v60 = vadd.f32 %v3345_v32, %v3249_v43  ;;  %v3472_v48 = vadd.f32 %v9929_v56, %v3360_v31  ;;  %v3352_v4 = vadd.f32 %v13184_v21, %v3240_v30  ;;  %v3683_v38 = vadd.f32 1.0, %v5636_v61  ;;  %v13187_v56 = vld [vmem:[#allocation75_spill] sm:$0xff]  ;;  %13189 = vst [vmem:[#allocation66_spill] sm:$0xff] %v10120_v3  ;;  %v13191_v32 = vld [vmem:[#allocation106_spill] sm:$0xff]  ;;  %v13195_v43 = vld [vmem:[#allocation69_spill] sm:$0xff] }
 0x6d9   : > { %v3122_v52 = vmul.f32 %v9683_v34, %v13185_v28  ;;  %v3573_v14 = vadd.f32 %v13186_v0, %v3461_v26  ;;  %v3583_v12 = vadd.f32 %v9989_v37, %v3471_v29  ;;  %v3612_v9 = vadd.f32 %v13171_v23, %v3572_v40  ;;  %v13188_v61 = vld [vmem:[#allocation139_spill] sm:$0xff]  ;;  %v10122_v37 = vpop.permute.xlu1 %4595  ;;  %v13202_v21 = vld [vmem:[#allocation165_spill] sm:$0xff] }
 0x6da   : > { %5641 = vpow2.f32 %v5368_v55  ;;  %v3464_v24 = vadd.f32 %v3448_v47, %v3352_v4  ;;  %v5372_v18 = vmul.f32 -1.442695, %v3615_v50  ;;  %v3684_v46 = vadd.f32 1.0, %v5638_v39  ;;  %13190 = vst [vmem:[#allocation32_spill] sm:$0xff] %v10122_v37  ;;  %v10516_v37 = vld [vmem:[%s11814_s15 + $0x8] sm:$0xff] }
 0x6db   : > { %v3082_v49 = vadd.f32 %v3066_v44, %v2970_v17  ;;  %v3090_v54 = vadd.f32 %v9848_v59, %v2978_v58  ;;  %v3241_v5 = vadd.f32 %v13187_v56, %v3129_v1  ;;  %5643 = vpow2.f32 %v5379_v22  ;;  %v13192_v17 = vld [vmem:[#allocation104_spill] sm:$0xff]  ;;  %v13193_v22 = vld [vmem:[#allocation173_spill] sm:$0xff]  ;;  %13253 = vst [vmem:[#allocation187_spill] sm:$0xff] %v10516_v37 }
 0x6dc   : > { %v3574_v35 = vadd.f32 %v13188_v61, %v3462_v16  ;;  %v3473_v34 = vadd.f32 %v9981_v27, %v3361_v60  ;;  %v3584_v51 = vadd.f32 %v10002_v62, %v3472_v48  ;;  %5645 = vrcp.f32 %v3683_v38  ;;  %v13194_v62 = vld [vmem:[#allocation213_spill] sm:$0xff]  ;;  %v3789_v42 = vpop.xlane.xlu0 %3788 }
 0x6dd   : > { %v3138_v2 = vadd.f32 %v3122_v52, %v3090_v54  ;;  %v3623_v31 = vadd.f32 %v13191_v32, %v3583_v12  ;;  %v3449_v59 = vmul.f32 %v10037_v19, %v13192_v17  ;;  %v3613_v57 = vadd.f32 %v13171_v23, %v3573_v14  ;;  %v3792_v47 = vpop.xlane.xlu1 %3791  ;;  %v13198_v16 = vld [vmem:[#allocation81_spill] sm:$0xff] }
 0x6de   : > { %v5369_v30 = vmul.f32 -1.442695, %v3612_v9  ;;  %v3576_v41 = vadd.f32 %v13193_v22, %v3464_v24  ;;  %5647 = vpow2.f32 %v5372_v18  ;;  %v3426_v27 = vmul.f32 %v9965_v10, %v12921_v20  ;;  %v13204_v54 = vld [vmem:[#allocation153_spill] sm:$0xff] }
 0x6df   : > { %5649 = vrcp.f32 %v3684_v46  ;;  %v3130_v26 = vadd.f32 %v13194_v62, %v3082_v49  ;;  %v3353_v29 = vadd.f32 %v13195_v43, %v3241_v5  ;;  %v3614_v39 = vadd.f32 %v13171_v23, %v3574_v35  ;;  %v13197_v23 = vld [vmem:[#allocation44_spill] sm:$0xff]  ;;  %v13203_v46 = vld [vmem:[#allocation82_spill] sm:$0xff] }
 0x6e0   : > { %v3346_v45 = vmul.f32 %v9880_v15, %v9949_v63  ;;  %v3585_v40 = vadd.f32 %v10008_v25, %v3473_v34  ;;  %v3624_v55 = vadd.f32 %v13191_v32, %v3584_v51  ;;  %v5380_v50 = vmul.f32 -1.442695, %v3623_v31  ;;  %v13199_v63 = vld [vmem:[#allocation194_spill] sm:$0xff]  ;;  %v13200_v15 = vld [vmem:[#allocation208_spill] sm:$0xff]  ;;  %v3795_v12 = vpop.xlane.xlu0 %3794  ;;  %v13206_v34 = vld [vmem:[#allocation103_spill] sm:$0xff] }
 0x6e1   : > { %v3465_v58 = vadd.f32 %v3449_v59, %v3353_v29  ;;  %v5384_v6 = vmul.f32 -1.442695, %v3789_v42  ;;  %v5385_v10 = vmul.f32 -1.442695, %v3792_v47  ;;  %5651 = vpow2.f32 %v5369_v30  ;;  %v13205_v35 = vld [vmem:[#allocation164_spill] sm:$0xff]  ;;  %v13207_v59 = vld [vmem:[#allocation102_spill] sm:$0xff]  ;;  %v3864_v30 = vpop.xlane.xlu1 %3863 }
 0x6e2   : > { %v5370_v44 = vmul.f32 -1.442695, %v3613_v57  ;;  %v3250_v1 = vadd.f32 %v13196_v53, %v3138_v2  ;;  %v3616_v7 = vadd.f32 %v13179_v8, %v3576_v41  ;;  %v3561_v60 = vmul.f32 %v13198_v16, %v13197_v23  ;;  %v13208_v43 = vld [vmem:[#allocation30_spill] sm:$0xff] }
 0x6e3   : > { %v3522_v48 = vsel %vm2125_vm9, %v13200_v15, %v13199_v63  ;;  %v3242_v4 = vadd.f32 %v13202_v21, %v3130_v26  ;;  %5653 = vpow2.f32 %v5384_v6  ;;  %v10147_v38 = vpop.eup %5639  ;;  %v5371_v52 = vmul.f32 -1.442695, %v3614_v39 }
 0x6e4   : > { %v3362_v0 = vadd.f32 %v3346_v45, %v3250_v1  ;;  %v3625_v14 = vadd.f32 %v13191_v32, %v3585_v40  ;;  %5655 = vpow2.f32 %v5385_v10  ;;  %v5381_v9 = vmul.f32 -1.442695, %v3624_v55  ;;  %v3798_v22 = vpop.xlane.xlu0 %3797 }
 0x6e5   : > { %5657 = vpow2.f32 %v5380_v50  ;;  %v3577_v24 = vadd.f32 %v3561_v60, %v3465_v58  ;;  %v5386_v18 = vmul.f32 -1.442695, %v3795_v12  ;;  %v3458_v49 = vmul.f32 %v13203_v46, %v3426_v27  ;;  %v3870_v50 = vpop.xlane.xlu1 %3869 }
 0x6e6   : > { %5659 = vpow2.f32 %v5370_v44  ;;  %v3450_v56 = vmul.f32 %v10037_v19, %v13204_v54  ;;  %v5373_v5 = vmul.f32 -1.442695, %v3616_v7  ;;  %v3530_v51 = vmul.f32 %v13206_v34, %v13205_v35 }
 0x6e7   : > { %v5642_v61 = vpop.eup %5641  ;;  %v3538_v2 = vmul.f32 %v3522_v48, %v13205_v35  ;;  %5661 = vpow2.f32 %v5386_v18  ;;  %v3474_v31 = vadd.f32 %v3458_v49, %v3362_v0  ;;  %v5382_v17 = vmul.f32 -1.442695, %v3625_v14 }
 0x6e8   : > { %5663 = vpow2.f32 %v5371_v52  ;;  %v3354_v57 = vadd.f32 %v13207_v59, %v3242_v4  ;;  %v10157_v41 = vpop.eup %5643  ;;  %v3617_v19 = vadd.f32 %v13179_v8, %v3577_v24  ;;  %v5388_v27 = vmul.f32 -1.442695, %v3864_v30  ;;  %v3867_v58 = vpop.xlane.xlu0 %3866 }
 0x6e9   : > { %5665 = vpow2.f32 %v5381_v9  ;;  %v5387_v62 = vmul.f32 -1.442695, %v3798_v22  ;;  %v10160_v26 = vpop.eup %5645  ;;  %v3570_v29 = vmul.f32 %v13208_v43, %v3538_v2  ;;  %v3675_v39 = vadd.f32 1.0, %v5642_v61 }
 0x6ea   : > { %v3466_v45 = vadd.f32 %v3450_v56, %v3354_v57  ;;  %5667 = vpow2.f32 %v5373_v5  ;;  %v3562_v42 = vmul.f32 %v13198_v16, %v3530_v51  ;;  %v5374_v6 = vmul.f32 -1.442695, %v3617_v19 }
 0x6eb   : > { %v5648_v40 = vpop.eup %5647  ;;  %5669 = vpow2.f32 %v5388_v27  ;;  %v3586_v47 = vadd.f32 %v3570_v29, %v3474_v31  ;;  %v5390_v10 = vmul.f32 -1.442695, %v3870_v50  ;;  %v5389_v44 = vmul.f32 -1.442695, %v3867_v58 }
 0x6ec   : > { %v10163_v55 = vpop.eup %5649  ;;  %5671 = vpow2.f32 %v5387_v62  ;;  %v3578_v53 = vadd.f32 %v3562_v42, %v3466_v45  ;;  %v3679_v1 = vadd.f32 1.0, %v5648_v40  ;;  %v3873_v63 = vpop.xlane.xlu0 %3872  ;;  %v3685_v57 = vadd.f32 1.0, %v10147_v38  ;;  %v13209_v45 = vld [vmem:[#allocation108_spill] sm:$0xff] }
 0x6ed   : > { %5673 = vpow2.f32 %v5382_v17  ;;  %v3626_v60 = vadd.f32 %v13191_v32, %v3586_v47  ;;  %v5391_v48 = vmul.f32 -1.442695, %v3873_v63  ;;  %v13210_v38 = vld [vmem:[#allocation56_spill] sm:$0xff] }
 0x6ee   : > { %5675 = vrcp.f32 %v3675_v39  ;;  %v5652_v7 = vpop.eup %5651  ;;  %v3618_v52 = vadd.f32 %v13179_v8, %v3578_v53 }
 0x6ef   : > { %5677 = vpow2.f32 %v5390_v10  ;;  %v3676_v4 = vadd.f32 1.0, %v5652_v7  ;;  %v5383_v9 = vmul.f32 -1.442695, %v3626_v60 }
 0x6f0   : > { %v5654_v23 = vpop.eup %5653  ;;  %5679 = vpow2.f32 %v5389_v44  ;;  %v5375_v49 = vmul.f32 -1.442695, %v3618_v52 }
 0x6f1   : > { %v5656_v15 = vpop.eup %5655  ;;  %5681 = vpow2.f32 %v5374_v6  ;;  %v3811_v16 = vadd.f32 1.0, %v5654_v23 }
 0x6f2   : > { %v5658_v21 = vpop.eup %5657  ;;  %5683 = vrcp.f32 %v3679_v1  ;;  %v3812_v0 = vadd.f32 1.0, %v5656_v15  ;;  %v13212_v1 = vld [vmem:[#allocation90_spill] sm:$0xff]  ;;  %v3686_v15 = vadd.f32 1.0, %v10157_v41 }
 0x6f3   : > { %v5660_v14 = vpop.eup %5659  ;;  %5685 = vrcp.f32 %v3811_v16  ;;  %v3687_v18 = vadd.f32 1.0, %v5658_v21  ;;  %v13213_v16 = vld [vmem:[#allocation57_spill] sm:$0xff] }
 0x6f4   : > { %v5662_v12 = vpop.eup %5661  ;;  %5687 = vrcp.f32 %v3812_v0  ;;  %v3677_v8 = vadd.f32 1.0, %v5660_v14 }
 0x6f5   : > { %v5664_v24 = vpop.eup %5663  ;;  %v3813_v32 = vadd.f32 1.0, %v5662_v12  ;;  %5689 = vpow2.f32 %v5391_v48  ;;  %v3731_v48 = vmul.f32 %v10160_v26, %v13213_v16  ;;  %v13216_v26 = vld [vmem:[#allocation94_spill] sm:$0xff] }
 0x6f6   : > { %v5666_v46 = vpop.eup %5665  ;;  %5691 = vrcp.f32 %v3676_v4  ;;  %v3678_v39 = vadd.f32 1.0, %v5664_v24 }
 0x6f7   : > { %v5668_v54 = vpop.eup %5667  ;;  %5693 = vrcp.f32 %v3813_v32  ;;  %v3688_v19 = vadd.f32 1.0, %v5666_v46  ;;  %v3732_v32 = vmul.f32 %v10163_v55, %v13216_v26 }
 0x6f8   : > { %v5670_v56 = vpop.eup %5669  ;;  %5695 = vpow2.f32 %v5383_v9  ;;  %v3680_v51 = vadd.f32 1.0, %v5668_v54  ;;  %v13217_v54 = vld [vmem:[#allocation63_spill] sm:$0xff] }
 0x6f9   : > { %v5672_v5 = vpop.eup %5671  ;;  %5697 = vrcp.f32 %v3687_v18  ;;  %v3886_v61 = vadd.f32 1.0, %v5670_v56 }
 0x6fa   : > { %v5674_v34 = vpop.eup %5673  ;;  %5699 = vpow2.f32 %v5375_v49  ;;  %v3814_v2 = vadd.f32 1.0, %v5672_v5 }
 0x6fb   : > { %v5676_v31 = vpop.eup %5675  ;;  %5701 = vrcp.f32 %v3886_v61  ;;  %v3689_v52 = vadd.f32 1.0, %v5674_v34  ;;  %v13218_v61 = vld [vmem:[#allocation96_spill] sm:$0xff] }
 0x6fc   : > { %v5678_v17 = vpop.eup %5677  ;;  %5703 = vrcp.f32 %v3814_v2  ;;  %v3723_v40 = vmul.f32 %v5676_v31, %v13209_v45  ;;  %v13220_v2 = vld [vmem:[#allocation62_spill] sm:$0xff] }
 0x6fd   : > { %v5680_v59 = vpop.eup %5679  ;;  %5705 = vrcp.f32 %v3677_v8  ;;  %v3888_v30 = vadd.f32 1.0, %v5678_v17 }
 0x6fe   : > { %v5682_v22 = vpop.eup %5681  ;;  %5707 = vrcp.f32 %v3680_v51  ;;  %v3887_v43 = vadd.f32 1.0, %v5680_v59 }
 0x6ff   : > { %v5684_v27 = vpop.eup %5683  ;;  %5709 = vrcp.f32 %v3888_v30  ;;  %v3681_v50 = vadd.f32 1.0, %v5682_v22 }
 0x700   : > { %v5686_v62 = vpop.eup %5685  ;;  %5711 = vrcp.f32 %v3685_v57  ;;  %v3727_v58 = vmul.f32 %v5684_v27, %v13210_v38 }
 0x701   : > { %v5688_v29 = vpop.eup %5687  ;;  %v3898_v42 = vmul.f32 %v5686_v62, %v13209_v45  ;;  %5713 = vrcp.f32 %v3688_v19  ;;  %v3899_v7 = vmul.f32 %v5686_v62, %v13212_v1 }
 0x702   : > { %v5690_v47 = vpop.eup %5689  ;;  %v3902_v6 = vmul.f32 %v5688_v29, %v13210_v38  ;;  %5715 = vrcp.f32 %v3887_v43  ;;  %v3903_v34 = vmul.f32 %v5688_v29, %v13218_v61  ;;  %v13221_v43 = vld [vmem:[#allocation61_spill] sm:$0xff] }
 0x703   : > { %v5692_v10 = vpop.eup %5691  ;;  %v10173_v44 = vadd.f32 %v3898_v42, %v3723_v40  ;;  %v3889_v60 = vadd.f32 1.0, %v5690_v47  ;;  %5717 = vrcp.f32 %v3678_v39  ;;  %v13222_v39 = vld [vmem:[#allocation36_spill] sm:$0xff] }
 0x704   : > { %v5694_v53 = vpop.eup %5693  ;;  %v10176_v23 = vadd.f32 %v3902_v6, %v3727_v58  ;;  %5719 = vrcp.f32 %v3681_v50  ;;  %v3724_v0 = vmul.f32 %v5692_v10, %v13212_v1  ;;  %v13223_v58 = vld [vmem:[#allocation34_spill] sm:$0xff]  ;;  %v13225_v1 = vld [vmem:[#allocation65_spill] sm:$0xff] }
 0x705   : > { %13211 = vst [vmem:[#allocation98_spill] sm:$0xff] %v10173_v44  ;;  %v5696_v63 = vpop.eup %5695  ;;  %v3906_v21 = vmul.f32 %v5694_v53, %v13213_v16  ;;  %3930 = vrot.lane.b32.xlu1 %v10173_v44, %s5987_s26  ;;  %v3907_v24 = vmul.f32 %v5694_v53, %v13216_v26  ;;  %5721 = vrcp.f32 %v3889_v60 }
 0x706   : > { %v5698_v4 = vpop.eup %5697  ;;  %3932 = vrot.lane.b32.xlu0 %v10176_v23, %s5987_s26  ;;  %v10189_v9 = vadd.f32 %v3899_v7, %v3724_v0  ;;  %5723 = vrcp.f32 %v3686_v15  ;;  %v3690_v57 = vadd.f32 1.0, %v5696_v63 }
 0x707   : > { %v5700_v14 = vpop.eup %5699  ;;  %v10187_v12 = vadd.f32 %v3906_v21, %v3731_v48  ;;  %5725 = vrcp.f32 %v3689_v52  ;;  %v3735_v56 = vmul.f32 %v5698_v4, %v13217_v54  ;;  %v10201_v51 = vadd.f32 %v3907_v24, %v3732_v32  ;;  %v13226_v4 = vld [vmem:[#allocation42_spill] sm:$0xff]  ;;  %v13228_v32 = vld [vmem:[#allocation64_spill] sm:$0xff] }
 0x708   : > { %v5702_v41 = vpop.eup %5701  ;;  %13215 = vst [vmem:[#allocation38_spill] sm:$0xff] %v10189_v9  ;;  %v3682_v49 = vadd.f32 1.0, %v5700_v14 }
 0x709   : > { %13214 = vst [vmem:[#allocation183_spill] sm:$0xff] %v10187_v12  ;;  %v5704_v18 = vpop.eup %5703  ;;  %3934 = vrot.lane.b32.xlu1 %v10187_v12, %s5987_s26  ;;  %13219 = vst [vmem:[#allocation85_spill] sm:$0xff] %v10201_v51  ;;  %v3900_v55 = vmul.f32 %v5702_v41, %v13220_v2  ;;  %v3901_v6 = vmul.f32 %v5702_v41, %v13223_v58 }
 0x70a   : > { %v5706_v46 = vpop.eup %5705  ;;  %v3910_v5 = vmul.f32 %v5704_v18, %v13217_v54  ;;  %3938 = vrot.lane.b32.xlu0 %v10189_v9, %s5987_s26  ;;  %5727 = vrcp.f32 %v3682_v49  ;;  %v3911_v29 = vmul.f32 %v5704_v18, %v13221_v43 }
 0x70b   : > { %v5708_v8 = vpop.eup %5707  ;;  %v3725_v22 = vmul.f32 %v5706_v46, %v13220_v2  ;;  %5729 = vrcp.f32 %v3690_v57 }
 0x70c   : > { %v10204_v31 = vadd.f32 %v3910_v5, %v3735_v56  ;;  %v5710_v17 = vpop.eup %5709  ;;  %v3728_v30 = vmul.f32 %v5708_v8, %v13218_v61 }
 0x70d   : > { %v5712_v59 = vpop.eup %5711  ;;  %v10214_v62 = vadd.f32 %v3900_v55, %v3725_v22  ;;  %v3908_v45 = vmul.f32 %v5710_v17, %v13222_v39  ;;  %v3909_v52 = vmul.f32 %v5710_v17, %v13226_v4 }
 0x70e   : > { %3936 = vrot.lane.b32.xlu1 %v10204_v31, %s5987_s26  ;;  %3942 = vrot.lane.b32.xlu0 %v10201_v51, %s5987_s26  ;;  %v5714_v19 = vpop.eup %5713  ;;  %v10212_v27 = vadd.f32 %v3903_v34, %v3728_v30  ;;  %v3733_v50 = vmul.f32 %v5712_v59, %v13222_v39 }
 0x70f   : > { %v5716_v40 = vpop.eup %5715  ;;  %v3736_v47 = vmul.f32 %v5714_v19, %v13221_v43 }
 0x710   : > { %v5718_v42 = vpop.eup %5717  ;;  %v10227_v53 = vadd.f32 %v3908_v45, %v3733_v50  ;;  %v3904_v7 = vmul.f32 %v5716_v40, %v13225_v1  ;;  %v3905_v46 = vmul.f32 %v5716_v40, %v13228_v32 }
 0x711   : > { %v5720_v38 = vpop.eup %5719  ;;  %v10225_v10 = vadd.f32 %v3911_v29, %v3736_v47  ;;  %v3726_v15 = vmul.f32 %v5718_v42, %v13223_v58 }
 0x712   : > { %3940 = vrot.lane.b32.xlu1 %v10212_v27, %s5987_s26  ;;  %3946 = vrot.lane.b32.xlu0 %v10214_v62, %s5987_s26  ;;  %13224 = vst [vmem:[#allocation166_spill] sm:$0xff] %v10227_v53  ;;  %v5722_v60 = vpop.eup %5721  ;;  %v3729_v16 = vmul.f32 %v5720_v38, %v13225_v1 }
 0x713   : > { %v5724_v63 = vpop.eup %5723  ;;  %v10236_v21 = vadd.f32 %v3901_v6, %v3726_v15  ;;  %v3912_v14 = vmul.f32 %v5722_v60, %v13162_v33  ;;  %v3913_v5 = vmul.f32 %v5722_v60, %v13185_v28 }
 0x714   : > { %v5726_v48 = vpop.eup %5725  ;;  %v10239_v0 = vadd.f32 %v3904_v7, %v3729_v16  ;;  %v3734_v41 = vmul.f32 %v5724_v63, %v13226_v4 }
 0x715   : > { %v3737_v26 = vmul.f32 %v5726_v48, %v13162_v33 }
 0x716   : > { %3944 = vrot.lane.b32.xlu1 %v10225_v10, %s5987_s26  ;;  %3950 = vrot.lane.b32.xlu0 %v10227_v53, %s5987_s26  ;;  %v10248_v18 = vadd.f32 %v3909_v52, %v3734_v41 }
 0x717   : > { %v5728_v24 = vpop.eup %5727  ;;  %v10251_v49 = vadd.f32 %v3912_v14, %v3737_v26 }
 0x718   : > { %13227 = vst [vmem:[#allocation31_spill] sm:$0xff] %v10248_v18  ;;  %v3730_v54 = vmul.f32 %v5728_v24, %v13228_v32  ;;  %v5730_v33 = vpop.eup %5729 }
 0x719   : > { %13229 = vst [vmem:[#allocation185_spill] sm:$0xff] %v10251_v49  ;;  %v3738_v8 = vmul.f32 %v5730_v33, %v13185_v28 }
 0x71a   : > { %3948 = vrot.lane.b32.xlu1 %v10239_v0, %s5987_s26  ;;  %3954 = vrot.lane.b32.xlu0 %v10236_v21, %s5987_s26  ;;  %v10258_v56 = vadd.f32 %v3905_v46, %v3730_v54 }
 0x71b   : > { %v10266_v61 = vadd.f32 %v3913_v5, %v3738_v8 }
 0x71c   : > { %13230 = vst [vmem:[#allocation87_spill] sm:$0xff] %v10258_v56 }
 0x71e   : > { %3952 = vrot.lane.b32.xlu1 %v10251_v49, %s5987_s26  ;;  %3958 = vrot.lane.b32.xlu0 %v10248_v18, %s5987_s26 }
 0x722   : > { %3956 = vrot.lane.b32.xlu1 %v10258_v56, %s5987_s26  ;;  %4034 = vrot.lane.b32.xlu0 %v10173_v44, %s5988_s24 }
 0x726   : > { %3960 = vrot.lane.b32.xlu1 %v10266_v61, %s5987_s26  ;;  %4038 = vrot.lane.b32.xlu0 %v10187_v12, %s5988_s24  ;;  %s13298_s26 = sld [smem:[#allocation237_spill]] }
 0x72a   : > { %4036 = vrot.lane.b32.xlu1 %v10176_v23, %s5988_s24  ;;  %4042 = vrot.lane.b32.xlu0 %v10189_v9, %s5988_s24 }
 0x72e   : > { %4040 = vrot.lane.b32.xlu1 %v10204_v31, %s5988_s24  ;;  %4046 = vrot.lane.b32.xlu0 %v10201_v51, %s5988_s24 }
 0x732   : > { %4044 = vrot.lane.b32.xlu1 %v10212_v27, %s5988_s24  ;;  %4050 = vrot.lane.b32.xlu0 %v10214_v62, %s5988_s24 }
 0x736   : > { %4048 = vrot.lane.b32.xlu1 %v10225_v10, %s5988_s24  ;;  %4054 = vrot.lane.b32.xlu0 %v10227_v53, %s5988_s24 }
 0x73a   : > { %4052 = vrot.lane.b32.xlu1 %v10239_v0, %s5988_s24  ;;  %4058 = vrot.lane.b32.xlu0 %v10236_v21, %s5988_s24 }
 0x73e   : > { %4056 = vrot.lane.b32.xlu1 %v10251_v49, %s5988_s24  ;;  %4062 = vrot.lane.b32.xlu0 %v10248_v18, %s5988_s24 }
 0x742   : > { %4060 = vrot.lane.b32.xlu1 %v10258_v56, %s5988_s24  ;;  %4158 = vrot.lane.b32.xlu0 %v10201_v51, %s5989_s3 }
 0x746   : > { %4064 = vrot.lane.b32.xlu1 %v10266_v61, %s5988_s24  ;;  %4166 = vrot.lane.b32.xlu0 %v10227_v53, %s5989_s3  ;;  %s11725_s24 = scalar_lea.vmem [#allocation13], %s5293_s25 }
 0x74a   : > { %4150 = vrot.lane.b32.xlu1 %v10187_v12, %s5989_s3  ;;  %4174 = vrot.lane.b32.xlu0 %v10248_v18, %s5989_s3 }
 0x74e   : > { %4152 = vrot.lane.b32.xlu1 %v10204_v31, %s5989_s3  ;;  %4270 = vrot.lane.b32.xlu0 %v10201_v51, %s5990_s1 }
 0x752   : > { %4160 = vrot.lane.b32.xlu1 %v10225_v10, %s5989_s3  ;;  %4278 = vrot.lane.b32.xlu0 %v10227_v53, %s5990_s1 }
 0x756   : > { %4168 = vrot.lane.b32.xlu1 %v10251_v49, %s5989_s3  ;;  %4286 = vrot.lane.b32.xlu0 %v10248_v18, %s5990_s1 }
 0x75a   : > { %4176 = vrot.lane.b32.xlu1 %v10266_v61, %s5989_s3  ;;  %4148 = vrot.lane.b32.xlu0 %v10176_v23, %s5989_s3 }
 0x75e   : > { %4262 = vrot.lane.b32.xlu1 %v10187_v12, %s5990_s1  ;;  %4156 = vrot.lane.b32.xlu0 %v10212_v27, %s5989_s3 }
 0x762   : > { %4264 = vrot.lane.b32.xlu1 %v10204_v31, %s5990_s1  ;;  %4164 = vrot.lane.b32.xlu0 %v10239_v0, %s5989_s3 }
 0x766   : > { %4272 = vrot.lane.b32.xlu1 %v10225_v10, %s5990_s1  ;;  %4172 = vrot.lane.b32.xlu0 %v10258_v56, %s5989_s3 }
 0x76a   : > { %4280 = vrot.lane.b32.xlu1 %v10251_v49, %s5990_s1  ;;  %4258 = vrot.lane.b32.xlu0 %v10173_v44, %s5990_s1 }
 0x76e   : > { %4288 = vrot.lane.b32.xlu1 %v10266_v61, %s5990_s1  ;;  %4266 = vrot.lane.b32.xlu0 %v10189_v9, %s5990_s1 }
 0x772   : > { %4146 = vrot.lane.b32.xlu1 %v10173_v44, %s5989_s3  ;;  %4274 = vrot.lane.b32.xlu0 %v10214_v62, %s5990_s1 }
 0x776   : > { %4154 = vrot.lane.b32.xlu1 %v10189_v9, %s5989_s3  ;;  %4282 = vrot.lane.b32.xlu0 %v10236_v21, %s5990_s1 }
 0x777   : > { %v10352_v28 = vpop.permute.xlu1 %3930 }
 0x778   : > { %13231 = vst [vmem:[#allocation41_spill] sm:$0xff] %v10352_v28  ;;  %v10354_v34 = vpop.permute.xlu0 %3932  ;;  %v13274_v28 = vld [vmem:[#allocation171_spill] sm:$0xff] }
 0x77a   : > { %4162 = vrot.lane.b32.xlu1 %v10214_v62, %s5989_s3  ;;  %4424 = vrot.lane.b32.xlu0 %v10204_v31, %s5991_s19 }
 0x77b   : > { %v10360_v2 = vpop.permute.xlu1 %3934 }
 0x77c   : > { %13232 = vst [vmem:[#allocation193_spill] sm:$0xff] %v10360_v2  ;;  %v10362_v55 = vpop.permute.xlu0 %3938 }
 0x77d   : > { %13233 = vst [vmem:[#allocation172_spill] sm:$0xff] %v10362_v55  ;;  %v13276_v55 = vld [vmem:[#allocation161_spill] sm:$0xff] }
 0x77e   : > { %4170 = vrot.lane.b32.xlu1 %v10236_v21, %s5989_s3  ;;  %4432 = vrot.lane.b32.xlu0 %v10225_v10, %s5991_s19  ;;  %s5405_s3 = sshll.u32 %s6127_s2, 11  ;;  %s5129_s2 = scalar_lea.sflag [#allocation4], %s6283_s28 }
 0x77f   : > { %s11750_s27 = scalar_lea.hbm %s13496_s18, %s5405_s3 }
 0x780   : > { %v10368_v17 = vpop.permute.xlu0 %3942  ;;  %v10370_v59 = vpop.permute.xlu1 %3936 }
 0x781   : > { %13234 = vst [vmem:[#allocation174_spill] sm:$0xff] %v10368_v17 }
 0x782   : > { %4260 = vrot.lane.b32.xlu1 %v10176_v23, %s5990_s1  ;;  %4440 = vrot.lane.b32.xlu0 %v10251_v49, %s5991_s19 }
 0x784   : > { %v10376_v57 = vpop.permute.xlu0 %3946  ;;  %v10378_v30 = vpop.permute.xlu1 %3940 }
 0x785   : > { %13235 = vst [vmem:[#allocation195_spill] sm:$0xff] %v10376_v57 }
 0x786   : > { %4268 = vrot.lane.b32.xlu1 %v10212_v27, %s5990_s1  ;;  %4448 = vrot.lane.b32.xlu0 %v10266_v61, %s5991_s19 }
 0x788   : > { %v10384_v22 = vpop.permute.xlu0 %3950  ;;  %v10386_v19 = vpop.permute.xlu1 %3944 }
 0x789   : > { %13236 = vst [vmem:[#allocation189_spill] sm:$0xff] %v10384_v22 }
 0x78a   : > { %4276 = vrot.lane.b32.xlu1 %v10239_v0, %s5990_s1  ;;  %4534 = vrot.lane.b32.xlu0 %v10187_v12, %s5992_s5 }
 0x78c   : > { %v10392_v43 = vpop.permute.xlu0 %3954  ;;  %v10394_v29 = vpop.permute.xlu1 %3948 }
 0x78d   : > { %13237 = vst [vmem:[#allocation168_spill] sm:$0xff] %v10392_v43  ;;  %v3967_v17 = vsel %vm1240_vm1, %v10378_v30, %v10394_v29 }
 0x78e   : > { %4284 = vrot.lane.b32.xlu1 %v10258_v56, %s5990_s1  ;;  %4542 = vrot.lane.b32.xlu0 %v10201_v51, %s5992_s5  ;;  %s5142_s1 = sshll.u32 %s11725_s24, 4  ;;  %s11752_s1 = int_to_ptr.vmem [resolvable:$true] %s5142_s1 }
 0x78f   : > { %s5900_s8 = scalar_lea.vmem %s11752_s1, 2048 }
 0x790   : > { %v10400_v39 = vpop.permute.xlu0 %3958  ;;  %v10402_v45 = vpop.permute.xlu1 %3952  ;;  %p5901_p10 = scmp.ne.s32.totalorder %s11752_s1, %s5900_s8 }
 0x791   : > { %13238 = vst [vmem:[#allocation170_spill] sm:$0xff] %v10400_v39 }
 0x792   : > { %4422 = vrot.lane.b32.xlu1 %v10187_v12, %s5991_s19  ;;  %4550 = vrot.lane.b32.xlu0 %v10227_v53, %s5992_s5  ;;  %p5902_p13 = pnand %p5901_p10, %p13497_p0 }
 0x794   : > { %v10408_v40 = vpop.permute.xlu0 %4034  ;;  %v10410_v42 = vpop.permute.xlu1 %3956  ;;  %p5903_p5 = pneg %p5902_p13 }
 0x795   : > { %13239 = vst [vmem:[#allocation191_spill] sm:$0xff] %v10408_v40 }
 0x796   : > { %4430 = vrot.lane.b32.xlu1 %v10201_v51, %s5991_s19  ;;  %4558 = vrot.lane.b32.xlu0 %v10248_v18, %s5992_s5 }
 0x798   : > { %v10416_v47 = vpop.permute.xlu0 %4038  ;;  %v10418_v50 = vpop.permute.xlu1 %3960 }
 0x799   : > { %13240 = vst [vmem:[#allocation197_spill] sm:$0xff] %v10416_v47 }
 0x79a   : > { %4438 = vrot.lane.b32.xlu1 %v10227_v53, %s5991_s19  ;;  %4420 = vrot.lane.b32.xlu0 %v10176_v23, %s5991_s19 }
 0x79c   : > { %v10424_v38 = vpop.permute.xlu0 %4042  ;;  %v10426_v58 = vpop.permute.xlu1 %4036 }
 0x79d   : > { %13241 = vst [vmem:[#allocation176_spill] sm:$0xff] %v10424_v38 }
 0x79e   : > { %4446 = vrot.lane.b32.xlu1 %v10248_v18, %s5991_s19  ;;  %4428 = vrot.lane.b32.xlu0 %v10212_v27, %s5991_s19 }
 0x7a0   : > { %v10432_v6 = vpop.permute.xlu0 %4046  ;;  %v10434_v1 = vpop.permute.xlu1 %4040 }
 0x7a1   : > { %13242 = vst [vmem:[#allocation23_spill] sm:$0xff] %v10432_v6 }
 0x7a2   : > { %4536 = vrot.lane.b32.xlu1 %v10204_v31, %s5992_s5  ;;  %4436 = vrot.lane.b32.xlu0 %v10239_v0, %s5991_s19 }
 0x7a4   : > { %v10440_v7 = vpop.permute.xlu0 %4050  ;;  %v10442_v60 = vpop.permute.xlu1 %4044 }
 0x7a5   : > { %13243 = vst [vmem:[#allocation178_spill] sm:$0xff] %v10440_v7 }
 0x7a6   : > { %4544 = vrot.lane.b32.xlu1 %v10225_v10, %s5992_s5  ;;  %4444 = vrot.lane.b32.xlu0 %v10258_v56, %s5991_s19 }
 0x7a8   : > { %v10448_v63 = vpop.permute.xlu0 %4054  ;;  %v10450_v15 = vpop.permute.xlu1 %4048 }
 0x7a9   : > { %13244 = vst [vmem:[#allocation198_spill] sm:$0xff] %v10448_v63 }
 0x7aa   : > { %4552 = vrot.lane.b32.xlu1 %v10251_v49, %s5992_s5  ;;  %4654 = vrot.lane.b32.xlu0 %v10201_v51, %s5993_s4 }
 0x7ac   : > { %v10456_v16 = vpop.permute.xlu0 %4058  ;;  %v10458_v48 = vpop.permute.xlu1 %4052 }
 0x7ad   : > { %13245 = vst [vmem:[#allocation115_spill] sm:$0xff] %v10456_v16 }
 0x7ae   : > { %4560 = vrot.lane.b32.xlu1 %v10266_v61, %s5992_s5  ;;  %4662 = vrot.lane.b32.xlu0 %v10227_v53, %s5993_s4 }
 0x7b0   : > { %v10464_v4 = vpop.permute.xlu0 %4062  ;;  %v10466_v52 = vpop.permute.xlu1 %4056 }
 0x7b1   : > { %13246 = vst [vmem:[#allocation182_spill] sm:$0xff] %v10464_v4 }
 0x7b2   : > { %4418 = vrot.lane.b32.xlu1 %v10173_v44, %s5991_s19  ;;  %4670 = vrot.lane.b32.xlu0 %v10248_v18, %s5993_s4 }
 0x7b4   : > { %v10472_v14 = vpop.permute.xlu0 %4158  ;;  %v10474_v41 = vpop.permute.xlu1 %4060 }
 0x7b5   : > { %13247 = vst [vmem:[#allocation200_spill] sm:$0xff] %v10472_v14 }
 0x7b6   : > { %4426 = vrot.lane.b32.xlu1 %v10189_v9, %s5991_s19  ;;  %4532 = vrot.lane.b32.xlu0 %v10176_v23, %s5992_s5 }
 0x7b8   : > { %v10480_v26 = vpop.permute.xlu0 %4166  ;;  %v10482_v24 = vpop.permute.xlu1 %4064 }
 0x7b9   : > { %13248 = vst [vmem:[#allocation180_spill] sm:$0xff] %v10480_v26 }
 0x7ba   : > { %4434 = vrot.lane.b32.xlu1 %v10214_v62, %s5991_s19  ;;  %4540 = vrot.lane.b32.xlu0 %v10212_v27, %s5992_s5 }
 0x7bc   : > { %v10488_v32 = vpop.permute.xlu0 %4174  ;;  %v10490_v46 = vpop.permute.xlu1 %4150 }
 0x7bd   : > { %13249 = vst [vmem:[#allocation48_spill] sm:$0xff] %v10488_v32  ;;  %13250 = vst [vmem:[#allocation188_spill] sm:$0xff] %v10490_v46 }
 0x7be   : > { %4442 = vrot.lane.b32.xlu1 %v10236_v21, %s5991_s19  ;;  %4548 = vrot.lane.b32.xlu0 %v10239_v0, %s5992_s5 }
 0x7c0   : > { %v10496_v54 = vpop.permute.xlu0 %4270  ;;  %v10498_v33 = vpop.permute.xlu1 %4152 }
 0x7c1   : > { %13251 = vst [vmem:[#allocation199_spill] sm:$0xff] %v10496_v54 }
 0x7c2   : > { %4646 = vrot.lane.b32.xlu1 %v10187_v12, %s5993_s4  ;;  %4556 = vrot.lane.b32.xlu0 %v10258_v56, %s5992_s5 }
 0x7c4   : > { %v4279_v5 = vpop.permute.xlu0 %4278  ;;  %v10504_v8 = vpop.permute.xlu1 %4160 }
 0x7c5   : > { %v10509_v35 = vsel %vm1511_vm4, %v10496_v54, %v4279_v5  ;;  %v10534_v54 = vld [vmem:[%s11814_s15 + $0x10] sm:$0xff] }
 0x7c6   : > { %13252 = vst [vmem:[#allocation202_spill] sm:$0xff] %v10509_v35  ;;  %4648 = vrot.lane.b32.xlu1 %v10204_v31, %s5993_s4  ;;  %4711 = vperm.xlu0 %5554, %v10516_v37   ;;  %v13256_v35 = vmov 8  }
 0x7c8   : > { %v10519_v11 = vpop.permute.xlu0 %4286  ;;  %v10521_v3 = vpop.permute.xlu1 %4168 }
 0x7c9   : > { %13254 = vst [vmem:[#allocation186_spill] sm:$0xff] %v10519_v11  ;;  %v10526_v46 = vsel %vm1511_vm4, %v4279_v5, %v10519_v11 }
 0x7ca   : > { %13255 = vst [vmem:[#allocation204_spill] sm:$0xff] %v10526_v46  ;;  %4656 = vrot.lane.b32.xlu1 %v10225_v10, %s5993_s4  ;;  %5557 = vset.pattern.permute.xlu0 %v13256_v35 }
 0x7cb   : > { %4827 = vperm.xlu0 %5557, %v10534_v54  }
 0x7cc   : > { %v4149_v32 = vpop.permute.xlu0 %4148  ;;  %v10537_v14 = vpop.permute.xlu1 %4176 }
 0x7ce   : > { %4664 = vrot.lane.b32.xlu1 %v10251_v49, %s5993_s4 }
 0x7cf   : > { %4766 = vrot.lane.b32.xlu0 %v10201_v51, %s5994_s29  ;;  %v4075_v51 = vsel %vm1329_vm2, %v10426_v58, %v10442_v60 }
 0x7d0   : > { %v4157_v5 = vpop.permute.xlu0 %4156  ;;  %v10543_v46 = vpop.permute.xlu1 %4262 }
 0x7d1   : > { %13257 = vst [vmem:[#allocation201_spill] sm:$0xff] %v10543_v46  ;;  %v4187_v11 = vsel %vm1418_vm3, %v4149_v32, %v4157_v5  ;;  %v5740_v46 = vld [vmem:[%s11814_s15 + $0x18] sm:$0xff] }
 0x7d2   : > { %4672 = vrot.lane.b32.xlu1 %v10266_v61, %s5993_s4 }
 0x7d3   : > { %4774 = vrot.lane.b32.xlu0 %v10227_v53, %s5994_s29 }
 0x7d4   : > { %v4165_v26 = vpop.permute.xlu0 %4164  ;;  %v10551_v4 = vpop.permute.xlu1 %4264 }
 0x7d5   : > { %v10555_v39 = vsel %vm1418_vm3, %v4157_v5, %v4165_v26  ;;  %v13258_v5 = vmov 7  }
 0x7d6   : > { %4831 = vperm.xlu1 %5555, %v5740_v46  }
 0x7d7   : > { %4782 = vrot.lane.b32.xlu0 %v10248_v18, %s5994_s29 }
 0x7d8   : > { %v4173_v16 = vpop.permute.xlu0 %4172  ;;  %v10562_v63 = vpop.permute.xlu1 %4272 }
 0x7d9   : > { %v10566_v43 = vsel %vm1418_vm3, %v4165_v26, %v4173_v16  ;;  %v10570_v7 = vsel %vm1418_vm3, %v4173_v16, %v4149_v32 }
 0x7da   : > { %4530 = vrot.lane.b32.xlu1 %v10173_v44, %s5992_s5 }
 0x7db   : > { %5556 = vset.pattern.permute.xlu1 %v13258_v5  ;;  %4642 = vrot.lane.b32.xlu0 %v10173_v44, %s5993_s4  ;;  %v3975_v44 = vsel %vm1240_vm1, %v10410_v42, %v10354_v34 }
 0x7dc   : > { %v4259_v46 = vpop.permute.xlu0 %4258  ;;  %v10577_v47 = vpop.permute.xlu1 %4280 }
 0x7dd   : > { %13259 = vst [vmem:[#allocation184_spill] sm:$0xff] %v10577_v47 }
 0x7de   : > { %4538 = vrot.lane.b32.xlu1 %v10189_v9, %s5992_s5 }
 0x7df   : > { %4650 = vrot.lane.b32.xlu0 %v10189_v9, %s5993_s4 }
 0x7e0   : > { %v4267_v26 = vpop.permute.xlu0 %4266  ;;  %v10583_v16 = vpop.permute.xlu1 %4288 }
 0x7e1   : > { %v10587_v32 = vsel %vm1511_vm4, %v4259_v46, %v4267_v26 }
 0x7e2   : > { %13260 = vst [vmem:[#allocation192_spill] sm:$0xff] %v10587_v32  ;;  %4546 = vrot.lane.b32.xlu1 %v10214_v62, %s5992_s5 }
 0x7e3   : > { %4658 = vrot.lane.b32.xlu0 %v10214_v62, %s5993_s4 }
 0x7e4   : > { %v4275_v5 = vpop.permute.xlu0 %4274  ;;  %v10593_v6 = vpop.permute.xlu1 %4146 }
 0x7e5   : > { %13261 = vst [vmem:[#allocation203_spill] sm:$0xff] %v10593_v6  ;;  %v10597_v53 = vsel %vm1511_vm4, %v4267_v26, %v4275_v5  ;;  %v5741_v26 = vld [vmem:[%s11814_s15] sm:$0xff] }
 0x7e6   : > { %13262 = vst [vmem:[#allocation190_spill] sm:$0xff] %v10597_v53  ;;  %4554 = vrot.lane.b32.xlu1 %v10236_v21, %s5992_s5  ;;  %s6003_s5 = smov [#allocation13]  }
 0x7e7   : > { %4666 = vrot.lane.b32.xlu0 %v10236_v21, %s5993_s4  ;;  %s5904_s21 = sshll.u32 %s6003_s5, 4  ;;  %s5905_s21 = int_to_ptr.vmem [resolvable:$false] %s5904_s21 }
 0x7e8   : > { %v4283_v32 = vpop.permute.xlu0 %4282  ;;  %v10603_v18 = vpop.permute.xlu1 %4154  ;;  %p5907_p9 = scmp.lt.s32.totalorder %s11752_s1, %s5905_s21 }
 0x7e9   : > { %13263 = vst [vmem:[#allocation162_spill] sm:$0xff] %v10603_v18  ;;  %v10607_v40 = vsel %vm1511_vm4, %v4275_v5, %v4283_v32  ;;  %v10611_v6 = vsel %vm1511_vm4, %v4283_v32, %v4259_v46  ;;  %v3971_v46 = vsel %vm1240_vm1, %v10354_v34, %v10378_v30  ;;  %v13267_v32 = vld [vmem:[#allocation120_spill] sm:$0xff]  ;;  %v4869_v30 = vld [vmem:[%s11815_s16 + $0x18] sm:$0xff] }
 0x7ea   : > { %13264 = vst [vmem:[#allocation217_spill] sm:$0xff] %v10607_v40  ;;  %13265 = vst [vmem:[#allocation216_spill] sm:$0xff] %v10611_v6  ;;  %4707 = vperm.xlu1 %5556, %v5741_v26   ;;  %v4087_v40 = vmul.f32 %v4075_v51, %v13267_v32  ;;  %v13268_v6 = vmov 0   ;;  %v13273_v51 = vld [vmem:[#allocation125_spill] sm:$0xff] }
 0x7eb   : > { %4819 = vperm.xlu0 %5557, %v5741_v26  }
 0x7ec   : > { %v4425_v53 = vpop.permute.xlu0 %4424  ;;  %v4163_v38 = vpop.permute.xlu1 %4162 }
 0x7ed   : > { %v10623_v5 = vsel %vm1418_vm3, %v10603_v18, %v4163_v38 }
 0x7ee   : > { %13266 = vst [vmem:[#allocation70_spill] sm:$0xff] %v10623_v5  ;;  %4758 = vrot.lane.b32.xlu1 %v10187_v12, %s5994_s29  ;;  %v13272_v12 = vld [vmem:[#allocation117_spill] sm:$0xff] }
 0x7ef   : > { %5559 = vset.pattern.permute.xlu1 %v13256_v35  ;;  %5558 = vset.pattern.permute.xlu0 %v13268_v6  ;;  %v3983_v2 = vmul.f32 %v3971_v46, %v13272_v12  ;;  %v4071_v35 = vsel %vm1329_vm2, %v10442_v60, %v10458_v48  ;;  %v13277_v60 = vld [vmem:[#allocation121_spill] sm:$0xff]  ;;  %v13280_v6 = vld [vmem:[#allocation126_spill] sm:$0xff] }
 0x7f0   : > { %v4433_v22 = vpop.permute.xlu0 %4432  ;;  %v10634_v57 = vpop.permute.xlu1 %4170  ;;  %4000 = vperm.xlu0 %5558, %v5741_v26   ;;  %v4199_v26 = vmul.f32 %v4187_v11, %v13273_v51  ;;  %v4088_v36 = vmul.f32 %v4071_v35, %v13277_v60  ;;  %v4079_v11 = vsel %vm1329_vm2, %v10474_v41, %v10426_v58  ;;  %v3963_v58 = vsel %vm1240_vm1, %v10394_v29, %v10410_v42  ;;  %v13284_v42 = vld [vmem:[#allocation123_spill] sm:$0xff] }
 0x7f1   : > { %13269 = vst [vmem:[#allocation46_spill] sm:$0xff] %v10634_v57  ;;  %v10638_v5 = vsel %vm1608_vm5, %v4425_v53, %v4433_v22  ;;  %v10643_v18 = vsel %vm1418_vm3, %v4163_v38, %v10634_v57  ;;  %v4119_v38 = vmul.f32 %v13274_v28, %v4087_v40  ;;  %v4023_v20 = vmul.f32 %v13276_v55, %v3983_v2  ;;  %v13278_v40 = vld [vmem:[#allocation116_spill] sm:$0xff] }
 0x7f2   : > { %13270 = vst [vmem:[#allocation205_spill] sm:$0xff] %v10638_v5  ;;  %13271 = vst [vmem:[#allocation206_spill] sm:$0xff] %v10643_v18  ;;  %4760 = vrot.lane.b32.xlu1 %v10204_v31, %s5994_s29  ;;  %v4067_v2 = vsel %vm1329_vm2, %v10458_v48, %v10474_v41  ;;  %v13281_v5 = vld [vmem:[#allocation122_spill] sm:$0xff] }
 0x7f3   : > { %v4086_v48 = vmul.f32 %v4079_v11, %v13281_v5 }
 0x7f4   : > { %v4441_v18 = vpop.permute.xlu0 %4440  ;;  %v4261_v57 = vpop.permute.xlu1 %4260  ;;  %4010 = vperm.xlu0 %5558, %v10534_v54   ;;  %v3984_v54 = vmul.f32 %v3967_v17, %v13278_v40  ;;  %v4200_v17 = vmul.f32 %v10555_v39, %v13280_v6  ;;  %v4089_v39 = vmul.f32 %v4067_v2, %v13284_v42  ;;  %v13290_v6 = vld [vmem:[#allocation35_spill] sm:$0xff] }
 0x7f5   : > { %v10661_v46 = vsel %vm1608_vm5, %v4433_v22, %v4441_v18  ;;  %v13279_v22 = vld [vmem:[#allocation37_spill] sm:$0xff] }
 0x7f6   : > { %13275 = vst [vmem:[#allocation207_spill] sm:$0xff] %v10661_v46  ;;  %4768 = vrot.lane.b32.xlu1 %v10225_v10, %s5994_s29  ;;  %v4231_v35 = vmul.f32 %v13279_v22, %v4199_v26  ;;  %v4135_v46 = vadd.f32 %v4119_v38, %v4023_v20  ;;  %v4120_v20 = vmul.f32 %v13274_v28, %v4088_v36  ;;  %v13285_v26 = vld [vmem:[#allocation130_spill] sm:$0xff]  ;;  %v13289_v36 = vld [vmem:[#allocation129_spill] sm:$0xff] }
 0x7f7   : > { %v4024_v11 = vmul.f32 %v13276_v55, %v3984_v54  ;;  %v4201_v2 = vmul.f32 %v10566_v43, %v13289_v36  ;;  %v4118_v54 = vmul.f32 %v13274_v28, %v4086_v48 }
 0x7f8   : > { %v4449_v13 = vpop.permute.xlu0 %4448  ;;  %v4269_v37 = vpop.permute.xlu1 %4268  ;;  %4887 = vperm.xlu0 %5558, %v4869_v30  }
 0x7f9   : > { %v10693_v41 = vsel %vm1608_vm5, %v4441_v18, %v4449_v13  ;;  %v10697_v29 = vsel %vm1608_vm5, %v4449_v13, %v4425_v53  ;;  %v4299_v34 = vsel %vm1511_vm4, %v4261_v57, %v4269_v37  ;;  %v13286_v18 = vld [vmem:[#allocation119_spill] sm:$0xff]  ;;  %v4247_v13 = vadd.f32 %v4231_v35, %v4135_v46 }
 0x7fa   : > { %13282 = vst [vmem:[#allocation124_spill] sm:$0xff] %v10693_v41  ;;  %13283 = vst [vmem:[#allocation227_spill] sm:$0xff] %v10697_v29  ;;  %v4311_v38 = vmul.f32 %v4299_v34, %v13285_v26  ;;  %4776 = vrot.lane.b32.xlu1 %v10251_v49, %s5994_s29  ;;  %v3982_v30 = vmul.f32 %v3975_v44, %v13286_v18  ;;  %v13287_v41 = vld [vmem:[#allocation118_spill] sm:$0xff]  ;;  %v4232_v53 = vmul.f32 %v13279_v22, %v4200_v17  ;;  %v13288_v29 = vld [vmem:[#allocation127_spill] sm:$0xff] }
 0x7fb   : > { %v3985_v47 = vmul.f32 %v3963_v58, %v13287_v41  ;;  %v4198_v56 = vmul.f32 %v10570_v7, %v13288_v29  ;;  %v4136_v46 = vadd.f32 %v4120_v20, %v4024_v11  ;;  %v4121_v35 = vmul.f32 %v13274_v28, %v4089_v39  ;;  %v13291_v58 = vld [vmem:[#allocation131_spill] sm:$0xff] }
 0x7fc   : > { %v4343_v34 = vmul.f32 %v13290_v6, %v4311_v38  ;;  %v10715_v26 = vpop.permute.xlu0 %4534  ;;  %v4277_v49 = vpop.permute.xlu1 %4276  ;;  %4762 = vrot.lane.b32.xlu0 %v10189_v9, %s5994_s29  ;;  %v4022_v17 = vmul.f32 %v13276_v55, %v3982_v30  ;;  %v13292_v38 = vld [vmem:[#allocation33_spill] sm:$0xff]  ;;  %v4233_v39 = vmul.f32 %v13279_v22, %v4201_v2  ;;  %v13294_v2 = vld [vmem:[#allocation132_spill] sm:$0xff] }
 0x7fd   : > { %v4295_v44 = vsel %vm1511_vm4, %v4269_v37, %v4277_v49  ;;  %v4025_v48 = vmul.f32 %v13276_v55, %v3985_v47  ;;  %v10732_v9 = vmul.f32 %v13292_v38, %v10176_v23  ;;  %v10736_v37 = vmul.f32 %v13292_v38, %v10212_v27 }
 0x7fe   : > { %v10723_v7 = vadd.f32 %v4343_v34, %v4247_v13  ;;  %v4312_v43 = vmul.f32 %v4295_v44, %v13291_v58  ;;  %4784 = vrot.lane.b32.xlu1 %v10266_v61, %s5994_s29  ;;  %v4248_v28 = vadd.f32 %v4232_v53, %v4136_v46  ;;  %v4230_v20 = vmul.f32 %v13279_v22, %v4198_v56 }
 0x7ff   : > { %v4134_v30 = vadd.f32 %v4118_v54, %v4022_v17  ;;  %v4137_v22 = vadd.f32 %v4121_v35, %v4025_v48  ;;  %v13295_v54 = vld [vmem:[#allocation133_spill] sm:$0xff] }
 0x800   : > { %v4344_v11 = vmul.f32 %v13290_v6, %v4312_v43  ;;  %v4543_v13 = vpop.permute.xlu0 %4542  ;;  %v4285_v34 = vpop.permute.xlu1 %4284  ;;  %4770 = vrot.lane.b32.xlu0 %v10214_v62, %s5994_s29  ;;  %v3973_v43 = vsel %vm1240_vm1, %v10370_v59, %v10386_v19  ;;  %v13296_v35 = vld [vmem:[#allocation101_spill] sm:$0xff] }
 0x801   : > { %v10746_v55 = vsel %vm1947_vm6, %v10715_v26, %v4543_v13  ;;  %v4291_v47 = vsel %vm1511_vm4, %v4277_v49, %v4285_v34  ;;  %v4303_v56 = vsel %vm1511_vm4, %v4285_v34, %v4261_v57  ;;  %v3977_v49 = vsel %vm1240_vm1, %v10418_v50, %v10370_v59 }
 0x802   : > { %13293 = vst [vmem:[#allocation229_spill] sm:$0xff] %v10746_v55  ;;  %v10752_v53 = vadd.f32 %v4344_v11, %v4248_v28  ;;  %v4310_v44 = vmul.f32 %v4303_v56, %v13294_v2  ;;  %v4313_v46 = vmul.f32 %v4291_v47, %v13295_v54  ;;  %4644 = vrot.lane.b32.xlu1 %v10176_v23, %s5993_s4 }
 0x803   : > { %v4081_v57 = vsel %vm1329_vm2, %v10482_v24, %v10434_v1  ;;  %v10772_v17 = vmul.f32 %v13296_v35, %v10204_v31  ;;  %v4246_v48 = vadd.f32 %v4230_v20, %v4134_v30  ;;  %v4249_v28 = vadd.f32 %v4233_v39, %v4137_v22 }
 0x804   : > { %v4342_v11 = vmul.f32 %v13290_v6, %v4310_v44  ;;  %v4345_v34 = vmul.f32 %v13290_v6, %v4313_v46  ;;  %v4551_v47 = vpop.permute.xlu0 %4550  ;;  %v10776_v56 = vpop.permute.xlu1 %4422  ;;  %v3969_v59 = vsel %vm1240_vm1, %v10386_v19, %v10402_v45  ;;  %v4193_v31 = vsel %vm1418_vm3, %v10537_v14, %v10498_v33  ;;  %4778 = vrot.lane.b32.xlu0 %v10236_v21, %s5994_s29 }
 0x805   : > { %v10788_v20 = vmul.f32 %v13296_v35, %v10225_v10  ;;  %v10794_v6 = vsel %vm1947_vm6, %v4543_v13, %v4551_v47  ;;  %v4094_v39 = vmul.f32 %v4081_v57, %v13281_v5  ;;  %v4908_v10 = vld [vmem:[%s13298_s26 + $0x10] sm:$0xff]  ;;  %v10808_v22 = vmul.f32 %v13292_v38, %v10239_v0 }
 0x806   : > { %13297 = vst [vmem:[#allocation196_spill] sm:$0xff] %v10794_v6  ;;  %v10797_v30 = vadd.f32 %v4342_v11, %v4246_v48  ;;  %v10799_v19 = vadd.f32 %v4345_v34, %v4249_v28  ;;  %4652 = vrot.lane.b32.xlu1 %v10212_v27, %s5993_s4  ;;  %v3991_v13 = vmul.f32 %v3973_v43, %v13272_v12 }
 0x807   : > { %v3990_v44 = vmul.f32 %v3977_v49, %v13286_v18  ;;  %v4077_v46 = vsel %vm1329_vm2, %v10434_v1, %v10450_v15  ;;  %v4073_v57 = vsel %vm1329_vm2, %v10450_v15, %v10466_v52  ;;  %v3992_v48 = vmul.f32 %v3969_v59, %v13278_v40 }
 0x808   : > { %v4069_v28 = vsel %vm1329_vm2, %v10466_v52, %v10482_v24  ;;  %v4206_v43 = vmul.f32 %v4193_v31, %v13288_v29  ;;  %v4305_v49 = vsel %vm1511_vm4, %v10583_v16, %v10551_v4  ;;  %v4559_v1 = vpop.permute.xlu0 %4558  ;;  %v4431_v11 = vpop.permute.xlu1 %4430  ;;  %v4189_v15 = vsel %vm1418_vm3, %v10498_v33, %v10504_v8  ;;  %4922 = vperm.xlu0 %5558, %v4908_v10   ;;  %v13302_v31 = vld [vmem:[#allocation224_spill] sm:$0xff] }
 0x809   : > { %v10836_v34 = vsel %vm1947_vm6, %v4551_v47, %v4559_v1  ;;  %v10841_v52 = vsel %vm1947_vm6, %v4559_v1, %v10715_v26  ;;  %v10846_v24 = vsel %vm1608_vm5, %v10776_v56, %v4431_v11  ;;  %v3965_v33 = vsel %vm1240_vm1, %v10402_v45, %v10418_v50  ;;  %v4866_v26 = vld [vmem:[%s11815_s16] sm:$0xff]  ;;  %v13303_v1 = vld [vmem:[#allocation149_spill] sm:$0xff] }
 0x80a   : > { %13299 = vst [vmem:[#allocation107_spill] sm:$0xff] %v10836_v34  ;;  %13300 = vst [vmem:[#allocation95_spill] sm:$0xff] %v10841_v52  ;;  %v4095_v59 = vmul.f32 %v4077_v46, %v13267_v32  ;;  %v4096_v47 = vmul.f32 %v4073_v57, %v13277_v60  ;;  %v4126_v10 = vmul.f32 %v13302_v31, %v4094_v39  ;;  %4660 = vrot.lane.b32.xlu1 %v10239_v0, %s5993_s4  ;;  %v13304_v57 = vld [vmem:[#allocation112_spill] sm:$0xff] }
 0x80b   : > { %13301 = vst [vmem:[#allocation151_spill] sm:$0xff] %v10846_v24  ;;  %v4030_v24 = vmul.f32 %v13303_v1, %v3990_v44  ;;  %v4097_v52 = vmul.f32 %v4069_v28, %v13284_v42  ;;  %v4185_v45 = vsel %vm1418_vm3, %v10504_v8, %v10521_v3  ;;  %v4318_v50 = vmul.f32 %v4305_v49, %v13294_v2 }
 0x80c   : > { %v4207_v39 = vmul.f32 %v4189_v15, %v13273_v51  ;;  %v4181_v46 = vsel %vm1418_vm3, %v10521_v3, %v10537_v14  ;;  %v4238_v34 = vmul.f32 %v13304_v57, %v4206_v43  ;;  %v4301_v44 = vsel %vm1511_vm4, %v10551_v4, %v10562_v63  ;;  %v10877_v28 = vpop.permute.xlu0 %4420  ;;  %v4439_v6 = vpop.permute.xlu1 %4438  ;;  %4872 = vperm.xlu0 %5558, %v4866_v26   ;;  %v13306_v4 = vld [vmem:[#allocation126_spill] sm:$0xff]  ;;  %v13307_v51 = vld [vmem:[#allocation87_spill] sm:$0xff] }
 0x80d   : > { %v4031_v8 = vmul.f32 %v13303_v1, %v3991_v13  ;;  %v4032_v49 = vmul.f32 %v13303_v1, %v3992_v48  ;;  %v3993_v15 = vmul.f32 %v3965_v33, %v13287_v41  ;;  %v10884_v3 = vsel %vm1608_vm5, %v4431_v11, %v4439_v6  ;;  %v4906_v13 = vld [vmem:[%s13298_s26] sm:$0xff]  ;;  %v13308_v11 = vld [vmem:[#allocation130_spill] sm:$0xff] }
 0x80e   : > { %13305 = vst [vmem:[#allocation154_spill] sm:$0xff] %v10884_v3  ;;  %v4127_v14 = vmul.f32 %v13302_v31, %v4095_v59  ;;  %v4128_v43 = vmul.f32 %v13302_v31, %v4096_v47  ;;  %v4142_v55 = vadd.f32 %v4126_v10, %v4030_v24  ;;  %v4208_v2 = vmul.f32 %v4185_v45, %v13306_v4  ;;  %v13309_v3 = vld [vmem:[#allocation167_spill] sm:$0xff]  ;;  %v13310_v10 = vld [vmem:[#allocation184_spill] sm:$0xff] }
 0x80f   : > { %4668 = vrot.lane.b32.xlu1 %v13307_v51, %s5993_s4  ;;  %v4129_v48 = vmul.f32 %v13302_v31, %v4097_v52  ;;  %v4209_v33 = vmul.f32 %v4181_v46, %v13289_v36  ;;  %v4319_v26 = vmul.f32 %v4301_v44, %v13308_v11  ;;  %v4350_v59 = vmul.f32 %v13309_v3, %v4318_v50  ;;  %v13311_v46 = vld [vmem:[#allocation134_spill] sm:$0xff]  ;;  %v13312_v36 = vld [vmem:[#allocation205_spill] sm:$0xff] }
 0x810   : > { %v4239_v47 = vmul.f32 %v13304_v57, %v4207_v39  ;;  %v4254_v24 = vadd.f32 %v4238_v34, %v4142_v55  ;;  %v4297_v45 = vsel %vm1511_vm4, %v10562_v63, %v13310_v10  ;;  %v4293_v29 = vsel %vm1511_vm4, %v13310_v10, %v10583_v16  ;;  %v4429_v52 = vpop.permute.xlu0 %4428  ;;  %v4447_v31 = vpop.permute.xlu1 %4446  ;;  %4912 = vperm.xlu0 %5558, %v4906_v13   ;;  %v13314_v13 = vld [vmem:[#allocation187_spill] sm:$0xff] }
 0x811   : > { %v4478_v44 = vmul.f32 %v13312_v36, %v13311_v46  ;;  %v4459_v55 = vsel %vm1608_vm5, %v10877_v28, %v4429_v52  ;;  %v10914_v34 = vsel %vm1608_vm5, %v4439_v6, %v4447_v31  ;;  %v10919_v63 = vsel %vm1608_vm5, %v4447_v31, %v10776_v56 }
 0x812   : > { %13313 = vst [vmem:[#allocation76_spill] sm:$0xff] %v10914_v34  ;;  %v4033_v16 = vmul.f32 %v13303_v1, %v3993_v15  ;;  %v4143_v50 = vadd.f32 %v4127_v14, %v4031_v8  ;;  %v4240_v39 = vmul.f32 %v13304_v57, %v4208_v2  ;;  %v4470_v36 = vmul.f32 %v4459_v55, %v13311_v46  ;;  %v13315_v8 = vld [vmem:[#allocation45_spill] sm:$0xff] }
 0x813   : > { %4823 = vperm.xlu1 %5559, %v13314_v13   ;;  %v4144_v10 = vadd.f32 %v4128_v43, %v4032_v49  ;;  %v4241_v11 = vmul.f32 %v13304_v57, %v4209_v33  ;;  %v4351_v6 = vmul.f32 %v13309_v3, %v4319_v26  ;;  %v4366_v34 = vadd.f32 %v4350_v59, %v4254_v24  ;;  %v4868_v49 = vld [vmem:[%s11815_s16 + $0x10] sm:$0xff]  ;;  %v13316_v33 = vld [vmem:[#allocation67_spill] sm:$0xff] }
 0x814   : > { %v4320_v4 = vmul.f32 %v4297_v45, %v13291_v58  ;;  %v4321_v56 = vmul.f32 %v4293_v29, %v13295_v54  ;;  %v4406_v1 = vadd.f32 %v10732_v9, %v10797_v30  ;;  %v4502_v15 = vmul.f32 %v13315_v8, %v4470_v36  ;;  %v4437_v2 = vpop.permute.xlu0 %4436  ;;  %v4537_v14 = vpop.permute.xlu1 %4536  ;;  %v13317_v45 = vld [vmem:[#allocation135_spill] sm:$0xff] }
 0x815   : > { %v4145_v43 = vadd.f32 %v4129_v48, %v4033_v16  ;;  %v4255_v57 = vadd.f32 %v4239_v47, %v4143_v50  ;;  %v4510_v26 = vmul.f32 %v13316_v33, %v4478_v44  ;;  %v4455_v59 = vsel %vm1608_vm5, %v4429_v52, %v4437_v2  ;;  %v13319_v47 = vld [vmem:[#allocation207_spill] sm:$0xff] }
 0x816   : > { %v4256_v24 = vadd.f32 %v4240_v39, %v4144_v10  ;;  %v10938_v29 = vadd.f32 %v4502_v15, %v4406_v1  ;;  %v4471_v9 = vmul.f32 %v4455_v59, %v13317_v45  ;;  %v13318_v30 = vmov 0  }
 0x817   : > { %5560 = vset.pattern.permute.xlu1 %v13318_v30  ;;  %v4393_v31 = vmul.f32 %v13292_v38, %v13307_v51  ;;  %v4257_v55 = vadd.f32 %v4241_v11, %v4145_v43  ;;  %v4367_v36 = vadd.f32 %v4351_v6, %v4255_v57  ;;  %v4414_v48 = vadd.f32 %v10772_v17, %v4366_v34  ;;  %v13324_v43 = vld [vmem:[#allocation227_spill] sm:$0xff] }
 0x818   : > { %v4479_v44 = vmul.f32 %v13319_v47, %v13317_v45  ;;  %4882 = vperm.xlu1 %5560, %v4868_v49   ;;  %v4352_v52 = vmul.f32 %v13309_v3, %v4320_v4  ;;  %v4353_v16 = vmul.f32 %v13309_v3, %v4321_v56  ;;  %v4407_v50 = vadd.f32 %v10736_v37, %v10723_v7  ;;  %v4445_v13 = vpop.permute.xlu0 %4444  ;;  %v4545_v10 = vpop.permute.xlu1 %4544  ;;  %v13320_v3 = vld [vmem:[#allocation136_spill] sm:$0xff]  ;;  %v13321_v7 = vld [vmem:[#allocation137_spill] sm:$0xff]  ;;  %v13322_v56 = vld [vmem:[#allocation138_spill] sm:$0xff] }
 0x819   : > { %v4503_v39 = vmul.f32 %v13315_v8, %v4471_v9  ;;  %v4526_v38 = vadd.f32 %v4510_v26, %v4414_v48  ;;  %v4451_v11 = vsel %vm1608_vm5, %v4437_v2, %v4445_v13  ;;  %v4463_v17 = vsel %vm1608_vm5, %v4445_v13, %v10877_v28  ;;  %v13323_v49 = vld [vmem:[#allocation124_spill] sm:$0xff]  ;;  %v13325_v26 = vld [vmem:[#allocation98_spill] sm:$0xff] }
 0x81a   : > { %v4573_v4 = vsel %vm1947_vm6, %v4537_v14, %v4545_v10  ;;  %v4472_v6 = vmul.f32 %v4451_v11, %v13320_v3  ;;  %v4473_v37 = vmul.f32 %v4463_v17, %v13321_v7  ;;  %v4511_v15 = vmul.f32 %v13316_v33, %v4479_v44  ;;  %v13326_v47 = vld [vmem:[#allocation26_spill] sm:$0xff] }
 0x81b   : > { %v10959_v34 = vadd.f32 %v4503_v39, %v4407_v50  ;;  %v4590_v1 = vmul.f32 %v4573_v4, %v13322_v56  ;;  %v4480_v2 = vmul.f32 %v13323_v49, %v13320_v3  ;;  %v4481_v57 = vmul.f32 %v13324_v43, %v13321_v7 }
 0x81c   : > { %v4408_v28 = vadd.f32 %v10808_v22, %v10752_v53  ;;  %4754 = vrot.lane.b32.xlu1 %v13325_v26, %s5994_s29  ;;  %v4409_v59 = vadd.f32 %v4393_v31, %v10799_v19  ;;  %v4504_v9 = vmul.f32 %v13315_v8, %v4472_v6  ;;  %v4505_v48 = vmul.f32 %v13315_v8, %v4473_v37  ;;  %v10977_v50 = vpop.permute.xlu0 %4654  ;;  %v4553_v39 = vpop.permute.xlu1 %4552  ;;  %v13327_v31 = vld [vmem:[#allocation140_spill] sm:$0xff]  ;;  %v13328_v6 = vld [vmem:[#allocation185_spill] sm:$0xff] }
 0x81d   : > { %v4622_v44 = vmul.f32 %v13326_v47, %v4590_v1  ;;  %v4368_v13 = vadd.f32 %v4352_v52, %v4256_v24  ;;  %v4369_v11 = vadd.f32 %v4353_v16, %v4257_v55  ;;  %v4415_v17 = vadd.f32 %v10788_v20, %v4367_v36 }
 0x81e   : > { %v4569_v53 = vsel %vm1947_vm6, %v4545_v10, %v4553_v39  ;;  %v10982_v22 = vadd.f32 %v4504_v9, %v4408_v28  ;;  %v10984_v4 = vadd.f32 %v4505_v48, %v4409_v59  ;;  %v4400_v37 = vmul.f32 %v13296_v35, %v13328_v6 }
 0x81f   : > { %v10986_v19 = vadd.f32 %v4622_v44, %v4526_v38  ;;  %v4591_v8 = vmul.f32 %v4569_v53, %v13327_v31  ;;  %v4401_v24 = vmul.f32 %v13296_v35, %v10266_v61  ;;  %v4527_v20 = vadd.f32 %v4511_v15, %v4415_v17  ;;  %v4909_v53 = vld [vmem:[%s13298_s26 + $0x18] sm:$0xff] }
 0x820   : > { %4756 = vrot.lane.b32.xlu1 %v10176_v23, %s5994_s29  ;;  %v4512_v55 = vmul.f32 %v13316_v33, %v4480_v2  ;;  %v4513_v36 = vmul.f32 %v13316_v33, %v4481_v57  ;;  %v4561_v16 = vpop.permute.xlu1 %4560  ;;  %v4416_v10 = vadd.f32 %v4400_v37, %v4368_v13  ;;  %v4663_v1 = vpop.permute.xlu0 %4662  ;;  %v13329_v33 = vld [vmem:[#allocation141_spill] sm:$0xff]  ;;  %v13330_v2 = vld [vmem:[#allocation142_spill] sm:$0xff] }
 0x821   : > { %v4623_v52 = vmul.f32 %v13326_v47, %v4591_v8  ;;  %v4417_v38 = vadd.f32 %v4401_v24, %v4369_v11  ;;  %v4565_v49 = vsel %vm1947_vm6, %v4553_v39, %v4561_v16  ;;  %v4577_v61 = vsel %vm1947_vm6, %v4561_v16, %v4537_v14 }
 0x822   : > { %v11007_v23 = vsel %vm2036_vm7, %v10977_v50, %v4663_v1  ;;  %v4592_v15 = vmul.f32 %v4565_v49, %v13329_v33  ;;  %v4593_v43 = vmul.f32 %v4577_v61, %v13330_v2  ;;  %v4528_v57 = vadd.f32 %v4512_v55, %v4416_v10  ;;  %v4907_v61 = vld [vmem:[%s13298_s26 + $0x8] sm:$0xff] }
 0x823   : > { %v11002_v35 = vadd.f32 %v4623_v52, %v4527_v20  ;;  %v4529_v28 = vadd.f32 %v4513_v36, %v4417_v38  ;;  %v13331_v20 = vld [vmem:[#allocation24_spill] sm:$0xff] }
 0x824   : > { %4764 = vrot.lane.b32.xlu1 %v10212_v27, %s5994_s29  ;;  %v4624_v59 = vmul.f32 %v13326_v47, %v4592_v15  ;;  %v4625_v14 = vmul.f32 %v13326_v47, %v4593_v43  ;;  %v4419_v9 = vpop.permute.xlu1 %4418  ;;  %v4671_v48 = vpop.permute.xlu0 %4670 }
 0x825   : > { %v11017_v13 = vsel %vm2036_vm7, %v4663_v1, %v4671_v48 }
 0x826   : > { %v4640_v44 = vadd.f32 %v4624_v59, %v4528_v57  ;;  %v4641_v39 = vadd.f32 %v4625_v14, %v4529_v28 }
 0x828   : > { %4772 = vrot.lane.b32.xlu1 %v10239_v0, %s5994_s29  ;;  %v4427_v11 = vpop.permute.xlu1 %4426  ;;  %v4533_v17 = vpop.permute.xlu0 %4532 }
 0x829   : > { %v11023_v27 = vsel %vm1608_vm5, %v4419_v9, %v4427_v11 }
 0x82c   : > { %4780 = vrot.lane.b32.xlu1 %v13307_v51, %s5994_s29  ;;  %v4435_v47 = vpop.permute.xlu1 %4434  ;;  %v4541_v8 = vpop.permute.xlu0 %4540  ;;  %v4867_v51 = vld [vmem:[%s11815_s16 + $0x8] sm:$0xff]  ;;  %s5906_s29 = scalar_lea.vmem %s5905_s21, 4096 }
 0x82d   : > { %v11032_v6 = vsel %vm1608_vm5, %v4427_v11, %v4435_v47  ;;  %v4571_v0 = vsel %vm1947_vm6, %v4533_v17, %v4541_v8  ;;  %p5908_p1 = scmp.lt.s32.totalorder %s5906_s29, %s5900_s8 }
 0x82e   : > { %v4582_v37 = vmul.f32 %v4571_v0, %v13322_v56  ;;  %v13336_v0 = vld [vmem:[#allocation143_spill] sm:$0xff] }
 0x82f   : > { %p5909_p3 = por %p5908_p1, %p5907_p9 }
 0x830   : > { %4927 = vperm.xlu1 %5560, %v4909_v53   ;;  %v4443_v24 = vpop.permute.xlu1 %4442  ;;  %v4614_v55 = vmul.f32 %v13331_v20, %v4582_v37  ;;  %v4549_v36 = vpop.permute.xlu0 %4548 }
 0x831   : > { %v11043_v52 = vsel %vm1608_vm5, %v4435_v47, %v4443_v24  ;;  %v11047_v16 = vsel %vm1608_vm5, %v4443_v24, %v4419_v9  ;;  %v4567_v10 = vsel %vm1947_vm6, %v4541_v8, %v4549_v36  ;;  %v13337_v24 = vld [vmem:[#allocation181_spill] sm:$0xff]  ;;  %p5910_p4 = pnand %p5909_p3, %p5903_p5 }
 0x832   : > { %v11052_v38 = vadd.f32 %v4614_v55, %v10938_v29  ;;  %v4583_v1 = vmul.f32 %v4567_v10, %v13327_v31 }
 0x834   : > { %13332 = vst [vmem:[#allocation214_spill] sm:$0xff] %v11052_v38  ;;  %4877 = vperm.xlu1 %5560, %v4867_v51   ;;  %v4647_v49 = vpop.permute.xlu1 %4646  ;;  %v4615_v15 = vmul.f32 %v13331_v20, %v4583_v1  ;;  %v4557_v43 = vpop.permute.xlu0 %4556 }
 0x835   : > { %v11062_v57 = vsel %vm2036_vm7, %v4647_v49, %v10977_v50  ;;  %v11066_v29 = vsel %vm2036_vm7, %v4671_v48, %v4647_v49  ;;  %v4563_v28 = vsel %vm1947_vm6, %v4549_v36, %v4557_v43  ;;  %v4575_v59 = vsel %vm1947_vm6, %v4557_v43, %v4533_v17 }
 0x836   : > { %v11073_v14 = vadd.f32 %v4615_v15, %v10959_v34  ;;  %v4584_v9 = vmul.f32 %v4563_v28, %v13329_v33  ;;  %v4585_v11 = vmul.f32 %v4575_v59, %v13330_v2  ;;  %v13342_v28 = vld [vmem:[#allocation145_spill] sm:$0xff] }
 0x838   : > { %13333 = vst [vmem:[#allocation109_spill] sm:$0xff] %v11073_v14  ;;  %4917 = vperm.xlu1 %5560, %v4907_v61   ;;  %v4649_v50 = vpop.permute.xlu1 %4648  ;;  %v4616_v47 = vmul.f32 %v13331_v20, %v4584_v9  ;;  %v4617_v48 = vmul.f32 %v13331_v20, %v4585_v11  ;;  %v13374_v14 = vld [vmem:[#allocation197_spill] sm:$0xff] }
 0x83a   : > { %v11080_v53 = vadd.f32 %v4616_v47, %v10982_v22  ;;  %v11083_v8 = vadd.f32 %v4617_v48, %v10984_v4  ;;  %v13339_v22 = vld [vmem:[#allocation144_spill] sm:$0xff] }
 0x83c   : > { %13334 = vst [vmem:[#allocation110_spill] sm:$0xff] %v11080_v53  ;;  %13335 = vst [vmem:[#allocation155_spill] sm:$0xff] %v11083_v8  ;;  %v4657_v17 = vpop.permute.xlu1 %4656  ;;  %v13367_v8 = vld [vmem:[#allocation191_spill] sm:$0xff]  ;;  %v13370_v53 = vld [vmem:[#allocation166_spill] sm:$0xff] }
 0x83d   : > { %v4685_v34 = vsel %vm2036_vm7, %v4649_v50, %v4657_v17 }
 0x83e   : > { %v4702_v37 = vmul.f32 %v4685_v34, %v13336_v0 }
 0x840   : > { %v4734_v51 = vmul.f32 %v13337_v24, %v4702_v37  ;;  %v4665_v55 = vpop.permute.xlu1 %4664 }
 0x841   : > { %v4681_v36 = vsel %vm2036_vm7, %v4657_v17, %v4665_v55  ;;  %v11095_v1 = vpop.permute.xlu0 %4711 }
 0x842   : > { %v11092_v20 = vadd.f32 %v4734_v51, %v10986_v19  ;;  %v4703_v10 = vmul.f32 %v4681_v36, %v13339_v22  ;;  %13340 = vst [vmem:[#allocation50_spill] sm:$0xff] %v11095_v1  ;;  %v13343_v19 = vld [vmem:[#allocation146_spill] sm:$0xff]  ;;  %v13349_v51 = vld [vmem:[#allocation41_spill] sm:$0xff] }
 0x843   : > { %v13375_v1 = vld [vmem:[#allocation178_spill] sm:$0xff] }
 0x844   : > { %13338 = vst [vmem:[#allocation72_spill] sm:$0xff] %v11092_v20  ;;  %v4735_v4 = vmul.f32 %v13337_v24, %v4703_v10  ;;  %v4673_v49 = vpop.permute.xlu1 %4672  ;;  %v13352_v10 = vld [vmem:[#allocation174_spill] sm:$0xff] }
 0x845   : > { %v4677_v61 = vsel %vm2036_vm7, %v4665_v55, %v4673_v49  ;;  %v4689_v15 = vsel %vm2036_vm7, %v4673_v49, %v4649_v50  ;;  %v13348_v50 = vld [vmem:[#allocation172_spill] sm:$0xff]  ;;  %v13350_v55 = vld [vmem:[#allocation177_spill] sm:$0xff]  ;;  %v13355_v49 = vld [vmem:[#allocation38_spill] sm:$0xff] }
 0x846   : > { %v11103_v43 = vadd.f32 %v4735_v4, %v11002_v35  ;;  %v4704_v59 = vmul.f32 %v4677_v61, %v13342_v28  ;;  %v4705_v9 = vmul.f32 %v4689_v15, %v13343_v19  ;;  %v11107_v11 = vpop.permute.xlu0 %4827  ;;  %v3970_v35 = vsel %vm1240_vm1, %v13349_v51, %v13348_v50  ;;  %v13353_v4 = vld [vmem:[#allocation193_spill] sm:$0xff]  ;;  %v13357_v15 = vld [vmem:[#allocation183_spill] sm:$0xff] }
 0x847   : > { %13344 = vst [vmem:[#allocation77_spill] sm:$0xff] %v11107_v11  ;;  %v11123_v36 = vmul.f32 %v13350_v55, %v13325_v26  ;;  %v11135_v61 = vmul.f32 %v13350_v55, %v13355_v49  ;;  %v13360_v26 = vld [vmem:[#allocation189_spill] sm:$0xff]  ;;  %v11149_v30 = vmul.f32 %v13350_v55, %v10214_v62 }
 0x848   : > { %13341 = vst [vmem:[#allocation215_spill] sm:$0xff] %v11103_v43  ;;  %v4736_v47 = vmul.f32 %v13337_v24, %v4704_v59  ;;  %v4737_v48 = vmul.f32 %v13337_v24, %v4705_v9  ;;  %v3972_v24 = vsel %vm1240_vm1, %v13353_v4, %v13352_v10  ;;  %v13358_v59 = vld [vmem:[#allocation97_spill] sm:$0xff] }
 0x849   : > { %13351 = vst [vmem:[#allocation218_spill] sm:$0xff] %v11123_v36  ;;  %13356 = vst [vmem:[#allocation157_spill] sm:$0xff] %v11135_v61  ;;  %v11139_v9 = vmul.f32 %v13358_v59, %v13357_v15  ;;  %v13364_v49 = vld [vmem:[#allocation85_spill] sm:$0xff]  ;;  %v11160_v15 = vmul.f32 %v3970_v35, %v13272_v12  ;;  %v13373_v35 = vld [vmem:[#allocation23_spill] sm:$0xff] }
 0x84a   : > { %v11111_v17 = vadd.f32 %v4736_v47, %v4640_v44  ;;  %v11113_v34 = vadd.f32 %v4737_v48, %v4641_v39  ;;  %v11115_v37 = vpop.permute.xlu0 %4766  ;;  %v13354_v44 = vld [vmem:[#allocation195_spill] sm:$0xff]  ;;  %v3968_v47 = vsel %vm1240_vm1, %v13352_v10, %v13360_v26  ;;  %13362 = vst [vmem:[#allocation226_spill] sm:$0xff] %v11149_v30  ;;  %v11157_v11 = vmul.f32 %v13358_v59, %v13364_v49  ;;  %v13402_v30 = vld [vmem:[#allocation202_spill] sm:$0xff] }
 0x84b   : > { %13347 = vst [vmem:[#allocation159_spill] sm:$0xff] %v11115_v37  ;;  %v3966_v39 = vsel %vm1240_vm1, %v13348_v50, %v13354_v44  ;;  %13359 = vst [vmem:[#allocation210_spill] sm:$0xff] %v11139_v9  ;;  %v11153_v50 = vmul.f32 %v13350_v55, %v10236_v21  ;;  %v13366_v37 = vld [vmem:[#allocation176_spill] sm:$0xff]  ;;  %v11172_v21 = vmul.f32 %v13358_v59, %v13370_v53 }
 0x84c   : > { %13345 = vst [vmem:[#allocation78_spill] sm:$0xff] %v11111_v17  ;;  %13346 = vst [vmem:[#allocation219_spill] sm:$0xff] %v11113_v34  ;;  %v4074_v10 = vsel %vm1329_vm2, %v13367_v8, %v13366_v37  ;;  %v11175_v55 = vmul.f32 %v3972_v24, %v13272_v12  ;;  %v11178_v49 = vmul.f32 %v3966_v39, %v13278_v40  ;;  %v13378_v12 = vld [vmem:[#allocation168_spill] sm:$0xff]  ;;  %v13379_v39 = vld [vmem:[#allocation198_spill] sm:$0xff] }
 0x84d   : > { %13363 = vst [vmem:[#allocation74_spill] sm:$0xff] %v11153_v50  ;;  %13365 = vst [vmem:[#allocation73_spill] sm:$0xff] %v11157_v11  ;;  %v4076_v38 = vsel %vm1329_vm2, %v13374_v14, %v13373_v35  ;;  %v11191_v53 = vmul.f32 %v3968_v47, %v13278_v40  ;;  %v3962_v24 = vsel %vm1240_vm1, %v13354_v44, %v13378_v12  ;;  %v13380_v17 = vld [vmem:[#allocation115_spill] sm:$0xff]  ;;  %v13381_v47 = vld [vmem:[#allocation170_spill] sm:$0xff] }
 0x84e   : > { %v11145_v48 = vpop.permute.xlu0 %4774  ;;  %13371 = vst [vmem:[#allocation51_spill] sm:$0xff] %v11172_v21  ;;  %13372 = vst [vmem:[#allocation105_spill] sm:$0xff] %v11175_v55  ;;  %v3974_v40 = vsel %vm1240_vm1, %v13378_v12, %v13349_v51  ;;  %v3964_v44 = vsel %vm1240_vm1, %v13360_v26, %v13381_v47  ;;  %v4083_v50 = vmul.f32 %v4074_v10, %v13267_v32  ;;  %v13383_v26 = vld [vmem:[#allocation182_spill] sm:$0xff]  ;;  %v13398_v21 = vld [vmem:[#allocation201_spill] sm:$0xff] }
 0x84f   : > { %13361 = vst [vmem:[#allocation128_spill] sm:$0xff] %v11145_v48  ;;  %v13368_v48 = vld [vmem:[#allocation31_spill] sm:$0xff]  ;;  %13377 = vst [vmem:[#allocation220_spill] sm:$0xff] %v11191_v53  ;;  %v4066_v51 = vsel %vm1329_vm2, %v13375_v1, %v13380_v17  ;;  %v4080_v12 = vsel %vm1329_vm2, %v13383_v26, %v13374_v14  ;;  %v11244_v14 = vmul.f32 %v3962_v24, %v13287_v41  ;;  %v13410_v53 = vld [vmem:[#allocation162_spill] sm:$0xff] }
 0x850   : > { %v11168_v62 = vmul.f32 %v13358_v59, %v13368_v48  ;;  %v4070_v48 = vsel %vm1329_vm2, %v13366_v37, %v13375_v1  ;;  %v4072_v59 = vsel %vm1329_vm2, %v13373_v35, %v13379_v39  ;;  %v4078_v37 = vsel %vm1329_vm2, %v13380_v17, %v13367_v8 }
 0x851   : > { %v11188_v34 = vpop.permute.xlu1 %4831  ;;  %v3976_v35 = vsel %vm1240_vm1, %v13381_v47, %v13353_v4  ;;  %v4091_v8 = vmul.f32 %v4076_v38, %v13267_v32  ;;  %v4084_v20 = vmul.f32 %v4070_v48, %v13277_v60  ;;  %v4092_v4 = vmul.f32 %v4072_v59, %v13277_v60  ;;  %v13384_v38 = vld [vmem:[#allocation180_spill] sm:$0xff] }
 0x852   : > { %13369 = vst [vmem:[#allocation228_spill] sm:$0xff] %v11168_v62  ;;  %13376 = vst [vmem:[#allocation84_spill] sm:$0xff] %v11188_v34  ;;  %v11218_v43 = vpop.permute.xlu0 %4782  ;;  %v4082_v10 = vmul.f32 %v4078_v37, %v13281_v5  ;;  %v4068_v32 = vsel %vm1329_vm2, %v13379_v39, %v13383_v26  ;;  %v13385_v48 = vld [vmem:[#allocation200_spill] sm:$0xff]  ;;  %v11241_v17 = vmul.f32 %v3974_v40, %v13286_v18  ;;  %v13388_v37 = vld [vmem:[#allocation221_spill] sm:$0xff] }
 0x853   : > { %13382 = vst [vmem:[#allocation83_spill] sm:$0xff] %v11218_v43  ;;  %v4184_v47 = vsel %vm1418_vm3, %v13385_v48, %v13384_v38  ;;  %v11247_v60 = vmul.f32 %v3976_v35, %v13286_v18  ;;  %v11250_v59 = vmul.f32 %v3964_v44, %v13287_v41  ;;  %v11253_v39 = vmul.f32 %v13388_v37, %v4083_v50  ;;  %v13389_v34 = vld [vmem:[#allocation48_spill] sm:$0xff]  ;;  %v13391_v35 = vld [vmem:[#allocation126_spill] sm:$0xff]  ;;  %v13393_v44 = vld [vmem:[#allocation39_spill] sm:$0xff] }
 0x854   : > { %v4085_v26 = vmul.f32 %v4066_v51, %v13284_v42  ;;  %v4090_v43 = vmul.f32 %v4080_v12, %v13281_v5  ;;  %v4180_v40 = vsel %vm1418_vm3, %v13384_v38, %v13389_v34  ;;  %v4093_v18 = vmul.f32 %v4068_v32, %v13284_v42  ;;  %v13392_v41 = vld [vmem:[#allocation188_spill] sm:$0xff] }
 0x855   : > { %v4531_v1 = vpop.permute.xlu1 %4530  ;;  %13386 = vst [vmem:[#allocation54_spill] sm:$0xff] %v11247_v60  ;;  %13387 = vst [vmem:[#allocation114_spill] sm:$0xff] %v11250_v59  ;;  %v4204_v62 = vmul.f32 %v4184_v47, %v13391_v35  ;;  %v4188_v50 = vsel %vm1418_vm3, %v13392_v41, %v13385_v48  ;;  %v4192_v5 = vsel %vm1418_vm3, %v13389_v34, %v13392_v41  ;;  %v13396_v47 = vld [vmem:[#allocation129_spill] sm:$0xff]  ;;  %v13400_v41 = vld [vmem:[#allocation127_spill] sm:$0xff] }
 0x856   : > { %v11261_v24 = vpop.permute.xlu0 %4642  ;;  %v11274_v51 = vmul.f32 %v13393_v44, %v4091_v8  ;;  %v11277_v12 = vmul.f32 %v13388_v37, %v4084_v20  ;;  %v11280_v42 = vmul.f32 %v13393_v44, %v4092_v4  ;;  %v11283_v32 = vmul.f32 %v13388_v37, %v4082_v10  ;;  %v13399_v8 = vld [vmem:[#allocation186_spill] sm:$0xff] }
 0x857   : > { %13390 = vst [vmem:[#allocation71_spill] sm:$0xff] %v11261_v24  ;;  %v4205_v48 = vmul.f32 %v4180_v40, %v13396_v47  ;;  %v13397_v24 = vld [vmem:[#allocation199_spill] sm:$0xff]  ;;  %v4304_v20 = vsel %vm1511_vm4, %v13399_v8, %v13398_v21  ;;  %v11299_v10 = vmul.f32 %v13388_v37, %v4085_v26  ;;  %v4202_v11 = vmul.f32 %v4192_v5, %v13400_v41  ;;  %v13401_v40 = vld [vmem:[#allocation125_spill] sm:$0xff]  ;;  %v13405_v8 = vld [vmem:[#allocation100_spill] sm:$0xff] }
 0x858   : > { %13394 = vst [vmem:[#allocation152_spill] sm:$0xff] %v11274_v51  ;;  %13395 = vst [vmem:[#allocation89_spill] sm:$0xff] %v11280_v42  ;;  %v4300_v34 = vsel %vm1511_vm4, %v13398_v21, %v13397_v24  ;;  %v4203_v9 = vmul.f32 %v4188_v50, %v13401_v40  ;;  %v4316_v36 = vmul.f32 %v13402_v30, %v13291_v58  ;;  %v13407_v37 = vld [vmem:[#allocation204_spill] sm:$0xff]  ;;  %v13409_v50 = vld [vmem:[#allocation130_spill] sm:$0xff] }
 0x859   : > { %v4539_v38 = vpop.permute.xlu1 %4538  ;;  %v11308_v61 = vmul.f32 %v13393_v44, %v4090_v43  ;;  %v11311_v21 = vmul.f32 %v13393_v44, %v4093_v18  ;;  %v11314_v42 = vmul.f32 %v13405_v8, %v4204_v62  ;;  %v4317_v26 = vmul.f32 %v13407_v37, %v13295_v54  ;;  %v13408_v5 = vld [vmem:[#allocation132_spill] sm:$0xff]  ;;  %v13411_v30 = vld [vmem:[#allocation203_spill] sm:$0xff]  ;;  %v13412_v43 = vld [vmem:[#allocation46_spill] sm:$0xff] }
 0x85a   : > { %v11296_v4 = vsel %vm1947_vm6, %v4531_v1, %v4539_v38  ;;  %v11305_v24 = vpop.permute.xlu0 %4650  ;;  %v4314_v51 = vmul.f32 %v4304_v20, %v13408_v5  ;;  %v4315_v59 = vmul.f32 %v4300_v34, %v13409_v50  ;;  %v4186_v55 = vsel %vm1418_vm3, %v13411_v30, %v13410_v53  ;;  %v13414_v37 = vld [vmem:[#allocation192_spill] sm:$0xff]  ;;  %v13415_v20 = vld [vmem:[#allocation190_spill] sm:$0xff] }
 0x85b   : > { %13403 = vst [vmem:[#allocation222_spill] sm:$0xff] %v11308_v61  ;;  %13404 = vst [vmem:[#allocation60_spill] sm:$0xff] %v11311_v21  ;;  %v4190_v18 = vsel %vm1418_vm3, %v13412_v43, %v13411_v30  ;;  %v11329_v62 = vmul.f32 %v13405_v8, %v4205_v48  ;;  %v4308_v34 = vmul.f32 %v13415_v20, %v13291_v58  ;;  %v13416_v30 = vld [vmem:[#allocation169_spill] sm:$0xff]  ;;  %v13418_v48 = vld [vmem:[#allocation216_spill] sm:$0xff] }
 0x85c   : > { %13406 = vst [vmem:[#allocation53_spill] sm:$0xff] %v11314_v42  ;;  %v4307_v42 = vmul.f32 %v13414_v37, %v13409_v50  ;;  %v11338_v53 = vmul.f32 %v13405_v8, %v4202_v11  ;;  %v11341_v61 = vmul.f32 %v13405_v8, %v4203_v9  ;;  %v11344_v43 = vmul.f32 %v13416_v30, %v4316_v36  ;;  %v13419_v50 = vld [vmem:[#allocation217_spill] sm:$0xff] }
 0x85d   : > { %v4547_v44 = vpop.permute.xlu1 %4546  ;;  %13413 = vst [vmem:[#allocation52_spill] sm:$0xff] %v11329_v62  ;;  %v4306_v62 = vmul.f32 %v13418_v48, %v13408_v5  ;;  %v4309_v37 = vmul.f32 %v13419_v50, %v13295_v54  ;;  %v4195_v58 = vmul.f32 %v4186_v55, %v13401_v40  ;;  %v4194_v11 = vmul.f32 %v4190_v18, %v13400_v41  ;;  %v13423_v5 = vld [vmem:[#allocation206_spill] sm:$0xff]  ;;  %v13424_v50 = vld [vmem:[#allocation27_spill] sm:$0xff]  ;;  %v13426_v40 = vld [vmem:[#allocation229_spill] sm:$0xff] }
 0x85e   : > { %v4566_v21 = vsel %vm1947_vm6, %v4539_v38, %v4547_v44  ;;  %13417 = vst [vmem:[#allocation211_spill] sm:$0xff] %v11344_v43  ;;  %v4659_v60 = vpop.permute.xlu0 %4658  ;;  %v13420_v38 = vld [vmem:[#allocation70_spill] sm:$0xff]  ;;  %v11355_v9 = vmul.f32 %v13416_v30, %v4317_v26  ;;  %v11358_v36 = vmul.f32 %v13416_v30, %v4314_v51  ;;  %v11361_v8 = vmul.f32 %v13416_v30, %v4315_v59  ;;  %v13427_v26 = vld [vmem:[#allocation196_spill] sm:$0xff]  ;;  %v13428_v18 = vld [vmem:[#allocation107_spill] sm:$0xff] }
 0x85f   : > { %v4196_v20 = vmul.f32 %v13420_v38, %v13391_v35  ;;  %v4197_v48 = vmul.f32 %v13423_v5, %v13396_v47  ;;  %v11366_v55 = vmul.f32 %v13424_v50, %v4307_v42  ;;  %v11369_v35 = vmul.f32 %v13424_v50, %v4308_v34  ;;  %v13429_v38 = vld [vmem:[#allocation43_spill] sm:$0xff] }
 0x860   : > { %13421 = vst [vmem:[#allocation223_spill] sm:$0xff] %v11355_v9  ;;  %13422 = vst [vmem:[#allocation156_spill] sm:$0xff] %v11361_v8  ;;  %v11378_v59 = vmul.f32 %v13424_v50, %v4306_v62  ;;  %v4586_v47 = vmul.f32 %v13426_v40, %v13322_v56  ;;  %v4587_v42 = vmul.f32 %v13427_v26, %v13327_v31  ;;  %v13430_v40 = vld [vmem:[#allocation95_spill] sm:$0xff] }
 0x861   : > { %v4555_v54 = vpop.permute.xlu1 %4554  ;;  %v4588_v34 = vmul.f32 %v13428_v18, %v13329_v33  ;;  %v4228_v5 = vmul.f32 %v13429_v38, %v4196_v20  ;;  %v4226_v62 = vmul.f32 %v13429_v38, %v4194_v11  ;;  %v13431_v26 = vld [vmem:[#allocation151_spill] sm:$0xff]  ;;  %v13432_v18 = vld [vmem:[#allocation154_spill] sm:$0xff]  ;;  %v4477_v20 = vmul.f32 %v10919_v63, %v13321_v7 }
 0x862   : > { %v4562_v41 = vsel %vm1947_vm6, %v4547_v44, %v4555_v54  ;;  %v11375_v51 = vsel %vm1947_vm6, %v4555_v54, %v4531_v1  ;;  %v11386_v30 = vpop.permute.xlu0 %4666  ;;  %v11389_v44 = vmul.f32 %v13424_v50, %v4309_v37  ;;  %v4227_v1 = vmul.f32 %v13429_v38, %v4195_v58  ;;  %v13433_v37 = vld [vmem:[#allocation76_spill] sm:$0xff]  ;;  %v13434_v50 = vld [vmem:[#allocation179_spill] sm:$0xff] }
 0x863   : > { %13425 = vst [vmem:[#allocation68_spill] sm:$0xff] %v11375_v51  ;;  %v4229_v54 = vmul.f32 %v13429_v38, %v4197_v48  ;;  %v4589_v51 = vmul.f32 %v13430_v40, %v13330_v2  ;;  %v4474_v9 = vmul.f32 %v13431_v26, %v13311_v46  ;;  %v4475_v43 = vmul.f32 %v13432_v18, %v13317_v45 }
 0x864   : > { %v4476_v58 = vmul.f32 %v13433_v37, %v13320_v3  ;;  %v4699_v11 = vmul.f32 %v11007_v23, %v13339_v22  ;;  %v4700_v48 = vmul.f32 %v11017_v13, %v13342_v28  ;;  %v11412_v38 = vmul.f32 %v13434_v50, %v4586_v47 }
 0x865   : > { %v11401_v8 = vpop.permute.xlu1 %4707  ;;  %v11415_v40 = vmul.f32 %v13434_v50, %v4587_v42  ;;  %v11418_v26 = vmul.f32 %v13434_v50, %v4588_v34  ;;  %v4466_v18 = vmul.f32 %v11023_v27, %v13311_v46  ;;  %v4467_v63 = vmul.f32 %v11032_v6, %v13317_v45  ;;  %v13437_v34 = vld [vmem:[#allocation86_spill] sm:$0xff] }
 0x866   : > { %v11422_v37 = vpop.permute.xlu0 %4819  ;;  %v4468_v23 = vmul.f32 %v11043_v52, %v13320_v3  ;;  %v4469_v13 = vmul.f32 %v11047_v16, %v13321_v7  ;;  %v4698_v47 = vmul.f32 %v11062_v57, %v13336_v0  ;;  %v11433_v42 = vmul.f32 %v13434_v50, %v4589_v51  ;;  %v13439_v6 = vld [vmem:[#allocation66_spill] sm:$0xff]  ;;  %v13440_v57 = vld [vmem:[#allocation40_spill] sm:$0xff] }
 0x867   : > { %13435 = vst [vmem:[#allocation79_spill] sm:$0xff] %v11418_v26  ;;  %13436 = vst [vmem:[#allocation99_spill] sm:$0xff] %v11422_v37  ;;  %v11436_v26 = vmul.f32 %v13437_v34, %v4474_v9  ;;  %v11439_v46 = vmul.f32 %v13437_v34, %v4475_v43  ;;  %v4701_v45 = vmul.f32 %v11066_v29, %v13343_v19 }
 0x868   : > { %v11446_v3 = vmul.f32 %v13437_v34, %v4476_v58  ;;  %v11449_v7 = vmul.f32 %v13437_v34, %v4477_v20  ;;  %v11452_v52 = vmul.f32 %v13439_v6, %v4699_v11  ;;  %v11455_v16 = vmul.f32 %v13439_v6, %v4700_v48  ;;  %v13441_v34 = vld [vmem:[#allocation32_spill] sm:$0xff] }
 0x869   : > { %v11443_v27 = vpop.permute.xlu1 %4758  ;;  %v11458_v43 = vmul.f32 %v13440_v57, %v4466_v18  ;;  %v4579_v9 = vmul.f32 %v4566_v21, %v13327_v31  ;;  %v4678_v29 = vsel %vm2036_vm7, %v11305_v24, %v4659_v60  ;;  %v4580_v51 = vmul.f32 %v4562_v41, %v13329_v33 }
 0x86a   : > { %13438 = vst [vmem:[#allocation93_spill] sm:$0xff] %v11443_v27  ;;  %v4499_v58 = vmul.f32 %v13440_v57, %v4467_v63  ;;  %v4500_v20 = vmul.f32 %v13440_v57, %v4468_v23  ;;  %v11468_v11 = vmul.f32 %v13440_v57, %v4469_v13  ;;  %v11471_v48 = vmul.f32 %v13439_v6, %v4698_v47 }
 0x86b   : > { %v4001_v50 = vpop.permute.xlu0 %4000  ;;  %v11474_v18 = vmul.f32 %v13439_v6, %v4701_v45  ;;  %v4674_v31 = vsel %vm2036_vm7, %v4659_v60, %v11386_v30  ;;  %v11483_v63 = vmul.f32 %v11296_v4, %v13322_v56  ;;  %v4691_v23 = vmul.f32 %v4678_v29, %v13339_v22 }
 0x86c   : > { %v4018_v33 = vmul.f32 %v4001_v50, %v11241_v17  ;;  %v4019_v21 = vmul.f32 %v4001_v50, %v11160_v15  ;;  %v4020_v13 = vmul.f32 %v4001_v50, %v11178_v49  ;;  %v4021_v47 = vmul.f32 %v4001_v50, %v11244_v14  ;;  %v13442_v14 = vld [vmem:[#allocation54_spill] sm:$0xff] }
 0x86d   : > { %v4761_v41 = vpop.permute.xlu1 %4760  ;;  %v4611_v45 = vmul.f32 %v13441_v34, %v4579_v9  ;;  %v4612_v6 = vmul.f32 %v13441_v34, %v4580_v51  ;;  %v4692_v15 = vmul.f32 %v4674_v31, %v13342_v28  ;;  %v4723_v57 = vmul.f32 %v11401_v8, %v4691_v23  ;;  %v13443_v9 = vld [vmem:[#allocation105_spill] sm:$0xff] }
 0x86e   : > { %v4130_v60 = vadd.f32 %v11283_v32, %v4018_v33  ;;  %v4131_v17 = vadd.f32 %v11253_v39, %v4019_v21  ;;  %v4132_v56 = vadd.f32 %v11277_v12, %v4020_v13  ;;  %v4133_v4 = vadd.f32 %v11299_v10, %v4021_v47  ;;  %v13444_v33 = vld [vmem:[#allocation220_spill] sm:$0xff]  ;;  %v13445_v21 = vld [vmem:[#allocation114_spill] sm:$0xff] }
 0x86f   : > { %v4011_v29 = vpop.permute.xlu0 %4010  ;;  %v13446_v13 = vld [vmem:[#allocation222_spill] sm:$0xff]  ;;  %v13447_v47 = vld [vmem:[#allocation152_spill] sm:$0xff] }
 0x870   : > { %v4242_v49 = vadd.f32 %v4226_v62, %v4130_v60  ;;  %v4243_v37 = vadd.f32 %v4227_v1, %v4131_v17  ;;  %v4026_v50 = vmul.f32 %v4011_v29, %v13442_v14  ;;  %v4027_v27 = vmul.f32 %v4011_v29, %v13443_v9  ;;  %v13448_v17 = vld [vmem:[#allocation89_spill] sm:$0xff] }
 0x871   : > { %v4769_v51 = vpop.permute.xlu1 %4768  ;;  %v4244_v22 = vadd.f32 %v4228_v5, %v4132_v56  ;;  %v4245_v32 = vadd.f32 %v4229_v54, %v4133_v4  ;;  %v4028_v39 = vmul.f32 %v4011_v29, %v13444_v33  ;;  %v4029_v31 = vmul.f32 %v4011_v29, %v13445_v21  ;;  %v13449_v5 = vld [vmem:[#allocation60_spill] sm:$0xff]  ;;  %v13450_v4 = vld [vmem:[#allocation157_spill] sm:$0xff] }
 0x872   : > { %v4354_v23 = vadd.f32 %v11378_v59, %v4242_v49  ;;  %v4355_v12 = vadd.f32 %v11366_v55, %v4243_v37  ;;  %v4138_v10 = vadd.f32 %v13446_v13, %v4026_v50  ;;  %v4139_v62 = vadd.f32 %v13447_v47, %v4027_v27  ;;  %v13451_v49 = vld [vmem:[#allocation218_spill] sm:$0xff]  ;;  %v13458_v13 = vld [vmem:[#allocation147_spill] sm:$0xff]  ;;  %v13459_v47 = vld [vmem:[#allocation148_spill] sm:$0xff] }
 0x873   : > { %v4356_v1 = vadd.f32 %v11369_v35, %v4244_v22  ;;  %v4357_v60 = vadd.f32 %v11389_v44, %v4245_v32  ;;  %v4140_v14 = vadd.f32 %v13448_v17, %v4028_v39  ;;  %v4141_v54 = vadd.f32 %v13449_v5, %v4029_v31  ;;  %v13452_v27 = vld [vmem:[#allocation226_spill] sm:$0xff]  ;;  %v13453_v22 = vld [vmem:[#allocation53_spill] sm:$0xff]  ;;  %v13454_v44 = vld [vmem:[#allocation52_spill] sm:$0xff] }
 0x874   : > { %v4724_v56 = vmul.f32 %v11401_v8, %v4692_v15  ;;  %v4403_v29 = vadd.f32 %v13450_v4, %v4355_v12  ;;  %v4250_v59 = vadd.f32 %v11338_v53, %v4138_v10  ;;  %v4251_v55 = vadd.f32 %v11341_v61, %v4139_v62  ;;  %v13455_v39 = vld [vmem:[#allocation156_spill] sm:$0xff]  ;;  %v13456_v61 = vld [vmem:[#allocation211_spill] sm:$0xff] }
 0x875   : > { %v4777_v37 = vpop.permute.xlu1 %4776  ;;  %v4402_v50 = vadd.f32 %v13451_v49, %v4354_v23  ;;  %v4404_v9 = vadd.f32 %v13452_v27, %v4356_v1  ;;  %v4252_v35 = vadd.f32 %v13453_v22, %v4140_v14  ;;  %v4253_v32 = vadd.f32 %v13454_v44, %v4141_v54  ;;  %v13457_v12 = vld [vmem:[#allocation223_spill] sm:$0xff]  ;;  %v13460_v1 = vld [vmem:[#allocation210_spill] sm:$0xff]  ;;  %v13461_v14 = vld [vmem:[#allocation73_spill] sm:$0xff] }
 0x876   : > { %v4362_v33 = vadd.f32 %v11358_v36, %v4250_v59  ;;  %v4363_v21 = vadd.f32 %v13455_v39, %v4251_v55  ;;  %v4797_v15 = vsel %vm2125_vm9, %v4761_v41, %v4769_v51  ;;  %v4793_v53 = vsel %vm2125_vm9, %v4769_v51, %v4777_v37  ;;  %v13462_v59 = vld [vmem:[#allocation51_spill] sm:$0xff]  ;;  %v13463_v49 = vld [vmem:[#allocation228_spill] sm:$0xff] }
 0x877   : > { %v4364_v31 = vadd.f32 %v13456_v61, %v4252_v35  ;;  %v4365_v23 = vadd.f32 %v13457_v12, %v4253_v32  ;;  %v4814_v10 = vmul.f32 %v4797_v15, %v13458_v13  ;;  %v4815_v62 = vmul.f32 %v4793_v53, %v13459_v47  ;;  %v13464_v51 = vld [vmem:[#allocation84_spill] sm:$0xff] }
 0x878   : > { %v4410_v17 = vadd.f32 %v13460_v1, %v4362_v33  ;;  %v4411_v36 = vadd.f32 %v13461_v14, %v4363_v21  ;;  %v4515_v54 = vadd.f32 %v4499_v58, %v4403_v29  ;;  %v4516_v4 = vadd.f32 %v4500_v20, %v4404_v9  ;;  %v13465_v21 = vld [vmem:[#allocation72_spill] sm:$0xff]  ;;  %v13466_v58 = vld [vmem:[#allocation215_spill] sm:$0xff] }
 0x879   : > { %v4785_v5 = vpop.permute.xlu1 %4784  ;;  %v4412_v55 = vadd.f32 %v13462_v59, %v4364_v31  ;;  %v4413_v27 = vadd.f32 %v13463_v49, %v4365_v23  ;;  %v4846_v22 = vmul.f32 %v13464_v51, %v4814_v10  ;;  %v4847_v35 = vmul.f32 %v13464_v51, %v4815_v62  ;;  %v13467_v29 = vld [vmem:[#allocation163_spill] sm:$0xff]  ;;  %v13468_v53 = vld [vmem:[#allocation164_spill] sm:$0xff] }
 0x87a   : > { %v4789_v44 = vsel %vm2125_vm9, %v4777_v37, %v4785_v5  ;;  %v4801_v32 = vsel %vm2125_vm9, %v4785_v5, %v4761_v41  ;;  %v4627_v33 = vadd.f32 %v4611_v45, %v4515_v54  ;;  %v4628_v39 = vadd.f32 %v4612_v6, %v4516_v4  ;;  %v13469_v31 = vld [vmem:[#allocation71_spill] sm:$0xff]  ;;  %v13470_v23 = vld [vmem:[#allocation68_spill] sm:$0xff] }
 0x87b   : > { %v11537_v15 = vadd.f32 %v4846_v22, %v13465_v21  ;;  %v11540_v20 = vadd.f32 %v4847_v35, %v13466_v58  ;;  %v4816_v9 = vmul.f32 %v4789_v44, %v13467_v29  ;;  %v4817_v61 = vmul.f32 %v4801_v32, %v13468_v53  ;;  %v13473_v4 = vld [vmem:[#allocation219_spill] sm:$0xff]  ;;  %v13475_v32 = vld [vmem:[#allocation50_spill] sm:$0xff] }
 0x87c   : > { %v4682_v37 = vsel %vm2036_vm7, %v13469_v31, %v11305_v24  ;;  %v11548_v12 = vadd.f32 %v4723_v57, %v4627_v33  ;;  %v11550_v45 = vadd.f32 %v4724_v56, %v4628_v39  ;;  %v4522_v6 = vadd.f32 %v11436_v26, %v4410_v17  ;;  %v13471_v17 = vld [vmem:[#allocation74_spill] sm:$0xff] }
 0x87d   : > { %v4645_v41 = vpop.permute.xlu1 %4644  ;;  %v4581_v10 = vmul.f32 %v13470_v23, %v13330_v2  ;;  %v4686_v62 = vsel %vm2036_vm7, %v11386_v30, %v13469_v31  ;;  %v4848_v1 = vmul.f32 %v13464_v51, %v4816_v9  ;;  %v4849_v14 = vmul.f32 %v13464_v51, %v4817_v61  ;;  %v13472_v2 = vld [vmem:[#allocation78_spill] sm:$0xff]  ;;  %v4888_v31 = vpop.permute.xlu0 %4887 }
 0x87e   : > { %v4523_v24 = vadd.f32 %v11439_v46, %v4411_v36  ;;  %v4524_v57 = vadd.f32 %v11446_v3, %v4412_v55  ;;  %v4525_v56 = vadd.f32 %v11449_v7, %v4413_v27  ;;  %v4634_v26 = vadd.f32 %v11412_v38, %v4522_v6  ;;  %v13474_v36 = vld [vmem:[#allocation79_spill] sm:$0xff]  ;;  %v13478_v6 = vld [vmem:[#allocation109_spill] sm:$0xff] }
 0x87f   : > { %v4405_v5 = vadd.f32 %v13471_v17, %v4357_v60  ;;  %v11567_v54 = vadd.f32 %v4848_v1, %v13472_v2  ;;  %v11570_v59 = vadd.f32 %v4849_v14, %v13473_v4  ;;  %v4514_v30 = vadd.f32 %v11458_v43, %v4402_v50 }
 0x880   : > { %v4610_v49 = vmul.f32 %v13441_v34, %v11483_v63  ;;  %v4635_v3 = vadd.f32 %v11415_v40, %v4523_v24  ;;  %v4636_v7 = vadd.f32 %v13474_v36, %v4524_v57  ;;  %v4637_v38 = vadd.f32 %v11433_v42, %v4525_v56  ;;  %v13479_v57 = vld [vmem:[#allocation110_spill] sm:$0xff] }
 0x881   : > { %v4653_v46 = vpop.permute.xlu1 %4652  ;;  %v4690_v60 = vmul.f32 %v4682_v37, %v13336_v0  ;;  %v4693_v55 = vmul.f32 %v4686_v62, %v13343_v19  ;;  %v4746_v51 = vadd.f32 %v11471_v48, %v4634_v26  ;;  %v4613_v22 = vmul.f32 %v13441_v34, %v4581_v10  ;;  %v13477_v34 = vld [vmem:[#allocation144_spill] sm:$0xff]  ;;  %v13480_v26 = vld [vmem:[#allocation155_spill] sm:$0xff] }
 0x882   : > { %v4683_v27 = vsel %vm2036_vm7, %v4645_v41, %v4653_v46  ;;  %v4747_v63 = vadd.f32 %v11452_v52, %v4635_v3  ;;  %v4748_v50 = vadd.f32 %v11455_v16, %v4636_v7  ;;  %v4749_v40 = vadd.f32 %v11474_v18, %v4637_v38  ;;  %v13476_v16 = vld [vmem:[#allocation214_spill] sm:$0xff] }
 0x883   : > { %v4694_v43 = vmul.f32 %v4683_v27, %v13336_v0  ;;  %v4722_v42 = vmul.f32 %v11401_v8, %v4690_v60  ;;  %v4517_v35 = vadd.f32 %v11468_v11, %v4405_v5  ;;  %v4626_v44 = vadd.f32 %v4610_v49, %v4514_v30  ;;  %v13481_v30 = vld [vmem:[#allocation83_spill] sm:$0xff] }
 0x884   : > { %v4725_v48 = vmul.f32 %v11401_v8, %v4693_v55  ;;  %v13483_v49 = vld [vmem:[#allocation159_spill] sm:$0xff] }
 0x885   : > { %v4726_v33 = vmul.f32 %v13475_v32, %v4694_v43  ;;  %v4661_v39 = vpop.permute.xlu1 %4660  ;;  %v4629_v52 = vadd.f32 %v4613_v22, %v4517_v35  ;;  %v11594_v21 = vadd.f32 %v4722_v42, %v4626_v44 }
 0x886   : > { %v4679_v0 = vsel %vm2036_vm7, %v4653_v46, %v4661_v39  ;;  %v13484_v46 = vld [vmem:[#allocation93_spill] sm:$0xff] }
 0x887   : > { %v11597_v18 = vadd.f32 %v4726_v33, %v13476_v16  ;;  %v4695_v58 = vmul.f32 %v4679_v0, %v13477_v34  ;;  %v11600_v9 = vadd.f32 %v4725_v48, %v4629_v52  ;;  %v4796_v3 = vsel %vm2125_vm9, %v13484_v46, %v13483_v49 }
 0x888   : > { %v4800_v7 = vsel %vm2125_vm9, %v13481_v30, %v13484_v46  ;;  %v4810_v55 = vmul.f32 %v4796_v3, %v13458_v13  ;;  %v4903_v3 = vmul.f32 %v4888_v31, %v11540_v20 }
 0x889   : > { %v4727_v11 = vmul.f32 %v13475_v32, %v4695_v58  ;;  %v4669_v61 = vpop.permute.xlu1 %4668  ;;  %v4813_v22 = vmul.f32 %v4800_v7, %v13468_v53  ;;  %v4905_v7 = vmul.f32 %v4888_v31, %v11570_v59 }
 0x88a   : > { %v4675_v8 = vsel %vm2036_vm7, %v4661_v39, %v4669_v61  ;;  %v4687_v37 = vsel %vm2036_vm7, %v4669_v61, %v4645_v41  ;;  %v4763_v41 = vpop.permute.xlu0 %4762  ;;  %v13485_v39 = vld [vmem:[#allocation77_spill] sm:$0xff] }
 0x88b   : > { %v11608_v23 = vadd.f32 %v4727_v11, %v13478_v6  ;;  %v4696_v10 = vmul.f32 %v4675_v8, %v13342_v28  ;;  %v4697_v62 = vmul.f32 %v4687_v37, %v13343_v19  ;;  %v13482_v28 = vld [vmem:[#allocation128_spill] sm:$0xff]  ;;  %v4842_v0 = vmul.f32 %v13485_v39, %v4810_v55 }
 0x88c   : > { %v4788_v19 = vsel %vm2125_vm9, %v13482_v28, %v13481_v30  ;;  %v4792_v36 = vsel %vm2125_vm9, %v13483_v49, %v13482_v28  ;;  %v4845_v34 = vmul.f32 %v13485_v39, %v4813_v22 }
 0x88d   : > { %v4728_v1 = vmul.f32 %v13475_v32, %v4696_v10  ;;  %v4729_v14 = vmul.f32 %v13475_v32, %v4697_v62  ;;  %v4812_v60 = vmul.f32 %v4788_v19, %v13467_v29  ;;  %v4811_v43 = vmul.f32 %v4792_v36, %v13459_v47 }
 0x88e   : > { %v11614_v24 = vpop.permute.xlu1 %4823  ;;  %v4771_v2 = vpop.permute.xlu0 %4770  ;;  %v4858_v8 = vadd.f32 %v4842_v0, %v4746_v51 }
 0x88f   : > { %v11617_v56 = vadd.f32 %v4728_v1, %v13479_v57  ;;  %v11620_v17 = vadd.f32 %v4729_v14, %v13480_v26  ;;  %v4790_v42 = vsel %vm2125_vm9, %v4763_v41, %v4771_v2  ;;  %v4844_v48 = vmul.f32 %v13485_v39, %v4812_v60 }
 0x890   : > { %v4803_v52 = vmul.f32 %v4790_v42, %v13459_v47  ;;  %v4843_v16 = vmul.f32 %v13485_v39, %v4811_v43  ;;  %v4861_v1 = vadd.f32 %v4845_v34, %v4749_v40  ;;  %v4902_v26 = vmul.f32 %v4888_v31, %v11537_v15 }
 0x891   : > { %v4860_v37 = vadd.f32 %v4844_v48, %v4748_v50 }
 0x892   : > { %v4779_v27 = vpop.permute.xlu0 %4778  ;;  %v4859_v62 = vadd.f32 %v4843_v16, %v4747_v63 }
 0x893   : > { %v4883_v5 = vpop.permute.xlu1 %4882  ;;  %v4786_v33 = vsel %vm2125_vm9, %v4771_v2, %v4779_v27 }
 0x894   : > { %v4804_v61 = vmul.f32 %v4786_v33, %v13467_v29  ;;  %v4900_v30 = vmul.f32 %v4883_v5, %v4860_v37  ;;  %v4899_v28 = vmul.f32 %v4883_v5, %v4859_v62  ;;  %v4901_v19 = vmul.f32 %v4883_v5, %v4861_v1 }
 0x896   : > { %v4923_v10 = vpop.permute.xlu0 %4922 }
 0x897   : > { %v4755_v4 = vpop.permute.xlu1 %4754  ;;  %v4940_v55 = vadd.f32 %v4923_v10, %v4900_v30  ;;  %v4939_v22 = vadd.f32 %v4923_v10, %v4899_v28  ;;  %v4941_v42 = vadd.f32 %v4923_v10, %v4901_v19  ;;  %v5633_v28 = vld [vmem:[#allocation11] sm:$0xff]   ;;  %v13487_v19 = vmov 0  }
 0x898   : > { %v4794_v35 = vsel %vm2125_vm9, %v4755_v4, %v4763_v41  ;;  %v4798_v44 = vsel %vm2125_vm9, %v4779_v27, %v4755_v4  ;;  %v13486_v41 = vld [vmem:[#allocation99_spill] sm:$0xff]  ;;  %v4898_v4 = vmul.f32 %v4883_v5, %v4858_v8  ;;  %v4904_v5 = vmul.f32 %v4888_v31, %v11567_v54 }
 0x899   : > { %v4802_v58 = vmul.f32 %v4794_v35, %v13458_v13  ;;  %v4805_v11 = vmul.f32 %v4798_v44, %v13468_v53  ;;  %v4835_v2 = vmul.f32 %v13486_v41, %v4803_v52  ;;  %v4836_v63 = vmul.f32 %v13486_v41, %v4804_v61 }
 0x89a   : > { %v4938_v60 = vadd.f32 %v4923_v10, %v4898_v4 }
 0x89b   : > { %v4757_v38 = vpop.permute.xlu1 %4756  ;;  %v4834_v51 = vmul.f32 %v13486_v41, %v4802_v58  ;;  %v4837_v50 = vmul.f32 %v13486_v41, %v4805_v11  ;;  %v4851_v52 = vadd.f32 %v4835_v2, %v11548_v12 }
 0x89d   : > { %v4850_v43 = vadd.f32 %v4834_v51, %v11594_v21  ;;  %v4853_v20 = vadd.f32 %v4837_v50, %v11600_v9  ;;  %v5634_v51 = vld [vmem:[#allocation11 + $0x8] sm:$0xff]   ;;  %v2499_v50 = vpop.f32.mrf.mxu0 }
 0x89f   : > { %v4765_v32 = vpop.permute.xlu1 %4764 }
 0x8a0   : > { %v4795_v14 = vsel %vm2125_vm9, %v4757_v38, %v4765_v32 }
 0x8a1   : > { %v4806_v40 = vmul.f32 %v4795_v14, %v13458_v13 }
 0x8a3   : > { %v4773_v6 = vpop.permute.xlu1 %4772  ;;  %v4838_v25 = vmul.f32 %v11614_v24, %v4806_v40  ;;  %v2501_v40 = vpop.f32.mrf.mxu0 }
 0x8a4   : > { %v4791_v57 = vsel %vm2125_vm9, %v4765_v32, %v4773_v6  ;;  %v4852_v32 = vadd.f32 %v4836_v63, %v11550_v45  ;;  %v2552_v63 = vpop.f32.mrf.mxu1 }
 0x8a5   : > { %v4807_v49 = vmul.f32 %v4791_v57, %v13459_v47  ;;  %v4873_v47 = vpop.permute.xlu0 %4872  ;;  %v4854_v11 = vadd.f32 %v4838_v25, %v11597_v18 }
 0x8a6   : > { %v4890_v16 = vmul.f32 %v4873_v47, %v4850_v43  ;;  %v4891_v45 = vmul.f32 %v4873_v47, %v4851_v52 }
 0x8a7   : > { %v4781_v46 = vpop.permute.xlu1 %4780 }
 0x8a8   : > { %v4787_v15 = vsel %vm2125_vm9, %v4773_v6, %v4781_v46  ;;  %v4799_v36 = vsel %vm2125_vm9, %v4781_v46, %v4757_v38  ;;  %v4839_v38 = vmul.f32 %v11614_v24, %v4807_v49  ;;  %v2554_v49 = vpop.f32.mrf.mxu1  ;;  %v2503_v46 = vpop.f32.mrf.mxu0 }
 0x8a9   : > { %v4808_v27 = vmul.f32 %v4787_v15, %v13467_v29  ;;  %v4809_v13 = vmul.f32 %v4799_v36, %v13468_v53  ;;  %v4913_v58 = vpop.permute.xlu0 %4912 }
 0x8aa   : > { %v4855_v61 = vadd.f32 %v4839_v38, %v11608_v23  ;;  %v4931_v10 = vadd.f32 %v4913_v58, %v4891_v45  ;;  %v4930_v62 = vadd.f32 %v4913_v58, %v4890_v16  ;;  %v2505_v15 = vpop.f32.mrf.mxu0 }
 0x8ab   : > { %v4840_v54 = vmul.f32 %v11614_v24, %v4808_v27  ;;  %v4841_v59 = vmul.f32 %v11614_v24, %v4809_v13  ;;  %v4928_v31 = vpop.permute.xlu1 %4927  ;;  %v4893_v24 = vmul.f32 %v4873_v47, %v4853_v20 }
 0x8ac   : > { %v4942_v35 = vadd.f32 %v4928_v31, %v4902_v26  ;;  %v4943_v29 = vadd.f32 %v4928_v31, %v4903_v3  ;;  %v4944_v44 = vadd.f32 %v4928_v31, %v4904_v5  ;;  %v4945_v53 = vadd.f32 %v4928_v31, %v4905_v7  ;;  %v2556_v3 = vpop.f32.mrf.mxu1  ;;  %v2509_v5 = vpop.f32.mrf.mxu0 }
 0x8ad   : > { %v4856_v21 = vadd.f32 %v4840_v54, %v11617_v56  ;;  %v4857_v9 = vadd.f32 %v4841_v59, %v11620_v17  ;;  %v4892_v56 = vmul.f32 %v4873_v47, %v4852_v32  ;;  %v4933_v14 = vadd.f32 %v4913_v58, %v4893_v24  ;;  %v13488_v47 = vld [vmem:[#allocation29_spill] sm:$0xff]  ;;  %v13490_v59 = vld [vmem:[#allocation28_spill] sm:$0xff]  ;;  %v13491_v32 = vld [vmem:[#allocation59_spill] sm:$0xff] }
 0x8ae   : > { %v4955_v33 = vpack.c.bf16 %v4943_v29, %v4939_v22  ;;  %v4957_v39 = vpack.c.bf16 %v4945_v53, %v4941_v42  ;;  %v4954_v48 = vpack.c.bf16 %v4942_v35, %v4938_v60  ;;  %v4956_v0 = vpack.c.bf16 %v4944_v44, %v4940_v55  ;;  %v2558_v36 = vpop.f32.mrf.mxu1  ;;  %v2511_v60 = vpop.f32.mrf.mxu0  ;;  %v13489_v42 = vld [vmem:[#allocation49_spill] sm:$0xff] }
 0x8af   : > { %v4878_v34 = vpop.permute.xlu1 %4877  ;;  %v4932_v12 = vadd.f32 %v4913_v58, %v4892_v56  ;;  %v2595_v43 = vmul.f32 %v13488_v47, %v2499_v50  ;;  %v2597_v20 = vmul.f32 %v13488_v47, %v2552_v63  ;;  %v2596_v22 = vmul.f32 %v13488_v47, %v2501_v40  ;;  %v13492_v58 = vld [vmem:[#allocation25_spill] sm:$0xff] }
 0x8b0   : > { %4986 = vmatprep.subr.bf16.mxu0 %v4955_v33  ;;  %5039 = vmatprep.subr.bf16.mxu1 %v4957_v39  ;;  %v4894_v17 = vmul.f32 %v4878_v34, %v4854_v11  ;;  %v4895_v8 = vmul.f32 %v4878_v34, %v4855_v61  ;;  %v4896_v37 = vmul.f32 %v4878_v34, %v4856_v21  ;;  %v2562_v7 = vpop.f32.mrf.mxu1  ;;  %v2513_v27 = vpop.f32.mrf.mxu0 }
 0x8b1   : > { %4987 = vmatpush1.bf16.msra.mxu0 %v4954_v48  ;;  %5040 = vmatpush1.bf16.msra.mxu1 %v4956_v0  ;;  %v4897_v6 = vmul.f32 %v4878_v34, %v4857_v9  ;;  %v2599_v25 = vmul.f32 %v13489_v42, %v2503_v46  ;;  %v2598_v38 = vmul.f32 %v13488_v47, %v2554_v49  ;;  %v13495_v47 = vld [vmem:[#allocation150_spill] sm:$0xff] }
 0x8b2   : > { %v2564_v55 = vpop.f32.mrf.mxu1  ;;  %v2600_v54 = vmul.f32 %v13489_v42, %v2505_v15  ;;  %v2603_v31 = vmul.f32 %v13490_v59, %v2509_v5  ;;  %v2601_v35 = vmul.f32 %v13489_v42, %v2556_v3  ;;  %v2602_v29 = vmul.f32 %v13489_v42, %v2558_v36  ;;  %v2515_v44 = vpop.f32.mrf.mxu0 }
 0x8b3   : > { %v4918_v1 = vpop.permute.xlu1 %4917  ;;  %v2635_v21 = vadd.f32 %v13491_v32, %v2595_v43  ;;  %v2637_v9 = vadd.f32 %v13491_v32, %v2597_v20  ;;  %v2604_v33 = vmul.f32 %v13490_v59, %v2511_v60  ;;  %v2605_v39 = vmul.f32 %v13490_v59, %v2562_v7 }
 0x8b4   : > { %v4934_v57 = vadd.f32 %v4918_v1, %v4894_v17  ;;  %v4935_v26 = vadd.f32 %v4918_v1, %v4895_v8  ;;  %v4936_v18 = vadd.f32 %v4918_v1, %v4896_v37  ;;  %v4937_v41 = vadd.f32 %v4918_v1, %v4897_v6  ;;  %v2566_v13 = vpop.f32.mrf.mxu1  ;;  %v13493_v37 = vld [vmem:[#allocation58_spill] sm:$0xff] }
 0x8b5   : > { %v2636_v52 = vadd.f32 %v13491_v32, %v2596_v22  ;;  %v2638_v24 = vadd.f32 %v13491_v32, %v2598_v38  ;;  %v2639_v11 = vadd.f32 %v13492_v58, %v2599_v25  ;;  %v2641_v56 = vadd.f32 %v13492_v58, %v2601_v35 }
 0x8b6   : > { %v4950_v23 = vpack.c.bf16 %v4934_v57, %v4930_v62  ;;  %v4952_v2 = vpack.c.bf16 %v4936_v18, %v4932_v12  ;;  %v4951_v4 = vpack.c.bf16 %v4935_v26, %v4931_v10  ;;  %v4953_v30 = vpack.c.bf16 %v4937_v41, %v4933_v14  ;;  %v2568_v53 = vpop.f32.mrf.mxu1  ;;  %v13494_v14 = vld [vmem:[#allocation88_spill] sm:$0xff] }
 0x8b7   : > { %v2640_v17 = vadd.f32 %v13492_v58, %v2600_v54  ;;  %v2642_v8 = vadd.f32 %v13492_v58, %v2602_v29  ;;  %v2643_v6 = vadd.f32 %v13493_v37, %v2603_v31  ;;  %v2607_v57 = vmul.f32 %v13494_v14, %v2513_v27 }
 0x8b8   : > { %4988 = vmatprep.subr.bf16.mxu0 %v4951_v4  ;;  %5041 = vmatprep.subr.bf16.mxu1 %v4953_v30  ;;  %v2606_v26 = vmul.f32 %v13490_v59, %v2564_v55  ;;  %v2609_v50 = vmul.f32 %v13494_v14, %v2566_v13  ;;  %v2610_v7 = vmul.f32 %v13494_v14, %v2568_v53 }
 0x8b9   : > { %4989 = vmatpush1.bf16.msra.mxu0 %v4950_v23  ;;  %5042 = vmatpush1.bf16.msra.mxu1 %v4952_v2  ;;  %v2645_v23 = vadd.f32 %v13493_v37, %v2605_v39  ;;  %v2644_v2 = vadd.f32 %v13493_v37, %v2604_v33  ;;  %v2647_v43 = vadd.f32 %v13495_v47, %v2607_v57 }
 0x8ba   : > { %v2646_v31 = vadd.f32 %v13493_v37, %v2606_v26  ;;  %v2649_v29 = vadd.f32 %v13495_v47, %v2609_v50 }
 0x8bc   : > { %5394 = vmatmul.mubr.msk.bf16.vlgmr.msra.gmra.mxu0 %vm1093_vm0, %v5633_v28  ;;  %5396 = vmatmul.mubr.msk.bf16.vlgmr.msra.gmra.mxu1 %vm1093_vm0, %v5633_v28 }
 0x8bd   : > { %5016 = vmatprep.mubr.bf16.mxu0 %v13487_v19  ;;  %5069 = vmatprep.mubr.bf16.mxu1 %v13487_v19 }
 0x8c4   : > { %5395 = vmatmul.mubr.msk.bf16.gmra.mxu0 %vm1093_vm0, %v5634_v51  ;;  %5397 = vmatmul.mubr.msk.bf16.gmra.mxu1 %vm1093_vm0, %v5634_v51  ;;  %v2608_v51 = vmul.f32 %v13494_v14, %v2515_v44 }
 0x97c   : > { %v5008_v48 = vpop.f32.mrf.mxu0  ;;  %v5061_v0 = vpop.f32.mrf.mxu1 }
 0x97d   : > { %v5009_v16 = vadd.f32 %v5008_v48, %v2635_v21  ;;  %v5062_v34 = vadd.f32 %v5061_v0, %v2637_v9  ;;  %v2648_v0 = vadd.f32 %v13495_v47, %v2608_v51 }
 0x97e   : > { %v5010_v61 = vpop.f32.mrf.mxu0  ;;  %v5063_v45 = vpop.f32.mrf.mxu1 }
 0x97f   : > { %v5080_v10 = vmax.f32 %v5009_v16, 0.0  ;;  %v5082_v12 = vmax.f32 %v5062_v34, 0.0  ;;  %v5011_v62 = vadd.f32 %v5010_v61, %v2636_v52  ;;  %v5064_v1 = vadd.f32 %v5063_v45, %v2638_v24 }
 0x980   : > { %v5012_v18 = vpop.f32.mrf.mxu0  ;;  %v5065_v41 = vpop.f32.mrf.mxu1  ;;  %v2650_v52 = vadd.f32 %v13495_v47, %v2610_v7 }
 0x981   : > { %v5096_v4 = vmin.f32 %v5080_v10, 6.0  ;;  %v5098_v30 = vmin.f32 %v5082_v12, 6.0  ;;  %v5081_v28 = vmax.f32 %v5011_v62, 0.0  ;;  %v5083_v19 = vmax.f32 %v5064_v1, 0.0 }
 0x982   : > { %v5013_v63 = vadd.f32 %v5012_v18, %v2639_v11  ;;  %v5066_v40 = vadd.f32 %v5065_v41, %v2641_v56  ;;  %v5014_v49 = vpop.f32.mrf.mxu0  ;;  %v5067_v46 = vpop.f32.mrf.mxu1 }
 0x983   : > { %5112 = vst [vmem:[%s11725_s24] sm:$0xff] %v5096_v4  ;;  %5114 = vst [vmem:[%s11725_s24 + $0x10] sm:$0xff] %v5098_v30  ;;  %v5097_v3 = vmin.f32 %v5081_v28, 6.0  ;;  %v5099_v15 = vmin.f32 %v5083_v19, 6.0  ;;  %v5015_v36 = vadd.f32 %v5014_v49, %v2640_v17  ;;  %v5068_v5 = vadd.f32 %v5067_v46, %v2642_v8 }
 0x984   : > { %v5084_v60 = vmax.f32 %v5013_v63, 0.0  ;;  %v5086_v55 = vmax.f32 %v5066_v40, 0.0  ;;  %v5018_v27 = vpop.f32.mrf.mxu0  ;;  %v5071_v13 = vpop.f32.mrf.mxu1 }
 0x985   : > { %5113 = vst [vmem:[%s11725_s24 + $0x8] sm:$0xff] %v5097_v3  ;;  %5115 = vst [vmem:[%s11725_s24 + $0x18] sm:$0xff] %v5099_v15  ;;  %v5085_v20 = vmax.f32 %v5015_v36, 0.0  ;;  %v5087_v22 = vmax.f32 %v5068_v5, 0.0  ;;  %v5019_v42 = vadd.f32 %v5018_v27, %v2643_v6  ;;  %v5072_v25 = vadd.f32 %v5071_v13, %v2645_v23 }
 0x986   : > { %v5100_v38 = vmin.f32 %v5084_v60, 6.0  ;;  %v5102_v54 = vmin.f32 %v5086_v55, 6.0  ;;  %v5020_v59 = vpop.f32.mrf.mxu0  ;;  %v5073_v35 = vpop.f32.mrf.mxu1 }
 0x987   : > { %v5101_v44 = vmin.f32 %v5085_v20, 6.0  ;;  %v5103_v53 = vmin.f32 %v5087_v22, 6.0  ;;  %v5088_v32 = vmax.f32 %v5019_v42, 0.0  ;;  %v5090_v21 = vmax.f32 %v5072_v25, 0.0 }
 0x988   : > { %5116 = vst [vmem:[%s11725_s24 + $0x20] sm:$0xff] %v5100_v38  ;;  %5118 = vst [vmem:[%s11725_s24 + $0x30] sm:$0xff] %v5102_v54  ;;  %v5021_v9 = vadd.f32 %v5020_v59, %v2644_v2  ;;  %v5074_v33 = vadd.f32 %v5073_v35, %v2646_v31  ;;  %v5022_v39 = vpop.f32.mrf.mxu0  ;;  %v5075_v48 = vpop.f32.mrf.mxu1 }
 0x989   : > { %5117 = vst [vmem:[%s11725_s24 + $0x28] sm:$0xff] %v5101_v44  ;;  %5119 = vst [vmem:[%s11725_s24 + $0x38] sm:$0xff] %v5103_v53  ;;  %v5104_v16 = vmin.f32 %v5088_v32, 6.0  ;;  %v5106_v34 = vmin.f32 %v5090_v21, 6.0  ;;  %v5023_v24 = vadd.f32 %v5022_v39, %v2647_v43  ;;  %v5076_v58 = vadd.f32 %v5075_v48, %v2649_v29 }
 0x98a   : > { %v5089_v11 = vmax.f32 %v5021_v9, 0.0  ;;  %v5091_v61 = vmax.f32 %v5074_v33, 0.0  ;;  %v5024_v45 = vpop.f32.mrf.mxu0  ;;  %v5077_v56 = vpop.f32.mrf.mxu1 }
 0x98b   : > { %5120 = vst [vmem:[%s11725_s24 + $0x40] sm:$0xff] %v5104_v16  ;;  %5122 = vst [vmem:[%s11725_s24 + $0x50] sm:$0xff] %v5106_v34  ;;  %v5092_v17 = vmax.f32 %v5023_v24, 0.0  ;;  %v5094_v8 = vmax.f32 %v5076_v58, 0.0  ;;  %v5025_v37 = vadd.f32 %v5024_v45, %v2648_v0  ;;  %v5078_v6 = vadd.f32 %v5077_v56, %v2650_v52 }
 0x98c   : > { %v5105_v10 = vmin.f32 %v5089_v11, 6.0  ;;  %v5107_v12 = vmin.f32 %v5091_v61, 6.0 }
 0x98d   : > { %v5108_v62 = vmin.f32 %v5092_v17, 6.0  ;;  %v5110_v1 = vmin.f32 %v5094_v8, 6.0  ;;  %v5093_v14 = vmax.f32 %v5025_v37, 0.0  ;;  %v5095_v57 = vmax.f32 %v5078_v6, 0.0 }
 0x98e   : > { %5121 = vst [vmem:[%s11725_s24 + $0x48] sm:$0xff] %v5105_v10  ;;  %5123 = vst [vmem:[%s11725_s24 + $0x58] sm:$0xff] %v5107_v12 }
 0x98f   : > { %5124 = vst [vmem:[%s11725_s24 + $0x60] sm:$0xff] %v5108_v62  ;;  %5126 = vst [vmem:[%s11725_s24 + $0x70] sm:$0xff] %v5110_v1  ;;  %v5109_v26 = vmin.f32 %v5093_v14, 6.0  ;;  %v5111_v18 = vmin.f32 %v5095_v57, 6.0 }
 0x991   : > { %5125 = vst [vmem:[%s11725_s24 + $0x68] sm:$0xff] %v5109_v26  ;;  %5127 = vst [vmem:[%s11725_s24 + $0x78] sm:$0xff] %v5111_v18 }
 0x992   : > { %5913 = shalt.err (!%p5910_p4)
}
 0x993   : > { %s5914_s20 = scalar_lea.hbm %s11750_s27, 2048  ;;  %s5918_s3 = scalar_lea.hbm %s13496_s18, 4096 }
 0x994   : > { %p5915_p12 = scmp.ne.s32.totalorder %s11750_s27, %s5914_s20  ;;  %p5919_p7 = scmp.lt.s32.totalorder %s11750_s27, %s13496_s18 }
 0x995   : > { %p5920_p8 = scmp.lt.s32.totalorder %s5918_s3, %s5914_s20 }
 0x996   : > { %p5916_p6 = pnand %p5915_p12, %p13497_p0 }
 0x997   : > { %p5921_p11 = por %p5920_p8, %p5919_p7 }
 0x998   : > { %p5917_p2 = pneg %p5916_p6 }
 0x99a   : > { %p5922_p10 = pnand %p5921_p11, %p5917_p2 }
 0x99c   : > { %5925 = shalt.err (!%p5922_p10)
}
 0x99d   : > { %s6004_s8 = smov 512   ;;  %s6005_s5 = smov 32  }
 0x99e   : > { %5428 = dma.vmem_to_hbm [thread:$0]  (%p13497_p0), %s11752_s1, 2048, %s11750_s27, %s5129_s2, %s6004_s8, %s6004_s8, %s6005_s5  }
 0x99f PF: > { %s13498_s21 = sld [smem:[#allocation20_spill]]  ;;  %s5157_s29 = sand.u32 1, %s5964_s0  }
 0x9a0   : > { %p13499_p13 = scmp.ne.s32.totalorder %s12356_s22, 0  ;;  %s5158_s20 = scalar_lea.sflag [#allocation4], %s5157_s29 }
 0x9a5   : > { %p13500_p5 = scmp.ge.s32.totalorder %s13498_s21, 2 }
 0x9a7   : > { %p5451_p9 = pnand %p13500_p5, %p13499_p13 }
 0x9a9   : > { %p5452_p1 = pneg %p5451_p9 }
 0x9ab   : > { %5959 = dma.done.wait (%p5452_p1), %s5158_s20, 2048  }
 0x9ac   : > { %5961 = vsyncadd (%p5452_p1), %s5158_s20, 4294965248  ;;  %s13501_s21 = sld [smem:[#allocation21_spill]]  ;;  %s13504_s0 = smov %s5968_s30 }
 0x9ad   : > { %s13502_s25 = sld [smem:[#allocation19_spill]] }
 0x9ae   : > { %s13503_s20 = sld [smem:[#allocation22_spill]] }
 0x9b2   : > { %p35_p3 = scmp.ge.s32.totalorder %s13501_s21, 4  }
 0x9b3   : > { %s13505_s30 = smov %s13502_s25 }
 0x9b4   :  { %37 = sbr.rel (!%p35_p3) target bundleno = 19 (0x13), region = 166 }
 0x9b9   :  { %5163 = vsyncpa [#allocation3], 1 }
 0x9ba   :  { %5165 = vsyncpa [#allocation3 + $0x1], 1 }
 0x9bb   :  { %5166 = vsyncpa [#allocation6], 1 }
 0x9bc   :  { %5167 = vsyncpa [#allocation9], 1 }
 0x9bd   :  { %5168 = vsyncpa [#allocation12], 1 }
 0x9be   :  { %5169 = vsyncpa [#allocation4], 1 }
 0x9bf   :  { %5171 = vsyncpa [#allocation4 + $0x1], 1 }

</bundles_post_ra>
